<compile_context>
chip_gen: v7x
topology: tpu7x:2x2x1
jax: 0.10.0
libtpu: 0.0.40
codegen_flags: <defaults>
</compile_context>

<pallas_src>
import functools
import math

import jax
import jax.numpy as jnp
from jax.experimental import pallas as pl
from jax.experimental.pallas import tpu as pltpu


def _round_up(x, m):
    return (x + m - 1) // m * m


@functools.lru_cache(maxsize=None)
def _tpu_config():
    """Returns (vmem_budget_bytes, prefer_128_wide_n) for the local TPU gen."""
    kind = ""
    try:
        kind = jax.devices()[0].device_kind.lower()
    except Exception:
        pass
    vmem_cap = None
    try:
        vmem_cap = int(pltpu.get_tpu_info().vmem_capacity_bytes)
    except Exception:
        pass
    if vmem_cap is None:
        vmem_cap = (64 << 20) if "v7" in kind else (128 << 20)
    if vmem_cap <= (64 << 20):          # v7x: 64 MiB / TensorCore
        budget = min(int(0.70 * vmem_cap), 44 << 20)
    else:                               # v5e / v6e: 128 MiB
        budget = min(int(0.80 * vmem_cap), 100 << 20)
    prefer_128_n = ("v5e" in kind) or ("v5 lite" in kind) or ("v5lite" in kind)
    return budget, prefer_128_n


# --------------------------------------------------- fused stride-1 3x3 conv kernel
def _conv3x3_s1_kernel(x_ref, w_ref, b_ref, *rest, oh, ow, relu, has_residual):
    """One (image, cout-tile): stride-1 3x3 conv + folded-BN bias [+res] [+ReLU].

    x_ref: (Hp, Wp, Cin) zero-padded activation (Hp=oh+2, Wp=ow+2), bf16.
    w_ref: (9, Cin, tn) scale-folded weights, tap-major.  b_ref: (1, tn) f32.
    The 9 taps are unrolled as shifted-window MXU matmuls accumulated in f32;
    no im2col matrix ever exists in HBM.
    """
    if has_residual:
        r_ref, o_ref = rest
    else:
        (o_ref,) = rest
    cin = x_ref.shape[-1]
    tn = o_ref.shape[-1]

    acc = jnp.zeros((oh * ow, tn), jnp.float32)
    for ki in range(3):
        for kj in range(3):
            a = x_ref[pl.ds(ki, oh), pl.ds(kj, ow), :].reshape(oh * ow, cin)
            acc = acc + jnp.dot(a, w_ref[ki * 3 + kj],
                                preferred_element_type=jnp.float32)

    out = acc + b_ref[...]                                  # (1, tn) broadcast
    if has_residual:
        out = out + r_ref[...].reshape(oh * ow, tn).astype(jnp.float32)
    if relu:
        out = jnp.maximum(out, 0.0)
    o_ref[...] = out.reshape(oh, ow, tn).astype(o_ref.dtype)


def conv3x3_s1_bn_act(x, p, relu=True, residual=None):
    """Fused stride-1 3x3 conv (pad=1) + folded BN + optional residual/ReLU.

    x: (N, H, W, Cin) bf16 NHWC -> (N, H, W, Cout) bf16.  The only wrapper-side
    data movement is the +1 spatial zero-pad (no im2col, no channel padding,
    no output slice).
    """
    budget, _ = _tpu_config()
    N, H, W, cin = x.shape
    cout = p["oc"]
    oh, ow = H, W
    hp, wp = H + 2, W + 2
    xp = jnp.pad(x, ((0, 0), (1, 1), (1, 1), (0, 0)))

    # Output-channel tile: whole Cout when the footprint fits the VMEM budget.
    def fits(tn):
        lane = lambda c: max(_round_up(c, 128), 128)
        xb = 2 * hp * wp * lane(cin) * 2               # padded image, dbl-buffered
        wb = 2 * 9 * max(cin, 8) * lane(tn) * 2        # weights
        ob = 2 * oh * ow * lane(tn) * 2                # output
        rb = ob if residual is not None else 0         # residual
        accb = oh * ow * lane(tn) * 4                  # f32 accumulator value
        return xb + wb + ob + rb + accb <= int(0.8 * budget)

    tn = cout
    if not fits(tn):
        for cand in (512, 256, 128):
            if cout % cand == 0 and fits(cand):
                tn = cand
                break
        else:
            tn = 128 if cout % 128 == 0 else cout
    # Keep >=2 parallel output tiles so both v7x TensorCores have work.
    if N * (cout // tn) < 2 and tn % 256 == 0:
        tn //= 2
    grid = (N, cout // tn)

    in_specs = [
        pl.BlockSpec((None, hp, wp, cin), lambda n, j: (n, 0, 0, 0)),
        pl.BlockSpec((9, cin, tn), lambda n, j: (0, 0, j)),
        pl.BlockSpec((1, tn), lambda n, j: (0, j)),
    ]
    args = [xp, p["w"], p["bias"]]
    if residual is not None:
        in_specs.append(pl.BlockSpec((None, oh, ow, tn), lambda n, j: (n, 0, 0, j)))
        args.append(residual)

    kernel = functools.partial(_conv3x3_s1_kernel, oh=oh, ow=ow, relu=relu,
                               has_residual=residual is not None)
    return pl.pallas_call(
        kernel,
        out_shape=jax.ShapeDtypeStruct((N, oh, ow, cout), jnp.bfloat16),
        grid_spec=pltpu.PrefetchScalarGridSpec(
            num_scalar_prefetch=0,
            grid=grid,
            in_specs=in_specs,
            out_specs=pl.BlockSpec((None, oh, ow, tn), lambda n, j: (n, 0, 0, j)),
        ),
        compiler_params=pltpu.CompilerParams(
            dimension_semantics=("parallel", "parallel"),
            vmem_limit_bytes=budget,
        ),
    )(*args)


# ---------------------------------------------------------- fused matmul kernels
def _mm_kernel_single(a_ref, w_ref, b_ref, *rest, relu, has_residual):
    """Whole-problem fused (A @ W) + bias [+ residual] [+ ReLU]; no K tiling."""
    if has_residual:
        r_ref, o_ref = rest
    else:
        (o_ref,) = rest
    out = jnp.dot(a_ref[...], w_ref[...],
                  preferred_element_type=jnp.float32) + b_ref[...]
    if has_residual:
        out = out + r_ref[...].astype(jnp.float32)
    if relu:
        out = jnp.maximum(out, 0.0)
    o_ref[...] = out.astype(o_ref.dtype)


def _mm_kernel_tiled(a_ref, w_ref, b_ref, *rest, relu, has_residual):
    """Tiled fused matmul with an f32 VMEM accumulator over the K grid axis."""
    if has_residual:
        r_ref, o_ref, acc_ref = rest
    else:
        o_ref, acc_ref = rest
    k = pl.program_id(2)

    @pl.when(k == 0)
    def _init():
        acc_ref[...] = jnp.zeros_like(acc_ref)

    acc_ref[...] += jnp.dot(a_ref[...], w_ref[...],
                            preferred_element_type=jnp.float32)

    @pl.when(k == pl.num_programs(2) - 1)
    def _finalize():
        out = acc_ref[...] + b_ref[...]
        if has_residual:
            out = out + r_ref[...].astype(jnp.float32)
        if relu:
            out = jnp.maximum(out, 0.0)
        o_ref[...] = out.astype(o_ref.dtype)


def fused_matmul_bias(a, w, bias, residual=None, relu=True,
                      out_dtype=jnp.bfloat16):
    """[relu]((A @ W) + bias [+ residual]); BN scale already folded into W.

    a: (M, K) bf16, w: (K, Nc) bf16, bias: (1, Nc) f32, residual: (M, Nc) bf16.
    Small problems launch as a single whole-VMEM block (no padding / slicing /
    accumulator); large ones use a padded, tiled grid with big tm/tk tiles.
    """
    budget, prefer_128_n = _tpu_config()
    M, K = a.shape
    K2, Nc = w.shape
    assert K == K2, (K, K2)
    has_res = residual is not None
    lane = lambda c: max(_round_up(c, 128), 128)

    single_bytes = (2 * M * lane(K) * 2            # A (double-buffered, bf16)
                    + 2 * K * lane(Nc) * 2         # W
                    + 2 * M * lane(Nc) * 2         # out
                    + (2 * M * lane(Nc) * 2 if has_res else 0)
                    + M * lane(Nc) * 4)            # f32 result value

    if single_bytes <= budget // 2:
        in_specs = [
            pl.BlockSpec((M, K), lambda i: (0, 0)),
            pl.BlockSpec((K, Nc), lambda i: (0, 0)),
            pl.BlockSpec((1, Nc), lambda i: (0, 0)),
        ]
        args = [a, w, bias]
        if has_res:
            in_specs.append(pl.BlockSpec((M, Nc), lambda i: (0, 0)))
            args.append(residual)
        kernel = functools.partial(_mm_kernel_single, relu=relu,
                                   has_residual=has_res)
        return pl.pallas_call(
            kernel,
            out_shape=jax.ShapeDtypeStruct((M, Nc), out_dtype),
            grid_spec=pltpu.PrefetchScalarGridSpec(
                num_scalar_prefetch=0,
                grid=(1,),
                in_specs=in_specs,
                out_specs=pl.BlockSpec((M, Nc), lambda i: (0, 0)),
            ),
            compiler_params=pltpu.CompilerParams(
                dimension_semantics=("arbitrary",),
                vmem_limit_bytes=budget,
            ),
        )(*args)

    # Large problem: padded, tiled launch with big tiles.
    # TODO(synk): mask the ragged final M tile in-kernel instead of pad+slice.
    Mp, Kp, Np = _round_up(M, 128), _round_up(K, 128), _round_up(Nc, 128)
    a_p = jnp.pad(a, ((0, Mp - M), (0, Kp - K)))
    w_p = jnp.pad(w, ((0, Kp - K), (0, Np - Nc)))
    b_p = jnp.pad(bias, ((0, 0), (0, Np - Nc)))
    r_p = jnp.pad(residual, ((0, Mp - M), (0, Np - Nc))) if has_res else None

    def pick(dim, cands):
        for c in cands:
            if c <= dim and dim % c == 0:
                return c
        return 128

    tn = pick(Np, (128,) if prefer_128_n else (256, 128))
    tm = pick(Mp, (512, 256, 128))
    tk = pick(Kp, (2048, 1024, 512, 256, 128))

    def footprint(tm_, tn_, tk_):
        return (2 * (tm_ * tk_ + tk_ * tn_) * 2
                + 2 * tm_ * tn_ * 2 * (2 if has_res else 1)
                + tm_ * tn_ * 4 + 4 * tn_ * 4)

    while footprint(tm, tn, tk) > budget and tk > 128:
        tk //= 2
    while footprint(tm, tn, tk) > budget and tm > 128:
        tm //= 2

    grid = (Mp // tm, Np // tn, Kp // tk)
    in_specs = [
        pl.BlockSpec((tm, tk), lambda i, j, k: (i, k)),
        pl.BlockSpec((tk, tn), lambda i, j, k: (k, j)),
        pl.BlockSpec((1, tn), lambda i, j, k: (0, j)),
    ]
    args = [a_p, w_p, b_p]
    if has_res:
        in_specs.append(pl.BlockSpec((tm, tn), lambda i, j, k: (i, j)))
        args.append(r_p)
    kernel = functools.partial(_mm_kernel_tiled, relu=relu, has_residual=has_res)
    out = pl.pallas_call(
        kernel,
        out_shape=jax.ShapeDtypeStruct((Mp, Np), out_dtype),
        grid_spec=pltpu.PrefetchScalarGridSpec(
            num_scalar_prefetch=0,
            grid=grid,
            in_specs=in_specs,
            out_specs=pl.BlockSpec((tm, tn), lambda i, j, k: (i, j)),
            scratch_shapes=[pltpu.VMEM((tm, tn), jnp.float32)],
        ),
        compiler_params=pltpu.CompilerParams(
            dimension_semantics=("parallel", "parallel", "arbitrary"),
            vmem_limit_bytes=budget,
        ),
    )(*args)
    return out[:M, :Nc]


# ------------------------------------------------------------------------- glue
def _im2col(x, kh, kw, stride, pad):
    """NHWC -> (N*OH*OW, kh*kw*C), K ordered (ki, kj, c).
    Used only as the fallback for the (rare) stride-2 3x3 conv."""
    N, H, W, C = x.shape
    xp = jnp.pad(x, ((0, 0), (pad, pad), (pad, pad), (0, 0)))
    OH = (H + 2 * pad - kh) // stride + 1
    OW = (W + 2 * pad - kw) // stride + 1
    cols = []
    for i in range(kh):
        for j in range(kw):
            patch = jax.lax.slice(
                xp, (0, i, j, 0),
                (N, i + (OH - 1) * stride + 1, j + (OW - 1) * stride + 1, C),
                (1, stride, stride, 1))
            cols.append(patch)
    col = jnp.concatenate(cols, axis=-1)
    return col.reshape(N * OH * OW, kh * kw * C), OH, OW


def conv_via_matmul(x, p, stride, pad, relu=True, residual=None):
    """1x1 conv (no im2col) or stride-2 3x3 fallback (im2col) + folded BN."""
    N, _, _, cin = x.shape
    kh, kw, oc = p["kh"], p["kw"], p["oc"]
    if kh == 1 and kw == 1:
        xs = x[:, ::stride, ::stride, :]
        OH, OW = xs.shape[1], xs.shape[2]
        a = xs.reshape(N * OH * OW, cin)
    else:
        a, OH, OW = _im2col(x, kh, kw, stride, pad)
    w2d = p["w"].reshape(kh * kw * cin, oc)
    r = residual.reshape(N * OH * OW, oc) if residual is not None else None
    out = fused_matmul_bias(a, w2d, p["bias"], residual=r, relu=relu)
    return out.reshape(N, OH, OW, oc)


# -------------------------------------------------------------------- parameters
def make_conv_bn_params(key, kh, kw, ic, oc):
    """Conv weight with eval-mode BatchNorm folded in (w * gamma/sqrt(var+eps))
    plus the remaining per-output-channel bias.

    Weight stored tap-major as (kh*kw, ic, oc) bf16; bias as (1, oc) f32."""
    k1, k2, k3, k4, k5 = jax.random.split(key, 5)
    w = jax.random.normal(k1, (kh, kw, ic, oc), jnp.float32) * math.sqrt(
        2.0 / (kh * kw * ic))
    gamma = 1.0 + 0.1 * jax.random.normal(k2, (oc,), jnp.float32)
    beta = 0.1 * jax.random.normal(k3, (oc,), jnp.float32)
    running_mean = 0.1 * jax.random.normal(k4, (oc,), jnp.float32)
    running_var = 1.0 + 0.1 * jax.random.uniform(k5, (oc,), jnp.float32)
    scale = gamma / jnp.sqrt(running_var + 1e-5)
    bias = beta - running_mean * scale
    w_folded = (w * scale[None, None, None, :]).reshape(kh * kw, ic, oc)
    return dict(w=w_folded.astype(jnp.bfloat16),
                bias=bias.reshape(1, oc).astype(jnp.float32),
                kh=kh, kw=kw, ic=ic, oc=oc)


def make_basic_block_params(key, in_channels, out_channels, stride=1):
    k1, k2, k3 = jax.random.split(key, 3)
    p = {
        "stride": stride,
        "conv1": make_conv_bn_params(k1, 3, 3, in_channels, out_channels),
        "conv2": make_conv_bn_params(k2, 3, 3, out_channels, out_channels),
    }
    if stride != 1 or in_channels != out_channels:    # BasicBlock.expansion == 1
        p["down"] = make_conv_bn_params(k3, 1, 1, in_channels, out_channels)
    return p


# ----------------------------------------------------------------------- forward
def basic_block_forward(x_nchw, p):
    """BasicBlock.forward: conv1-bn1-relu, conv2-bn2, (+downsample), add, relu."""
    x = jnp.transpose(x_nchw, (0, 2, 3, 1)).astype(jnp.bfloat16)    # NCHW -> NHWC
    identity = x
    stride = p["stride"]
    if stride == 1:
        out = conv3x3_s1_bn_act(x, p["conv1"], relu=True)
    else:
        # TODO(synk): fuse the stride-2 3x3 taps too (phase-decomposed kernel).
        out = conv_via_matmul(x, p["conv1"], stride=stride, pad=1, relu=True)
    if "down" in p:
        identity = conv_via_matmul(x, p["down"], stride=stride, pad=0, relu=False)
    # conv2 is always stride 1; residual add + final ReLU fused into its epilogue.
    out = conv3x3_s1_bn_act(out, p["conv2"], relu=True, residual=identity)
    return jnp.transpose(out, (0, 3, 1, 2)).astype(jnp.float32)     # NHWC -> NCHW


# ---------------------------------------------------------------- pure-JAX reference
def _ref_conv_bn(x_nhwc, p, stride, pad, relu=True, residual=None):
    kh, kw, ic, oc = p["kh"], p["kw"], p["ic"], p["oc"]
    w = p["w"].astype(jnp.float32).reshape(kh, kw, ic, oc)
    y = jax.lax.conv_general_dilated(
        x_nhwc, w, window_strides=(stride, stride),
        padding=[(pad, pad), (pad, pad)],
        dimension_numbers=("NHWC", "HWIO", "NHWC"))
    y = y + p["bias"][0]
    if residual is not None:
        y = y + residual
    if relu:
        y = jnp.maximum(y, 0.0)
    return y


def ref_basic_block(x_nchw, p):
    x = jnp.transpose(x_nchw, (0, 2, 3, 1)).astype(jnp.float32)
    identity = x
    out = _ref_conv_bn(x, p["conv1"], p["stride"], 1, relu=True)
    if "down" in p:
        identity = _ref_conv_bn(x, p["down"], p["stride"], 0, relu=False)
    out = _ref_conv_bn(out, p["conv2"], 1, 1, relu=True, residual=identity)
    return jnp.transpose(out, (0, 3, 1, 2))


# -------------------------------------------------------------------------- main
if __name__ == "__main__":
    key = jax.random.PRNGKey(0)
    kp1, kp2, kx = jax.random.split(key, 3)

    # Small input consistent with the module: batch=2, 32 channels, 16x16 spatial.
    x = jax.random.normal(kx, (2, 32, 16, 16), jnp.float32)

    # Exercise both BasicBlock configurations:
    #   blk1: stride=1, in==out  -> identity shortcut (both 3x3 convs fully fused)
    #   blk2: stride=2, 32->64   -> 1x1-conv downsample shortcut
    blk1 = make_basic_block_params(kp1, 32, 32, stride=1)
    blk2 = make_basic_block_params(kp2, 32, 64, stride=2)

    @jax.jit
    def fwd(inp):
        y = basic_block_forward(inp, blk1)
        y = basic_block_forward(y, blk2)
        return y

    out = jax.block_until_ready(fwd(x))

    assert out.shape == (2, 64, 8, 8), out.shape
    assert bool(jnp.all(jnp.isfinite(out)))

    # Correctness vs. pure-JAX f32 reference (same folded bf16 weights);
    # loose tolerance covers bf16 matmuls / bf16 intermediate activations.
    ref = ref_basic_block(ref_basic_block(x, blk1), blk2)
    err = float(jnp.max(jnp.abs(out - ref)))
    mag = float(jnp.max(jnp.abs(ref))) + 1e-6
    assert err <= 0.08 * mag + 1e-3, (err, mag)

    print("KERNEL_OK")
</pallas_src>

<mosaic_0001>
module attributes {stable_mosaic.version = 11 : i64} {
  func.func @_conv3x3_s1_kernel(%arg0: i32, %arg1: i32, %arg2: memref<1x18x18x32xbf16, #tpu.memory_space<vmem>>, %arg3: memref<9x32x32xbf16, #tpu.memory_space<vmem>>, %arg4: memref<1x32xf32, #tpu.memory_space<vmem>>, %arg5: memref<1x16x16x32xbf16, #tpu.memory_space<vmem>>) attributes {dimension_semantics = [#tpu.dimension_semantics<parallel>, #tpu.dimension_semantics<parallel>], iteration_bounds = array<i64: 2, 1>, scalar_prefetch = 0 : i64, scratch_operands = 0 : i64, tpu.core_type = #tpu.core_type<tc>, window_params = [{transform_indices = @transform_0, window_bounds = array<i64: 1, 18, 18, 32>}, {transform_indices = @transform_1, window_bounds = array<i64: 9, 32, 32>}, {transform_indices = @transform_2, window_bounds = array<i64: 1, 32>}, {transform_indices = @transform_3, window_bounds = array<i64: 1, 16, 16, 32>}]} {
    %cst = arith.constant 0.000000e+00 : f32
    %0 = vector.broadcast %cst : f32 to vector<256x32xf32>
    %c0 = arith.constant 0 : index
    %c0_0 = arith.constant 0 : index
    %c0_1 = arith.constant 0 : index
    %c0_2 = arith.constant 0 : index
    %1 = vector.load %arg2[%c0, %c0_0, %c0_1, %c0_2] : memref<1x18x18x32xbf16, #tpu.memory_space<vmem>>, vector<1x16x16x32xbf16>
    %2 = vector.shape_cast %1 : vector<1x16x16x32xbf16> to vector<16x16x32xbf16>
    %3 = vector.shape_cast %2 : vector<16x16x32xbf16> to vector<256x32xbf16>
    %c0_3 = arith.constant 0 : index
    %c0_4 = arith.constant 0 : index
    %c0_5 = arith.constant 0 : index
    %4 = vector.load %arg3[%c0_3, %c0_4, %c0_5] : memref<9x32x32xbf16, #tpu.memory_space<vmem>>, vector<1x32x32xbf16>
    %5 = vector.shape_cast %4 : vector<1x32x32xbf16> to vector<32x32xbf16>
    %cst_6 = arith.constant dense<0.000000e+00> : vector<256x32xf32>
    %6 = tpu.matmul %3, %5, %cst_6 {dimension_numbers = #tpu.dot_dimension_numbers<[1], [0], [0], [1], [0, 0, 1, 1], [], []>} : vector<256x32xbf16>, vector<32x32xbf16>, vector<256x32xf32> -> vector<256x32xf32>
    %7 = arith.addf %0, %6 : vector<256x32xf32>
    %c0_7 = arith.constant 0 : index
    %c0_8 = arith.constant 0 : index
    %c1 = arith.constant 1 : index
    %c0_9 = arith.constant 0 : index
    %8 = vector.load %arg2[%c0_7, %c0_8, %c1, %c0_9] : memref<1x18x18x32xbf16, #tpu.memory_space<vmem>>, vector<1x16x16x32xbf16>
    %9 = vector.shape_cast %8 : vector<1x16x16x32xbf16> to vector<16x16x32xbf16>
    %10 = vector.shape_cast %9 : vector<16x16x32xbf16> to vector<256x32xbf16>
    %c1_10 = arith.constant 1 : index
    %c0_11 = arith.constant 0 : index
    %c0_12 = arith.constant 0 : index
    %11 = vector.load %arg3[%c1_10, %c0_11, %c0_12] : memref<9x32x32xbf16, #tpu.memory_space<vmem>>, vector<1x32x32xbf16>
    %12 = vector.shape_cast %11 : vector<1x32x32xbf16> to vector<32x32xbf16>
    %cst_13 = arith.constant dense<0.000000e+00> : vector<256x32xf32>
    %13 = tpu.matmul %10, %12, %cst_13 {dimension_numbers = #tpu.dot_dimension_numbers<[1], [0], [0], [1], [0, 0, 1, 1], [], []>} : vector<256x32xbf16>, vector<32x32xbf16>, vector<256x32xf32> -> vector<256x32xf32>
    %14 = arith.addf %7, %13 : vector<256x32xf32>
    %c0_14 = arith.constant 0 : index
    %c0_15 = arith.constant 0 : index
    %c2 = arith.constant 2 : index
    %c0_16 = arith.constant 0 : index
    %15 = vector.load %arg2[%c0_14, %c0_15, %c2, %c0_16] : memref<1x18x18x32xbf16, #tpu.memory_space<vmem>>, vector<1x16x16x32xbf16>
    %16 = vector.shape_cast %15 : vector<1x16x16x32xbf16> to vector<16x16x32xbf16>
    %17 = vector.shape_cast %16 : vector<16x16x32xbf16> to vector<256x32xbf16>
    %c2_17 = arith.constant 2 : index
    %c0_18 = arith.constant 0 : index
    %c0_19 = arith.constant 0 : index
    %18 = vector.load %arg3[%c2_17, %c0_18, %c0_19] : memref<9x32x32xbf16, #tpu.memory_space<vmem>>, vector<1x32x32xbf16>
    %19 = vector.shape_cast %18 : vector<1x32x32xbf16> to vector<32x32xbf16>
    %cst_20 = arith.constant dense<0.000000e+00> : vector<256x32xf32>
    %20 = tpu.matmul %17, %19, %cst_20 {dimension_numbers = #tpu.dot_dimension_numbers<[1], [0], [0], [1], [0, 0, 1, 1], [], []>} : vector<256x32xbf16>, vector<32x32xbf16>, vector<256x32xf32> -> vector<256x32xf32>
    %21 = arith.addf %14, %20 : vector<256x32xf32>
    %c0_21 = arith.constant 0 : index
    %c1_22 = arith.constant 1 : index
    %c0_23 = arith.constant 0 : index
    %c0_24 = arith.constant 0 : index
    %22 = vector.load %arg2[%c0_21, %c1_22, %c0_23, %c0_24] : memref<1x18x18x32xbf16, #tpu.memory_space<vmem>>, vector<1x16x16x32xbf16>
    %23 = vector.shape_cast %22 : vector<1x16x16x32xbf16> to vector<16x16x32xbf16>
    %24 = vector.shape_cast %23 : vector<16x16x32xbf16> to vector<256x32xbf16>
    %c3 = arith.constant 3 : index
    %c0_25 = arith.constant 0 : index
    %c0_26 = arith.constant 0 : index
    %25 = vector.load %arg3[%c3, %c0_25, %c0_26] : memref<9x32x32xbf16, #tpu.memory_space<vmem>>, vector<1x32x32xbf16>
    %26 = vector.shape_cast %25 : vector<1x32x32xbf16> to vector<32x32xbf16>
    %cst_27 = arith.constant dense<0.000000e+00> : vector<256x32xf32>
    %27 = tpu.matmul %24, %26, %cst_27 {dimension_numbers = #tpu.dot_dimension_numbers<[1], [0], [0], [1], [0, 0, 1, 1], [], []>} : vector<256x32xbf16>, vector<32x32xbf16>, vector<256x32xf32> -> vector<256x32xf32>
    %28 = arith.addf %21, %27 : vector<256x32xf32>
    %c0_28 = arith.constant 0 : index
    %c1_29 = arith.constant 1 : index
    %c1_30 = arith.constant 1 : index
    %c0_31 = arith.constant 0 : index
    %29 = vector.load %arg2[%c0_28, %c1_29, %c1_30, %c0_31] : memref<1x18x18x32xbf16, #tpu.memory_space<vmem>>, vector<1x16x16x32xbf16>
    %30 = vector.shape_cast %29 : vector<1x16x16x32xbf16> to vector<16x16x32xbf16>
    %31 = vector.shape_cast %30 : vector<16x16x32xbf16> to vector<256x32xbf16>
    %c4 = arith.constant 4 : index
    %c0_32 = arith.constant 0 : index
    %c0_33 = arith.constant 0 : index
    %32 = vector.load %arg3[%c4, %c0_32, %c0_33] : memref<9x32x32xbf16, #tpu.memory_space<vmem>>, vector<1x32x32xbf16>
    %33 = vector.shape_cast %32 : vector<1x32x32xbf16> to vector<32x32xbf16>
    %cst_34 = arith.constant dense<0.000000e+00> : vector<256x32xf32>
    %34 = tpu.matmul %31, %33, %cst_34 {dimension_numbers = #tpu.dot_dimension_numbers<[1], [0], [0], [1], [0, 0, 1, 1], [], []>} : vector<256x32xbf16>, vector<32x32xbf16>, vector<256x32xf32> -> vector<256x32xf32>
    %35 = arith.addf %28, %34 : vector<256x32xf32>
    %c0_35 = arith.constant 0 : index
    %c1_36 = arith.constant 1 : index
    %c2_37 = arith.constant 2 : index
    %c0_38 = arith.constant 0 : index
    %36 = vector.load %arg2[%c0_35, %c1_36, %c2_37, %c0_38] : memref<1x18x18x32xbf16, #tpu.memory_space<vmem>>, vector<1x16x16x32xbf16>
    %37 = vector.shape_cast %36 : vector<1x16x16x32xbf16> to vector<16x16x32xbf16>
    %38 = vector.shape_cast %37 : vector<16x16x32xbf16> to vector<256x32xbf16>
    %c5 = arith.constant 5 : index
    %c0_39 = arith.constant 0 : index
    %c0_40 = arith.constant 0 : index
    %39 = vector.load %arg3[%c5, %c0_39, %c0_40] : memref<9x32x32xbf16, #tpu.memory_space<vmem>>, vector<1x32x32xbf16>
    %40 = vector.shape_cast %39 : vector<1x32x32xbf16> to vector<32x32xbf16>
    %cst_41 = arith.constant dense<0.000000e+00> : vector<256x32xf32>
    %41 = tpu.matmul %38, %40, %cst_41 {dimension_numbers = #tpu.dot_dimension_numbers<[1], [0], [0], [1], [0, 0, 1, 1], [], []>} : vector<256x32xbf16>, vector<32x32xbf16>, vector<256x32xf32> -> vector<256x32xf32>
    %42 = arith.addf %35, %41 : vector<256x32xf32>
    %c0_42 = arith.constant 0 : index
    %c2_43 = arith.constant 2 : index
    %c0_44 = arith.constant 0 : index
    %c0_45 = arith.constant 0 : index
    %43 = vector.load %arg2[%c0_42, %c2_43, %c0_44, %c0_45] : memref<1x18x18x32xbf16, #tpu.memory_space<vmem>>, vector<1x16x16x32xbf16>
    %44 = vector.shape_cast %43 : vector<1x16x16x32xbf16> to vector<16x16x32xbf16>
    %45 = vector.shape_cast %44 : vector<16x16x32xbf16> to vector<256x32xbf16>
    %c6 = arith.constant 6 : index
    %c0_46 = arith.constant 0 : index
    %c0_47 = arith.constant 0 : index
    %46 = vector.load %arg3[%c6, %c0_46, %c0_47] : memref<9x32x32xbf16, #tpu.memory_space<vmem>>, vector<1x32x32xbf16>
    %47 = vector.shape_cast %46 : vector<1x32x32xbf16> to vector<32x32xbf16>
    %cst_48 = arith.constant dense<0.000000e+00> : vector<256x32xf32>
    %48 = tpu.matmul %45, %47, %cst_48 {dimension_numbers = #tpu.dot_dimension_numbers<[1], [0], [0], [1], [0, 0, 1, 1], [], []>} : vector<256x32xbf16>, vector<32x32xbf16>, vector<256x32xf32> -> vector<256x32xf32>
    %49 = arith.addf %42, %48 : vector<256x32xf32>
    %c0_49 = arith.constant 0 : index
    %c2_50 = arith.constant 2 : index
    %c1_51 = arith.constant 1 : index
    %c0_52 = arith.constant 0 : index
    %50 = vector.load %arg2[%c0_49, %c2_50, %c1_51, %c0_52] : memref<1x18x18x32xbf16, #tpu.memory_space<vmem>>, vector<1x16x16x32xbf16>
    %51 = vector.shape_cast %50 : vector<1x16x16x32xbf16> to vector<16x16x32xbf16>
    %52 = vector.shape_cast %51 : vector<16x16x32xbf16> to vector<256x32xbf16>
    %c7 = arith.constant 7 : index
    %c0_53 = arith.constant 0 : index
    %c0_54 = arith.constant 0 : index
    %53 = vector.load %arg3[%c7, %c0_53, %c0_54] : memref<9x32x32xbf16, #tpu.memory_space<vmem>>, vector<1x32x32xbf16>
    %54 = vector.shape_cast %53 : vector<1x32x32xbf16> to vector<32x32xbf16>
    %cst_55 = arith.constant dense<0.000000e+00> : vector<256x32xf32>
    %55 = tpu.matmul %52, %54, %cst_55 {dimension_numbers = #tpu.dot_dimension_numbers<[1], [0], [0], [1], [0, 0, 1, 1], [], []>} : vector<256x32xbf16>, vector<32x32xbf16>, vector<256x32xf32> -> vector<256x32xf32>
    %56 = arith.addf %49, %55 : vector<256x32xf32>
    %c0_56 = arith.constant 0 : index
    %c2_57 = arith.constant 2 : index
    %c2_58 = arith.constant 2 : index
    %c0_59 = arith.constant 0 : index
    %57 = vector.load %arg2[%c0_56, %c2_57, %c2_58, %c0_59] : memref<1x18x18x32xbf16, #tpu.memory_space<vmem>>, vector<1x16x16x32xbf16>
    %58 = vector.shape_cast %57 : vector<1x16x16x32xbf16> to vector<16x16x32xbf16>
    %59 = vector.shape_cast %58 : vector<16x16x32xbf16> to vector<256x32xbf16>
    %c8 = arith.constant 8 : index
    %c0_60 = arith.constant 0 : index
    %c0_61 = arith.constant 0 : index
    %60 = vector.load %arg3[%c8, %c0_60, %c0_61] : memref<9x32x32xbf16, #tpu.memory_space<vmem>>, vector<1x32x32xbf16>
    %61 = vector.shape_cast %60 : vector<1x32x32xbf16> to vector<32x32xbf16>
    %cst_62 = arith.constant dense<0.000000e+00> : vector<256x32xf32>
    %62 = tpu.matmul %59, %61, %cst_62 {dimension_numbers = #tpu.dot_dimension_numbers<[1], [0], [0], [1], [0, 0, 1, 1], [], []>} : vector<256x32xbf16>, vector<32x32xbf16>, vector<256x32xf32> -> vector<256x32xf32>
    %63 = arith.addf %56, %62 : vector<256x32xf32>
    %c0_63 = arith.constant 0 : index
    %c0_64 = arith.constant 0 : index
    %64 = vector.load %arg4[%c0_63, %c0_64] : memref<1x32xf32, #tpu.memory_space<vmem>>, vector<1x32xf32>
    %65 = vector.broadcast %64 : vector<1x32xf32> to vector<256x32xf32>
    %66 = arith.addf %63, %65 : vector<256x32xf32>
    %cst_65 = arith.constant 0.000000e+00 : f32
    %67 = vector.broadcast %cst_65 : f32 to vector<256x32xf32>
    %68 = arith.maximumf %66, %67 : vector<256x32xf32>
    %69 = vector.shape_cast %68 : vector<256x32xf32> to vector<16x16x32xf32>
    %70 = arith.truncf %69 : vector<16x16x32xf32> to vector<16x16x32xbf16>
    %c0_66 = arith.constant 0 : index
    %c0_67 = arith.constant 0 : index
    %c0_68 = arith.constant 0 : index
    %c0_69 = arith.constant 0 : index
    %71 = vector.load %arg5[%c0_66, %c0_67, %c0_68, %c0_69] : memref<1x16x16x32xbf16, #tpu.memory_space<vmem>>, vector<1x16x16x32xbf16>
    %72 = vector.shape_cast %71 : vector<1x16x16x32xbf16> to vector<16x16x32xbf16>
    %73 = vector.shape_cast %70 : vector<16x16x32xbf16> to vector<1x16x16x32xbf16>
    tpu.vector_store %arg5[%c0_66, %c0_67, %c0_68, %c0_69], %73 {strides = array<i32>} : memref<1x16x16x32xbf16, #tpu.memory_space<vmem>>, vector<1x16x16x32xbf16>,
    return
  }
  func.func @transform_0(%arg0: i32, %arg1: i32) -> (i32, i32, i32, i32) {
    %c0_i32 = arith.constant 0 : i32
    %c0_i32_0 = arith.constant 0 : i32
    %c0_i32_1 = arith.constant 0 : i32
    %c0_i32_2 = arith.constant 0 : i32
    return %arg0, %c0_i32, %c0_i32_0, %c0_i32_1 : i32, i32, i32, i32
  }
  func.func @transform_1(%arg0: i32, %arg1: i32) -> (i32, i32, i32) {
    %c0_i32 = arith.constant 0 : i32
    %c0_i32_0 = arith.constant 0 : i32
    %c0_i32_1 = arith.constant 0 : i32
    return %c0_i32, %c0_i32_0, %arg1 : i32, i32, i32
  }
  func.func @transform_2(%arg0: i32, %arg1: i32) -> (i32, i32) {
    %c0_i32 = arith.constant 0 : i32
    %c0_i32_0 = arith.constant 0 : i32
    return %c0_i32, %arg1 : i32, i32
  }
  func.func @transform_3(%arg0: i32, %arg1: i32) -> (i32, i32, i32, i32) {
    %c0_i32 = arith.constant 0 : i32
    %c0_i32_0 = arith.constant 0 : i32
    %c0_i32_1 = arith.constant 0 : i32
    return %arg0, %c0_i32, %c0_i32_0, %arg1 : i32, i32, i32, i32
  }
}

module attributes {stable_mosaic.version = 11 : i64} {
  func.func @_conv3x3_s1_kernel(%arg0: i32, %arg1: i32, %arg2: memref<1x18x18x32xbf16, #tpu.memory_space<vmem>>, %arg3: memref<9x32x32xbf16, #tpu.memory_space<vmem>>, %arg4: memref<1x32xf32, #tpu.memory_space<vmem>>, %arg5: memref<1x16x16x32xbf16, #tpu.memory_space<vmem>>, %arg6: memref<1x16x16x32xbf16, #tpu.memory_space<vmem>>) attributes {dimension_semantics = [#tpu.dimension_semantics<parallel>, #tpu.dimension_semantics<parallel>], iteration_bounds = array<i64: 2, 1>, scalar_prefetch = 0 : i64, scratch_operands = 0 : i64, tpu.core_type = #tpu.core_type<tc>, window_params = [{transform_indices = @transform_0, window_bounds = array<i64: 1, 18, 18, 32>}, {transform_indices = @transform_1, window_bounds = array<i64: 9, 32, 32>}, {transform_indices = @transform_2, window_bounds = array<i64: 1, 32>}, {transform_indices = @transform_3, window_bounds = array<i64: 1, 16, 16, 32>}, {transform_indices = @transform_4, window_bounds = array<i64: 1, 16, 16, 32>}]} {
    %cst = arith.constant 0.000000e+00 : f32
    %0 = vector.broadcast %cst : f32 to vector<256x32xf32>
    %c0 = arith.constant 0 : index
    %c0_0 = arith.constant 0 : index
    %c0_1 = arith.constant 0 : index
    %c0_2 = arith.constant 0 : index
    %1 = vector.load %arg2[%c0, %c0_0, %c0_1, %c0_2] : memref<1x18x18x32xbf16, #tpu.memory_space<vmem>>, vector<1x16x16x32xbf16>
    %2 = vector.shape_cast %1 : vector<1x16x16x32xbf16> to vector<16x16x32xbf16>
    %3 = vector.shape_cast %2 : vector<16x16x32xbf16> to vector<256x32xbf16>
    %c0_3 = arith.constant 0 : index
    %c0_4 = arith.constant 0 : index
    %c0_5 = arith.constant 0 : index
    %4 = vector.load %arg3[%c0_3, %c0_4, %c0_5] : memref<9x32x32xbf16, #tpu.memory_space<vmem>>, vector<1x32x32xbf16>
    %5 = vector.shape_cast %4 : vector<1x32x32xbf16> to vector<32x32xbf16>
    %cst_6 = arith.constant dense<0.000000e+00> : vector<256x32xf32>
    %6 = tpu.matmul %3, %5, %cst_6 {dimension_numbers = #tpu.dot_dimension_numbers<[1], [0], [0], [1], [0, 0, 1, 1], [], []>} : vector<256x32xbf16>, vector<32x32xbf16>, vector<256x32xf32> -> vector<256x32xf32>
    %7 = arith.addf %0, %6 : vector<256x32xf32>
    %c0_7 = arith.constant 0 : index
    %c0_8 = arith.constant 0 : index
    %c1 = arith.constant 1 : index
    %c0_9 = arith.constant 0 : index
    %8 = vector.load %arg2[%c0_7, %c0_8, %c1, %c0_9] : memref<1x18x18x32xbf16, #tpu.memory_space<vmem>>, vector<1x16x16x32xbf16>
    %9 = vector.shape_cast %8 : vector<1x16x16x32xbf16> to vector<16x16x32xbf16>
    %10 = vector.shape_cast %9 : vector<16x16x32xbf16> to vector<256x32xbf16>
    %c1_10 = arith.constant 1 : index
    %c0_11 = arith.constant 0 : index
    %c0_12 = arith.constant 0 : index
    %11 = vector.load %arg3[%c1_10, %c0_11, %c0_12] : memref<9x32x32xbf16, #tpu.memory_space<vmem>>, vector<1x32x32xbf16>
    %12 = vector.shape_cast %11 : vector<1x32x32xbf16> to vector<32x32xbf16>
    %cst_13 = arith.constant dense<0.000000e+00> : vector<256x32xf32>
    %13 = tpu.matmul %10, %12, %cst_13 {dimension_numbers = #tpu.dot_dimension_numbers<[1], [0], [0], [1], [0, 0, 1, 1], [], []>} : vector<256x32xbf16>, vector<32x32xbf16>, vector<256x32xf32> -> vector<256x32xf32>
    %14 = arith.addf %7, %13 : vector<256x32xf32>
    %c0_14 = arith.constant 0 : index
    %c0_15 = arith.constant 0 : index
    %c2 = arith.constant 2 : index
    %c0_16 = arith.constant 0 : index
    %15 = vector.load %arg2[%c0_14, %c0_15, %c2, %c0_16] : memref<1x18x18x32xbf16, #tpu.memory_space<vmem>>, vector<1x16x16x32xbf16>
    %16 = vector.shape_cast %15 : vector<1x16x16x32xbf16> to vector<16x16x32xbf16>
    %17 = vector.shape_cast %16 : vector<16x16x32xbf16> to vector<256x32xbf16>
    %c2_17 = arith.constant 2 : index
    %c0_18 = arith.constant 0 : index
    %c0_19 = arith.constant 0 : index
    %18 = vector.load %arg3[%c2_17, %c0_18, %c0_19] : memref<9x32x32xbf16, #tpu.memory_space<vmem>>, vector<1x32x32xbf16>
    %19 = vector.shape_cast %18 : vector<1x32x32xbf16> to vector<32x32xbf16>
    %cst_20 = arith.constant dense<0.000000e+00> : vector<256x32xf32>
    %20 = tpu.matmul %17, %19, %cst_20 {dimension_numbers = #tpu.dot_dimension_numbers<[1], [0], [0], [1], [0, 0, 1, 1], [], []>} : vector<256x32xbf16>, vector<32x32xbf16>, vector<256x32xf32> -> vector<256x32xf32>
    %21 = arith.addf %14, %20 : vector<256x32xf32>
    %c0_21 = arith.constant 0 : index
    %c1_22 = arith.constant 1 : index
    %c0_23 = arith.constant 0 : index
    %c0_24 = arith.constant 0 : index
    %22 = vector.load %arg2[%c0_21, %c1_22, %c0_23, %c0_24] : memref<1x18x18x32xbf16, #tpu.memory_space<vmem>>, vector<1x16x16x32xbf16>
    %23 = vector.shape_cast %22 : vector<1x16x16x32xbf16> to vector<16x16x32xbf16>
    %24 = vector.shape_cast %23 : vector<16x16x32xbf16> to vector<256x32xbf16>
    %c3 = arith.constant 3 : index
    %c0_25 = arith.constant 0 : index
    %c0_26 = arith.constant 0 : index
    %25 = vector.load %arg3[%c3, %c0_25, %c0_26] : memref<9x32x32xbf16, #tpu.memory_space<vmem>>, vector<1x32x32xbf16>
    %26 = vector.shape_cast %25 : vector<1x32x32xbf16> to vector<32x32xbf16>
    %cst_27 = arith.constant dense<0.000000e+00> : vector<256x32xf32>
    %27 = tpu.matmul %24, %26, %cst_27 {dimension_numbers = #tpu.dot_dimension_numbers<[1], [0], [0], [1], [0, 0, 1, 1], [], []>} : vector<256x32xbf16>, vector<32x32xbf16>, vector<256x32xf32> -> vector<256x32xf32>
    %28 = arith.addf %21, %27 : vector<256x32xf32>
    %c0_28 = arith.constant 0 : index
    %c1_29 = arith.constant 1 : index
    %c1_30 = arith.constant 1 : index
    %c0_31 = arith.constant 0 : index
    %29 = vector.load %arg2[%c0_28, %c1_29, %c1_30, %c0_31] : memref<1x18x18x32xbf16, #tpu.memory_space<vmem>>, vector<1x16x16x32xbf16>
    %30 = vector.shape_cast %29 : vector<1x16x16x32xbf16> to vector<16x16x32xbf16>
    %31 = vector.shape_cast %30 : vector<16x16x32xbf16> to vector<256x32xbf16>
    %c4 = arith.constant 4 : index
    %c0_32 = arith.constant 0 : index
    %c0_33 = arith.constant 0 : index
    %32 = vector.load %arg3[%c4, %c0_32, %c0_33] : memref<9x32x32xbf16, #tpu.memory_space<vmem>>, vector<1x32x32xbf16>
    %33 = vector.shape_cast %32 : vector<1x32x32xbf16> to vector<32x32xbf16>
    %cst_34 = arith.constant dense<0.000000e+00> : vector<256x32xf32>
    %34 = tpu.matmul %31, %33, %cst_34 {dimension_numbers = #tpu.dot_dimension_numbers<[1], [0], [0], [1], [0, 0, 1, 1], [], []>} : vector<256x32xbf16>, vector<32x32xbf16>, vector<256x32xf32> -> vector<256x32xf32>
    %35 = arith.addf %28, %34 : vector<256x32xf32>
    %c0_35 = arith.constant 0 : index
    %c1_36 = arith.constant 1 : index
    %c2_37 = arith.constant 2 : index
    %c0_38 = arith.constant 0 : index
    %36 = vector.load %arg2[%c0_35, %c1_36, %c2_37, %c0_38] : memref<1x18x18x32xbf16, #tpu.memory_space<vmem>>, vector<1x16x16x32xbf16>
    %37 = vector.shape_cast %36 : vector<1x16x16x32xbf16> to vector<16x16x32xbf16>
    %38 = vector.shape_cast %37 : vector<16x16x32xbf16> to vector<256x32xbf16>
    %c5 = arith.constant 5 : index
    %c0_39 = arith.constant 0 : index
    %c0_40 = arith.constant 0 : index
    %39 = vector.load %arg3[%c5, %c0_39, %c0_40] : memref<9x32x32xbf16, #tpu.memory_space<vmem>>, vector<1x32x32xbf16>
    %40 = vector.shape_cast %39 : vector<1x32x32xbf16> to vector<32x32xbf16>
    %cst_41 = arith.constant dense<0.000000e+00> : vector<256x32xf32>
    %41 = tpu.matmul %38, %40, %cst_41 {dimension_numbers = #tpu.dot_dimension_numbers<[1], [0], [0], [1], [0, 0, 1, 1], [], []>} : vector<256x32xbf16>, vector<32x32xbf16>, vector<256x32xf32> -> vector<256x32xf32>
    %42 = arith.addf %35, %41 : vector<256x32xf32>
    %c0_42 = arith.constant 0 : index
    %c2_43 = arith.constant 2 : index
    %c0_44 = arith.constant 0 : index
    %c0_45 = arith.constant 0 : index
    %43 = vector.load %arg2[%c0_42, %c2_43, %c0_44, %c0_45] : memref<1x18x18x32xbf16, #tpu.memory_space<vmem>>, vector<1x16x16x32xbf16>
    %44 = vector.shape_cast %43 : vector<1x16x16x32xbf16> to vector<16x16x32xbf16>
    %45 = vector.shape_cast %44 : vector<16x16x32xbf16> to vector<256x32xbf16>
    %c6 = arith.constant 6 : index
    %c0_46 = arith.constant 0 : index
    %c0_47 = arith.constant 0 : index
    %46 = vector.load %arg3[%c6, %c0_46, %c0_47] : memref<9x32x32xbf16, #tpu.memory_space<vmem>>, vector<1x32x32xbf16>
    %47 = vector.shape_cast %46 : vector<1x32x32xbf16> to vector<32x32xbf16>
    %cst_48 = arith.constant dense<0.000000e+00> : vector<256x32xf32>
    %48 = tpu.matmul %45, %47, %cst_48 {dimension_numbers = #tpu.dot_dimension_numbers<[1], [0], [0], [1], [0, 0, 1, 1], [], []>} : vector<256x32xbf16>, vector<32x32xbf16>, vector<256x32xf32> -> vector<256x32xf32>
    %49 = arith.addf %42, %48 : vector<256x32xf32>
    %c0_49 = arith.constant 0 : index
    %c2_50 = arith.constant 2 : index
    %c1_51 = arith.constant 1 : index
    %c0_52 = arith.constant 0 : index
    %50 = vector.load %arg2[%c0_49, %c2_50, %c1_51, %c0_52] : memref<1x18x18x32xbf16, #tpu.memory_space<vmem>>, vector<1x16x16x32xbf16>
    %51 = vector.shape_cast %50 : vector<1x16x16x32xbf16> to vector<16x16x32xbf16>
    %52 = vector.shape_cast %51 : vector<16x16x32xbf16> to vector<256x32xbf16>
    %c7 = arith.constant 7 : index
    %c0_53 = arith.constant 0 : index
    %c0_54 = arith.constant 0 : index
    %53 = vector.load %arg3[%c7, %c0_53, %c0_54] : memref<9x32x32xbf16, #tpu.memory_space<vmem>>, vector<1x32x32xbf16>
    %54 = vector.shape_cast %53 : vector<1x32x32xbf16> to vector<32x32xbf16>
    %cst_55 = arith.constant dense<0.000000e+00> : vector<256x32xf32>
    %55 = tpu.matmul %52, %54, %cst_55 {dimension_numbers = #tpu.dot_dimension_numbers<[1], [0], [0], [1], [0, 0, 1, 1], [], []>} : vector<256x32xbf16>, vector<32x32xbf16>, vector<256x32xf32> -> vector<256x32xf32>
    %56 = arith.addf %49, %55 : vector<256x32xf32>
    %c0_56 = arith.constant 0 : index
    %c2_57 = arith.constant 2 : index
    %c2_58 = arith.constant 2 : index
    %c0_59 = arith.constant 0 : index
    %57 = vector.load %arg2[%c0_56, %c2_57, %c2_58, %c0_59] : memref<1x18x18x32xbf16, #tpu.memory_space<vmem>>, vector<1x16x16x32xbf16>
    %58 = vector.shape_cast %57 : vector<1x16x16x32xbf16> to vector<16x16x32xbf16>
    %59 = vector.shape_cast %58 : vector<16x16x32xbf16> to vector<256x32xbf16>
    %c8 = arith.constant 8 : index
    %c0_60 = arith.constant 0 : index
    %c0_61 = arith.constant 0 : index
    %60 = vector.load %arg3[%c8, %c0_60, %c0_61] : memref<9x32x32xbf16, #tpu.memory_space<vmem>>, vector<1x32x32xbf16>
    %61 = vector.shape_cast %60 : vector<1x32x32xbf16> to vector<32x32xbf16>
    %cst_62 = arith.constant dense<0.000000e+00> : vector<256x32xf32>
    %62 = tpu.matmul %59, %61, %cst_62 {dimension_numbers = #tpu.dot_dimension_numbers<[1], [0], [0], [1], [0, 0, 1, 1], [], []>} : vector<256x32xbf16>, vector<32x32xbf16>, vector<256x32xf32> -> vector<256x32xf32>
    %63 = arith.addf %56, %62 : vector<256x32xf32>
    %c0_63 = arith.constant 0 : index
    %c0_64 = arith.constant 0 : index
    %64 = vector.load %arg4[%c0_63, %c0_64] : memref<1x32xf32, #tpu.memory_space<vmem>>, vector<1x32xf32>
    %65 = vector.broadcast %64 : vector<1x32xf32> to vector<256x32xf32>
    %66 = arith.addf %63, %65 : vector<256x32xf32>
    %c0_65 = arith.constant 0 : index
    %c0_66 = arith.constant 0 : index
    %c0_67 = arith.constant 0 : index
    %c0_68 = arith.constant 0 : index
    %67 = vector.load %arg5[%c0_65, %c0_66, %c0_67, %c0_68] : memref<1x16x16x32xbf16, #tpu.memory_space<vmem>>, vector<1x16x16x32xbf16>
    %68 = vector.shape_cast %67 : vector<1x16x16x32xbf16> to vector<16x16x32xbf16>
    %69 = vector.shape_cast %68 : vector<16x16x32xbf16> to vector<256x32xbf16>
    %70 = arith.extf %69 : vector<256x32xbf16> to vector<256x32xf32>
    %71 = arith.addf %66, %70 : vector<256x32xf32>
    %cst_69 = arith.constant 0.000000e+00 : f32
    %72 = vector.broadcast %cst_69 : f32 to vector<256x32xf32>
    %73 = arith.maximumf %71, %72 : vector<256x32xf32>
    %74 = vector.shape_cast %73 : vector<256x32xf32> to vector<16x16x32xf32>
    %75 = arith.truncf %74 : vector<16x16x32xf32> to vector<16x16x32xbf16>
    %c0_70 = arith.constant 0 : index
    %c0_71 = arith.constant 0 : index
    %c0_72 = arith.constant 0 : index
    %c0_73 = arith.constant 0 : index
    %76 = vector.load %arg6[%c0_70, %c0_71, %c0_72, %c0_73] : memref<1x16x16x32xbf16, #tpu.memory_space<vmem>>, vector<1x16x16x32xbf16>
    %77 = vector.shape_cast %76 : vector<1x16x16x32xbf16> to vector<16x16x32xbf16>
    %78 = vector.shape_cast %75 : vector<16x16x32xbf16> to vector<1x16x16x32xbf16>
    tpu.vector_store %arg6[%c0_70, %c0_71, %c0_72, %c0_73], %78 {strides = array<i32>} : memref<1x16x16x32xbf16, #tpu.memory_space<vmem>>, vector<1x16x16x32xbf16>,
    return
  }
  func.func @transform_0(%arg0: i32, %arg1: i32) -> (i32, i32, i32, i32) {
    %c0_i32 = arith.constant 0 : i32
    %c0_i32_0 = arith.constant 0 : i32
    %c0_i32_1 = arith.constant 0 : i32
    %c0_i32_2 = arith.constant 0 : i32
    return %arg0, %c0_i32, %c0_i32_0, %c0_i32_1 : i32, i32, i32, i32
  }
  func.func @transform_1(%arg0: i32, %arg1: i32) -> (i32, i32, i32) {
    %c0_i32 = arith.constant 0 : i32
    %c0_i32_0 = arith.constant 0 : i32
    %c0_i32_1 = arith.constant 0 : i32
    return %c0_i32, %c0_i32_0, %arg1 : i32, i32, i32
  }
  func.func @transform_2(%arg0: i32, %arg1: i32) -> (i32, i32) {
    %c0_i32 = arith.constant 0 : i32
    %c0_i32_0 = arith.constant 0 : i32
    return %c0_i32, %arg1 : i32, i32
  }
  func.func @transform_3(%arg0: i32, %arg1: i32) -> (i32, i32, i32, i32) {
    %c0_i32 = arith.constant 0 : i32
    %c0_i32_0 = arith.constant 0 : i32
    %c0_i32_1 = arith.constant 0 : i32
    return %arg0, %c0_i32, %c0_i32_0, %arg1 : i32, i32, i32, i32
  }
  func.func @transform_4(%arg0: i32, %arg1: i32) -> (i32, i32, i32, i32) {
    %c0_i32 = arith.constant 0 : i32
    %c0_i32_0 = arith.constant 0 : i32
    %c0_i32_1 = arith.constant 0 : i32
    return %arg0, %c0_i32, %c0_i32_0, %arg1 : i32, i32, i32, i32
  }
}

module attributes {stable_mosaic.version = 11 : i64} {
  func.func @_mm_kernel_single(%arg0: i32, %arg1: memref<128x32xbf16, #tpu.memory_space<vmem>>, %arg2: memref<32x64xbf16, #tpu.memory_space<vmem>>, %arg3: memref<1x64xf32, #tpu.memory_space<vmem>>, %arg4: memref<128x64xbf16, #tpu.memory_space<vmem>>) attributes {dimension_semantics = [#tpu.dimension_semantics<arbitrary>], iteration_bounds = array<i64: 1>, scalar_prefetch = 0 : i64, scratch_operands = 0 : i64, tpu.core_type = #tpu.core_type<tc>, window_params = [{pipeline_mode = #tpu.pipeline_mode<synchronous>, transform_indices = @transform_0, window_bounds = array<i64: 128, 32>}, {pipeline_mode = #tpu.pipeline_mode<synchronous>, transform_indices = @transform_1, window_bounds = array<i64: 32, 64>}, {pipeline_mode = #tpu.pipeline_mode<synchronous>, transform_indices = @transform_2, window_bounds = array<i64: 1, 64>}, {pipeline_mode = #tpu.pipeline_mode<synchronous>, transform_indices = @transform_3, window_bounds = array<i64: 128, 64>}]} {
    %c0 = arith.constant 0 : index
    %c0_0 = arith.constant 0 : index
    %0 = vector.load %arg1[%c0, %c0_0] : memref<128x32xbf16, #tpu.memory_space<vmem>>, vector<128x32xbf16>
    %c0_1 = arith.constant 0 : index
    %c0_2 = arith.constant 0 : index
    %1 = vector.load %arg2[%c0_1, %c0_2] : memref<32x64xbf16, #tpu.memory_space<vmem>>, vector<32x64xbf16>
    %cst = arith.constant dense<0.000000e+00> : vector<128x64xf32>
    %2 = tpu.matmul %0, %1, %cst {dimension_numbers = #tpu.dot_dimension_numbers<[1], [0], [0], [1], [0, 0, 1, 1], [], []>} : vector<128x32xbf16>, vector<32x64xbf16>, vector<128x64xf32> -> vector<128x64xf32>
    %c0_3 = arith.constant 0 : index
    %c0_4 = arith.constant 0 : index
    %3 = vector.load %arg3[%c0_3, %c0_4] : memref<1x64xf32, #tpu.memory_space<vmem>>, vector<1x64xf32>
    %4 = vector.broadcast %3 : vector<1x64xf32> to vector<128x64xf32>
    %5 = arith.addf %2, %4 : vector<128x64xf32>
    %6 = arith.truncf %5 : vector<128x64xf32> to vector<128x64xbf16>
    %c0_5 = arith.constant 0 : index
    %c0_6 = arith.constant 0 : index
    %7 = vector.load %arg4[%c0_5, %c0_6] : memref<128x64xbf16, #tpu.memory_space<vmem>>, vector<128x64xbf16>
    tpu.vector_store %arg4[%c0_5, %c0_6], %6 {strides = array<i32>} : memref<128x64xbf16, #tpu.memory_space<vmem>>, vector<128x64xbf16>,
    return
  }
  func.func @transform_0(%arg0: i32) -> (i32, i32) {
    %c0_i32 = arith.constant 0 : i32
    %c0_i32_0 = arith.constant 0 : i32
    %c0_i32_1 = arith.constant 0 : i32
    return %c0_i32, %c0_i32_0 : i32, i32
  }
  func.func @transform_1(%arg0: i32) -> (i32, i32) {
    %c0_i32 = arith.constant 0 : i32
    %c0_i32_0 = arith.constant 0 : i32
    %c0_i32_1 = arith.constant 0 : i32
    return %c0_i32, %c0_i32_0 : i32, i32
  }
  func.func @transform_2(%arg0: i32) -> (i32, i32) {
    %c0_i32 = arith.constant 0 : i32
    %c0_i32_0 = arith.constant 0 : i32
    %c0_i32_1 = arith.constant 0 : i32
    return %c0_i32, %c0_i32_0 : i32, i32
  }
  func.func @transform_3(%arg0: i32) -> (i32, i32) {
    %c0_i32 = arith.constant 0 : i32
    %c0_i32_0 = arith.constant 0 : i32
    %c0_i32_1 = arith.constant 0 : i32
    return %c0_i32, %c0_i32_0 : i32, i32
  }
}

module attributes {stable_mosaic.version = 11 : i64} {
  func.func @_mm_kernel_single(%arg0: i32, %arg1: memref<128x288xbf16, #tpu.memory_space<vmem>>, %arg2: memref<288x64xbf16, #tpu.memory_space<vmem>>, %arg3: memref<1x64xf32, #tpu.memory_space<vmem>>, %arg4: memref<128x64xbf16, #tpu.memory_space<vmem>>) attributes {dimension_semantics = [#tpu.dimension_semantics<arbitrary>], iteration_bounds = array<i64: 1>, scalar_prefetch = 0 : i64, scratch_operands = 0 : i64, tpu.core_type = #tpu.core_type<tc>, window_params = [{pipeline_mode = #tpu.pipeline_mode<synchronous>, transform_indices = @transform_0, window_bounds = array<i64: 128, 288>}, {pipeline_mode = #tpu.pipeline_mode<synchronous>, transform_indices = @transform_1, window_bounds = array<i64: 288, 64>}, {pipeline_mode = #tpu.pipeline_mode<synchronous>, transform_indices = @transform_2, window_bounds = array<i64: 1, 64>}, {pipeline_mode = #tpu.pipeline_mode<synchronous>, transform_indices = @transform_3, window_bounds = array<i64: 128, 64>}]} {
    %c0 = arith.constant 0 : index
    %c0_0 = arith.constant 0 : index
    %0 = vector.load %arg1[%c0, %c0_0] : memref<128x288xbf16, #tpu.memory_space<vmem>>, vector<128x288xbf16>
    %c0_1 = arith.constant 0 : index
    %c0_2 = arith.constant 0 : index
    %1 = vector.load %arg2[%c0_1, %c0_2] : memref<288x64xbf16, #tpu.memory_space<vmem>>, vector<288x64xbf16>
    %cst = arith.constant dense<0.000000e+00> : vector<128x64xf32>
    %2 = tpu.matmul %0, %1, %cst {dimension_numbers = #tpu.dot_dimension_numbers<[1], [0], [0], [1], [0, 0, 1, 1], [], []>} : vector<128x288xbf16>, vector<288x64xbf16>, vector<128x64xf32> -> vector<128x64xf32>
    %c0_3 = arith.constant 0 : index
    %c0_4 = arith.constant 0 : index
    %3 = vector.load %arg3[%c0_3, %c0_4] : memref<1x64xf32, #tpu.memory_space<vmem>>, vector<1x64xf32>
    %4 = vector.broadcast %3 : vector<1x64xf32> to vector<128x64xf32>
    %5 = arith.addf %2, %4 : vector<128x64xf32>
    %cst_5 = arith.constant 0.000000e+00 : f32
    %6 = vector.broadcast %cst_5 : f32 to vector<128x64xf32>
    %7 = arith.maximumf %5, %6 : vector<128x64xf32>
    %8 = arith.truncf %7 : vector<128x64xf32> to vector<128x64xbf16>
    %c0_6 = arith.constant 0 : index
    %c0_7 = arith.constant 0 : index
    %9 = vector.load %arg4[%c0_6, %c0_7] : memref<128x64xbf16, #tpu.memory_space<vmem>>, vector<128x64xbf16>
    tpu.vector_store %arg4[%c0_6, %c0_7], %8 {strides = array<i32>} : memref<128x64xbf16, #tpu.memory_space<vmem>>, vector<128x64xbf16>,
    return
  }
  func.func @transform_0(%arg0: i32) -> (i32, i32) {
    %c0_i32 = arith.constant 0 : i32
    %c0_i32_0 = arith.constant 0 : i32
    %c0_i32_1 = arith.constant 0 : i32
    return %c0_i32, %c0_i32_0 : i32, i32
  }
  func.func @transform_1(%arg0: i32) -> (i32, i32) {
    %c0_i32 = arith.constant 0 : i32
    %c0_i32_0 = arith.constant 0 : i32
    %c0_i32_1 = arith.constant 0 : i32
    return %c0_i32, %c0_i32_0 : i32, i32
  }
  func.func @transform_2(%arg0: i32) -> (i32, i32) {
    %c0_i32 = arith.constant 0 : i32
    %c0_i32_0 = arith.constant 0 : i32
    %c0_i32_1 = arith.constant 0 : i32
    return %c0_i32, %c0_i32_0 : i32, i32
  }
  func.func @transform_3(%arg0: i32) -> (i32, i32) {
    %c0_i32 = arith.constant 0 : i32
    %c0_i32_0 = arith.constant 0 : i32
    %c0_i32_1 = arith.constant 0 : i32
    return %c0_i32, %c0_i32_0 : i32, i32
  }
}

module attributes {stable_mosaic.version = 11 : i64} {
  func.func @_conv3x3_s1_kernel(%arg0: i32, %arg1: i32, %arg2: memref<1x10x10x64xbf16, #tpu.memory_space<vmem>>, %arg3: memref<9x64x64xbf16, #tpu.memory_space<vmem>>, %arg4: memref<1x64xf32, #tpu.memory_space<vmem>>, %arg5: memref<1x8x8x64xbf16, #tpu.memory_space<vmem>>, %arg6: memref<1x8x8x64xbf16, #tpu.memory_space<vmem>>) attributes {dimension_semantics = [#tpu.dimension_semantics<parallel>, #tpu.dimension_semantics<parallel>], iteration_bounds = array<i64: 2, 1>, scalar_prefetch = 0 : i64, scratch_operands = 0 : i64, tpu.core_type = #tpu.core_type<tc>, window_params = [{transform_indices = @transform_0, window_bounds = array<i64: 1, 10, 10, 64>}, {transform_indices = @transform_1, window_bounds = array<i64: 9, 64, 64>}, {transform_indices = @transform_2, window_bounds = array<i64: 1, 64>}, {transform_indices = @transform_3, window_bounds = array<i64: 1, 8, 8, 64>}, {transform_indices = @transform_4, window_bounds = array<i64: 1, 8, 8, 64>}]} {
    %cst = arith.constant 0.000000e+00 : f32
    %0 = vector.broadcast %cst : f32 to vector<64x64xf32>
    %c0 = arith.constant 0 : index
    %c0_0 = arith.constant 0 : index
    %c0_1 = arith.constant 0 : index
    %c0_2 = arith.constant 0 : index
    %1 = vector.load %arg2[%c0, %c0_0, %c0_1, %c0_2] : memref<1x10x10x64xbf16, #tpu.memory_space<vmem>>, vector<1x8x8x64xbf16>
    %2 = vector.shape_cast %1 : vector<1x8x8x64xbf16> to vector<8x8x64xbf16>
    %3 = vector.shape_cast %2 : vector<8x8x64xbf16> to vector<64x64xbf16>
    %c0_3 = arith.constant 0 : index
    %c0_4 = arith.constant 0 : index
    %c0_5 = arith.constant 0 : index
    %4 = vector.load %arg3[%c0_3, %c0_4, %c0_5] : memref<9x64x64xbf16, #tpu.memory_space<vmem>>, vector<1x64x64xbf16>
    %5 = vector.shape_cast %4 : vector<1x64x64xbf16> to vector<64x64xbf16>
    %cst_6 = arith.constant dense<0.000000e+00> : vector<64x64xf32>
    %6 = tpu.matmul %3, %5, %cst_6 {dimension_numbers = #tpu.dot_dimension_numbers<[1], [0], [0], [1], [0, 0, 1, 1], [], []>} : vector<64x64xbf16>, vector<64x64xbf16>, vector<64x64xf32> -> vector<64x64xf32>
    %7 = arith.addf %0, %6 : vector<64x64xf32>
    %c0_7 = arith.constant 0 : index
    %c0_8 = arith.constant 0 : index
    %c1 = arith.constant 1 : index
    %c0_9 = arith.constant 0 : index
    %8 = vector.load %arg2[%c0_7, %c0_8, %c1, %c0_9] : memref<1x10x10x64xbf16, #tpu.memory_space<vmem>>, vector<1x8x8x64xbf16>
    %9 = vector.shape_cast %8 : vector<1x8x8x64xbf16> to vector<8x8x64xbf16>
    %10 = vector.shape_cast %9 : vector<8x8x64xbf16> to vector<64x64xbf16>
    %c1_10 = arith.constant 1 : index
    %c0_11 = arith.constant 0 : index
    %c0_12 = arith.constant 0 : index
    %11 = vector.load %arg3[%c1_10, %c0_11, %c0_12] : memref<9x64x64xbf16, #tpu.memory_space<vmem>>, vector<1x64x64xbf16>
    %12 = vector.shape_cast %11 : vector<1x64x64xbf16> to vector<64x64xbf16>
    %cst_13 = arith.constant dense<0.000000e+00> : vector<64x64xf32>
    %13 = tpu.matmul %10, %12, %cst_13 {dimension_numbers = #tpu.dot_dimension_numbers<[1], [0], [0], [1], [0, 0, 1, 1], [], []>} : vector<64x64xbf16>, vector<64x64xbf16>, vector<64x64xf32> -> vector<64x64xf32>
    %14 = arith.addf %7, %13 : vector<64x64xf32>
    %c0_14 = arith.constant 0 : index
    %c0_15 = arith.constant 0 : index
    %c2 = arith.constant 2 : index
    %c0_16 = arith.constant 0 : index
    %15 = vector.load %arg2[%c0_14, %c0_15, %c2, %c0_16] : memref<1x10x10x64xbf16, #tpu.memory_space<vmem>>, vector<1x8x8x64xbf16>
    %16 = vector.shape_cast %15 : vector<1x8x8x64xbf16> to vector<8x8x64xbf16>
    %17 = vector.shape_cast %16 : vector<8x8x64xbf16> to vector<64x64xbf16>
    %c2_17 = arith.constant 2 : index
    %c0_18 = arith.constant 0 : index
    %c0_19 = arith.constant 0 : index
    %18 = vector.load %arg3[%c2_17, %c0_18, %c0_19] : memref<9x64x64xbf16, #tpu.memory_space<vmem>>, vector<1x64x64xbf16>
    %19 = vector.shape_cast %18 : vector<1x64x64xbf16> to vector<64x64xbf16>
    %cst_20 = arith.constant dense<0.000000e+00> : vector<64x64xf32>
    %20 = tpu.matmul %17, %19, %cst_20 {dimension_numbers = #tpu.dot_dimension_numbers<[1], [0], [0], [1], [0, 0, 1, 1], [], []>} : vector<64x64xbf16>, vector<64x64xbf16>, vector<64x64xf32> -> vector<64x64xf32>
    %21 = arith.addf %14, %20 : vector<64x64xf32>
    %c0_21 = arith.constant 0 : index
    %c1_22 = arith.constant 1 : index
    %c0_23 = arith.constant 0 : index
    %c0_24 = arith.constant 0 : index
    %22 = vector.load %arg2[%c0_21, %c1_22, %c0_23, %c0_24] : memref<1x10x10x64xbf16, #tpu.memory_space<vmem>>, vector<1x8x8x64xbf16>
    %23 = vector.shape_cast %22 : vector<1x8x8x64xbf16> to vector<8x8x64xbf16>
    %24 = vector.shape_cast %23 : vector<8x8x64xbf16> to vector<64x64xbf16>
    %c3 = arith.constant 3 : index
    %c0_25 = arith.constant 0 : index
    %c0_26 = arith.constant 0 : index
    %25 = vector.load %arg3[%c3, %c0_25, %c0_26] : memref<9x64x64xbf16, #tpu.memory_space<vmem>>, vector<1x64x64xbf16>
    %26 = vector.shape_cast %25 : vector<1x64x64xbf16> to vector<64x64xbf16>
    %cst_27 = arith.constant dense<0.000000e+00> : vector<64x64xf32>
    %27 = tpu.matmul %24, %26, %cst_27 {dimension_numbers = #tpu.dot_dimension_numbers<[1], [0], [0], [1], [0, 0, 1, 1], [], []>} : vector<64x64xbf16>, vector<64x64xbf16>, vector<64x64xf32> -> vector<64x64xf32>
    %28 = arith.addf %21, %27 : vector<64x64xf32>
    %c0_28 = arith.constant 0 : index
    %c1_29 = arith.constant 1 : index
    %c1_30 = arith.constant 1 : index
    %c0_31 = arith.constant 0 : index
    %29 = vector.load %arg2[%c0_28, %c1_29, %c1_30, %c0_31] : memref<1x10x10x64xbf16, #tpu.memory_space<vmem>>, vector<1x8x8x64xbf16>
    %30 = vector.shape_cast %29 : vector<1x8x8x64xbf16> to vector<8x8x64xbf16>
    %31 = vector.shape_cast %30 : vector<8x8x64xbf16> to vector<64x64xbf16>
    %c4 = arith.constant 4 : index
    %c0_32 = arith.constant 0 : index
    %c0_33 = arith.constant 0 : index
    %32 = vector.load %arg3[%c4, %c0_32, %c0_33] : memref<9x64x64xbf16, #tpu.memory_space<vmem>>, vector<1x64x64xbf16>
    %33 = vector.shape_cast %32 : vector<1x64x64xbf16> to vector<64x64xbf16>
    %cst_34 = arith.constant dense<0.000000e+00> : vector<64x64xf32>
    %34 = tpu.matmul %31, %33, %cst_34 {dimension_numbers = #tpu.dot_dimension_numbers<[1], [0], [0], [1], [0, 0, 1, 1], [], []>} : vector<64x64xbf16>, vector<64x64xbf16>, vector<64x64xf32> -> vector<64x64xf32>
    %35 = arith.addf %28, %34 : vector<64x64xf32>
    %c0_35 = arith.constant 0 : index
    %c1_36 = arith.constant 1 : index
    %c2_37 = arith.constant 2 : index
    %c0_38 = arith.constant 0 : index
    %36 = vector.load %arg2[%c0_35, %c1_36, %c2_37, %c0_38] : memref<1x10x10x64xbf16, #tpu.memory_space<vmem>>, vector<1x8x8x64xbf16>
    %37 = vector.shape_cast %36 : vector<1x8x8x64xbf16> to vector<8x8x64xbf16>
    %38 = vector.shape_cast %37 : vector<8x8x64xbf16> to vector<64x64xbf16>
    %c5 = arith.constant 5 : index
    %c0_39 = arith.constant 0 : index
    %c0_40 = arith.constant 0 : index
    %39 = vector.load %arg3[%c5, %c0_39, %c0_40] : memref<9x64x64xbf16, #tpu.memory_space<vmem>>, vector<1x64x64xbf16>
    %40 = vector.shape_cast %39 : vector<1x64x64xbf16> to vector<64x64xbf16>
    %cst_41 = arith.constant dense<0.000000e+00> : vector<64x64xf32>
    %41 = tpu.matmul %38, %40, %cst_41 {dimension_numbers = #tpu.dot_dimension_numbers<[1], [0], [0], [1], [0, 0, 1, 1], [], []>} : vector<64x64xbf16>, vector<64x64xbf16>, vector<64x64xf32> -> vector<64x64xf32>
    %42 = arith.addf %35, %41 : vector<64x64xf32>
    %c0_42 = arith.constant 0 : index
    %c2_43 = arith.constant 2 : index
    %c0_44 = arith.constant 0 : index
    %c0_45 = arith.constant 0 : index
    %43 = vector.load %arg2[%c0_42, %c2_43, %c0_44, %c0_45] : memref<1x10x10x64xbf16, #tpu.memory_space<vmem>>, vector<1x8x8x64xbf16>
    %44 = vector.shape_cast %43 : vector<1x8x8x64xbf16> to vector<8x8x64xbf16>
    %45 = vector.shape_cast %44 : vector<8x8x64xbf16> to vector<64x64xbf16>
    %c6 = arith.constant 6 : index
    %c0_46 = arith.constant 0 : index
    %c0_47 = arith.constant 0 : index
    %46 = vector.load %arg3[%c6, %c0_46, %c0_47] : memref<9x64x64xbf16, #tpu.memory_space<vmem>>, vector<1x64x64xbf16>
    %47 = vector.shape_cast %46 : vector<1x64x64xbf16> to vector<64x64xbf16>
    %cst_48 = arith.constant dense<0.000000e+00> : vector<64x64xf32>
    %48 = tpu.matmul %45, %47, %cst_48 {dimension_numbers = #tpu.dot_dimension_numbers<[1], [0], [0], [1], [0, 0, 1, 1], [], []>} : vector<64x64xbf16>, vector<64x64xbf16>, vector<64x64xf32> -> vector<64x64xf32>
    %49 = arith.addf %42, %48 : vector<64x64xf32>
    %c0_49 = arith.constant 0 : index
    %c2_50 = arith.constant 2 : index
    %c1_51 = arith.constant 1 : index
    %c0_52 = arith.constant 0 : index
    %50 = vector.load %arg2[%c0_49, %c2_50, %c1_51, %c0_52] : memref<1x10x10x64xbf16, #tpu.memory_space<vmem>>, vector<1x8x8x64xbf16>
    %51 = vector.shape_cast %50 : vector<1x8x8x64xbf16> to vector<8x8x64xbf16>
    %52 = vector.shape_cast %51 : vector<8x8x64xbf16> to vector<64x64xbf16>
    %c7 = arith.constant 7 : index
    %c0_53 = arith.constant 0 : index
    %c0_54 = arith.constant 0 : index
    %53 = vector.load %arg3[%c7, %c0_53, %c0_54] : memref<9x64x64xbf16, #tpu.memory_space<vmem>>, vector<1x64x64xbf16>
    %54 = vector.shape_cast %53 : vector<1x64x64xbf16> to vector<64x64xbf16>
    %cst_55 = arith.constant dense<0.000000e+00> : vector<64x64xf32>
    %55 = tpu.matmul %52, %54, %cst_55 {dimension_numbers = #tpu.dot_dimension_numbers<[1], [0], [0], [1], [0, 0, 1, 1], [], []>} : vector<64x64xbf16>, vector<64x64xbf16>, vector<64x64xf32> -> vector<64x64xf32>
    %56 = arith.addf %49, %55 : vector<64x64xf32>
    %c0_56 = arith.constant 0 : index
    %c2_57 = arith.constant 2 : index
    %c2_58 = arith.constant 2 : index
    %c0_59 = arith.constant 0 : index
    %57 = vector.load %arg2[%c0_56, %c2_57, %c2_58, %c0_59] : memref<1x10x10x64xbf16, #tpu.memory_space<vmem>>, vector<1x8x8x64xbf16>
    %58 = vector.shape_cast %57 : vector<1x8x8x64xbf16> to vector<8x8x64xbf16>
    %59 = vector.shape_cast %58 : vector<8x8x64xbf16> to vector<64x64xbf16>
    %c8 = arith.constant 8 : index
    %c0_60 = arith.constant 0 : index
    %c0_61 = arith.constant 0 : index
    %60 = vector.load %arg3[%c8, %c0_60, %c0_61] : memref<9x64x64xbf16, #tpu.memory_space<vmem>>, vector<1x64x64xbf16>
    %61 = vector.shape_cast %60 : vector<1x64x64xbf16> to vector<64x64xbf16>
    %cst_62 = arith.constant dense<0.000000e+00> : vector<64x64xf32>
    %62 = tpu.matmul %59, %61, %cst_62 {dimension_numbers = #tpu.dot_dimension_numbers<[1], [0], [0], [1], [0, 0, 1, 1], [], []>} : vector<64x64xbf16>, vector<64x64xbf16>, vector<64x64xf32> -> vector<64x64xf32>
    %63 = arith.addf %56, %62 : vector<64x64xf32>
    %c0_63 = arith.constant 0 : index
    %c0_64 = arith.constant 0 : index
    %64 = vector.load %arg4[%c0_63, %c0_64] : memref<1x64xf32, #tpu.memory_space<vmem>>, vector<1x64xf32>
    %65 = vector.broadcast %64 : vector<1x64xf32> to vector<64x64xf32>
    %66 = arith.addf %63, %65 : vector<64x64xf32>
    %c0_65 = arith.constant 0 : index
    %c0_66 = arith.constant 0 : index
    %c0_67 = arith.constant 0 : index
    %c0_68 = arith.constant 0 : index
    %67 = vector.load %arg5[%c0_65, %c0_66, %c0_67, %c0_68] : memref<1x8x8x64xbf16, #tpu.memory_space<vmem>>, vector<1x8x8x64xbf16>
    %68 = vector.shape_cast %67 : vector<1x8x8x64xbf16> to vector<8x8x64xbf16>
    %69 = vector.shape_cast %68 : vector<8x8x64xbf16> to vector<64x64xbf16>
    %70 = arith.extf %69 : vector<64x64xbf16> to vector<64x64xf32>
    %71 = arith.addf %66, %70 : vector<64x64xf32>
    %cst_69 = arith.constant 0.000000e+00 : f32
    %72 = vector.broadcast %cst_69 : f32 to vector<64x64xf32>
    %73 = arith.maximumf %71, %72 : vector<64x64xf32>
    %74 = vector.shape_cast %73 : vector<64x64xf32> to vector<8x8x64xf32>
    %75 = arith.truncf %74 : vector<8x8x64xf32> to vector<8x8x64xbf16>
    %c0_70 = arith.constant 0 : index
    %c0_71 = arith.constant 0 : index
    %c0_72 = arith.constant 0 : index
    %c0_73 = arith.constant 0 : index
    %76 = vector.load %arg6[%c0_70, %c0_71, %c0_72, %c0_73] : memref<1x8x8x64xbf16, #tpu.memory_space<vmem>>, vector<1x8x8x64xbf16>
    %77 = vector.shape_cast %76 : vector<1x8x8x64xbf16> to vector<8x8x64xbf16>
    %78 = vector.shape_cast %75 : vector<8x8x64xbf16> to vector<1x8x8x64xbf16>
    tpu.vector_store %arg6[%c0_70, %c0_71, %c0_72, %c0_73], %78 {strides = array<i32>} : memref<1x8x8x64xbf16, #tpu.memory_space<vmem>>, vector<1x8x8x64xbf16>,
    return
  }
  func.func @transform_0(%arg0: i32, %arg1: i32) -> (i32, i32, i32, i32) {
    %c0_i32 = arith.constant 0 : i32
    %c0_i32_0 = arith.constant 0 : i32
    %c0_i32_1 = arith.constant 0 : i32
    %c0_i32_2 = arith.constant 0 : i32
    return %arg0, %c0_i32, %c0_i32_0, %c0_i32_1 : i32, i32, i32, i32
  }
  func.func @transform_1(%arg0: i32, %arg1: i32) -> (i32, i32, i32) {
    %c0_i32 = arith.constant 0 : i32
    %c0_i32_0 = arith.constant 0 : i32
    %c0_i32_1 = arith.constant 0 : i32
    return %c0_i32, %c0_i32_0, %arg1 : i32, i32, i32
  }
  func.func @transform_2(%arg0: i32, %arg1: i32) -> (i32, i32) {
    %c0_i32 = arith.constant 0 : i32
    %c0_i32_0 = arith.constant 0 : i32
    return %c0_i32, %arg1 : i32, i32
  }
  func.func @transform_3(%arg0: i32, %arg1: i32) -> (i32, i32, i32, i32) {
    %c0_i32 = arith.constant 0 : i32
    %c0_i32_0 = arith.constant 0 : i32
    %c0_i32_1 = arith.constant 0 : i32
    return %arg0, %c0_i32, %c0_i32_0, %arg1 : i32, i32, i32, i32
  }
  func.func @transform_4(%arg0: i32, %arg1: i32) -> (i32, i32, i32, i32) {
    %c0_i32 = arith.constant 0 : i32
    %c0_i32_0 = arith.constant 0 : i32
    %c0_i32_1 = arith.constant 0 : i32
    return %arg0, %c0_i32, %c0_i32_0, %arg1 : i32, i32, i32, i32
  }
}

</mosaic_0001>

<bundles_post_ra>
// kernel: fwd.8
= control target key start
LH: loop header
LB: loop body
LE: loop exit
PB: predicated region body
PF: predicated region fallthrough
CT: control target
= control target key end

     0   :  { %8 = vsyncpa [#allocation3], 0  ;;  %s664_s0 = inlined_call_operand.hbm [shape: bf16[128,32], index: 0, kind: input, shape index: {}]   ;;  %s665_s1 = inlined_call_operand.hbm [shape: bf16[32,64], index: 1, kind: input, shape index: {}]   ;;  %s666_s2 = inlined_call_operand.hbm [shape: f32[1,64], index: 2, kind: input, shape index: {}]   ;;  %s667_s3 = inlined_call_operand.hbm [shape: bf16[128,64], index: 3, kind: output, shape index: {}]  }
   0x1   :  { %9 = vsyncpa [#allocation6], 0 }
   0x2   :  { %10 = vsyncpa [#allocation4], 0  ;;  %s550_s12 = smov [#allocation5]   ;;  %s551_s14 = smov [#allocation2]  }
   0x3   :  { %s28_s13 = sshll.u32 %s550_s12, 4  ;;  %s16_s15 = sshll.u32 %s551_s14, 4  ;;  %s29_s13 = int_to_ptr.vmem [resolvable:$true] %s28_s13  ;;  %s576_s15 = int_to_ptr.vmem [resolvable:$true] %s16_s15 }
   0x4   :  { %s456_s18 = scalar_lea.hbm %s665_s1, 256 }
   0x5   :  { %p457_p0 = scmp.ne.s32.totalorder %s665_s1, %s456_s18  ;;  %p460_p1 = scmp.lt.u32.totalorder %s456_s18, %s665_s1 }
   0x7   :  { %p462_p2 = pnand %p460_p1, %p457_p0 }
   0x9   :  { %465 = shalt.err (!%p462_p2)
}
   0xa   :  { %s466_s23 = scalar_lea.vmem %s29_s13, 256  ;;  %p471_p4 = scmp.lt.s32.totalorder %s29_s13, %s29_s13 }
   0xb   :  { %p467_p3 = scmp.ne.s32.totalorder %s29_s13, %s466_s23  ;;  %p472_p5 = scmp.lt.s32.totalorder %s466_s23, %s466_s23 }
   0xd   :  { %p473_p6 = por %p472_p5, %p471_p4 }
   0xf   :  { %p474_p7 = pnand %p473_p6, %p467_p3 }
  0x11   :  { %477 = shalt.err (!%p474_p7)
}
  0x12   :  { %s552_s24 = smov 64   ;;  %s553_s25 = smov 4  }
  0x13   :  { %34 = dma.hbm_to_vmem [thread:$0]  %s665_s1, 256, %s29_s13, [#allocation6], %s552_s24, %s552_s24, %s553_s25  }
  0x14   :  { %s478_s30 = scalar_lea.hbm %s664_s0, 1024 }
  0x15   :  { %p479_p8 = scmp.ne.s32.totalorder %s664_s0, %s478_s30  ;;  %p482_p9 = scmp.lt.u32.totalorder %s478_s30, %s664_s0 }
  0x17   :  { %p484_p10 = pnand %p482_p9, %p479_p8 }
  0x19   :  { %487 = shalt.err (!%p484_p10)
}
  0x1a   :  { %s488_s8 = scalar_lea.vmem %s576_s15, 1024  ;;  %p493_p12 = scmp.lt.s32.totalorder %s576_s15, %s576_s15 }
  0x1b   :  { %p489_p11 = scmp.ne.s32.totalorder %s576_s15, %s488_s8  ;;  %p494_p13 = scmp.lt.s32.totalorder %s488_s8, %s488_s8 }
  0x1d   :  { %p495_p0 = por %p494_p13, %p493_p12 }
  0x1f   :  { %p496_p1 = pnand %p495_p0, %p489_p11 }
  0x21   :  { %499 = shalt.err (!%p496_p1)
}
  0x22   :  { %22 = dma.hbm_to_vmem [thread:$0]  %s664_s0, 1024, %s576_s15, [#allocation3], %s552_s24, %s552_s24, %s553_s25  }
  0x23   :  { %s554_s10 = smov [#allocation7]   ;;  %s500_s14 = scalar_lea.hbm %s666_s2, 16 }
  0x24   :  { %s41_s11 = sshll.u32 %s554_s10, 4  ;;  %p501_p2 = scmp.ne.s32.totalorder %s666_s2, %s500_s14  ;;  %s42_s11 = int_to_ptr.vmem [resolvable:$true] %s41_s11 }
  0x25   :  { %p504_p3 = scmp.lt.u32.totalorder %s500_s14, %s666_s2 }
  0x27   :  { %p506_p4 = pnand %p504_p3, %p501_p2 }
  0x29   :  { %509 = shalt.err (!%p506_p4)
}
  0x2a   :  { %s510_s20 = scalar_lea.vmem %s42_s11, 16  ;;  %s514_s0 = scalar_lea.vmem %s42_s11, 32 }
  0x2b   :  { %p511_p5 = scmp.ne.s32.totalorder %s42_s11, %s510_s20  ;;  %p515_p6 = scmp.lt.s32.totalorder %s42_s11, %s42_s11 }
  0x2c   :  { %p516_p7 = scmp.lt.s32.totalorder %s514_s0, %s510_s20 }
  0x2e   :  { %p517_p8 = por %p516_p7, %p515_p6 }
  0x30   :  { %p518_p9 = pnand %p517_p8, %p511_p5 }
  0x32   :  { %521 = shalt.err (!%p518_p9)
}
  0x33   :  { %44 = dma.hbm_to_vmem [thread:$0]  %s666_s2, 16, %s42_s11, [#allocation6]  }
  0x34   :  { %544 = dma.done.wait [#allocation3], 1024  }
  0x35   :  { %545 = vsyncadd [#allocation3], 4294966272 }
  0x36   :  { %546 = dma.done.wait [#allocation6], 272  }
  0x37   :  { %547 = vsyncadd [#allocation6], 4294967024  ;;  %v446_v0 = vld [vmem:[#allocation5] sm:$0xff]   ;;  %v447_v1 = vld [vmem:[#allocation5 + $0x8] sm:$0xff]   ;;  %vm134_vm0 = vcmask 261120   ;;  %vm320_vm1 = vcmask 519168  }
  0x38   :  { %416 = vmatprep.subr.bf16.mxu0 %v446_v0  ;;  %436 = vmatprep.subr.bf16.mxu1 %v446_v0  ;;  %v448_v2 = vld [vmem:[#allocation2] sm:$0xff]   ;;  %v450_v4 = vld [vmem:[#allocation2 + $0x8] sm:$0xff]   ;;  %v452_v6 = vld [vmem:[#allocation2 + $0x10] sm:$0xff]   ;;  %s555_s2 = smov [#allocation8]  }
  0x39   :  { %417 = vmatpush3.bf16.msra.mxu0 %v446_v0  ;;  %438 = vmatpush3.bf16.msra.mxu1 %v446_v0  ;;  %v449_v3 = vld [vmem:[#allocation2 + $0x20] sm:$0xff]   ;;  %v451_v5 = vld [vmem:[#allocation2 + $0x28] sm:$0xff]   ;;  %v453_v7 = vld [vmem:[#allocation2 + $0x30] sm:$0xff]   ;;  %s342_s22 = sshll.u32 %s555_s2, 4  ;;  %s343_s22 = int_to_ptr.vmem [resolvable:$true] %s342_s22 }
  0x3a   :  { %418 = vmatprep.subr.bf16.mxu0 %v447_v1  ;;  %437 = vmatprep.subr.bf16.mxu1 %v447_v1  ;;  %v454_v8 = vld [vmem:[#allocation2 + $0x18] sm:$0xff]   ;;  %v355_v10 = vld [vmem:[#allocation7] ss:$0 sm:$0xff]  ;;  %s522_s23 = scalar_lea.vmem %s343_s22, 1024  ;;  %p527_p11 = scmp.lt.s32.totalorder %s343_s22, %s343_s22 }
  0x3b   :  { %420 = vmatprep.mubr.msk.bf16.mxu0 %vm134_vm0, %v448_v2  ;;  %428 = vmatprep.mubr.msk.bf16.mxu1 %vm134_vm0, %v449_v3  ;;  %v455_v9 = vld [vmem:[#allocation2 + $0x38] sm:$0xff]   ;;  %p523_p10 = scmp.ne.s32.totalorder %s343_s22, %s522_s23  ;;  %p528_p12 = scmp.lt.s32.totalorder %s522_s23, %s522_s23 }
  0x3d   :  { %419 = vmatpush3.bf16.msra.mxu0 %v447_v1  ;;  %439 = vmatpush3.bf16.msra.mxu1 %v447_v1  ;;  %p529_p13 = por %p528_p12, %p527_p11 }
  0x3f   :  { %p530_p0 = pnand %p529_p13, %p523_p10 }
  0x40   :  { %421 = vmatmul.mubr.msk.bf16.vlgmr.msra.gmra.mrb[0].mxu0 %vm134_vm0, %v450_v4  ;;  %429 = vmatmul.mubr.msk.bf16.vlgmr.msra.gmra.mrb[0].mxu1 %vm134_vm0, %v451_v5 }
  0x41   :  { %424 = vmatprep.mubr.msk.bf16.mxu0 %vm134_vm0, %v452_v6  ;;  %432 = vmatprep.mubr.msk.bf16.mxu1 %vm134_vm0, %v453_v7 }
  0x48   :  { %425 = vmatmul.mubr.msk.bf16.gmra.mrb[4].mxu0 %vm134_vm0, %v454_v8  ;;  %433 = vmatmul.mubr.msk.bf16.gmra.mrb[4].mxu1 %vm134_vm0, %v455_v9 }
 0x113   :  { %v422_v11 = vpop.f32.mrb[0].mxu0  ;;  %v430_v12 = vpop.f32.mrb[0].mxu1 }
 0x114   :  { %v202_v13 = vadd.f32 %v422_v11, %v355_v10  ;;  %v234_v14 = vadd.f32 %v430_v12, %v355_v10  ;;  %v193_v15 = vpop.f32.mrb[1].mxu0  ;;  %v225_v16 = vpop.f32.mrb[1].mxu1 }
 0x115   :  { %v194_v17 = vadd.f32 %v355_v10, %v193_v15  ;;  %v226_v18 = vadd.f32 %v355_v10, %v225_v16  ;;  %v423_v19 = vpop.f32.mrb[2].mxu0  ;;  %v431_v20 = vpop.f32.mrb[2].mxu1 }
 0x116   :  { %v392_v21 = vpack.c.bf16 %v202_v13, %v202_v13  ;;  %v400_v22 = vpack.c.bf16 %v234_v14, %v234_v14  ;;  %v205_v23 = vadd.f32 %v423_v19, %v355_v10  ;;  %v237_v24 = vadd.f32 %v431_v20, %v355_v10  ;;  %v196_v25 = vpop.f32.mrb[3].mxu0  ;;  %v228_v26 = vpop.f32.mrb[3].mxu1 }
 0x117   :  { %v390_v27 = vpack.c.bf16 %v194_v17, %v194_v17  ;;  %v398_v28 = vpack.c.bf16 %v226_v18, %v226_v18  ;;  %v197_v29 = vadd.f32 %v355_v10, %v196_v25  ;;  %v229_v30 = vadd.f32 %v355_v10, %v228_v26 }
 0x118   :  { %323 = vst.msk [vmem:[#allocation8 + $0x8] sm:$0xf] %vm320_vm1, %v392_v21  ;;  %331 = vst.msk [vmem:[#allocation8 + $0x28] sm:$0xf] %vm320_vm1, %v400_v22  ;;  %v393_v31 = vpack.c.bf16 %v205_v23, %v205_v23  ;;  %v401_v32 = vpack.c.bf16 %v237_v24, %v237_v24 }
 0x119   :  { %321 = vst.msk [vmem:[#allocation8] sm:$0xf] %vm320_vm1, %v390_v27  ;;  %329 = vst.msk [vmem:[#allocation8 + $0x20] sm:$0xf] %vm320_vm1, %v398_v28  ;;  %v391_v33 = vpack.c.bf16 %v197_v29, %v197_v29  ;;  %v399_v34 = vpack.c.bf16 %v229_v30, %v229_v30 }
 0x11a   :  { %324 = vst.msk [vmem:[#allocation8 + $0xc] sm:$0xf] %vm320_vm1, %v393_v31  ;;  %332 = vst.msk [vmem:[#allocation8 + $0x2c] sm:$0xf] %vm320_vm1, %v401_v32 }
 0x11b   :  { %322 = vst.msk [vmem:[#allocation8 + $0x4] sm:$0xf] %vm320_vm1, %v391_v33  ;;  %330 = vst.msk [vmem:[#allocation8 + $0x24] sm:$0xf] %vm320_vm1, %v399_v34  ;;  %v426_v35 = vpop.f32.mrb[4].mxu0  ;;  %v434_v36 = vpop.f32.mrb[4].mxu1 }
 0x11c   :  { %v218_v37 = vadd.f32 %v426_v35, %v355_v10  ;;  %v250_v38 = vadd.f32 %v434_v36, %v355_v10  ;;  %v209_v39 = vpop.f32.mrb[5].mxu0  ;;  %v241_v40 = vpop.f32.mrb[5].mxu1 }
 0x11d   :  { %v210_v41 = vadd.f32 %v355_v10, %v209_v39  ;;  %v242_v42 = vadd.f32 %v355_v10, %v241_v40  ;;  %v427_v43 = vpop.f32.mrb[6].mxu0  ;;  %v435_v44 = vpop.f32.mrb[6].mxu1 }
 0x11e   :  { %v396_v45 = vpack.c.bf16 %v218_v37, %v218_v37  ;;  %v404_v46 = vpack.c.bf16 %v250_v38, %v250_v38  ;;  %v221_v47 = vadd.f32 %v427_v43, %v355_v10  ;;  %v253_v48 = vadd.f32 %v435_v44, %v355_v10  ;;  %v212_v49 = vpop.f32.mrb[7].mxu0  ;;  %v244_v50 = vpop.f32.mrb[7].mxu1 }
 0x11f   :  { %v394_v51 = vpack.c.bf16 %v210_v41, %v210_v41  ;;  %v402_v52 = vpack.c.bf16 %v242_v42, %v242_v42  ;;  %v213_v53 = vadd.f32 %v355_v10, %v212_v49  ;;  %v245_v54 = vadd.f32 %v355_v10, %v244_v50 }
 0x120   :  { %327 = vst.msk [vmem:[#allocation8 + $0x18] sm:$0xf] %vm320_vm1, %v396_v45  ;;  %335 = vst.msk [vmem:[#allocation8 + $0x38] sm:$0xf] %vm320_vm1, %v404_v46  ;;  %v397_v55 = vpack.c.bf16 %v221_v47, %v221_v47  ;;  %v405_v56 = vpack.c.bf16 %v253_v48, %v253_v48 }
 0x121   :  { %325 = vst.msk [vmem:[#allocation8 + $0x10] sm:$0xf] %vm320_vm1, %v394_v51  ;;  %333 = vst.msk [vmem:[#allocation8 + $0x30] sm:$0xf] %vm320_vm1, %v402_v52  ;;  %v395_v57 = vpack.c.bf16 %v213_v53, %v213_v53  ;;  %v403_v58 = vpack.c.bf16 %v245_v54, %v245_v54 }
 0x122   :  { %328 = vst.msk [vmem:[#allocation8 + $0x1c] sm:$0xf] %vm320_vm1, %v397_v55  ;;  %336 = vst.msk [vmem:[#allocation8 + $0x3c] sm:$0xf] %vm320_vm1, %v405_v56 }
 0x123   :  { %326 = vst.msk [vmem:[#allocation8 + $0x14] sm:$0xf] %vm320_vm1, %v395_v57  ;;  %334 = vst.msk [vmem:[#allocation8 + $0x34] sm:$0xf] %vm320_vm1, %v403_v58 }
 0x124   :  { %533 = shalt.err (!%p530_p0)
}
 0x125   :  { %s534_s28 = scalar_lea.hbm %s667_s3, 1024 }
 0x126   :  { %p535_p1 = scmp.ne.s32.totalorder %s667_s3, %s534_s28  ;;  %p538_p2 = scmp.lt.u32.totalorder %s534_s28, %s667_s3 }
 0x128   :  { %p540_p3 = pnand %p538_p2, %p535_p1 }
 0x12a   :  { %543 = shalt.err (!%p540_p3)
}
 0x12b   :  { %348 = dma.vmem_to_hbm [thread:$0]  %s343_s22, 1024, %s667_s3, [#allocation4], %s552_s24, %s552_s24, %s553_s25  }
 0x12c   :  { %548 = dma.done.wait [#allocation4], 1024  }
 0x12d   :  { %549 = vsyncadd [#allocation4], 4294966272 }
 0x12e   :  { %352 = vsyncpa [#allocation3], 1 }
 0x12f   :  { %353 = vsyncpa [#allocation6], 1 }
 0x130   :  { %354 = vsyncpa [#allocation4], 1 }

// kernel: fwd.7
= control target key start
LH: loop header
LB: loop body
LE: loop exit
PB: predicated region body
PF: predicated region fallthrough
CT: control target
= control target key end

     0   :  { %8 = vsyncpa [#allocation3], 0  ;;  %s1173_s0 = inlined_call_operand.hbm [shape: bf16[128,288], index: 0, kind: input, shape index: {}]   ;;  %s1174_s1 = inlined_call_operand.hbm [shape: bf16[288,64], index: 1, kind: input, shape index: {}]   ;;  %s1175_s2 = inlined_call_operand.hbm [shape: f32[1,64], index: 2, kind: input, shape index: {}]   ;;  %s1176_s3 = inlined_call_operand.hbm [shape: bf16[128,64], index: 3, kind: output, shape index: {}]  }
   0x1   :  { %9 = vsyncpa [#allocation6], 0 }
   0x2   :  { %10 = vsyncpa [#allocation4], 0  ;;  %s1037_s12 = smov [#allocation5]   ;;  %s943_s16 = scalar_lea.hbm %s1174_s1, 2304 }
   0x3   :  { %s28_s13 = sshll.u32 %s1037_s12, 4  ;;  %p944_p0 = scmp.ne.s32.totalorder %s1174_s1, %s943_s16  ;;  %s29_s13 = int_to_ptr.vmem [resolvable:$true] %s28_s13 }
   0x4   :  { %p947_p1 = scmp.lt.u32.totalorder %s943_s16, %s1174_s1 }
   0x6   :  { %p949_p2 = pnand %p947_p1, %p944_p0 }
   0x8   :  { %952 = shalt.err (!%p949_p2)
}
   0x9   :  { %s953_s21 = scalar_lea.vmem %s29_s13, 2304  ;;  %p958_p4 = scmp.lt.s32.totalorder %s29_s13, %s29_s13 }
   0xa   :  { %p954_p3 = scmp.ne.s32.totalorder %s29_s13, %s953_s21  ;;  %p959_p5 = scmp.lt.s32.totalorder %s953_s21, %s953_s21 }
   0xc   :  { %p960_p6 = por %p959_p5, %p958_p4 }
   0xe   :  { %p961_p7 = pnand %p960_p6, %p954_p3 }
  0x10   :  { %964 = shalt.err (!%p961_p7)
}
  0x11   :  { %s1038_s22 = smov 64   ;;  %s1039_s23 = smov 4  }
  0x12   :  { %34 = dma.hbm_to_vmem [thread:$0]  %s1174_s1, 2304, %s29_s13, [#allocation6], %s1038_s22, %s1038_s22, %s1039_s23  }
  0x13   :  { %s1040_s26 = smov [#allocation2]   ;;  %s965_s30 = scalar_lea.hbm %s1173_s0, 3072 }
  0x14   :  { %s16_s27 = sshll.u32 %s1040_s26, 4  ;;  %p966_p8 = scmp.ne.s32.totalorder %s1173_s0, %s965_s30  ;;  %s17_s27 = int_to_ptr.vmem [resolvable:$true] %s16_s27 }
  0x15   :  { %p969_p9 = scmp.lt.u32.totalorder %s965_s30, %s1173_s0 }
  0x17   :  { %p971_p10 = pnand %p969_p9, %p966_p8 }
  0x19   :  { %974 = shalt.err (!%p971_p10)
}
  0x1a   :  { %s975_s8 = scalar_lea.vmem %s17_s27, 3072  ;;  %p980_p12 = scmp.lt.s32.totalorder %s17_s27, %s17_s27 }
  0x1b   :  { %p976_p11 = scmp.ne.s32.totalorder %s17_s27, %s975_s8  ;;  %p981_p13 = scmp.lt.s32.totalorder %s975_s8, %s975_s8 }
  0x1d   :  { %p982_p0 = por %p981_p13, %p980_p12 }
  0x1f   :  { %p983_p1 = pnand %p982_p0, %p976_p11 }
  0x21   :  { %986 = shalt.err (!%p983_p1)
}
  0x22   :  { %s1041_s1 = smov 192   ;;  %s1042_s9 = smov 12  }
  0x23   :  { %22 = dma.hbm_to_vmem [thread:$0]  %s1173_s0, 3072, %s17_s27, [#allocation3], %s1041_s1, %s1041_s1, %s1042_s9  }
  0x24   :  { %s1043_s12 = smov [#allocation7]   ;;  %s987_s16 = scalar_lea.hbm %s1175_s2, 16 }
  0x25   :  { %s41_s13 = sshll.u32 %s1043_s12, 4  ;;  %p988_p2 = scmp.ne.s32.totalorder %s1175_s2, %s987_s16  ;;  %s42_s13 = int_to_ptr.vmem [resolvable:$true] %s41_s13 }
  0x26   :  { %p991_p3 = scmp.lt.u32.totalorder %s987_s16, %s1175_s2 }
  0x28   :  { %p993_p4 = pnand %p991_p3, %p988_p2 }
  0x2a   :  { %996 = shalt.err (!%p993_p4)
}
  0x2b   :  { %s997_s21 = scalar_lea.vmem %s42_s13, 16  ;;  %s1001_s0 = scalar_lea.vmem %s42_s13, 32 }
  0x2c   :  { %p998_p5 = scmp.ne.s32.totalorder %s42_s13, %s997_s21  ;;  %p1002_p6 = scmp.lt.s32.totalorder %s42_s13, %s42_s13 }
  0x2d   :  { %p1003_p7 = scmp.lt.s32.totalorder %s1001_s0, %s997_s21 }
  0x2f   :  { %p1004_p8 = por %p1003_p7, %p1002_p6 }
  0x31   :  { %p1005_p9 = pnand %p1004_p8, %p998_p5 }
  0x33   :  { %1008 = shalt.err (!%p1005_p9)
}
  0x34   :  { %44 = dma.hbm_to_vmem [thread:$0]  %s1175_s2, 16, %s42_s13, [#allocation6]  }
  0x35   :  { %1031 = dma.done.wait [#allocation3], 3072  }
  0x36   :  { %1032 = vsyncadd [#allocation3], 4294964224 }
  0x37   :  { %1033 = dma.done.wait [#allocation6], 2320  }
  0x38   :  { %1034 = vsyncadd [#allocation6], 4294964976  ;;  %v893_v0 = vld [vmem:[#allocation5 + $0x40] sm:$0xff]   ;;  %v895_v2 = vld [vmem:[#allocation5 + $0x48] sm:$0xff]   ;;  %vm358_vm0 = vcmask 261120   ;;  %vm657_vm1 = vcmask 519168  }
  0x39   :  { %v894_v1 = vld [vmem:[#allocation5] sm:$0xff]   ;;  %775 = vmatprep.subr.bf16.mxu0 %v893_v0  ;;  %869 = vmatprep.subr.bf16.mxu1 %v893_v0  ;;  %v896_v3 = vld [vmem:[#allocation5 + $0x8] sm:$0xff]   ;;  %v897_v4 = vld [vmem:[#allocation5 + $0x50] sm:$0xff]   ;;  %s1044_s2 = smov [#allocation8]  }
  0x3a   :  { %776 = vmatpush3.bf16.msra.mxu0 %v894_v1  ;;  %877 = vmatpush3.bf16.msra.mxu1 %v894_v1  ;;  %v898_v5 = vld [vmem:[#allocation5 + $0x10] sm:$0xff]   ;;  %v899_v6 = vld [vmem:[#allocation5 + $0x58] sm:$0xff]   ;;  %v901_v8 = vld [vmem:[#allocation5 + $0x60] sm:$0xff]   ;;  %s679_s26 = sshll.u32 %s1044_s2, 4  ;;  %s680_s26 = int_to_ptr.vmem [resolvable:$true] %s679_s26 }
  0x3b   :  { %777 = vmatprep.subr.bf16.mxu0 %v895_v2  ;;  %870 = vmatprep.subr.bf16.mxu1 %v895_v2  ;;  %v900_v7 = vld [vmem:[#allocation5 + $0x18] sm:$0xff]   ;;  %v902_v9 = vld [vmem:[#allocation5 + $0x20] sm:$0xff]   ;;  %v903_v10 = vld [vmem:[#allocation5 + $0x68] sm:$0xff]   ;;  %s1009_s27 = scalar_lea.vmem %s680_s26, 1024  ;;  %p1014_p11 = scmp.lt.s32.totalorder %s680_s26, %s680_s26 }
  0x3c   :  { %v911_v11 = vld [vmem:[#allocation2 + $0x4] ss:$12 sps:$4 sm:$0xff]   ;;  %v914_v12 = vld [vmem:[#allocation2 + $0x94] ss:$12 sps:$4 sm:$0xff]   ;;  %v904_v13 = vld [vmem:[#allocation5 + $0x28] sm:$0xff]   ;;  %p1010_p10 = scmp.ne.s32.totalorder %s680_s26, %s1009_s27  ;;  %p1015_p12 = scmp.lt.s32.totalorder %s1009_s27, %s1009_s27 }
  0x3d   :  { %v905_v14 = vld [vmem:[#allocation5 + $0x70] sm:$0xff]   ;;  %415 = vmatprep.mubr.bf16.mxu0 %v911_v11  ;;  %463 = vmatprep.mubr.bf16.mxu1 %v914_v12  ;;  %v907_v16 = vld [vmem:[#allocation5 + $0x78] sm:$0xff]   ;;  %v909_v18 = vld [vmem:[#allocation2] ss:$12 sps:$4 sm:$0xff]  }
  0x3e   :  { %778 = vmatpush3.bf16.msra.mxu0 %v896_v3  ;;  %878 = vmatpush3.bf16.msra.mxu1 %v896_v3  ;;  %v906_v15 = vld [vmem:[#allocation5 + $0x30] sm:$0xff]   ;;  %v908_v17 = vld [vmem:[#allocation5 + $0x38] sm:$0xff]   ;;  %v915_v19 = vld [vmem:[#allocation5 + $0x80] sm:$0xff]   ;;  %p1016_p13 = por %p1015_p12, %p1014_p11 }
  0x3f   :  { %779 = vmatprep.subr.bf16.mxu0 %v897_v4  ;;  %871 = vmatprep.subr.bf16.mxu1 %v897_v4  ;;  %v912_v20 = vld [vmem:[#allocation2 + $0x90] ss:$12 sps:$4 sm:$0xff]   ;;  %v918_v22 = vld [vmem:[#allocation2 + $0xac] ss:$12 sps:$4 sm:$0xff]   ;;  %v921_v25 = vld [vmem:[#allocation2 + $0xa8] ss:$12 sps:$4 sm:$0xff]  }
  0x40   :  { %v916_v21 = vld [vmem:[#allocation2 + $0x1c] ss:$12 sps:$4 sm:$0xff]   ;;  %v920_v24 = vld [vmem:[#allocation2 + $0x18] ss:$12 sps:$4 sm:$0xff]   ;;  %v923_v26 = vld [vmem:[#allocation2 + $0x34] ss:$12 sps:$4 sm:$0xff]   ;;  %p1017_p0 = pnand %p1016_p13, %p1010_p10 }
  0x41   :  { %v922_v23 = vld [vmem:[#allocation5 + $0x88] sm:$0xff]   ;;  %v926_v28 = vld [vmem:[#allocation2 + $0x30] ss:$12 sps:$4 sm:$0xff]   ;;  %v930_v31 = vld [vmem:[#allocation2 + $0x38] ss:$12 sps:$4 sm:$0xff]  }
  0x42   :  { %780 = vmatpush3.bf16.msra.mxu0 %v898_v5  ;;  %879 = vmatpush3.bf16.msra.mxu1 %v898_v5  ;;  %v925_v27 = vld [vmem:[#allocation2 + $0x8] ss:$12 sps:$4 sm:$0xff]   ;;  %v927_v29 = vld [vmem:[#allocation2 + $0x20] ss:$12 sps:$4 sm:$0xff]   ;;  %v932_v33 = vld [vmem:[#allocation2 + $0x50] ss:$12 sps:$4 sm:$0xff]  }
  0x43   :  { %781 = vmatprep.subr.bf16.mxu0 %v899_v6  ;;  %872 = vmatprep.subr.bf16.mxu1 %v899_v6  ;;  %v928_v30 = vld [vmem:[#allocation2 + $0x4c] ss:$12 sps:$4 sm:$0xff]   ;;  %v931_v32 = vld [vmem:[#allocation2 + $0x48] ss:$12 sps:$4 sm:$0xff]   ;;  %v933_v34 = vld [vmem:[#allocation2 + $0x64] ss:$12 sps:$4 sm:$0xff]  }
  0x44   :  { %v935_v35 = vld [vmem:[#allocation2 + $0x68] ss:$12 sps:$4 sm:$0xff]   ;;  %v936_v36 = vld [vmem:[#allocation2 + $0x60] ss:$12 sps:$4 sm:$0xff]   ;;  %v940_v39 = vld [vmem:[#allocation2 + $0x98] ss:$12 sps:$4 sm:$0xff]  }
  0x45   :  { %v937_v37 = vld [vmem:[#allocation2 + $0x80] ss:$12 sps:$4 sm:$0xff]   ;;  %v938_v38 = vld [vmem:[#allocation2 + $0x7c] ss:$12 sps:$4 sm:$0xff]   ;;  %v941_v40 = vld [vmem:[#allocation2 + $0x78] ss:$12 sps:$4 sm:$0xff]  }
  0x46   :  { %782 = vmatpush3.bf16.msra.mxu0 %v900_v7  ;;  %880 = vmatpush3.bf16.msra.mxu1 %v900_v7  ;;  %v942_v41 = vld [vmem:[#allocation2 + $0xb0] ss:$12 sps:$4 sm:$0xff]  }
  0x47   :  { %783 = vmatprep.subr.bf16.mxu0 %v901_v8  ;;  %873 = vmatprep.subr.bf16.mxu1 %v901_v8  ;;  %v1120_v2 = vld [vmem:[#allocation7] ss:$0 sm:$0xff] }
  0x4a   :  { %784 = vmatpush3.bf16.msra.mxu0 %v902_v9  ;;  %881 = vmatpush3.bf16.msra.mxu1 %v902_v9 }
  0x4b   :  { %785 = vmatprep.subr.bf16.mxu0 %v903_v10  ;;  %874 = vmatprep.subr.bf16.mxu1 %v903_v10 }
  0x4e   :  { %786 = vmatpush3.bf16.msra.mxu0 %v904_v13  ;;  %882 = vmatpush3.bf16.msra.mxu1 %v904_v13 }
  0x4f   :  { %787 = vmatprep.subr.bf16.mxu0 %v905_v14  ;;  %875 = vmatprep.subr.bf16.mxu1 %v905_v14 }
  0x52   :  { %788 = vmatpush3.bf16.msra.mxu0 %v906_v15  ;;  %883 = vmatpush3.bf16.msra.mxu1 %v906_v15 }
  0x53   :  { %789 = vmatprep.subr.bf16.mxu0 %v907_v16  ;;  %876 = vmatprep.subr.bf16.mxu1 %v907_v16 }
  0x56   :  { %790 = vmatpush3.bf16.msra.mxu0 %v908_v17  ;;  %884 = vmatpush3.bf16.msra.mxu1 %v908_v17 }
  0x57   :  { %849 = vmatprep.subr.bf16.mxu1 %v915_v19 }
  0x59   :  { %416 = vmatmul.mubr.bf16.vlgmr.msra.gmra.mrb[0].mxu0 %v909_v18  ;;  %464 = vmatmul.mubr.bf16.vlgmr.msra.gmra.mrb[0].mxu1 %v912_v20 }
  0x5a   :  { %850 = vmatpush3.bf16.msra.mxu1 %v915_v19  ;;  %423 = vmatprep.mubr.bf16.mxu0 %v916_v21 }
  0x5b   :  { %471 = vmatprep.mubr.bf16.mxu1 %v918_v22  ;;  %851 = vmatprep.subr.bf16.mxu1 %v922_v23 }
  0x5e   :  { %852 = vmatpush3.bf16.msra.mxu1 %v922_v23 }
  0x61   :  { %424 = vmatmul.mubr.bf16.gmra.mrb[4].mxu0 %v920_v24  ;;  %472 = vmatmul.mubr.bf16.gmra.mrb[4].mxu1 %v921_v25 }
  0x62   :  { %431 = vmatprep.mubr.bf16.mxu0 %v923_v26  ;;  %853 = vmatprep.mubr.msk.bf16.mxu1 %vm358_vm0, %v925_v27 }
  0x69   :  { %432 = vmatmul.mubr.bf16.gmra.mrb[8].mxu0 %v926_v28  ;;  %854 = vmatmul.mubr.msk.bf16.vlgmr.msra.gmra.mrb[8].mxu1 %vm358_vm0, %v927_v29 }
  0x6a   :  { %439 = vmatprep.mubr.bf16.mxu0 %v928_v30  ;;  %857 = vmatprep.mubr.msk.bf16.mxu1 %vm358_vm0, %v930_v31 }
  0x71   :  { %440 = vmatmul.mubr.bf16.gmra.mrb[12].mxu0 %v931_v32  ;;  %858 = vmatmul.mubr.msk.bf16.gmra.mrb[12].mxu1 %vm358_vm0, %v932_v33 }
  0x72   :  { %447 = vmatprep.mubr.bf16.mxu0 %v933_v34  ;;  %861 = vmatprep.mubr.msk.bf16.mxu1 %vm358_vm0, %v935_v35 }
  0x79   :  { %448 = vmatmul.mubr.bf16.gmra.mrb[16].mxu0 %v936_v36  ;;  %862 = vmatmul.mubr.msk.bf16.gmra.mrb[16].mxu1 %vm358_vm0, %v937_v37 }
  0x7a   :  { %455 = vmatprep.mubr.bf16.mxu0 %v938_v38  ;;  %865 = vmatprep.mubr.msk.bf16.mxu1 %vm358_vm0, %v940_v39 }
  0x81   :  { %456 = vmatmul.mubr.bf16.gmra.mrb[20].mxu0 %v941_v40  ;;  %866 = vmatmul.mubr.msk.bf16.gmra.mrb[20].mxu1 %vm358_vm0, %v942_v41 }
 0x12c   :  { %v791_v42 = vpop.f32.mrb[0].mxu0  ;;  %v827_v43 = vpop.f32.mrb[0].mxu1 }
 0x12d   :  { %v792_v44 = vpop.f32.mrb[1].mxu0  ;;  %v828_v45 = vpop.f32.mrb[1].mxu1 }
 0x12e   :  { %v793_v46 = vadd.f32 %v792_v44, %v791_v42  ;;  %v794_v47 = vpop.f32.mrb[2].mxu0  ;;  %v1112_v48 = vadd.f32 %v828_v45, %v827_v43  ;;  %v830_v49 = vpop.f32.mrb[2].mxu1 }
 0x12f   :  { %v795_v50 = vpop.f32.mrb[3].mxu0  ;;  %v831_v51 = vpop.f32.mrb[3].mxu1 }
 0x130   :  { %v796_v52 = vadd.f32 %v795_v50, %v794_v47  ;;  %v1114_v53 = vadd.f32 %v831_v51, %v830_v49  ;;  %v418_v6 = vadd.f32 %v793_v46, %v1120_v2 }
 0x132   :  { %v421_v15 = vadd.f32 %v796_v52, %v1120_v2 }
 0x134   :  { %v797_v54 = vpop.f32.mrb[4].mxu0  ;;  %v833_v55 = vpop.f32.mrb[4].mxu1 }
 0x135   :  { %v798_v56 = vpop.f32.mrb[5].mxu0  ;;  %v834_v57 = vpop.f32.mrb[5].mxu1 }
 0x136   :  { %v799_v58 = vadd.f32 %v798_v56, %v797_v54  ;;  %v800_v59 = vpop.f32.mrb[6].mxu0  ;;  %v1116_v60 = vadd.f32 %v834_v57, %v833_v55  ;;  %v836_v61 = vpop.f32.mrb[6].mxu1 }
 0x137   :  { %v801_v62 = vpop.f32.mrb[7].mxu0  ;;  %v837_v63 = vpop.f32.mrb[7].mxu1 }
 0x138   :  { %v802_v0 = vadd.f32 %v801_v62, %v800_v59  ;;  %v1118_v1 = vadd.f32 %v837_v63, %v836_v61  ;;  %v426_v3 = vadd.f32 %v799_v58, %v1120_v2 }
 0x13a   :  { %v429_v10 = vadd.f32 %v802_v0, %v1120_v2 }
 0x13c   :  { %v803_v4 = vpop.f32.mrb[8].mxu0  ;;  %v855_v5 = vpop.f32.mrb[8].mxu1 }
 0x13d   :  { %v523_v7 = vadd.f32 %v855_v5, %v426_v3  ;;  %v804_v8 = vpop.f32.mrb[9].mxu0  ;;  %v514_v9 = vpop.f32.mrb[9].mxu1 }
 0x13e   :  { %v805_v11 = vadd.f32 %v804_v8, %v803_v4  ;;  %v515_v12 = vadd.f32 %v514_v9, %v418_v6  ;;  %v806_v13 = vpop.f32.mrb[10].mxu0  ;;  %v856_v14 = vpop.f32.mrb[10].mxu1  ;;  %v474_v9 = vadd.f32 %v1116_v60, %v1120_v2 }
 0x13f   :  { %v579_v16 = vmax.f32 %v523_v7, 0.0  ;;  %v526_v17 = vadd.f32 %v856_v14, %v429_v10  ;;  %v807_v18 = vpop.f32.mrb[11].mxu0  ;;  %v517_v19 = vpop.f32.mrb[11].mxu1  ;;  %v466_v14 = vadd.f32 %v1112_v48, %v1120_v2 }
 0x140   :  { %v577_v20 = vmax.f32 %v515_v12, 0.0  ;;  %v808_v21 = vadd.f32 %v807_v18, %v806_v13  ;;  %v518_v22 = vadd.f32 %v517_v19, %v421_v15  ;;  %v434_v31 = vadd.f32 %v805_v11, %v1120_v2 }
 0x141   :  { %v761_v23 = vpack.c.bf16 %v579_v16, %v579_v16  ;;  %v580_v24 = vmax.f32 %v526_v17, 0.0  ;;  %v477_v18 = vadd.f32 %v1118_v1, %v1120_v2 }
 0x142   :  { %v759_v25 = vpack.c.bf16 %v577_v20, %v577_v20  ;;  %v578_v26 = vmax.f32 %v518_v22, 0.0  ;;  %v437_v38 = vadd.f32 %v808_v21, %v1120_v2 }
 0x143   :  { %660 = vst.msk [vmem:[#allocation8 + $0x8] sm:$0xf] %vm657_vm1, %v761_v23  ;;  %v762_v27 = vpack.c.bf16 %v580_v24, %v580_v24 }
 0x144   :  { %658 = vst.msk [vmem:[#allocation8] sm:$0xf] %vm657_vm1, %v759_v25  ;;  %v760_v28 = vpack.c.bf16 %v578_v26, %v578_v26  ;;  %v809_v29 = vpop.f32.mrb[12].mxu0  ;;  %v859_v30 = vpop.f32.mrb[12].mxu1 }
 0x145   :  { %661 = vst.msk [vmem:[#allocation8 + $0xc] sm:$0xf] %vm657_vm1, %v762_v27  ;;  %v810_v32 = vpop.f32.mrb[13].mxu0  ;;  %v530_v33 = vpop.f32.mrb[13].mxu1  ;;  %v469_v27 = vadd.f32 %v1114_v53, %v1120_v2 }
 0x146   :  { %659 = vst.msk [vmem:[#allocation8 + $0x4] sm:$0xf] %vm657_vm1, %v760_v28  ;;  %v811_v34 = vadd.f32 %v810_v32, %v809_v29  ;;  %v531_v35 = vadd.f32 %v530_v33, %v434_v31  ;;  %v812_v36 = vpop.f32.mrb[14].mxu0  ;;  %v860_v37 = vpop.f32.mrb[14].mxu1 }
 0x147   :  { %v813_v39 = vpop.f32.mrb[15].mxu0  ;;  %v533_v40 = vpop.f32.mrb[15].mxu1 }
 0x148   :  { %v442_v41 = vadd.f32 %v811_v34, %v1120_v2  ;;  %v581_v42 = vmax.f32 %v531_v35, 0.0  ;;  %v814_v43 = vadd.f32 %v813_v39, %v812_v36  ;;  %v534_v44 = vadd.f32 %v533_v40, %v437_v38 }
 0x14a   :  { %v539_v45 = vadd.f32 %v859_v30, %v442_v41  ;;  %v763_v46 = vpack.c.bf16 %v581_v42, %v581_v42  ;;  %v445_v47 = vadd.f32 %v814_v43, %v1120_v2  ;;  %v582_v49 = vmax.f32 %v534_v44, 0.0 }
 0x14c   :  { %v583_v50 = vmax.f32 %v539_v45, 0.0  ;;  %662 = vst.msk [vmem:[#allocation8 + $0x10] sm:$0xf] %vm657_vm1, %v763_v46  ;;  %v542_v51 = vadd.f32 %v860_v37, %v445_v47  ;;  %v764_v52 = vpack.c.bf16 %v582_v49, %v582_v49  ;;  %v815_v54 = vpop.f32.mrb[16].mxu0  ;;  %v863_v55 = vpop.f32.mrb[16].mxu1 }
 0x14d   :  { %v816_v56 = vpop.f32.mrb[17].mxu0  ;;  %v546_v57 = vpop.f32.mrb[17].mxu1 }
 0x14e   :  { %v765_v58 = vpack.c.bf16 %v583_v50, %v583_v50  ;;  %v584_v59 = vmax.f32 %v542_v51, 0.0  ;;  %663 = vst.msk [vmem:[#allocation8 + $0x14] sm:$0xf] %vm657_vm1, %v764_v52  ;;  %v817_v61 = vadd.f32 %v816_v56, %v815_v54  ;;  %v818_v62 = vpop.f32.mrb[18].mxu0  ;;  %v864_v63 = vpop.f32.mrb[18].mxu1 }
 0x14f   :  { %v819_v0 = vpop.f32.mrb[19].mxu0  ;;  %v549_v3 = vpop.f32.mrb[19].mxu1 }
 0x150   :  { %664 = vst.msk [vmem:[#allocation8 + $0x18] sm:$0xf] %vm657_vm1, %v765_v58  ;;  %v766_v4 = vpack.c.bf16 %v584_v59, %v584_v59  ;;  %v450_v5 = vadd.f32 %v817_v61, %v1120_v2  ;;  %v820_v6 = vadd.f32 %v819_v0, %v818_v62 }
 0x152   :  { %665 = vst.msk [vmem:[#allocation8 + $0x1c] sm:$0xf] %vm657_vm1, %v766_v4  ;;  %v547_v7 = vadd.f32 %v546_v57, %v450_v5  ;;  %v453_v8 = vadd.f32 %v820_v6, %v1120_v2 }
 0x154   :  { %v585_v10 = vmax.f32 %v547_v7, 0.0  ;;  %v550_v11 = vadd.f32 %v549_v3, %v453_v8  ;;  %v821_v12 = vpop.f32.mrb[20].mxu0  ;;  %v867_v13 = vpop.f32.mrb[20].mxu1 }
 0x155   :  { %v571_v15 = vadd.f32 %v867_v13, %v474_v9  ;;  %v822_v16 = vpop.f32.mrb[21].mxu0  ;;  %v562_v17 = vpop.f32.mrb[21].mxu1 }
 0x156   :  { %v767_v19 = vpack.c.bf16 %v585_v10, %v585_v10  ;;  %v586_v20 = vmax.f32 %v550_v11, 0.0  ;;  %v823_v21 = vadd.f32 %v822_v16, %v821_v12  ;;  %v563_v22 = vadd.f32 %v562_v17, %v466_v14  ;;  %v824_v23 = vpop.f32.mrb[22].mxu0  ;;  %v868_v24 = vpop.f32.mrb[22].mxu1 }
 0x157   :  { %v591_v60 = vmax.f32 %v571_v15, 0.0  ;;  %v574_v25 = vadd.f32 %v868_v24, %v477_v18  ;;  %v825_v26 = vpop.f32.mrb[23].mxu0  ;;  %v565_v28 = vpop.f32.mrb[23].mxu1 }
 0x158   :  { %666 = vst.msk [vmem:[#allocation8 + $0x20] sm:$0xf] %vm657_vm1, %v767_v19  ;;  %v768_v48 = vpack.c.bf16 %v586_v20, %v586_v20  ;;  %v458_v29 = vadd.f32 %v823_v21, %v1120_v2  ;;  %v589_v30 = vmax.f32 %v563_v22, 0.0  ;;  %v826_v1 = vadd.f32 %v825_v26, %v824_v23 }
 0x159   :  { %v773_v31 = vpack.c.bf16 %v591_v60, %v591_v60  ;;  %v592_v32 = vmax.f32 %v574_v25, 0.0  ;;  %v566_v33 = vadd.f32 %v565_v28, %v469_v27 }
 0x15a   :  { %667 = vst.msk [vmem:[#allocation8 + $0x24] sm:$0xf] %vm657_vm1, %v768_v48  ;;  %v555_v34 = vadd.f32 %v863_v55, %v458_v29  ;;  %v771_v35 = vpack.c.bf16 %v589_v30, %v589_v30  ;;  %v461_v36 = vadd.f32 %v826_v1, %v1120_v2 }
 0x15b   :  { %672 = vst.msk [vmem:[#allocation8 + $0x38] sm:$0xf] %vm657_vm1, %v773_v31  ;;  %v774_v53 = vpack.c.bf16 %v592_v32, %v592_v32  ;;  %v590_v37 = vmax.f32 %v566_v33, 0.0 }
 0x15c   :  { %v587_v38 = vmax.f32 %v555_v34, 0.0  ;;  %670 = vst.msk [vmem:[#allocation8 + $0x30] sm:$0xf] %vm657_vm1, %v771_v35  ;;  %v558_v39 = vadd.f32 %v864_v63, %v461_v36 }
 0x15d   :  { %673 = vst.msk [vmem:[#allocation8 + $0x3c] sm:$0xf] %vm657_vm1, %v774_v53  ;;  %v772_v40 = vpack.c.bf16 %v590_v37, %v590_v37 }
 0x15e   :  { %v769_v41 = vpack.c.bf16 %v587_v38, %v587_v38  ;;  %v588_v42 = vmax.f32 %v558_v39, 0.0 }
 0x15f   :  { %671 = vst.msk [vmem:[#allocation8 + $0x34] sm:$0xf] %vm657_vm1, %v772_v40 }
 0x160   :  { %668 = vst.msk [vmem:[#allocation8 + $0x28] sm:$0xf] %vm657_vm1, %v769_v41  ;;  %v770_v2 = vpack.c.bf16 %v588_v42, %v588_v42 }
 0x162   :  { %669 = vst.msk [vmem:[#allocation8 + $0x2c] sm:$0xf] %vm657_vm1, %v770_v2 }
 0x163   :  { %1020 = shalt.err (!%p1017_p0)
}
 0x164   :  { %s1021_s30 = scalar_lea.hbm %s1176_s3, 1024 }
 0x165   :  { %p1022_p1 = scmp.ne.s32.totalorder %s1176_s3, %s1021_s30  ;;  %p1025_p2 = scmp.lt.u32.totalorder %s1021_s30, %s1176_s3 }
 0x167   :  { %p1027_p3 = pnand %p1025_p2, %p1022_p1 }
 0x169   :  { %1030 = shalt.err (!%p1027_p3)
}
 0x16a   :  { %685 = dma.vmem_to_hbm [thread:$0]  %s680_s26, 1024, %s1176_s3, [#allocation4], %s1038_s22, %s1038_s22, %s1039_s23  }
 0x16b   :  { %1035 = dma.done.wait [#allocation4], 1024  }
 0x16c   :  { %1036 = vsyncadd [#allocation4], 4294966272 }
 0x16d   :  { %689 = vsyncpa [#allocation3], 1 }
 0x16e   :  { %690 = vsyncpa [#allocation6], 1 }
 0x16f   :  { %691 = vsyncpa [#allocation4], 1 }

// kernel: fwd.5
= control target key start
LH: loop header
LB: loop body
LE: loop exit
PB: predicated region body
PF: predicated region fallthrough
CT: control target
= control target key end

     0   :  { %8 = vsyncpa [#allocation3], 0  ;;  %s9079_s0 = inlined_call_operand.hbm [shape: bf16[2,18,18,32], index: 0, kind: input, shape index: {}]   ;;  %s9080_s1 = inlined_call_operand.hbm [shape: bf16[9,32,32], index: 1, kind: input, shape index: {}]   ;;  %s9081_s2 = inlined_call_operand.hbm [shape: f32[1,32], index: 2, kind: input, shape index: {}]   ;;  %s9082_s3 = inlined_call_operand.hbm [shape: bf16[2,16,16,32], index: 3, kind: output, shape index: {}]  }
   0x1   :  { %10 = vsyncpa [#allocation3 + $0x1], 0 }
   0x2   :  { %11 = vsyncpa [#allocation6], 0 }
   0x3   :  { %12 = vsyncpa [#allocation4], 0 }
   0x4   :  { %14 = vsyncpa [#allocation4 + $0x1], 0  ;;  %s7057_s12 = smov 0   ;;  %s7059_s13 = smov 0  }
   0x5   :  { %s7061_s14 = smov 0   ;;  %s7063_s15 = smov 0  }
   0x6   :  { %s7065_s16 = smov 0   ;;  %s7067_s17 = smov 0  }
   0x7 LB: > { %s5264_s18 = sadd.s32 4294967295, %s7027_s17   ;;  %s5265_s19 = sadd.s32 4294967294, %s7027_s17   ;;  %s7027_s17 = sphi %s7067_s17, %s20_s17   ;;  %s7023_s16 = sphi %s7065_s16, %s9182_s16   ;;  %s7019_s15 = sphi %s7063_s15, %s9181_s15   ;;  %s7015_s14 = sphi %s7061_s14, %s9180_s14   ;;  %s7011_s13 = sphi %s7059_s13, %s9179_s13   ;;  %s7007_s12 = sphi %s7057_s12, %s9178_s12  }
   0x8   : > { %p52_p0 = scmp.ne.s32.totalorder %s7011_s13, %s7007_s12  ;;  %p7091_p1 = scmp.eq.s32.totalorder %s5264_s18, 0 }
   0x9   : > { %p7095_p2 = scmp.eq.s32.totalorder %s5264_s18, 1  ;;  %p136_p3 = scmp.eq.s32.totalorder %s5265_s19, 1 }
   0xa   : > { %s9105_s20 = scalar_select %p7091_p1, 1, 0 }
   0xb   : > { %p7101_p4 = por %p7091_p1, %p52_p0  ;;  %p5266_p5 = scmp.ge.s32.totalorder %s7027_s17, 1 }
   0xc   : > { %p7106_p6 = por %p136_p3, %p52_p0  ;;  %p143_p7 = scmp.lt.s32.totalorder %s7027_s17, 3 }
   0xd   : > { %s9107_s22 = scalar_select %p7101_p4, 1, 0 }
   0xe   : > { %s9108_s23 = scalar_select %p7106_p6, 1, 0 }
   0xf   : > { %p7111_p8 = pnand %p5266_p5, %p143_p7  ;;  %s7029_s25 = smov [#allocation5]  }
  0x10   : > { %s157_s26 = sshll.u32 %s7029_s25, 4  ;;  %s7030_s28 = smov [#allocation7]   ;;  %s7115_s26 = int_to_ptr.vmem [resolvable:$true] %s157_s26 }
  0x11   : > { %p6653_p9 = pneg %p7111_p8  ;;  %s173_s29 = sshll.u32 %s7030_s28, 4  ;;  %s7126_s29 = int_to_ptr.vmem [resolvable:$true] %s173_s29 }
  0x12   : > { %s6855_s5 = scalar_lea.hbm %s9080_s1, 2304 }
  0x13   : > { %p7122_p11 = pnand %p6653_p9, %p7091_p1  ;;  %p6856_p12 = scmp.ne.s32.totalorder %s9080_s1, %s6855_s5 }
  0x14   : > { %p6862_p5 = scmp.lt.u32.totalorder %s6855_s5, %s9080_s1 }
  0x15   : > { %p6857_p13 = pneg %p7122_p11 }
  0x17   : > { %p6858_p0 = pnand %p6857_p13, %p6856_p12 }
  0x19   : > { %p6859_p3 = pneg %p6858_p0 }
  0x1b   : > { %p6864_p7 = pnand %p6862_p5, %p6859_p3 }
  0x1d   : > { %6867 = shalt.err (!%p6864_p7)
}
  0x1e   : > { %s6868_s10 = scalar_lea.vmem %s7115_s26, 2304  ;;  %p6876_p1 = scmp.lt.s32.totalorder %s7115_s26, %s7115_s26 }
  0x1f   : > { %p6869_p9 = scmp.ne.s32.totalorder %s7115_s26, %s6868_s10  ;;  %p6877_p12 = scmp.lt.s32.totalorder %s6868_s10, %s6868_s10 }
  0x21   : > { %p6871_p10 = pnand %p6869_p9, %p6857_p13  ;;  %p6878_p0 = por %p6877_p12, %p6876_p1 }
  0x23   : > { %p6872_p6 = pneg %p6871_p10 }
  0x25   : > { %p6879_p4 = pnand %p6878_p0, %p6872_p6 }
  0x27   : > { %6882 = shalt.err (!%p6879_p4)
}
  0x28   : > { %s7031_s11 = smov 64   ;;  %s7032_s18 = smov 4  }
  0x29   : > { %6656 = dma.hbm_to_vmem [thread:$0]  (!%p7122_p11), %s9080_s1, 2304, %s7115_s26, [#allocation6], %s7031_s11, %s7031_s11, %s7032_s18  }
  0x2a   : > { %s6883_s4 = scalar_lea.hbm %s9081_s2, 16 }
  0x2b   : > { %p6884_p1 = scmp.ne.s32.totalorder %s9081_s2, %s6883_s4  ;;  %p6890_p10 = scmp.lt.u32.totalorder %s6883_s4, %s9081_s2 }
  0x2d   : > { %p6886_p4 = pnand %p6884_p1, %p6857_p13 }
  0x2f   : > { %p6887_p6 = pneg %p6886_p4 }
  0x31   : > { %p6892_p3 = pnand %p6890_p10, %p6887_p6 }
  0x33   : > { %6895 = shalt.err (!%p6892_p3)
}
  0x34   : > { %s6896_s26 = scalar_lea.vmem %s7126_s29, 16  ;;  %s6903_s9 = scalar_lea.vmem %s7126_s29, 32 }
  0x35   : > { %p6897_p5 = scmp.ne.s32.totalorder %s7126_s29, %s6896_s26  ;;  %p6904_p12 = scmp.lt.s32.totalorder %s7126_s29, %s7126_s29 }
  0x36   : > { %p6905_p0 = scmp.lt.s32.totalorder %s6903_s9, %s6896_s26 }
  0x37   : > { %p6899_p7 = pnand %p6897_p5, %p6857_p13 }
  0x38   : > { %p6906_p1 = por %p6905_p0, %p6904_p12 }
  0x39   : > { %p6900_p9 = pneg %p6899_p7 }
  0x3b   : > { %p6907_p4 = pnand %p6906_p1, %p6900_p9 }
  0x3d   : > { %6910 = shalt.err (!%p6907_p4)
}
  0x3e   : > { %6659 = dma.hbm_to_vmem [thread:$0]  (!%p7122_p11), %s9081_s2, 16, %s7126_s29, [#allocation6]  }
  0x3f   : > { %s32_s25 = sadd.s32 1, %s7023_s16  ;;  %s39_s28 = sadd.s32 1, %s7015_s14 }
  0x40   : > { %p34_p13 = scmp.ge.s32.totalorder %s32_s25, 2  ;;  %p46_p6 = scmp.ne.s32.totalorder %s7015_s14, %s7011_s13 }
  0x41   : > { %p47_p10 = scmp.eq.s32.totalorder %s7027_s17, 0  ;;  %p6670_p3 = scmp.lt.s32.totalorder %s7027_s17, 2 }
  0x42   : > { %s9184_s25 = smov (%p34_p13, %s32_s25), 0  ;;  %p7194_p7 = por %p7095_p2, %p46_p6 }
  0x43   : > { %p48_p5 = por %p47_p10, %p46_p6  ;;  %s36_s30 = ssub.s32 %s7023_s16, %s9184_s25 }
  0x44   : > { %s9111_s27 = scalar_select %p7194_p7, 1, 0 }
  0x45   : > { %s184_s4 = sand.u32 1, %s7015_s14   ;;  %p37_p9 = scmp.eq.s32.totalorder %s36_s30, 0 }
  0x46   : > { %s6638_s29 = smul.u32 216, %s184_s4  ;;  %p7201_p11 = pnand %p6670_p3, %p48_p5 }
  0x47   : > { %s7206_s6 = scalar_select %p37_p9, %s7015_s14, %s39_s28  }
  0x48   : > { %s6639_s7 = smul.u32 3456, %s7023_s16  ;;  %s188_s8 = scalar_lea.vmem [#allocation2], %s6638_s29 }
  0x49   : > { %s195_s26 = sshll.u32 %s188_s8, 4  ;;  %s7216_s19 = scalar_lea.sflag [#allocation3], %s184_s4  ;;  %s7214_s26 = int_to_ptr.vmem [resolvable:$true] %s195_s26 }
  0x4a   : > { %s7212_s10 = scalar_lea.hbm %s9079_s0, %s6639_s7  ;;  %p6913_p12 = pneg %p7201_p11 }
  0x4b   : > { %s6911_s30 = scalar_lea.hbm %s7212_s10, 3456  ;;  %s6916_s7 = scalar_lea.hbm %s9079_s0, 6912 }
  0x4c   : > { %p6912_p2 = scmp.ne.s32.totalorder %s7212_s10, %s6911_s30  ;;  %p6917_p4 = scmp.lt.u32.totalorder %s7212_s10, %s9079_s0 }
  0x4d   : > { %p6918_p13 = scmp.lt.u32.totalorder %s6916_s7, %s6911_s30  ;;  %p6920_p10 = scmp.lt.u32.totalorder %s6911_s30, %s7212_s10 }
  0x4e   : > { %p6914_p0 = pnand %p6913_p12, %p6912_p2 }
  0x4f   : > { %p6919_p6 = por %p6918_p13, %p6917_p4 }
  0x50   : > { %p6915_p1 = pneg %p6914_p0 }
  0x51   : > { %p6921_p3 = por %p6920_p10, %p6919_p6 }
  0x53   : > { %p6922_p5 = pnand %p6921_p3, %p6915_p1 }
  0x55   : > { %6925 = shalt.err (!%p6922_p5)
}
  0x56   : > { %s6926_s4 = scalar_lea.vmem %s7214_s26, 3456  ;;  %s7033_s9 = smov [#allocation2]  }
  0x57   : > { %p6927_p9 = scmp.ne.s32.totalorder %s7214_s26, %s6926_s4  ;;  %s6931_s28 = sshll.u32 %s7033_s9, 4  ;;  %s6932_s28 = int_to_ptr.vmem [resolvable:$false] %s6931_s28 }
  0x58   : > { %s6933_s29 = scalar_lea.vmem %s6932_s28, 6912  ;;  %p6934_p7 = scmp.lt.s32.totalorder %s7214_s26, %s6932_s28 }
  0x59   : > { %p6929_p2 = pnand %p6927_p9, %p6913_p12  ;;  %p6935_p4 = scmp.lt.s32.totalorder %s6933_s29, %s6926_s4 }
  0x5b   : > { %p6930_p0 = pneg %p6929_p2  ;;  %p6936_p13 = por %p6935_p4, %p6934_p7 }
  0x5d   : > { %p6937_p6 = pnand %p6936_p13, %p6930_p0 }
  0x5f   : > { %6940 = shalt.err (!%p6937_p6)
}
  0x60   : > { %6663 = dma.hbm_to_vmem [thread:$0]  (!%p7201_p11), %s7212_s10, 3456, %s7214_s26, %s7216_s19, %s7031_s11, %s7031_s11, %s7032_s18  }
  0x61   : > { %207 = sbr.rel (%p7111_p8) target bundleno = 699 (0x2bb), region = 32 }
  0x68   : > { %s7250_s30 = sand.u32 1, %s7011_s13   ;;  %p9113_p7 = scmp.ne.s32.totalorder %s9107_s22, 0 }
  0x69   : > { %s6640_s7 = smul.u32 216, %s7250_s30  ;;  %s210_s8 = scalar_lea.sflag [#allocation3], %s7250_s30 }
  0x6b   : > { %s7254_s21 = scalar_lea.vmem [#allocation2], %s6640_s7 }
  0x6c   : > { %6994 = dma.done.wait (%p9113_p7), %s210_s8, 3456  }
  0x6d   : > { %6996 = vsyncadd (%p9113_p7), %s210_s8, 4294963840  ;;  %p9114_p11 = scmp.ne.s32.totalorder %s9105_s20, 0 }
  0x6f   : > { %6998 = dma.done.wait (%p9114_p11), [#allocation6], 2320  }
  0x70   : > { %7000 = vsyncadd (%p9114_p11), [#allocation6], 4294964976  ;;  %vm297_vm0 = vsmask.f32 3328  ;;  %vm298_vm1 = vsmask.f32 7440 }
  0x71   : > { %v6728_v0 = vld [vmem:[#allocation5 + $0x10] sm:$0xff]   ;;  %v6729_v1 = vld [vmem:[#allocation5 + $0x40] sm:$0xff]   ;;  %v6730_v2 = vld [vmem:[#allocation5 + $0x18] sm:$0xff]   ;;  %vm749_vm3 = vcmask 261120   ;;  %vm1308_vm4 = vcmask 1042432   ;;  %vm1309_vm5 = vcmask 1046532  }
  0x72   : > { %6054 = vmatprep.subr.bf16.mxu1 %v6728_v0  ;;  %6198 = vmatprep.subr.bf16.mxu0 %v6729_v1  ;;  %v6731_v3 = vld [vmem:[#allocation5 + $0x48] sm:$0xff]   ;;  %v281_v6 = vld [vmem:[%s7254_s21 + $0x8] sm:$0x1]  ;;  %v7267_v12 = vld [vmem:[#allocation5] sm:$0xff]   ;;  %s5274_s20 = sshll.u32 %s7250_s30, 7  ;;  %vm5110_vm7 = vcmask 257024  }
  0x73   : > { %6055 = vmatpush3.bf16.msra.mxu1 %v6728_v0  ;;  %6199 = vmatpush3.bf16.msra.mxu0 %v6729_v1  ;;  %v245_v4 = vld [vmem:[%s7254_s21] sm:$0xf]  ;;  %v246_v5 = vld [vmem:[%s7254_s21 + $0x4] sm:$0xf]  ;;  %v320_v11 = vshll.u32 %v281_v6, 16  ;;  %vm7283_vm2 = vmor %vm297_vm0, %vm298_vm1  ;;  %s8923_s22 = scalar_lea.vmem [#allocation8], %s5274_s20 }
  0x74   : > { %6056 = vmatprep.subr.bf16.mxu1 %v6730_v2  ;;  %6200 = vmatprep.subr.bf16.mxu0 %v6731_v3  ;;  %v301_v7 = vshrl.u32 %v245_v4, 16  ;;  %v304_v8 = vshll.u32 %v245_v4, 16  ;;  %v310_v9 = vshll.u32 %v246_v5, 16  ;;  %v314_v10 = vshrl.u32 %v246_v5, 16  ;;  %v7269_v13 = vld [vmem:[#allocation5 + $0x50] sm:$0xff]   ;;  %vm7500_vm6 = vmor %vm1308_vm4, %vm1309_vm5  ;;  %s5891_s24 = sshll.u32 %s7019_s15, 11 }
  0x75   : > { %v5459_v18 = vld [vmem:[%s7254_s21 + $0xc] sm:$0xf]  ;;  %v322_v19 = vrot.slane %v320_v11, 5  ;;  %v7274_v20 = vld [vmem:[%s7254_s21 + $0x10] sm:$0xf]  ;;  %s5158_s11 = sshll.u32 %s8923_s22, 4  ;;  %s9022_s26 = scalar_lea.hbm %s9082_s3, %s5891_s24  ;;  %s9024_s11 = int_to_ptr.vmem [resolvable:$true] %s5158_s11 }
  0x76   : > { %v303_v14 = vrot.slane %v301_v7, 4  ;;  %v306_v15 = vrot.slane %v304_v8, 5  ;;  %v312_v16 = vrot.slane %v310_v9, 5  ;;  %v316_v17 = vrot.slane %v314_v10, 4  ;;  %v7277_v21 = vld [vmem:[%s7254_s21 + $0x14] sm:$0x1] }
  0x77   : > { %6057 = vmatpush3.bf16.msra.mxu1 %v6730_v2  ;;  %6201 = vmatpush3.bf16.msra.mxu0 %v6731_v3  ;;  %v2149_v22 = vshrl.u32 %v5459_v18, 16  ;;  %v2152_v25 = vshll.u32 %v5459_v18, 16  ;;  %v2158_v26 = vshll.u32 %v7274_v20, 16  ;;  %v2162_v29 = vshrl.u32 %v7274_v20, 16  ;;  %v247_v31 = vld [vmem:[%s7254_s21 + $0xc] sm:$0xf] }
  0x78   : > { %6090 = vmatprep.subr.bf16.mxu1 %v7267_v12  ;;  %v307_v23 = vor.u32 %v306_v15, %v303_v14  ;;  %v317_v24 = vor.u32 %v316_v17, %v312_v16  ;;  %6234 = vmatprep.subr.bf16.mxu0 %v7269_v13  ;;  %v2168_v30 = vshll.u32 %v7277_v21, 16  ;;  %v248_v36 = vld [vmem:[%s7254_s21 + $0x10] sm:$0xf]  ;;  %v282_v39 = vld [vmem:[%s7254_s21 + $0x14] sm:$0x1]  ;;  %v325_v40 = vshrl.u32 %v247_v31, 16 }
  0x79   : > { %v2151_v28 = vrot.slane %v2149_v22, 4  ;;  %v2154_v34 = vrot.slane %v2152_v25, 5  ;;  %v2160_v35 = vrot.slane %v2158_v26, 5  ;;  %v2164_v37 = vrot.slane %v2162_v29, 4  ;;  %v5462_v49 = vld [vmem:[%s7254_s21 + $0x18] sm:$0xf] }
  0x7a   : > { %v308_v32 = vrot.slane %v307_v23, 4  ;;  %v318_v33 = vrot.slane %v317_v24, 4  ;;  %v2170_v38 = vrot.slane %v2168_v30, 5  ;;  %v328_v44 = vshll.u32 %v247_v31, 16  ;;  %v7298_v54 = vld [vmem:[%s7254_s21 + $0x1c] sm:$0xf] }
  0x7b   : > { %v2155_v43 = vor.u32 %v2154_v34, %v2151_v28  ;;  %v2165_v46 = vor.u32 %v2164_v37, %v2160_v35  ;;  %v327_v47 = vrot.slane %v325_v40, 4  ;;  %v334_v48 = vshll.u32 %v248_v36, 16  ;;  %v7306_v63 = vld [vmem:[%s7254_s21 + $0x20] sm:$0x1]  ;;  %v249_v8 = vld [vmem:[%s7254_s21 + $0x18] sm:$0xf] }
  0x7c   : > { %v313_v41 = vsel %vm7283_vm2, %v308_v32, %v312_v16  ;;  %v323_v42 = vsel %vm7283_vm2, %v318_v33, %v322_v19  ;;  %v330_v51 = vrot.slane %v328_v44, 5  ;;  %v338_v52 = vshrl.u32 %v248_v36, 16  ;;  %v250_v19 = vld [vmem:[%s7254_s21 + $0x1c] sm:$0xf]  ;;  %v283_v25 = vld [vmem:[%s7254_s21 + $0x20] sm:$0x1] }
  0x7d   : > { %v5275_v45 = vcombine.low %v313_v41, %v323_v42  ;;  %v2156_v50 = vrot.slane %v2155_v43, 4  ;;  %v344_v53 = vshll.u32 %v282_v39, 16  ;;  %v2166_v55 = vrot.slane %v2165_v46, 4  ;;  %v5465_v32 = vld [vmem:[%s7254_s21 + $0x24] sm:$0xf]  ;;  %s5144_s15 = scalar_lea.sflag [#allocation4], %s7250_s30 }
  0x7e   : > { %v2904_v56 = vrot.slane %v7274_v20, 5  ;;  %v2907_v57 = vrot.slane %v7277_v21, 5  ;;  %v336_v58 = vrot.slane %v334_v48, 5  ;;  %v331_v60 = vor.u32 %v330_v51, %v327_v47  ;;  %v6735_v37 = vld [vmem:[#allocation5 + $0x8] sm:$0xff]   ;;  %v7329_v42 = vld [vmem:[%s7254_s21 + $0x28] sm:$0xf] }
  0x7f   : > { %6058 = vmatprep.mubr.msk.bf16.mxu1 %vm749_vm3, %v5275_v45  ;;  %v2161_v59 = vsel %vm7283_vm2, %v2156_v50, %v2160_v35  ;;  %v340_v61 = vrot.slane %v338_v52, 4  ;;  %v346_v62 = vrot.slane %v344_v53, 5  ;;  %v2171_v0 = vsel %vm7283_vm2, %v2166_v55, %v2170_v38  ;;  %v7335_v45 = vld [vmem:[%s7254_s21 + $0x2c] sm:$0x1]  ;;  %v251_v53 = vld [vmem:[%s7254_s21 + $0x24] sm:$0xf] }
  0x80   : > { %v2173_v1 = vshrl.u32 %v5462_v49, 16  ;;  %v2176_v2 = vshll.u32 %v5462_v49, 16  ;;  %v2182_v3 = vshll.u32 %v7298_v54, 16  ;;  %v5507_v4 = vcombine.low %v2161_v59, %v2171_v0  ;;  %v6734_v48 = vld [vmem:[#allocation5 + $0x58] sm:$0xff]   ;;  %v7529_v21 = vld [vmem:[%s7254_s21 + $0x78] sm:$0xf] }
  0x81   : > { %v332_v5 = vrot.slane %v331_v60, 4  ;;  %v341_v6 = vor.u32 %v340_v61, %v336_v58  ;;  %v2186_v7 = vshrl.u32 %v7298_v54, 16  ;;  %v2192_v14 = vshll.u32 %v7306_v63, 16  ;;  %v252_v55 = vld [vmem:[%s7254_s21 + $0x28] sm:$0xf]  ;;  %s6941_s10 = scalar_lea.vmem %s9024_s11, 2048 }
  0x82   : > { %v2175_v9 = vrot.slane %v2173_v1, 4  ;;  %v2178_v10 = vrot.slane %v2176_v2, 5  ;;  %v2184_v11 = vrot.slane %v2182_v3, 5  ;;  %6202 = vmatprep.mubr.msk.bf16.mxu0 %vm749_vm3, %v5507_v4  ;;  %v2911_v18 = vrot.slane %v7298_v54, 5  ;;  %p6942_p8 = scmp.ne.s32.totalorder %s9024_s11, %s6941_s10  ;;  %p9175_p12 = scmp.ne.s32.totalorder %s9111_s27, 0 }
  0x83   : > { %v337_v15 = vsel %vm7283_vm2, %v332_v5, %v336_v58  ;;  %v342_v16 = vrot.slane %v341_v6, 4  ;;  %v2188_v17 = vrot.slane %v2186_v7, 4  ;;  %v2194_v23 = vrot.slane %v2192_v14, 5  ;;  %v284_v5 = vld [vmem:[%s7254_s21 + $0x2c] sm:$0x1]  ;;  %s7034_s19 = smov [#allocation8]  }
  0x84   : > { %v2179_v22 = vor.u32 %v2178_v10, %v2175_v9  ;;  %v2914_v24 = vrot.slane %v7306_v63, 5  ;;  %v349_v26 = vshrl.u32 %v249_v8, 16  ;;  %v7325_v30 = vrot.slane %v2911_v18, 4  ;;  %v5468_v14 = vld [vmem:[%s7254_s21 + $0x30] sm:$0xf]  ;;  %p6943_p1 = pnand %p6942_p8, %p9175_p12  ;;  %s6945_s4 = sshll.u32 %s7034_s19, 4  ;;  %s6946_s4 = int_to_ptr.vmem [resolvable:$false] %s6945_s4 }
  0x85   : > { %v347_v28 = vsel %vm7283_vm2, %v342_v16, %v346_v62  ;;  %v2189_v29 = vor.u32 %v2188_v17, %v2184_v11  ;;  %v352_v31 = vshll.u32 %v249_v8, 16  ;;  %v358_v36 = vshll.u32 %v250_v19, 16  ;;  %v6738_v62 = vld [vmem:[#allocation5 + $0x20] sm:$0xff]   ;;  %v5543_v63 = vld [vmem:[%s7254_s21 + $0x24] sm:$0xe]  ;;  %s6947_s9 = scalar_lea.vmem %s6946_s4, 4096  ;;  %p6948_p3 = scmp.lt.s32.totalorder %s9024_s11, %s6946_s4 }
  0x86   : > { %v5276_v33 = vcombine.low %v337_v15, %v347_v28  ;;  %v2180_v34 = vrot.slane %v2179_v22, 4  ;;  %v351_v35 = vrot.slane %v349_v26, 4  ;;  %v362_v40 = vshrl.u32 %v250_v19, 16  ;;  %v7351_v22 = vld [vmem:[#allocation5 + $0x60] sm:$0xff]   ;;  %p6944_p10 = pneg %p6943_p1  ;;  %p6949_p5 = scmp.lt.s32.totalorder %s6947_s9, %s6941_s10 }
  0x87   : > { %v2190_v38 = vrot.slane %v2189_v29, 4  ;;  %v354_v39 = vrot.slane %v352_v31, 5  ;;  %v368_v41 = vshll.u32 %v283_v25, 16  ;;  %v360_v44 = vrot.slane %v358_v36, 5  ;;  %v7356_v28 = vld [vmem:[%s7254_s21 + $0x34] sm:$0xf] }
  0x88   : > { %6059 = vmatmul.mubr.msk.bf16.vlgmr.msra.gmra.mrb[0].mxu1 %vm749_vm3, %v5276_v33  ;;  %v2185_v43 = vsel %vm7283_vm2, %v2180_v34, %v2184_v11  ;;  %v2197_v46 = vshrl.u32 %v5465_v32, 16  ;;  %v2200_v47 = vshll.u32 %v5465_v32, 16  ;;  %v364_v51 = vrot.slane %v362_v40, 4  ;;  %v7361_v34 = vld [vmem:[%s7254_s21 + $0x38] sm:$0x1]  ;;  %p6950_p9 = por %p6949_p5, %p6948_p3 }
  0x89   : > { %6091 = vmatpush3.bf16.msra.mxu1 %v7267_v12  ;;  %v2195_v49 = vsel %vm7283_vm2, %v2190_v38, %v2194_v23  ;;  %v355_v50 = vor.u32 %v354_v39, %v351_v35  ;;  %v370_v52 = vrot.slane %v368_v41, 5  ;;  %v2206_v61 = vshll.u32 %v7329_v42, 16 }
  0x8a   : > { %v5508_v58 = vcombine.low %v2185_v43, %v2195_v49  ;;  %v2199_v59 = vrot.slane %v2197_v46, 4  ;;  %v2202_v60 = vrot.slane %v2200_v47, 5  ;;  %6092 = vmatprep.subr.bf16.mxu1 %v6735_v37  ;;  %v365_v1 = vor.u32 %v364_v51, %v360_v44  ;;  %p6951_p2 = pnand %p6950_p9, %p6944_p10 }
  0x8b   : > { %v356_v0 = vrot.slane %v355_v50, 4  ;;  %v2210_v12 = vshrl.u32 %v7329_v42, 16  ;;  %v2216_v2 = vshll.u32 %v7335_v45, 16  ;;  %v2208_v4 = vrot.slane %v2206_v61, 5 }
  0x8c   : > { %6203 = vmatmul.mubr.msk.bf16.vlgmr.msra.gmra.mrb[0].mxu0 %vm749_vm3, %v5508_v58  ;;  %v2203_v3 = vor.u32 %v2202_v60, %v2199_v59  ;;  %v373_v6 = vshrl.u32 %v251_v53, 16  ;;  %v376_v7 = vshll.u32 %v251_v53, 16  ;;  %v366_v9 = vrot.slane %v365_v1, 4  ;;  %v285_v58 = vld [vmem:[%s7254_s21 + $0x38] sm:$0x1] }
  0x8d   : > { %6235 = vmatpush3.bf16.msra.mxu0 %v7269_v13  ;;  %v361_v8 = vsel %vm7283_vm2, %v356_v0, %v360_v44  ;;  %v2212_v10 = vrot.slane %v2210_v12, 4  ;;  %v2218_v11 = vrot.slane %v2216_v2, 5  ;;  %6093 = vmatpush3.bf16.msra.mxu1 %v6735_v37  ;;  %v382_v19 = vshll.u32 %v252_v55, 16  ;;  %v253_v44 = vld [vmem:[%s7254_s21 + $0x30] sm:$0xf] }
  0x8e   : > { %v2204_v15 = vrot.slane %v2203_v3, 4  ;;  %v375_v16 = vrot.slane %v373_v6, 4  ;;  %v378_v17 = vrot.slane %v376_v7, 5  ;;  %6236 = vmatprep.subr.bf16.mxu0 %v6734_v48  ;;  %6126 = vmatprep.subr.bf16.mxu1 %v6738_v62  ;;  %v371_v13 = vsel %vm7283_vm2, %v366_v9, %v370_v52  ;;  %v5471_v3 = vld [vmem:[%s7254_s21 + $0x3c] sm:$0xf] }
  0x8f   : > { %v2213_v23 = vor.u32 %v2212_v10, %v2208_v4  ;;  %v386_v25 = vshrl.u32 %v252_v55, 16  ;;  %v392_v26 = vshll.u32 %v284_v5, 16  ;;  %v5277_v29 = vcombine.low %v361_v8, %v371_v13  ;;  %v7380_v8 = vld [vmem:[%s7254_s21 + $0x40] sm:$0xf] }
  0x90   : > { %v2209_v31 = vsel %vm7283_vm2, %v2204_v15, %v2208_v4  ;;  %v379_v32 = vor.u32 %v378_v17, %v375_v16  ;;  %v384_v33 = vrot.slane %v382_v19, 5  ;;  %v2221_v38 = vshrl.u32 %v5468_v14, 16  ;;  %v7383_v19 = vld [vmem:[%s7254_s21 + $0x44] sm:$0x1] }
  0x91   : > { %v2214_v35 = vrot.slane %v2213_v23, 4  ;;  %v388_v36 = vrot.slane %v386_v25, 4  ;;  %v394_v37 = vrot.slane %v392_v26, 5  ;;  %6237 = vmatpush3.bf16.msra.mxu0 %v6734_v48  ;;  %6062 = vmatprep.mubr.msk.bf16.mxu1 %vm749_vm3, %v5277_v29  ;;  %v2224_v40 = vshll.u32 %v5468_v14, 16  ;;  %v254_v48 = vld [vmem:[%s7254_s21 + $0x34] sm:$0xf] }
  0x92   : > { %v380_v39 = vrot.slane %v379_v32, 4  ;;  %v2230_v41 = vshll.u32 %v7356_v28, 16  ;;  %v2234_v43 = vshrl.u32 %v7356_v28, 16  ;;  %6270 = vmatprep.subr.bf16.mxu0 %v7351_v22  ;;  %v2223_v49 = vrot.slane %v2221_v38, 4  ;;  %v256_v32 = vld [vmem:[%s7254_s21 + $0x40] sm:$0xf] }
  0x93   : > { %v2219_v46 = vsel %vm7283_vm2, %v2214_v35, %v2218_v11  ;;  %v389_v47 = vor.u32 %v388_v36, %v384_v33  ;;  %v2240_v50 = vshll.u32 %v7361_v34, 16  ;;  %v2226_v53 = vrot.slane %v2224_v40, 5 }
  0x94   : > { %v5509_v51 = vcombine.low %v2209_v31, %v2219_v46  ;;  %v385_v52 = vsel %vm7283_vm2, %v380_v39, %v384_v33  ;;  %v2232_v55 = vrot.slane %v2230_v41, 5  ;;  %v2236_v60 = vrot.slane %v2234_v43, 4  ;;  %v255_v31 = vld [vmem:[%s7254_s21 + $0x3c] sm:$0xf]  ;;  %v286_v43 = vld [vmem:[%s7254_s21 + $0x44] sm:$0x1] }
  0x95   : > { %v390_v59 = vrot.slane %v389_v47, 4  ;;  %v2242_v61 = vrot.slane %v2240_v50, 5  ;;  %v397_v62 = vshrl.u32 %v253_v44, 16  ;;  %v2227_v0 = vor.u32 %v2226_v53, %v2223_v49  ;;  %v5474_v53 = vld [vmem:[%s7254_s21 + $0x48] sm:$0xf] }
  0x96   : > { %6206 = vmatprep.mubr.msk.bf16.mxu0 %vm749_vm3, %v5509_v51  ;;  %v400_v1 = vshll.u32 %v253_v44, 16  ;;  %v406_v12 = vshll.u32 %v254_v48, 16  ;;  %v410_v2 = vshrl.u32 %v254_v48, 16  ;;  %v2237_v5 = vor.u32 %v2236_v60, %v2232_v55 }
  0x97   : > { %v395_v4 = vsel %vm7283_vm2, %v390_v59, %v394_v37  ;;  %v399_v6 = vrot.slane %v397_v62, 4  ;;  %v416_v7 = vshll.u32 %v285_v58, 16  ;;  %v2228_v10 = vrot.slane %v2227_v0, 4 }
  0x98   : > { %v5278_v9 = vcombine.low %v385_v52, %v395_v4  ;;  %v402_v11 = vrot.slane %v400_v1, 5  ;;  %v408_v14 = vrot.slane %v406_v12, 5  ;;  %v2238_v15 = vrot.slane %v2237_v5, 4 }
  0x99   : > { %v412_v16 = vrot.slane %v410_v2, 4  ;;  %v418_v17 = vrot.slane %v416_v7, 5  ;;  %v2245_v13 = vshrl.u32 %v5471_v3, 16  ;;  %v2233_v23 = vsel %vm7283_vm2, %v2228_v10, %v2232_v55 }
  0x9a   : > { %6063 = vmatmul.mubr.msk.bf16.gmra.mrb[4].mxu1 %vm749_vm3, %v5278_v9  ;;  %v403_v25 = vor.u32 %v402_v11, %v399_v6  ;;  %v2248_v26 = vshll.u32 %v5471_v3, 16  ;;  %v2254_v29 = vshll.u32 %v7380_v8, 16  ;;  %v2243_v33 = vsel %vm7283_vm2, %v2238_v15, %v2242_v61  ;;  %v7403_v61 = vld [vmem:[%s7254_s21 + $0x4c] sm:$0xf]  ;;  %v7409_v9 = vld [vmem:[%s7254_s21 + $0x50] sm:$0x1] }
  0x9b   : > { %v413_v35 = vor.u32 %v412_v16, %v408_v14  ;;  %v2247_v36 = vrot.slane %v2245_v13, 4  ;;  %v2258_v37 = vshrl.u32 %v7380_v8, 16  ;;  %v5510_v38 = vcombine.low %v2233_v23, %v2243_v33  ;;  %v7418_v23 = vld [vmem:[%s7254_s21 + $0x4c] sm:$0xf] }
  0x9c   : > { %v404_v39 = vrot.slane %v403_v25, 4  ;;  %v2250_v40 = vrot.slane %v2248_v26, 5  ;;  %v2256_v41 = vrot.slane %v2254_v29, 5  ;;  %v2264_v47 = vshll.u32 %v7383_v19, 16 }
  0x9d   : > { %v414_v44 = vrot.slane %v413_v35, 4  ;;  %v2260_v46 = vrot.slane %v2258_v37, 4  ;;  %v421_v49 = vshrl.u32 %v255_v31, 16  ;;  %6207 = vmatmul.mubr.msk.bf16.gmra.mrb[4].mxu0 %vm749_vm3, %v5510_v38  ;;  %v424_v51 = vshll.u32 %v255_v31, 16 }
  0x9e   : > { %v409_v50 = vsel %vm7283_vm2, %v404_v39, %v408_v14  ;;  %v2251_v48 = vor.u32 %v2250_v40, %v2247_v36  ;;  %v430_v52 = vshll.u32 %v256_v32, 16  ;;  %v2266_v59 = vrot.slane %v2264_v47, 5  ;;  %v7413_v14 = vld [vmem:[%s7254_s21 + $0x48] sm:$0xf]  ;;  %v287_v39 = vld [vmem:[%s7254_s21 + $0x50] sm:$0x1] }
  0x9f   : > { %v419_v55 = vsel %vm7283_vm2, %v414_v44, %v418_v17  ;;  %v2261_v58 = vor.u32 %v2260_v46, %v2256_v41  ;;  %v423_v60 = vrot.slane %v421_v49, 4  ;;  %v426_v1 = vrot.slane %v424_v51, 5 }
  0xa0   : > { %v5279_v62 = vcombine.low %v409_v50, %v419_v55  ;;  %v2252_v0 = vrot.slane %v2251_v48, 4  ;;  %v432_v12 = vrot.slane %v430_v52, 5  ;;  %v434_v3 = vshrl.u32 %v256_v32, 16 }
  0xa1   : > { %v2262_v2 = vrot.slane %v2261_v58, 4  ;;  %v440_v4 = vshll.u32 %v286_v43, 16  ;;  %v2269_v5 = vshrl.u32 %v5474_v53, 16  ;;  %v427_v7 = vor.u32 %v426_v1, %v423_v60  ;;  %v5477_v43 = vld [vmem:[%s7254_s21 + $0x54] sm:$0xf] }
  0xa2   : > { %6066 = vmatprep.mubr.msk.bf16.mxu1 %vm749_vm3, %v5279_v62  ;;  %v2257_v6 = vsel %vm7283_vm2, %v2252_v0, %v2256_v41  ;;  %v2272_v10 = vshll.u32 %v5474_v53, 16  ;;  %v2278_v11 = vshll.u32 %v7403_v61, 16  ;;  %v436_v16 = vrot.slane %v434_v3, 4  ;;  %v7442_v3 = vld [vmem:[%s7254_s21 + $0x54] sm:$0xf] }
  0xa3   : > { %v2267_v15 = vsel %vm7283_vm2, %v2262_v2, %v2266_v59  ;;  %v442_v17 = vrot.slane %v440_v4, 5  ;;  %v2271_v13 = vrot.slane %v2269_v5, 4  ;;  %v428_v26 = vrot.slane %v427_v7, 4  ;;  %v7434_v59 = vld [vmem:[%s7254_s21 + $0x58] sm:$0xf] }
  0xa4   : > { %v5511_v25 = vcombine.low %v2257_v6, %v2267_v15  ;;  %v2274_v29 = vrot.slane %v2272_v10, 5  ;;  %v2280_v31 = vrot.slane %v2278_v11, 5  ;;  %v437_v32 = vor.u32 %v436_v16, %v432_v12  ;;  %v7439_v2 = vld [vmem:[%s7254_s21 + $0x5c] sm:$0x1] }
  0xa5   : > { %v2282_v33 = vshrl.u32 %v7403_v61, 16  ;;  %v2288_v35 = vshll.u32 %v7409_v9, 16  ;;  %v445_v36 = vshrl.u32 %v7413_v14, 16  ;;  %v433_v37 = vsel %vm7283_vm2, %v428_v26, %v432_v12  ;;  %v7451_v26 = vld [vmem:[%s7254_s21 + $0x58] sm:$0xf] }
  0xa6   : > { %6210 = vmatprep.mubr.msk.bf16.mxu0 %vm749_vm3, %v5511_v25  ;;  %v2275_v38 = vor.u32 %v2274_v29, %v2271_v13  ;;  %v448_v40 = vshll.u32 %v7413_v14, 16  ;;  %v454_v41 = vshll.u32 %v7418_v23, 16  ;;  %v438_v44 = vrot.slane %v437_v32, 4 }
  0xa7   : > { %v2284_v46 = vrot.slane %v2282_v33, 4  ;;  %v2290_v47 = vrot.slane %v2288_v35, 5  ;;  %v447_v49 = vrot.slane %v445_v36, 4  ;;  %v458_v52 = vshrl.u32 %v7418_v23, 16  ;;  %v288_v36 = vld [vmem:[%s7254_s21 + $0x5c] sm:$0x1] }
  0xa8   : > { %v2276_v50 = vrot.slane %v2275_v38, 4  ;;  %v450_v48 = vrot.slane %v448_v40, 5  ;;  %v456_v51 = vrot.slane %v454_v41, 5  ;;  %v443_v53 = vsel %vm7283_vm2, %v438_v44, %v442_v17  ;;  %v5480_v41 = vld [vmem:[%s7254_s21 + $0x60] sm:$0xf] }
  0xa9   : > { %v2285_v55 = vor.u32 %v2284_v46, %v2280_v31  ;;  %v464_v58 = vshll.u32 %v287_v39, 16  ;;  %v2293_v60 = vshrl.u32 %v5477_v43, 16  ;;  %v5280_v62 = vcombine.low %v433_v37, %v443_v53 }
  0xaa   : > { %v2281_v0 = vsel %vm7283_vm2, %v2276_v50, %v2280_v31  ;;  %v451_v1 = vor.u32 %v450_v48, %v447_v49  ;;  %v460_v12 = vrot.slane %v458_v52, 4  ;;  %v2296_v7 = vshll.u32 %v5477_v43, 16  ;;  %v7465_v52 = vld [vmem:[%s7254_s21 + $0x64] sm:$0xf] }
  0xab   : > { %v2286_v4 = vrot.slane %v2285_v55, 4  ;;  %v466_v5 = vrot.slane %v464_v58, 5  ;;  %v2295_v6 = vrot.slane %v2293_v60, 4  ;;  %6067 = vmatmul.mubr.msk.bf16.gmra.mrb[8].mxu1 %vm749_vm3, %v5280_v62  ;;  %v2302_v15 = vshll.u32 %v7434_v59, 16  ;;  %v7468_v60 = vld [vmem:[%s7254_s21 + $0x68] sm:$0x1] }
  0xac   : > { %v452_v10 = vrot.slane %v451_v1, 4  ;;  %v461_v11 = vor.u32 %v460_v12, %v456_v51  ;;  %v2306_v16 = vshrl.u32 %v7434_v59, 16  ;;  %v2298_v13 = vrot.slane %v2296_v7, 5 }
  0xad   : > { %v2291_v17 = vsel %vm7283_vm2, %v2286_v4, %v2290_v47  ;;  %v2312_v25 = vshll.u32 %v7439_v2, 16  ;;  %v469_v29 = vshrl.u32 %v7442_v3, 16  ;;  %v2304_v35 = vrot.slane %v2302_v15, 5 }
  0xae   : > { %v5512_v31 = vcombine.low %v2281_v0, %v2291_v17  ;;  %v457_v32 = vsel %vm7283_vm2, %v452_v10, %v456_v51  ;;  %v462_v33 = vrot.slane %v461_v11, 4  ;;  %v2299_v37 = vor.u32 %v2298_v13, %v2295_v6  ;;  %v7475_v11 = vld [vmem:[%s7254_s21 + $0x60] sm:$0xf] }
  0xaf   : > { %v2308_v38 = vrot.slane %v2306_v16, 4  ;;  %v2314_v39 = vrot.slane %v2312_v25, 5  ;;  %v471_v40 = vrot.slane %v469_v29, 4  ;;  %v472_v44 = vshll.u32 %v7442_v3, 16  ;;  %v7482_v25 = vld [vmem:[%s7254_s21 + $0x64] sm:$0xf] }
  0xb0   : > { %6211 = vmatmul.mubr.msk.bf16.gmra.mrb[8].mxu0 %vm749_vm3, %v5512_v31  ;;  %v467_v43 = vsel %vm7283_vm2, %v462_v33, %v466_v5  ;;  %v478_v46 = vshll.u32 %v7451_v26, 16  ;;  %v482_v47 = vshrl.u32 %v7451_v26, 16  ;;  %v2300_v50 = vrot.slane %v2299_v37, 4 }
  0xb1   : > { %v5281_v49 = vcombine.low %v457_v32, %v467_v43  ;;  %v2309_v48 = vor.u32 %v2308_v38, %v2304_v35  ;;  %v488_v51 = vshll.u32 %v288_v36, 16  ;;  %v474_v53 = vrot.slane %v472_v44, 5 }
  0xb2   : > { %v480_v55 = vrot.slane %v478_v46, 5  ;;  %v484_v58 = vrot.slane %v482_v47, 4  ;;  %v2317_v62 = vshrl.u32 %v5480_v41, 16  ;;  %v2305_v0 = vsel %vm7283_vm2, %v2300_v50, %v2304_v35  ;;  %v289_v35 = vld [vmem:[%s7254_s21 + $0x68] sm:$0x1] }
  0xb3   : > { %6070 = vmatprep.mubr.msk.bf16.mxu1 %vm749_vm3, %v5281_v49  ;;  %v2310_v1 = vrot.slane %v2309_v48, 4  ;;  %v490_v12 = vrot.slane %v488_v51, 5  ;;  %v2320_v4 = vshll.u32 %v5480_v41, 16  ;;  %v475_v5 = vor.u32 %v474_v53, %v471_v40  ;;  %v5541_v46 = vld [vmem:[%s7254_s21 + $0xc] sm:$0xe] }
  0xb4   : > { %v485_v6 = vor.u32 %v484_v58, %v480_v55  ;;  %v2319_v7 = vrot.slane %v2317_v62, 4  ;;  %v2326_v10 = vshll.u32 %v7465_v52, 16  ;;  %v2330_v17 = vshrl.u32 %v7465_v52, 16  ;;  %v7495_v51 = vld [vmem:[%s7254_s21 + $0x6c] sm:$0xf] }
  0xb5   : > { %v2315_v15 = vsel %vm7283_vm2, %v2310_v1, %v2314_v39  ;;  %v2322_v16 = vrot.slane %v2320_v4, 5  ;;  %v2336_v13 = vshll.u32 %v7468_v60, 16  ;;  %v476_v31 = vrot.slane %v475_v5, 4 }
  0xb6   : > { %v5513_v29 = vcombine.low %v2305_v0, %v2315_v15  ;;  %v486_v32 = vrot.slane %v485_v6, 4  ;;  %v2328_v33 = vrot.slane %v2326_v10, 5  ;;  %v2332_v37 = vrot.slane %v2330_v17, 4  ;;  %v7510_v15 = vld [vmem:[%s7254_s21 + $0x70] sm:$0xf] }
  0xb7   : > { %v2323_v36 = vor.u32 %v2322_v16, %v2319_v7  ;;  %v2338_v38 = vrot.slane %v2336_v13, 5  ;;  %v493_v40 = vshrl.u32 %v7475_v11, 16  ;;  %v481_v39 = vsel %vm7283_vm2, %v476_v31, %v480_v55  ;;  %v290_v31 = vld [vmem:[%s7254_s21 + $0x74] sm:$0x1] }
  0xb8   : > { %6214 = vmatprep.mubr.msk.bf16.mxu0 %vm749_vm3, %v5513_v29  ;;  %v491_v41 = vsel %vm7283_vm2, %v486_v32, %v490_v12  ;;  %v496_v43 = vshll.u32 %v7475_v11, 16  ;;  %v502_v44 = vshll.u32 %v7482_v25, 16  ;;  %v2333_v50 = vor.u32 %v2332_v37, %v2328_v33 }
  0xb9   : > { %v5282_v47 = vcombine.low %v481_v39, %v491_v41  ;;  %v2324_v49 = vrot.slane %v2323_v36, 4  ;;  %v495_v48 = vrot.slane %v493_v40, 4  ;;  %v506_v62 = vshrl.u32 %v7482_v25, 16 }
  0xba   : > { %v498_v53 = vrot.slane %v496_v43, 5  ;;  %v504_v58 = vrot.slane %v502_v44, 5  ;;  %v512_v55 = vshll.u32 %v289_v35, 16  ;;  %v2334_v12 = vrot.slane %v2333_v50, 4 }
  0xbb   : > { %6071 = vmatmul.mubr.msk.bf16.gmra.mrb[12].mxu1 %vm749_vm3, %v5282_v47  ;;  %v2329_v1 = vsel %vm7283_vm2, %v2324_v49, %v2328_v33  ;;  %v5557_v4 = vrot.slane %v5541_v46, 9  ;;  %v2906_v5 = vrot.slane %v2904_v56, 4  ;;  %v508_v7 = vrot.slane %v506_v62, 4  ;;  %v5542_v33 = vld [vmem:[%s7254_s21 + $0x18] sm:$0xe] }
  0xbc   : > { %v499_v6 = vor.u32 %v498_v53, %v495_v48  ;;  %v514_v10 = vrot.slane %v512_v55, 5  ;;  %v517_v16 = vshrl.u32 %v7495_v51, 16  ;;  %v2339_v17 = vsel %vm7283_vm2, %v2334_v12, %v2338_v38  ;;  %v7541_v48 = vld [vmem:[%s7254_s21 + $0x7c] sm:$0xf]  ;;  %v291_v55 = vld [vmem:[%s7254_s21 + $0x80] sm:$0x1] }
  0xbd   : > { %v2905_v13 = vsel %vm7500_vm6, %v5557_v4, %v2904_v56  ;;  %v2908_v29 = vsel %vm7500_vm6, %v2906_v5, %v2907_v57  ;;  %v520_v32 = vshll.u32 %v7495_v51, 16  ;;  %v5514_v35 = vcombine.low %v2329_v1, %v2339_v17  ;;  %v7553_v5 = vld [vmem:[%s7254_s21 + $0x84] sm:$0xf] }
  0xbe   : > { %v500_v36 = vrot.slane %v499_v6, 4  ;;  %v509_v37 = vor.u32 %v508_v7, %v504_v58  ;;  %v5573_v40 = vcombine.low %v2905_v13, %v2908_v29  ;;  %v519_v38 = vrot.slane %v517_v16, 4 }
  0xbf   : > { %v522_v39 = vrot.slane %v520_v32, 5  ;;  %v526_v20 = vshll.u32 %v7510_v15, 16  ;;  %v530_v56 = vshrl.u32 %v7510_v15, 16  ;;  %6215 = vmatmul.mubr.msk.bf16.gmra.mrb[12].mxu0 %vm749_vm3, %v5514_v35  ;;  %v536_v43 = vshll.u32 %v290_v31, 16  ;;  %v292_v31 = vld [vmem:[%s7254_s21 + $0x8c] sm:$0x1] }
  0xc0   : > { %v505_v57 = vsel %vm7283_vm2, %v500_v36, %v504_v58  ;;  %v510_v41 = vrot.slane %v509_v37, 4  ;;  %v5558_v44 = vrot.slane %v5542_v33, 9  ;;  %6238 = vmatprep.mubr.msk.bf16.mxu0 %vm749_vm3, %v5573_v40  ;;  %v2915_v50 = vsel %vm7500_vm6, %v7325_v30, %v2914_v24  ;;  %v6739_v32 = vld [vmem:[#allocation5 + $0x68] sm:$0xff]   ;;  %v5544_v40 = vld [vmem:[%s7254_s21 + $0x30] sm:$0xe] }
  0xc1   : > { %v523_v46 = vor.u32 %v522_v39, %v519_v38  ;;  %v528_v47 = vrot.slane %v526_v20, 5  ;;  %v532_v49 = vrot.slane %v530_v56, 4  ;;  %v538_v58 = vrot.slane %v536_v43, 5 }
  0xc2   : > { %v515_v53 = vsel %vm7283_vm2, %v510_v41, %v514_v10  ;;  %v2912_v62 = vsel %vm7500_vm6, %v5558_v44, %v2911_v18  ;;  %v541_v1 = vshrl.u32 %v7529_v21, 16  ;;  %v544_v7 = vshll.u32 %v7529_v21, 16  ;;  %v7559_v18 = vld [vmem:[%s7254_s21 + $0x88] sm:$0xf] }
  0xc3   : > { %v5283_v12 = vcombine.low %v505_v57, %v515_v53  ;;  %v524_v4 = vrot.slane %v523_v46, 4  ;;  %v533_v24 = vor.u32 %v532_v49, %v528_v47  ;;  %v5574_v30 = vcombine.low %v2912_v62, %v2915_v50  ;;  %v7580_v50 = vld [vmem:[%s7254_s21 + $0x90] sm:$0xf] }
  0xc4   : > { %v543_v6 = vrot.slane %v541_v1, 4  ;;  %v550_v54 = vshll.u32 %v7541_v48, 16  ;;  %v554_v10 = vshrl.u32 %v7541_v48, 16  ;;  %v560_v13 = vshll.u32 %v291_v55, 16  ;;  %v7585_v1 = vld [vmem:[%s7254_s21 + $0x94] sm:$0xf] }
  0xc5   : > { %6074 = vmatprep.mubr.msk.bf16.mxu1 %vm749_vm3, %v5283_v12  ;;  %v529_v16 = vsel %vm7283_vm2, %v524_v4, %v528_v47  ;;  %v534_v17 = vrot.slane %v533_v24, 4  ;;  %v5559_v29 = vrot.slane %v5543_v63, 9  ;;  %v546_v33 = vrot.slane %v544_v7, 5 }
  0xc6   : > { %v552_v35 = vrot.slane %v550_v54, 5  ;;  %v556_v36 = vrot.slane %v554_v10, 4  ;;  %v2918_v37 = vrot.slane %v7329_v42, 5  ;;  %v562_v39 = vrot.slane %v560_v13, 5  ;;  %v7574_v42 = vld [vmem:[#allocation5 + $0x70] sm:$0xff]  }
  0xc7   : > { %v539_v38 = vsel %vm7283_vm2, %v534_v17, %v538_v58  ;;  %v2921_v20 = vrot.slane %v7335_v45, 5  ;;  %v565_v56 = vshrl.u32 %v7553_v5, 16  ;;  %6239 = vmatmul.mubr.msk.bf16.vlgmr.msra.gmra.mrb[0].mxu0 %vm749_vm3, %v5574_v30  ;;  %v547_v41 = vor.u32 %v546_v33, %v543_v6  ;;  %v293_v54 = vld [vmem:[%s7254_s21 + $0x98] sm:$0x1] }
  0xc8   : > { %v5284_v57 = vcombine.low %v529_v16, %v539_v38  ;;  %v557_v43 = vor.u32 %v556_v36, %v552_v35  ;;  %v2919_v44 = vsel %vm7500_vm6, %v5559_v29, %v2918_v37  ;;  %6271 = vmatpush3.bf16.msra.mxu0 %v7351_v22  ;;  %v2920_v46 = vrot.slane %v2918_v37, 4  ;;  %v5545_v36 = vld [vmem:[%s7254_s21 + $0x3c] sm:$0xe] }
  0xc9   : > { %v567_v47 = vrot.slane %v565_v56, 4  ;;  %v568_v49 = vshll.u32 %v7553_v5, 16  ;;  %v574_v45 = vshll.u32 %v7559_v18, 16  ;;  %v548_v53 = vrot.slane %v547_v41, 4  ;;  %6272 = vmatprep.subr.bf16.mxu0 %v6739_v32  ;;  %v7606_v38 = vld [vmem:[%s7254_s21 + $0x9c] sm:$0xf] }
  0xca   : > { %6075 = vmatmul.mubr.msk.bf16.gmra.mrb[16].mxu1 %vm749_vm3, %v5284_v57  ;;  %v558_v58 = vrot.slane %v557_v43, 4  ;;  %v578_v62 = vshrl.u32 %v7559_v18, 16  ;;  %v584_v55 = vshll.u32 %v292_v31, 16  ;;  %v2922_v22 = vsel %vm7500_vm6, %v2920_v46, %v2921_v20  ;;  %v7610_v57 = vld [vmem:[%s7254_s21 + $0xa0] sm:$0xf] }
  0xcb   : > { %v570_v63 = vrot.slane %v568_v49, 5  ;;  %v576_v12 = vrot.slane %v574_v45, 5  ;;  %v5560_v4 = vrot.slane %v5544_v40, 9  ;;  %v553_v24 = vsel %vm7283_vm2, %v548_v53, %v552_v35 }
  0xcc   : > { %v563_v30 = vsel %vm7283_vm2, %v558_v58, %v562_v39  ;;  %v5575_v6 = vcombine.low %v2919_v44, %v2922_v22  ;;  %v580_v7 = vrot.slane %v578_v62, 4  ;;  %v586_v17 = vrot.slane %v584_v55, 5  ;;  %6273 = vmatpush3.bf16.msra.mxu0 %v6739_v32  ;;  %v294_v58 = vld [vmem:[%s7254_s21 + $0xa4] sm:$0x1] }
  0xcd   : > { %v5285_v10 = vcombine.low %v553_v24, %v563_v30  ;;  %v571_v16 = vor.u32 %v570_v63, %v567_v47  ;;  %v2925_v13 = vrot.slane %v7356_v28, 5  ;;  %v2928_v31 = vrot.slane %v7361_v34, 5  ;;  %6306 = vmatprep.subr.bf16.mxu0 %v7574_v42 }
  0xce   : > { %6242 = vmatprep.mubr.msk.bf16.mxu0 %vm749_vm3, %v5575_v6  ;;  %v581_v29 = vor.u32 %v580_v7, %v576_v12  ;;  %v589_v33 = vshrl.u32 %v7580_v50, 16  ;;  %v592_v35 = vshll.u32 %v7580_v50, 16  ;;  %v598_v40 = vshll.u32 %v7585_v1, 16 }
  0xcf   : > { %6078 = vmatprep.mubr.msk.bf16.mxu1 %vm749_vm3, %v5285_v10  ;;  %v572_v37 = vrot.slane %v571_v16, 4  ;;  %v2926_v28 = vsel %vm7500_vm6, %v5560_v4, %v2925_v13  ;;  %v2927_v32 = vrot.slane %v2925_v13, 4  ;;  %v602_v56 = vshrl.u32 %v7585_v1, 16  ;;  %v5546_v4 = vld [vmem:[%s7254_s21 + $0x48] sm:$0xe] }
  0xd0   : > { %v582_v34 = vrot.slane %v581_v29, 4  ;;  %v591_v39 = vrot.slane %v589_v33, 4  ;;  %v594_v20 = vrot.slane %v592_v35, 5  ;;  %v600_v44 = vrot.slane %v598_v40, 5  ;;  %v7630_v16 = vld [vmem:[%s7254_s21 + $0xa8] sm:$0xf] }
  0xd1   : > { %v577_v41 = vsel %vm7283_vm2, %v572_v37, %v576_v12  ;;  %v2929_v43 = vsel %vm7500_vm6, %v2927_v32, %v2928_v31  ;;  %v608_v46 = vshll.u32 %v293_v54, 16  ;;  %v604_v53 = vrot.slane %v602_v56, 4  ;;  %v7636_v31 = vld [vmem:[%s7254_s21 + $0xac] sm:$0xf] }
  0xd2   : > { %v587_v47 = vsel %vm7283_vm2, %v582_v34, %v586_v17  ;;  %v5576_v49 = vcombine.low %v2926_v28, %v2929_v43  ;;  %v595_v45 = vor.u32 %v594_v20, %v591_v39  ;;  %v5561_v22 = vrot.slane %v5545_v36, 9  ;;  %v295_v39 = vld [vmem:[%s7254_s21 + $0xb0] sm:$0x1] }
  0xd3   : > { %v5286_v62 = vcombine.low %v577_v41, %v587_v47  ;;  %v610_v55 = vrot.slane %v608_v46, 5  ;;  %v2932_v63 = vrot.slane %v7380_v8, 5  ;;  %v605_v24 = vor.u32 %v604_v53, %v600_v44 }
  0xd4   : > { %6243 = vmatmul.mubr.msk.bf16.gmra.mrb[4].mxu0 %vm749_vm3, %v5576_v49  ;;  %v596_v12 = vrot.slane %v595_v45, 4  ;;  %v2935_v30 = vrot.slane %v7383_v19, 5  ;;  %v613_v6 = vshrl.u32 %v7606_v38, 16  ;;  %v616_v10 = vshll.u32 %v7606_v38, 16  ;;  %v5547_v45 = vld [vmem:[%s7254_s21 + $0x54] sm:$0xe] }
  0xd5   : > { %6079 = vmatmul.mubr.msk.bf16.gmra.mrb[20].mxu1 %vm749_vm3, %v5286_v62  ;;  %v2933_v7 = vsel %vm7500_vm6, %v5561_v22, %v2932_v63  ;;  %v2934_v54 = vrot.slane %v2932_v63, 4  ;;  %v622_v8 = vshll.u32 %v7610_v57, 16  ;;  %v606_v13 = vrot.slane %v605_v24, 4 }
  0xd6   : > { %v601_v17 = vsel %vm7283_vm2, %v596_v12, %v600_v44  ;;  %v615_v19 = vrot.slane %v613_v6, 4  ;;  %v626_v29 = vshrl.u32 %v7610_v57, 16  ;;  %v618_v35 = vrot.slane %v616_v10, 5 }
  0xd7   : > { %v2936_v33 = vsel %vm7500_vm6, %v2934_v54, %v2935_v30  ;;  %v624_v36 = vrot.slane %v622_v8, 5  ;;  %v632_v37 = vshll.u32 %v294_v58, 16  ;;  %v611_v28 = vsel %vm7283_vm2, %v606_v13, %v610_v55  ;;  %v7654_v55 = vld [vmem:[%s7254_s21 + $0xb4] sm:$0xf]  ;;  %v296_v13 = vld [vmem:[%s7254_s21 + $0xbc] sm:$0x1] }
  0xd8   : > { %v5577_v32 = vcombine.low %v2933_v7, %v2936_v33  ;;  %v628_v40 = vrot.slane %v626_v29, 4  ;;  %v5562_v34 = vrot.slane %v5546_v4, 9  ;;  %v5287_v20 = vcombine.low %v601_v17, %v611_v28  ;;  %v7662_v7 = vld [vmem:[%s7254_s21 + $0xb8] sm:$0xf] }
  0xd9   : > { %v619_v56 = vor.u32 %v618_v35, %v615_v19  ;;  %v634_v41 = vrot.slane %v632_v37, 5  ;;  %v2939_v43 = vrot.slane %v7403_v61, 5  ;;  %v2942_v46 = vrot.slane %v7409_v9, 5 }
  0xda   : > { %6246 = vmatprep.mubr.msk.bf16.mxu0 %vm749_vm3, %v5577_v32  ;;  %v629_v44 = vor.u32 %v628_v40, %v624_v36  ;;  %v637_v47 = vshrl.u32 %v7630_v16, 16  ;;  %v640_v49 = vshll.u32 %v7630_v16, 16  ;;  %6082 = vmatprep.mubr.msk.bf16.mxu1 %vm749_vm3, %v5287_v20  ;;  %v646_v61 = vshll.u32 %v7636_v31, 16 }
  0xdb   : > { %v620_v53 = vrot.slane %v619_v56, 4  ;;  %v2940_v58 = vsel %vm7500_vm6, %v5562_v34, %v2939_v43  ;;  %v2941_v62 = vrot.slane %v2939_v43, 4  ;;  %v650_v4 = vshrl.u32 %v7636_v31, 16  ;;  %v5484_v56 = vld [vmem:[%s7254_s21 + $0x70] sm:$0xf] }
  0xdc   : > { %v630_v22 = vrot.slane %v629_v44, 4  ;;  %v639_v9 = vrot.slane %v637_v47, 4  ;;  %v642_v63 = vrot.slane %v640_v49, 5  ;;  %v648_v30 = vrot.slane %v646_v61, 5 }
  0xdd   : > { %v625_v12 = vsel %vm7283_vm2, %v620_v53, %v624_v36  ;;  %v2943_v24 = vsel %vm7500_vm6, %v2941_v62, %v2942_v46  ;;  %v656_v6 = vshll.u32 %v295_v39, 16  ;;  %v652_v17 = vrot.slane %v650_v4, 4  ;;  %v5548_v36 = vld [vmem:[%s7254_s21 + $0x60] sm:$0xe] }
  0xde   : > { %v635_v54 = vsel %vm7283_vm2, %v630_v22, %v634_v41  ;;  %v5578_v10 = vcombine.low %v2940_v58, %v2943_v24  ;;  %v643_v8 = vor.u32 %v642_v63, %v639_v9  ;;  %v5563_v33 = vrot.slane %v5547_v45, 9  ;;  %v5549_v41 = vld [vmem:[%s7254_s21 + $0x6c] sm:$0xe]  ;;  %v5485_v9 = vld [vmem:[%s7254_s21 + $0x74] sm:$0x1] }
  0xdf   : > { %v5288_v19 = vcombine.low %v625_v12, %v635_v54  ;;  %v658_v29 = vrot.slane %v656_v6, 5  ;;  %v2946_v35 = vrot.slane %v7434_v59, 5  ;;  %v653_v28 = vor.u32 %v652_v17, %v648_v30 }
  0xe0   : > { %6247 = vmatmul.mubr.msk.bf16.gmra.mrb[8].mxu0 %vm749_vm3, %v5578_v10  ;;  %v644_v37 = vrot.slane %v643_v8, 4  ;;  %v2949_v32 = vrot.slane %v7439_v2, 5  ;;  %v661_v40 = vshrl.u32 %v7654_v55, 16  ;;  %v664_v20 = vshll.u32 %v7654_v55, 16 }
  0xe1   : > { %6083 = vmatmul.mubr.msk.bf16.gmra.mrb[24].mxu1 %vm749_vm3, %v5288_v19  ;;  %v2947_v34 = vsel %vm7500_vm6, %v5563_v33, %v2946_v35  ;;  %v2948_v39 = vrot.slane %v2946_v35, 4  ;;  %v670_v59 = vshll.u32 %v7662_v7, 16  ;;  %v654_v44 = vrot.slane %v653_v28, 4  ;;  %v7699_v35 = vld [vmem:[%s7254_s21 + $0x80] sm:$0x1] }
  0xe2   : > { %v649_v43 = vsel %vm7283_vm2, %v644_v37, %v648_v30  ;;  %v663_v2 = vrot.slane %v661_v40, 4  ;;  %v674_v46 = vshrl.u32 %v7662_v7, 16  ;;  %v666_v49 = vrot.slane %v664_v20, 5  ;;  %v5550_v28 = vld [vmem:[%s7254_s21 + $0x78] sm:$0xe] }
  0xe3   : > { %v2950_v47 = vsel %vm7500_vm6, %v2948_v39, %v2949_v32  ;;  %v672_v45 = vrot.slane %v670_v59, 5  ;;  %v680_v53 = vshll.u32 %v296_v13, 16  ;;  %v659_v58 = vsel %vm7283_vm2, %v654_v44, %v658_v29  ;;  %v5490_v32 = vld [vmem:[%s7254_s21 + $0x88] sm:$0xf]  ;;  %v6794_v39 = vld [vmem:[%s7254_s21] sm:$0xf] }
  0xe4   : > { %v5579_v62 = vcombine.low %v2947_v34, %v2950_v47  ;;  %v676_v61 = vrot.slane %v674_v46, 4  ;;  %v5564_v22 = vrot.slane %v5548_v36, 9  ;;  %v5289_v63 = vcombine.low %v649_v43, %v659_v58  ;;  %v7711_v20 = vld [vmem:[%s7254_s21 + $0x4] sm:$0xf]  ;;  %v5493_v46 = vld [vmem:[%s7254_s21 + $0x94] sm:$0xf] }
  0xe5   : > { %v667_v4 = vor.u32 %v666_v49, %v663_v2  ;;  %v682_v12 = vrot.slane %v680_v53, 5  ;;  %v2953_v24 = vrot.slane %v7465_v52, 5  ;;  %v2956_v6 = vrot.slane %v7468_v60, 5  ;;  %v7694_v52 = vld [vmem:[%s7254_s21 + $0x7c] sm:$0xf] }
  0xe6   : > { %6250 = vmatprep.mubr.msk.bf16.mxu0 %vm749_vm3, %v5579_v62  ;;  %v677_v30 = vor.u32 %v676_v61, %v672_v45  ;;  %v5565_v54 = vrot.slane %v5549_v41, 9  ;;  %v2960_v10 = vrot.slane %v5484_v56, 5  ;;  %6086 = vmatprep.mubr.msk.bf16.mxu1 %vm749_vm3, %v5289_v63  ;;  %v2963_v19 = vrot.slane %v5485_v9, 5  ;;  %v5551_v41 = vld [vmem:[%s7254_s21 + $0x84] sm:$0xe] }
  0xe7   : > { %v668_v8 = vrot.slane %v667_v4, 4  ;;  %v2954_v17 = vsel %vm7500_vm6, %v5564_v22, %v2953_v24  ;;  %v2955_v13 = vrot.slane %v2953_v24, 4  ;;  %v5309_v59 = vcombine.low %v6794_v39, %v7711_v20  ;;  %v5491_v2 = vld [vmem:[%s7254_s21 + $0x8c] sm:$0x1]  ;;  %v5552_v53 = vld [vmem:[%s7254_s21 + $0x90] sm:$0xe] }
  0xe8   : > { %v678_v29 = vrot.slane %v677_v30, 4  ;;  %v2961_v60 = vsel %vm7500_vm6, %v5565_v54, %v2960_v10  ;;  %v2962_v33 = vrot.slane %v2960_v10, 4  ;;  %v5566_v47 = vrot.slane %v5550_v28, 9  ;;  %v5494_v63 = vld [vmem:[%s7254_s21 + $0x98] sm:$0x1] }
  0xe9   : > { %v673_v36 = vsel %vm7283_vm2, %v668_v8, %v672_v45  ;;  %v2957_v37 = vsel %vm7500_vm6, %v2955_v13, %v2956_v6  ;;  %v2967_v49 = vrot.slane %v7694_v52, 5  ;;  %v2970_v45 = vrot.slane %v7699_v35, 5  ;;  %v5496_v4 = vld [vmem:[%s7254_s21 + $0xa0] sm:$0xf]  ;;  %v7732_v24 = vld [vmem:[%s7254_s21 + $0x10] sm:$0xf] }
  0xea   : > { %v683_v40 = vsel %vm7283_vm2, %v678_v29, %v682_v12  ;;  %v5580_v34 = vcombine.low %v2954_v17, %v2957_v37  ;;  %v2964_v56 = vsel %vm7500_vm6, %v2962_v33, %v2963_v19  ;;  %v5567_v58 = vrot.slane %v5551_v41, 9  ;;  %v6796_v12 = vld [vmem:[%s7254_s21 + $0xc] sm:$0xf]  ;;  %v5497_v10 = vld [vmem:[%s7254_s21 + $0xa4] sm:$0x1] }
  0xeb   : > { %v5290_v43 = vcombine.low %v673_v36, %v683_v40  ;;  %v5581_v44 = vcombine.low %v2961_v60, %v2964_v56  ;;  %v2974_v62 = vrot.slane %v5490_v32, 5  ;;  %v2968_v61 = vsel %vm7500_vm6, %v5566_v47, %v2967_v49  ;;  %v5553_v8 = vld [vmem:[%s7254_s21 + $0x9c] sm:$0xe]  ;;  %v6798_v13 = vld [vmem:[%s7254_s21 + $0x18] sm:$0xf] }
  0xec   : > { %6251 = vmatmul.mubr.msk.bf16.gmra.mrb[12].mxu0 %vm749_vm3, %v5580_v34  ;;  %v2969_v22 = vrot.slane %v2967_v49, 4  ;;  %v2977_v9 = vrot.slane %v5491_v2, 5  ;;  %v5310_v30 = vcombine.low %v6796_v12, %v7732_v24  ;;  %v7743_v19 = vld [vmem:[%s7254_s21 + $0x1c] sm:$0xf]  ;;  %v5568_v60 = vrot.slane %v5552_v53, 9 }
  0xed   : > { %6087 = vmatmul.mubr.msk.bf16.gmra.mrb[28].mxu1 %vm749_vm3, %v5290_v43  ;;  %6254 = vmatprep.mubr.msk.bf16.mxu0 %vm749_vm3, %v5581_v44  ;;  %v2975_v6 = vsel %vm7500_vm6, %v5567_v58, %v2974_v62  ;;  %v2976_v54 = vrot.slane %v2974_v62, 4  ;;  %v5311_v29 = vcombine.low %v6798_v13, %v7743_v19  ;;  %v2981_v33 = vrot.slane %v5493_v46, 5  ;;  %v5499_v56 = vld [vmem:[%s7254_s21 + $0xac] sm:$0xf]  ;;  %v5502_v43 = vld [vmem:[%s7254_s21 + $0xb8] sm:$0xf] }
  0xee   : > { %6094 = vmatprep.mubr.msk.bf16.mxu1 %vm749_vm3, %v5309_v59  ;;  %v2971_v17 = vsel %vm7500_vm6, %v2969_v22, %v2970_v45  ;;  %v2984_v28 = vrot.slane %v5494_v63, 5  ;;  %v2988_v32 = vrot.slane %v5496_v4, 5  ;;  %v5569_v39 = vrot.slane %v5553_v8, 9  ;;  %v6748_v44 = vld [vmem:[#allocation5 + $0x28] sm:$0xff]   ;;  %v6800_v49 = vld [vmem:[#allocation5 + $0x20] sm:$0xff]   ;;  %v7766_v63 = vld [vmem:[#allocation5 + $0x30] sm:$0xff]  }
  0xef   : > { %v5582_v36 = vcombine.low %v2968_v61, %v2971_v17  ;;  %v2978_v37 = vsel %vm7500_vm6, %v2976_v54, %v2977_v9  ;;  %v2983_v34 = vrot.slane %v2981_v33, 4  ;;  %v2991_v59 = vrot.slane %v5497_v10, 5  ;;  %v5500_v58 = vld [vmem:[%s7254_s21 + $0xb0] sm:$0x1]  ;;  %v5554_v62 = vld [vmem:[%s7254_s21 + $0xa8] sm:$0xe] }
  0xf0   : > { %v5583_v40 = vcombine.low %v2975_v6, %v2978_v37  ;;  %v2990_v41 = vrot.slane %v2988_v32, 4  ;;  %v2982_v2 = vsel %vm7500_vm6, %v5568_v60, %v2981_v33  ;;  %v2995_v47 = vrot.slane %v5499_v56, 5  ;;  %v5503_v22 = vld [vmem:[%s7254_s21 + $0xbc] sm:$0x1]  ;;  %v5555_v9 = vld [vmem:[%s7254_s21 + $0xb4] sm:$0xe] }
  0xf1   : > { %v2985_v46 = vsel %vm7500_vm6, %v2983_v34, %v2984_v28  ;;  %v2989_v45 = vsel %vm7500_vm6, %v5569_v39, %v2988_v32  ;;  %v3002_v61 = vrot.slane %v5502_v43, 5  ;;  %v6801_v4 = vld [vmem:[%s7254_s21 + $0x24] sm:$0xf]  ;;  %v7770_v12 = vld [vmem:[%s7254_s21 + $0x28] sm:$0xf]  ;;  %v5570_v10 = vrot.slane %v5554_v62, 9 }
  0xf2   : > { %v2992_v53 = vsel %vm7500_vm6, %v2990_v41, %v2991_v59  ;;  %v5584_v6 = vcombine.low %v2982_v2, %v2985_v46  ;;  %v2997_v8 = vrot.slane %v2995_v47, 4  ;;  %v2998_v17 = vrot.slane %v5500_v58, 5  ;;  %v6803_v13 = vld [vmem:[%s7254_s21 + $0x30] sm:$0xf]  ;;  %v5505_v28 = vld [vmem:[%s7254_s21 + $0xc4] sm:$0xf] }
  0xf3   : > { %v5585_v54 = vcombine.low %v2989_v45, %v2992_v53  ;;  %v5571_v33 = vrot.slane %v5555_v9, 9  ;;  %v3005_v37 = vrot.slane %v5503_v22, 5  ;;  %v2996_v32 = vsel %vm7500_vm6, %v5570_v10, %v2995_v47  ;;  %v5506_v56 = vld [vmem:[%s7254_s21 + $0xc8] sm:$0x1]  ;;  %v5556_v41 = vld [vmem:[%s7254_s21 + $0xc0] sm:$0xe] }
  0xf4   : > { %6255 = vmatmul.mubr.msk.bf16.gmra.mrb[16].mxu0 %vm749_vm3, %v5582_v36  ;;  %v3004_v36 = vrot.slane %v3002_v61, 4  ;;  %v3009_v34 = vrot.slane %v5505_v28, 5  ;;  %v6805_v43 = vld [vmem:[%s7254_s21 + $0x3c] sm:$0xf]  ;;  %v3012_v53 = vrot.slane %v5506_v56, 5  ;;  %v5315_v58 = vcombine.low %v7413_v14, %v7418_v23 }
  0xf5   : > { %6095 = vmatmul.mubr.msk.bf16.vlgmr.msra.gmra.mrb[0].mxu1 %vm749_vm3, %v5310_v30  ;;  %6258 = vmatprep.mubr.msk.bf16.mxu0 %vm749_vm3, %v5583_v40  ;;  %v5312_v30 = vcombine.low %v6801_v4, %v7770_v12  ;;  %v2999_v40 = vsel %vm7500_vm6, %v2997_v8, %v2998_v17  ;;  %v3003_v39 = vsel %vm7500_vm6, %v5571_v33, %v3002_v61  ;;  %v2374_v22 = vshll.u32 %v7694_v52, 16  ;;  %v6749_v4 = vld [vmem:[%s7254_s21 + $0x18] sm:$0xff]   ;;  %v6807_v8 = vld [vmem:[%s7254_s21 + $0x8] sm:$0x1]  ;;  %v1264_v56 = vld [vmem:[%s7254_s21 + $0x30] sm:$0xe] }
  0xf6   : > { %6127 = vmatpush3.bf16.msra.mxu1 %v6800_v49  ;;  %6098 = vmatprep.mubr.msk.bf16.mxu1 %vm749_vm3, %v5311_v29  ;;  %v7775_v29 = vld [vmem:[%s7254_s21 + $0x34] sm:$0xf]  ;;  %v3006_v59 = vsel %vm7500_vm6, %v3004_v36, %v3005_v37  ;;  %v5586_v46 = vcombine.low %v2996_v32, %v2999_v40  ;;  %v5572_v49 = vrot.slane %v5556_v41, 9  ;;  %v3011_v45 = vrot.slane %v3009_v34, 4  ;;  %v6752_v37 = vld [vmem:[%s7254_s21 + $0x24] sm:$0xff]  }
  0xf7   : > { %6128 = vmatprep.subr.bf16.mxu1 %v6748_v44  ;;  %v5313_v60 = vcombine.low %v6803_v13, %v7775_v29  ;;  %v5587_v47 = vcombine.low %v3003_v39, %v3006_v59  ;;  %v2378_v14 = vshrl.u32 %v7694_v52, 16  ;;  %v5316_v9 = vcombine.low %v7442_v3, %v7451_v26  ;;  %v1260_v52 = vld [vmem:[%s7254_s21] sm:$0xe]  ;;  %v1261_v26 = vld [vmem:[%s7254_s21 + $0xc] sm:$0xe] }
  0xf8   : > { %v3010_v62 = vsel %vm7500_vm6, %v5572_v49, %v3009_v34  ;;  %v3013_v61 = vsel %vm7500_vm6, %v3011_v45, %v3012_v53  ;;  %v1316_v17 = vrot.slane %v6807_v8, 5  ;;  %v1320_v13 = vrot.slane %v7732_v24, 5  ;;  %v1263_v32 = vld [vmem:[%s7254_s21 + $0x24] sm:$0xe]  ;;  %v6754_v34 = vld [vmem:[%s7254_s21 + $0x30] sm:$0xff]  }
  0xf9   : > { %v5588_v23 = vcombine.low %v3010_v62, %v3013_v61  ;;  %v7819_v10 = vrot.slane %v2378_v14, 4  ;;  %v1313_v3 = vrot.slane %v7711_v20, 5  ;;  %v1327_v24 = vrot.slane %v7743_v19, 5  ;;  %v6767_v45 = vld [vmem:[#allocation5 + $0x78] sm:$0xff]   ;;  %v6811_v62 = vld [vmem:[%s7254_s21 + $0x38] sm:$0x1] }
  0xfa   : > { %6129 = vmatpush3.bf16.msra.mxu1 %v6748_v44  ;;  %v7796_v44 = vld [vmem:[%s7254_s21 + $0x40] sm:$0xf]  ;;  %v1334_v33 = vrot.slane %v7770_v12, 5  ;;  %v5318_v20 = vcombine.low %v7495_v51, %v7510_v15  ;;  %v5319_v28 = vcombine.low %v7529_v21, %v7541_v48  ;;  %v1341_v40 = vrot.slane %v7775_v29, 5  ;;  %v1265_v51 = vld [vmem:[%s7254_s21 + $0x3c] sm:$0xe] }
  0xfb   : > { %6162 = vmatprep.subr.bf16.mxu1 %v7766_v63  ;;  %v5314_v2 = vcombine.low %v6805_v43, %v7796_v44  ;;  %v5320_v19 = vcombine.low %v7553_v5, %v7559_v18  ;;  %v5321_v12 = vcombine.low %v7580_v50, %v7585_v1  ;;  %v5343_v39 = vrot.slane %v1260_v52, 9  ;;  %v6809_v21 = vld [vmem:[%s7254_s21 + $0x20] sm:$0x1] }
  0xfc   : > { %6259 = vmatmul.mubr.msk.bf16.gmra.mrb[20].mxu0 %vm749_vm3, %v5584_v6  ;;  %v5317_v6 = vcombine.low %v7475_v11, %v7482_v25  ;;  %v6808_v11 = vld [vmem:[%s7254_s21 + $0x14] sm:$0x1]  ;;  %v5344_v59 = vrot.slane %v1261_v26, 9  ;;  %v1315_v15 = vrot.slane %v1313_v3, 4  ;;  %v1322_v41 = vrot.slane %v1320_v13, 4 }
  0xfd   : > { %6099 = vmatmul.mubr.msk.bf16.gmra.mrb[4].mxu1 %vm749_vm3, %v5312_v30  ;;  %6262 = vmatprep.mubr.msk.bf16.mxu0 %vm749_vm3, %v5585_v54  ;;  %v2384_v30 = vshll.u32 %v7699_v35, 16  ;;  %v7817_v54 = vrot.slane %v2374_v22, 5  ;;  %v1323_v25 = vrot.slane %v6808_v11, 5  ;;  %v1330_v48 = vrot.slane %v6809_v21, 5  ;;  %v7899_v11 = vld [vmem:[#allocation5 + $0x80] sm:$0xff]  }
  0xfe   : > { %6102 = vmatprep.mubr.msk.bf16.mxu1 %vm749_vm3, %v5313_v60  ;;  %v1262_v60 = vld [vmem:[%s7254_s21 + $0x18] sm:$0xe]  ;;  %v5346_v29 = vrot.slane %v1263_v32, 9  ;;  %v5347_v53 = vrot.slane %v1264_v56, 9  ;;  %v1344_v61 = vrot.slane %v6811_v62, 5  ;;  %v1348_v22 = vrot.slane %v7796_v44, 5 }
  0xff   : > { %9119 = vst [vmem:[#allocation12_spill] sm:$0xff] %v7817_v54  ;;  %v7830_v35 = vrot.slane %v2384_v30, 5  ;;  %v2381_v36 = vor.u32 %v7819_v10, %v7817_v54  ;;  %v5345_v43 = vrot.slane %v1262_v60, 9  ;;  %v5322_v14 = vcombine.low %v7606_v38, %v7610_v57  ;;  %v5674_v32 = vld [vmem:[%s7254_s21 + $0x1c] sm:$0xf]  ;;  %v6764_v38 = vld [vmem:[%s7254_s21 + $0x6c] sm:$0xff]  }
 0x100   : > { %v7873_v44 = vsel %vm7500_vm6, %v1315_v15, %v1316_v17  ;;  %v7877_v30 = vsel %vm7500_vm6, %v1322_v41, %v1323_v25  ;;  %v5348_v8 = vrot.slane %v1265_v51, 9  ;;  %v7891_v17 = vsel %vm7500_vm6, %v5346_v29, %v1334_v33  ;;  %v6814_v56 = vld [vmem:[%s7254_s21 + $0x58] sm:$0xf]  ;;  %v5676_v15 = vld [vmem:[%s7254_s21 + $0x24] sm:$0xf]  ;;  %v6758_v41 = vld [vmem:[%s7254_s21 + $0x48] sm:$0xff]  }
 0x101   : > { %9120 = vst [vmem:[#allocation13_spill] sm:$0xff] %v7830_v35  ;;  %v7903_v25 = vsel %vm7500_vm6, %v5347_v53, %v1341_v40  ;;  %v1362_v51 = vrot.slane %v6814_v56, 5  ;;  %v5677_v29 = vld [vmem:[%s7254_s21 + $0x28] sm:$0xf] }
 0x104   : > { %6263 = vmatmul.mubr.msk.bf16.gmra.mrb[24].mxu0 %vm749_vm3, %v5586_v46  ;;  %v1336_v46 = vrot.slane %v1334_v33, 4  ;;  %v6813_v33 = vld [vmem:[%s7254_s21 + $0x44] sm:$0x1] }
 0x105   : > { %6103 = vmatmul.mubr.msk.bf16.gmra.mrb[8].mxu1 %vm749_vm3, %v5314_v2  ;;  %6266 = vmatprep.mubr.msk.bf16.mxu0 %vm749_vm3, %v5587_v47  ;;  %v1329_v2 = vrot.slane %v1327_v24, 4  ;;  %v6810_v47 = vld [vmem:[%s7254_s21 + $0x2c] sm:$0x1] }
 0x106   : > { %6106 = vmatprep.mubr.msk.bf16.mxu1 %vm749_vm3, %v5315_v58  ;;  %v1337_v49 = vrot.slane %v6810_v47, 5  ;;  %v1343_v58 = vrot.slane %v1341_v40, 4  ;;  %v5682_v40 = vld [vmem:[%s7254_s21 + $0x3c] sm:$0xf] }
 0x108   : > { %v7895_v52 = vsel %vm7500_vm6, %v1336_v46, %v1337_v49  ;;  %v7907_v60 = vsel %vm7500_vm6, %v1343_v58, %v1344_v61  ;;  %v6815_v58 = vld [vmem:[%s7254_s21 + $0x50] sm:$0x1]  ;;  %v1268_v61 = vld [vmem:[%s7254_s21 + $0x60] sm:$0xe] }
 0x109   : > { %v1358_v62 = vrot.slane %v6815_v58, 5  ;;  %v6760_v58 = vld [vmem:[%s7254_s21 + $0x54] sm:$0xff]   ;;  %v5351_v18 = vrot.slane %v1268_v61, 9 }
 0x10c   : > { %6267 = vmatmul.mubr.msk.bf16.gmra.mrb[28].mxu0 %vm749_vm3, %v5588_v23  ;;  %v5323_v23 = vcombine.low %v7630_v16, %v7636_v31 }
 0x10d   : > { %6107 = vmatmul.mubr.msk.bf16.gmra.mrb[12].mxu1 %vm749_vm3, %v5316_v9  ;;  %6274 = vmatprep.mubr.msk.bf16.mxu0 %vm749_vm3, %v6749_v4  ;;  %v7863_v9 = vsel %vm7500_vm6, %v5343_v39, %v1313_v3  ;;  %v7867_v4 = vsel %vm7500_vm6, %v5344_v59, %v1320_v13  ;;  %v1266_v13 = vld [vmem:[%s7254_s21 + $0x48] sm:$0xe]  ;;  %v6812_v3 = vld [vmem:[%s7254_s21 + $0x4c] sm:$0xf]  ;;  %v5324_v39 = vcombine.low %v7654_v55, %v7662_v7 }
 0x10e   : > { %6110 = vmatprep.mubr.msk.bf16.mxu1 %vm749_vm3, %v5317_v6  ;;  %v7881_v6 = vsel %vm7500_vm6, %v5345_v43, %v1327_v24  ;;  %v1355_v26 = vrot.slane %v6812_v3, 5  ;;  %v1350_v24 = vrot.slane %v1348_v22, 4  ;;  %v5359_v59 = vcombine.low %v7863_v9, %v7873_v44  ;;  %v1270_v43 = vld [vmem:[%s7254_s21 + $0x78] sm:$0xe] }
 0x10f   : > { %v1364_v3 = vrot.slane %v1362_v51, 4 }
 0x110   : > { %v1357_v47 = vrot.slane %v1355_v26, 4 }
 0x112   : > { %v7965_v50 = vsel %vm7500_vm6, %v1357_v47, %v1358_v62  ;;  %v5680_v47 = vld [vmem:[%s7254_s21 + $0x34] sm:$0xf] }
 0x114   : > { %6275 = vmatmul.mubr.msk.bf16.vlgmr.msra.gmra.mrb[0].mxu0 %vm749_vm3, %v6752_v37  ;;  %v1267_v37 = vld [vmem:[%s7254_s21 + $0x54] sm:$0xe] }
 0x115   : > { %6111 = vmatmul.mubr.msk.bf16.gmra.mrb[16].mxu1 %vm749_vm3, %v5318_v20  ;;  %6307 = vmatpush3.bf16.msra.mxu0 %v7574_v42  ;;  %v7887_v42 = vsel %vm7500_vm6, %v1329_v2, %v1330_v48  ;;  %v1351_v20 = vrot.slane %v6813_v33, 5  ;;  %v7929_v48 = vsel %vm7500_vm6, %v5348_v8, %v1348_v22  ;;  %v5349_v2 = vrot.slane %v1266_v13, 9  ;;  %v6816_v33 = vld [vmem:[%s7254_s21 + $0x5c] sm:$0x1] }
 0x116   : > { %6114 = vmatprep.mubr.msk.bf16.mxu1 %vm749_vm3, %v5319_v28  ;;  %6278 = vmatprep.mubr.msk.bf16.mxu0 %vm749_vm3, %v6754_v34  ;;  %v5673_v28 = vld [vmem:[%s7254_s21 + $0x18] sm:$0xf]  ;;  %v6756_v34 = vld [vmem:[%s7254_s21 + $0x3c] sm:$0xff]   ;;  %v3749_v22 = vshll.u32 %v5674_v32, 16  ;;  %v3753_v8 = vshrl.u32 %v5674_v32, 16  ;;  %v5350_v13 = vrot.slane %v1267_v37, 9 }
 0x117   : > { %6308 = vmatprep.subr.bf16.mxu0 %v6767_v45  ;;  %v3740_v49 = vshrl.u32 %v5673_v28, 16  ;;  %v7937_v53 = vsel %vm7500_vm6, %v1350_v24, %v1351_v20  ;;  %v1365_v56 = vrot.slane %v6816_v33, 5  ;;  %v5675_v24 = vld [vmem:[%s7254_s21 + $0x20] sm:$0x1]  ;;  %v3764_v20 = vshrl.u32 %v5676_v15, 16 }
 0x118   : > { %v3767_v32 = vshll.u32 %v5676_v15, 16  ;;  %v3777_v37 = vshrl.u32 %v5677_v29, 16  ;;  %v7957_v5 = vsel %vm7500_vm6, %v5349_v2, %v1355_v26  ;;  %v5678_v33 = vld [vmem:[%s7254_s21 + $0x2c] sm:$0x1]  ;;  %v7967_v1 = vrot.slane %v3749_v22, 5 }
 0x119   : > { %6309 = vmatpush3.bf16.msra.mxu0 %v6767_v45  ;;  %v3743_v45 = vshll.u32 %v5673_v28, 16  ;;  %v6817_v28 = vld [vmem:[%s7254_s21 + $0x64] sm:$0xf]  ;;  %v7972_v26 = vsel %vm7500_vm6, %v5350_v13, %v1362_v51  ;;  %v7976_v2 = vsel %vm7500_vm6, %v1364_v3, %v1365_v56  ;;  %v3766_v62 = vrot.slane %v3764_v20, 4  ;;  %v1269_v56 = vld [vmem:[%s7254_s21 + $0x6c] sm:$0xe] }
 0x11a   : > { %6342 = vmatprep.subr.bf16.mxu0 %v7899_v11  ;;  %v1369_v46 = vrot.slane %v6817_v28, 5  ;;  %v6762_v28 = vld [vmem:[%s7254_s21 + $0x60] sm:$0xff]   ;;  %v3769_v22 = vrot.slane %v3767_v32, 5  ;;  %v3759_v3 = vshll.u32 %v5675_v24, 16  ;;  %v6819_v32 = vld [vmem:[%s7254_s21 + $0x70] sm:$0xf] }
 0x11b   : > { %v3801_v24 = vshrl.u32 %v5680_v47, 16 }
 0x11c   : > { %6279 = vmatmul.mubr.msk.bf16.gmra.mrb[4].mxu0 %vm749_vm3, %v6756_v34  ;;  %v3773_v34 = vshll.u32 %v5677_v29, 16  ;;  %v5679_v29 = vld [vmem:[%s7254_s21 + $0x30] sm:$0xf]  ;;  %v7986_v51 = vsel %vm7500_vm6, %v5351_v18, %v1369_v46  ;;  %v3797_v18 = vshll.u32 %v5680_v47, 16 }
 0x11d   : > { %6115 = vmatmul.mubr.msk.bf16.gmra.mrb[20].mxu1 %vm749_vm3, %v5320_v19  ;;  %6282 = vmatprep.mubr.msk.bf16.mxu0 %vm749_vm3, %v6758_v41  ;;  %v3742_v19 = vrot.slane %v3740_v49, 4  ;;  %v3745_v41 = vrot.slane %v3743_v45, 5  ;;  %v1371_v49 = vrot.slane %v1369_v46, 4  ;;  %v6818_v45 = vld [vmem:[%s7254_s21 + $0x68] sm:$0x1]  ;;  %v3788_v21 = vshrl.u32 %v5679_v29, 16 }
 0x11e   : > { %6118 = vmatprep.mubr.msk.bf16.mxu1 %vm749_vm3, %v5321_v12  ;;  %v3755_v12 = vrot.slane %v3753_v8, 4  ;;  %v1372_v61 = vrot.slane %v6818_v45, 5  ;;  %v7980_v15 = vrot.slane %v3773_v34, 5  ;;  %v3779_v8 = vrot.slane %v3777_v37, 4 }
 0x11f   : > { %v3746_v13 = vor.u32 %v3745_v41, %v3742_v19  ;;  %v1376_v34 = vrot.slane %v6819_v32, 5  ;;  %v3783_v37 = vshll.u32 %v5678_v33, 16  ;;  %v3791_v46 = vshll.u32 %v5679_v29, 16  ;;  %v6820_v33 = vld [vmem:[%s7254_s21 + $0x7c] sm:$0xf] }
 0x120   : > { %v3756_v20 = vor.u32 %v3755_v12, %v7967_v1  ;;  %v8002_v19 = vsel %vm7500_vm6, %v1371_v49, %v1372_v61  ;;  %v3770_v41 = vor.u32 %v3769_v22, %v3766_v62  ;;  %v1383_v12 = vrot.slane %v6820_v33, 5  ;;  %v5681_v49 = vld [vmem:[%s7254_s21 + $0x38] sm:$0x1] }
 0x121   : > { %v3747_v57 = vrot.slane %v3746_v13, 4  ;;  %v3761_v29 = vrot.slane %v3759_v3, 5  ;;  %v6766_v61 = vld [vmem:[%s7254_s21 + $0x78] sm:$0xff]   ;;  %v1378_v22 = vrot.slane %v1376_v34, 4  ;;  %v5353_v32 = vrot.slane %v1270_v43, 9 }
 0x122   : > { %v3757_v62 = vrot.slane %v3756_v20, 4  ;;  %v3790_v33 = vrot.slane %v3788_v21, 4  ;;  %v3793_v45 = vrot.slane %v3791_v46, 5  ;;  %v8014_v16 = vrot.slane %v3797_v18, 5  ;;  %v8157_v20 = vld [vmem:[#allocation5 + $0x40] sm:$0xff]  }
 0x123   : > { %v3803_v31 = vrot.slane %v3801_v24, 4  ;;  %v1385_v3 = vrot.slane %v1383_v12, 4  ;;  %v3752_v43 = vsel %vm7283_vm2, %v3747_v57, %v7967_v1  ;;  %v8035_v24 = vsel %vm7500_vm6, %v5353_v32, %v1383_v12  ;;  %v8040_v1 = vld [vmem:[%s7254_s21 + $0x40] sm:$0xf]  ;;  %9131 = vst [vmem:[#allocation22_spill] sm:$0xff] %v8157_v20 }
 0x124   : > { %6283 = vmatmul.mubr.msk.bf16.gmra.mrb[8].mxu0 %vm749_vm3, %v6760_v58  ;;  %v3780_v58 = vor.u32 %v3779_v8, %v7980_v15  ;;  %v3785_v8 = vrot.slane %v3783_v37, 5  ;;  %v3807_v37 = vshll.u32 %v5681_v49, 16  ;;  %v3762_v46 = vsel %vm7283_vm2, %v3757_v62, %v3761_v29  ;;  %9121 = vst [vmem:[#allocation14_spill] sm:$0xff] %v8040_v1  ;;  %v6824_v49 = vld [vmem:[%s7254_s21 + $0x8c] sm:$0x1] }
 0x125   : > { %6119 = vmatmul.mubr.msk.bf16.gmra.mrb[24].mxu1 %vm749_vm3, %v5322_v14  ;;  %6286 = vmatprep.mubr.msk.bf16.mxu0 %vm749_vm3, %v6762_v28  ;;  %v5352_v14 = vrot.slane %v1269_v56, 9  ;;  %v6821_v28 = vld [vmem:[%s7254_s21 + $0x74] sm:$0x1]  ;;  %v6822_v56 = vld [vmem:[%s7254_s21 + $0x80] sm:$0x1]  ;;  %v3804_v57 = vor.u32 %v3803_v31, %v8014_v16  ;;  %v3812_v29 = vshrl.u32 %v5682_v40, 16  ;;  %v8076_v31 = vcombine.low %v3752_v43, %v3762_v46 }
 0x126   : > { %6122 = vmatprep.mubr.msk.bf16.mxu1 %vm749_vm3, %v5323_v23  ;;  %v1379_v47 = vrot.slane %v6821_v28, 5  ;;  %v3771_v23 = vrot.slane %v3770_v41, 4  ;;  %v3781_v13 = vrot.slane %v3780_v58, 4  ;;  %v1386_v28 = vrot.slane %v6822_v56, 5  ;;  %v1271_v41 = vld [vmem:[%s7254_s21 + $0x84] sm:$0xe] }
 0x127   : > { %v8025_v21 = vsel %vm7500_vm6, %v5352_v14, %v1376_v34  ;;  %v6823_v58 = vld [vmem:[%s7254_s21 + $0x88] sm:$0xf]  ;;  %v3794_v34 = vor.u32 %v3793_v45, %v3790_v33  ;;  %v3815_v14 = vshll.u32 %v5682_v40, 16  ;;  %v8048_v12 = vrot.slane %v2381_v36, 4  ;;  %v6769_v33 = vld [vmem:[%s7254_s21 + $0x90] sm:$0xff]  }
 0x128   : > { %v8031_v18 = vsel %vm7500_vm6, %v1378_v22, %v1379_v47  ;;  %v1390_v56 = vrot.slane %v6823_v58, 5  ;;  %v5685_v47 = vld [vmem:[%s7254_s21 + $0x48] sm:$0xf]  ;;  %v3776_v45 = vsel %vm7283_vm2, %v3771_v23, %v7980_v15  ;;  %v3786_v40 = vsel %vm7283_vm2, %v3781_v13, %v3785_v8  ;;  %v8071_v15 = vld [vmem:[%s7254_s21 + $0x4c] sm:$0xf] }
 0x129   : > { %9122 = vst [vmem:[#allocation15_spill] sm:$0xff] %v8048_v12  ;;  %v8062_v10 = vsel %vm7500_vm6, %v1385_v3, %v1386_v28  ;;  %v3809_v55 = vrot.slane %v3807_v37, 5  ;;  %v5354_v7 = vrot.slane %v1271_v41, 9  ;;  %v3821_v36 = vshll.u32 %v8040_v1, 16  ;;  %9123 = vst [vmem:[#allocation16_spill] sm:$0xff] %v8071_v15  ;;  %v6768_v8 = vld [vmem:[%s7254_s21 + $0x84] sm:$0xff]  }
 0x12a   : > { %v3836_v62 = vshrl.u32 %v5685_v47, 16  ;;  %v3839_v22 = vshll.u32 %v5685_v47, 16  ;;  %v3795_v9 = vrot.slane %v3794_v34, 4  ;;  %v3805_v44 = vrot.slane %v3804_v57, 4  ;;  %v8081_v13 = vld [vmem:[%s7254_s21 + $0x44] sm:$0x1] }
 0x12b   : > { %v3817_v32 = vrot.slane %v3815_v14, 5  ;;  %9124 = vst [vmem:[#allocation17_spill] sm:$0xff] %v8081_v13  ;;  %v3845_v3 = vshll.u32 %v8071_v15, 16  ;;  %v3849_v28 = vshrl.u32 %v8071_v15, 16  ;;  %v8085_v37 = vcombine.low %v3776_v45, %v3786_v40  ;;  %v5688_v43 = vld [vmem:[%s7254_s21 + $0x54] sm:$0xf] }
 0x12c   : > { %6287 = vmatmul.mubr.msk.bf16.gmra.mrb[12].mxu0 %vm749_vm3, %v6764_v38  ;;  %v1392_v38 = vrot.slane %v1390_v56, 4  ;;  %v8089_v58 = vrot.slane %v3821_v36, 5  ;;  %v6775_v46 = vld [vmem:[#allocation5 + $0x38] sm:$0xff]   ;;  %v8094_v57 = vsel %vm7500_vm6, %v5354_v7, %v1390_v56  ;;  %v3838_v14 = vrot.slane %v3836_v62, 4  ;;  %v8101_v45 = vld [vmem:[%s7254_s21 + $0x58] sm:$0xf] }
 0x12d   : > { %6123 = vmatmul.mubr.msk.bf16.gmra.mrb[28].mxu1 %vm749_vm3, %v5324_v39  ;;  %6290 = vmatprep.mubr.msk.bf16.mxu0 %vm749_vm3, %v6766_v61  ;;  %v3825_v39 = vshrl.u32 %v8040_v1, 16  ;;  %v1393_v61 = vrot.slane %v6824_v49, 5  ;;  %v3841_v47 = vrot.slane %v3839_v22, 5  ;;  %9125 = vst [vmem:[#allocation18_spill] sm:$0xff] %v8101_v45  ;;  %v3800_v40 = vsel %vm7283_vm2, %v3795_v9, %v8014_v16  ;;  %v5691_v22 = vld [vmem:[%s7254_s21 + $0x60] sm:$0xf] }
 0x12e   : > { %6130 = vmatprep.mubr.msk.bf16.mxu1 %vm749_vm3, %v5359_v59  ;;  %v3814_v59 = vrot.slane %v3812_v29, 4  ;;  %v3810_v56 = vsel %vm7283_vm2, %v3805_v44, %v3809_v55  ;;  %v3831_v36 = vshll.u32 %v8081_v13, 16  ;;  %v8116_v49 = vrot.slane %v3845_v3, 5 }
 0x12f   : > { %v3827_v34 = vrot.slane %v3825_v39, 4  ;;  %v8098_v29 = vsel %vm7500_vm6, %v1392_v38, %v1393_v61  ;;  %v1272_v39 = vld [vmem:[%s7254_s21 + $0x90] sm:$0xe]  ;;  %v9126_v38 = vcombine.low %v7867_v4, %v7877_v30  ;;  %v3851_v61 = vrot.slane %v3849_v28, 4  ;;  %v8144_v4 = vld [vmem:[%s7254_s21 + $0x64] sm:$0xf] }
 0x130   : > { %v3818_v7 = vor.u32 %v3817_v32, %v3814_v59  ;;  %v3860_v16 = vshrl.u32 %v5688_v43, 16  ;;  %v3863_v62 = vshll.u32 %v5688_v43, 16  ;;  %v9127_v55 = vcombine.low %v7881_v6, %v7887_v42  ;;  %v6825_v6 = vld [vmem:[%s7254_s21 + $0x94] sm:$0xf]  ;;  %9129 = vst [vmem:[#allocation20_spill] sm:$0xff] %v8144_v4 }
 0x131   : > { %v3828_v30 = vor.u32 %v3827_v34, %v8089_v58  ;;  %v3869_v9 = vshll.u32 %v8101_v45, 16  ;;  %v3873_v44 = vshrl.u32 %v8101_v45, 16  ;;  %v5355_v59 = vrot.slane %v1272_v39, 9 }
 0x132   : > { %v1397_v42 = vrot.slane %v6825_v6, 5  ;;  %v3842_v32 = vor.u32 %v3841_v47, %v3838_v14  ;;  %v8136_v3 = vrot.slane %v3818_v7, 4  ;;  %v8138_v28 = vrot.slane %v3831_v36, 5  ;;  %v6826_v47 = vld [vmem:[%s7254_s21 + $0x98] sm:$0x1] }
 0x133   : > { %v3884_v34 = vshrl.u32 %v5691_v22, 16  ;;  %v3887_v43 = vshll.u32 %v5691_v22, 16  ;;  %v3865_v39 = vrot.slane %v3863_v62, 5  ;;  %v3829_v14 = vrot.slane %v3828_v30, 4  ;;  %v8148_v6 = vld [vmem:[%s7254_s21 + $0x5c] sm:$0x1] }
 0x134   : > { %6291 = vmatmul.mubr.msk.bf16.gmra.mrb[16].mxu0 %vm749_vm3, %v6768_v8  ;;  %v8128_v8 = vld [vmem:[%s7254_s21 + $0x50] sm:$0x1]  ;;  %v1400_v7 = vrot.slane %v6826_v47, 5  ;;  %9130 = vst [vmem:[#allocation21_spill] sm:$0xff] %v8148_v6  ;;  %v8150_v36 = vrot.slane %v3869_v9, 5  ;;  %v3875_v22 = vrot.slane %v3873_v44, 4  ;;  %v8154_v41 = vsel %vm7500_vm6, %v5355_v59, %v1397_v42 }
 0x135   : > { %6131 = vmatmul.mubr.msk.bf16.vlgmr.msra.gmra.mrb[0].mxu1 %vm749_vm3, %v9126_v38  ;;  %6294 = vmatprep.mubr.msk.bf16.mxu0 %vm749_vm3, %v6769_v33  ;;  %9128 = vst [vmem:[#allocation19_spill] sm:$0xff] %v8128_v8  ;;  %v6770_v33 = vld [vmem:[%s7254_s21 + $0x9c] sm:$0xff]   ;;  %v6771_v38 = vld [vmem:[%s7254_s21 + $0xa8] sm:$0xff]   ;;  %v3843_v23 = vrot.slane %v3842_v32, 4  ;;  %v3886_v30 = vrot.slane %v3884_v34, 4  ;;  %v3889_v9 = vrot.slane %v3887_v43, 5  ;;  %v9133_v43 = vcombine.low %v7903_v25, %v7907_v60 }
 0x136   : > { %6163 = vmatpush3.bf16.msra.mxu1 %v7766_v63  ;;  %6134 = vmatprep.mubr.msk.bf16.mxu1 %vm749_vm3, %v9127_v55  ;;  %v8132_v63 = vcombine.low %v3800_v40, %v3810_v56  ;;  %v3852_v55 = vor.u32 %v3851_v61, %v8116_v49  ;;  %v3855_v40 = vshll.u32 %v8128_v8, 16  ;;  %v3862_v56 = vrot.slane %v3860_v16, 4  ;;  %v6827_v16 = vld [vmem:[%s7254_s21 + $0xa0] sm:$0xf]  ;;  %v8330_v8 = vld [vmem:[%s7254_s21 + $0x98] sm:$0x1] }
 0x137   : > { %6164 = vmatprep.subr.bf16.mxu1 %v6775_v46  ;;  %v1399_v61 = vrot.slane %v1397_v42, 4  ;;  %v1404_v62 = vrot.slane %v6827_v16, 5  ;;  %v3893_v44 = vshll.u32 %v8144_v4, 16  ;;  %v3897_v59 = vshrl.u32 %v8144_v4, 16  ;;  %v6830_v16 = vld [vmem:[%s7254_s21 + $0xa4] sm:$0x1] }
 0x138   : > { %v9132_v42 = vcombine.low %v7891_v17, %v7895_v52  ;;  %v3853_v32 = vrot.slane %v3852_v55, 4  ;;  %v3866_v47 = vor.u32 %v3865_v39, %v3862_v56  ;;  %v3879_v34 = vshll.u32 %v8148_v6, 16  ;;  %v1274_v55 = vld [vmem:[%s7254_s21 + $0xa8] sm:$0xe]  ;;  %v5706_v6 = vld [vmem:[%s7254_s21 + $0x9c] sm:$0xf] }
 0x139   : > { %v3824_v17 = vsel %vm7283_vm2, %v8136_v3, %v8089_v58  ;;  %v3834_v52 = vsel %vm7283_vm2, %v3829_v14, %v8138_v28  ;;  %v8186_v25 = vsel %vm7500_vm6, %v1399_v61, %v1400_v7  ;;  %v1406_v39 = vrot.slane %v1404_v62, 4  ;;  %v8190_v3 = vld [vmem:[%s7254_s21 + $0x68] sm:$0x1]  ;;  %v6773_v7 = vld [vmem:[%s7254_s21 + $0xc0] sm:$0xff]  }
 0x13a   : > { %6165 = vmatpush3.bf16.msra.mxu1 %v6775_v46  ;;  %v1273_v46 = vld [vmem:[%s7254_s21 + $0x9c] sm:$0xe]  ;;  %v1407_v58 = vrot.slane %v6830_v16, 5  ;;  %9134 = vst [vmem:[#allocation23_spill] sm:$0xff] %v8190_v3  ;;  %v3848_v28 = vsel %vm7283_vm2, %v3843_v23, %v8116_v49  ;;  %v3890_v14 = vor.u32 %v3889_v9, %v3886_v30  ;;  %v8204_v16 = vrot.slane %v3879_v34, 5 }
 0x13b   : > { %6378 = vmatprep.subr.bf16.mxu1 %v8157_v20  ;;  %v5356_v60 = vrot.slane %v1273_v46, 9  ;;  %v8202_v46 = vrot.slane %v3866_v47, 4  ;;  %v5357_v13 = vrot.slane %v1274_v55, 9  ;;  %v6831_v23 = vld [vmem:[%s7254_s21 + $0xb0] sm:$0x1]  ;;  %v3903_v30 = vshll.u32 %v8190_v3, 16 }
 0x13c   : > { %6295 = vmatmul.mubr.msk.bf16.gmra.mrb[20].mxu0 %vm749_vm3, %v6770_v33  ;;  %v3857_v33 = vrot.slane %v3855_v40, 5  ;;  %v6829_v40 = vld [vmem:[%s7254_s21 + $0xac] sm:$0xf]  ;;  %v1414_v49 = vrot.slane %v6831_v23, 5  ;;  %v8210_v9 = vcombine.low %v3824_v17, %v3834_v52  ;;  %v8222_v34 = vsel %vm7500_vm6, %v1406_v39, %v1407_v58  ;;  %v8244_v58 = vld [vmem:[%s7254_s21 + $0x70] sm:$0xf] }
 0x13d   : > { %6135 = vmatmul.mubr.msk.bf16.gmra.mrb[4].mxu1 %vm749_vm3, %v9132_v42  ;;  %6298 = vmatprep.mubr.msk.bf16.mxu0 %vm749_vm3, %v6771_v38  ;;  %v3876_v38 = vor.u32 %v3875_v22, %v8150_v36  ;;  %v1411_v56 = vrot.slane %v6829_v40, 5  ;;  %v6772_v42 = vld [vmem:[%s7254_s21 + $0xb4] sm:$0xff]   ;;  %v8196_v22 = vrot.slane %v3893_v44, 5  ;;  %v8218_v47 = vsel %vm7500_vm6, %v5356_v60, %v1404_v62  ;;  %9138 = vst [vmem:[#allocation26_spill] sm:$0xff] %v8244_v58 }
 0x13e   : > { %6138 = vmatprep.mubr.msk.bf16.mxu1 %vm749_vm3, %v9133_v43  ;;  %v3899_v43 = vrot.slane %v3897_v59, 4  ;;  %v1275_v40 = vld [vmem:[%s7254_s21 + $0xb4] sm:$0xe]  ;;  %v3858_v61 = vsel %vm7283_vm2, %v3853_v32, %v3857_v33  ;;  %v6832_v32 = vld [vmem:[%s7254_s21 + $0xb8] sm:$0xf]  ;;  %v8224_v17 = vrot.slane %v3890_v14, 4  ;;  %v9137_v55 = vcombine.low %v7929_v48, %v7937_v53 }
 0x13f   : > { %9135 = vst [vmem:[#allocation24_spill] sm:$0xff] %v8196_v22  ;;  %v8206_v1 = vrot.slane %v3876_v38, 4  ;;  %v1413_v20 = vrot.slane %v1411_v56, 4  ;;  %v5358_v59 = vrot.slane %v1275_v40, 9  ;;  %v1418_v33 = vrot.slane %v6832_v32, 5 }
 0x140   : > { %9136 = vst [vmem:[#allocation25_spill] sm:$0xff] %v8224_v17  ;;  %v3900_v52 = vor.u32 %v3899_v43, %v8196_v22  ;;  %v5694_v38 = vld [vmem:[%s7254_s21 + $0x6c] sm:$0xf]  ;;  %v8233_v62 = vcombine.low %v3848_v28, %v3858_v61  ;;  %v8241_v39 = vsel %vm7500_vm6, %v5357_v13, %v1411_v56  ;;  %v5697_v48 = vld [vmem:[%s7254_s21 + $0x78] sm:$0xf]  ;;  %v8262_v56 = vrot.slane %v3903_v30, 5 }
 0x141   : > { %v8248_v53 = vld [vmem:[%s7254_s21 + $0x7c] sm:$0xf]  ;;  %v8260_v13 = vsel %vm7500_vm6, %v1413_v20, %v1414_v49  ;;  %v5700_v40 = vld [vmem:[%s7254_s21 + $0x84] sm:$0xf]  ;;  %v3908_v61 = vshrl.u32 %v5694_v38, 16  ;;  %v3911_v23 = vshll.u32 %v5694_v38, 16 }
 0x142   : > { %9139 = vst [vmem:[#allocation27_spill] sm:$0xff] %v8248_v53  ;;  %v8265_v14 = vld [vmem:[%s7254_s21 + $0xbc] sm:$0x1]  ;;  %v5703_v20 = vld [vmem:[%s7254_s21 + $0x90] sm:$0xf]  ;;  %v8284_v32 = vrot.slane %v3900_v52, 4 }
 0x143   : > { %v6774_v49 = vld [vmem:[%s7254_s21 + $0xcc] sm:$0xff]   ;;  %v3935_v60 = vshll.u32 %v5697_v48, 16  ;;  %v3941_v38 = vshll.u32 %v8248_v53, 16  ;;  %v3945_v28 = vshrl.u32 %v8248_v53, 16  ;;  %v3956_v44 = vshrl.u32 %v5700_v40, 16 }
 0x144   : > { %6299 = vmatmul.mubr.msk.bf16.gmra.mrb[24].mxu0 %vm749_vm3, %v6772_v42  ;;  %v9140_v42 = vcombine.low %v7957_v5, %v7965_v50  ;;  %v8270_v5 = vld [vmem:[%s7254_s21 + $0x88] sm:$0xf]  ;;  %v8274_v50 = vsel %vm7500_vm6, %v5358_v59, %v1418_v33  ;;  %v8289_v59 = vld [vmem:[%s7254_s21 + $0x94] sm:$0xf]  ;;  %v3959_v43 = vshll.u32 %v5700_v40, 16  ;;  %v3910_v54 = vrot.slane %v3908_v61, 4 }
 0x145   : > { %6139 = vmatmul.mubr.msk.bf16.gmra.mrb[8].mxu1 %vm749_vm3, %v9137_v55  ;;  %6302 = vmatprep.mubr.msk.bf16.mxu0 %vm749_vm3, %v6773_v7  ;;  %9141 = vst [vmem:[#allocation28_spill] sm:$0xff] %v8270_v5  ;;  %9142 = vst [vmem:[#allocation29_spill] sm:$0xff] %v8274_v50  ;;  %v8276_v7 = vrot.slane %v1418_v33, 4  ;;  %v3917_v55 = vshll.u32 %v8244_v58, 16  ;;  %v3932_v33 = vshrl.u32 %v5697_v48, 16  ;;  %v3965_v30 = vshll.u32 %v8270_v5, 16 }
 0x146   : > { %6142 = vmatprep.mubr.msk.bf16.mxu1 %vm749_vm3, %v9140_v42  ;;  %v3921_v42 = vshrl.u32 %v8244_v58, 16  ;;  %9143 = vst [vmem:[#allocation30_spill] sm:$0xff] %v8289_v59  ;;  %v3969_v52 = vshrl.u32 %v8270_v5, 16  ;;  %v3980_v12 = vshrl.u32 %v5703_v20, 16  ;;  %v3983_v35 = vshll.u32 %v5703_v20, 16 }
 0x147   : > { %v3989_v58 = vshll.u32 %v8289_v59, 16  ;;  %v8298_v48 = vld [vmem:[%s7254_s21 + $0x74] sm:$0x1]  ;;  %v3913_v3 = vrot.slane %v3911_v23, 5  ;;  %v8300_v4 = vrot.slane %v3917_v55, 5  ;;  %v3993_v40 = vshrl.u32 %v8289_v59, 16 }
 0x148   : > { %v3923_v53 = vrot.slane %v3921_v42, 4  ;;  %v9144_v61 = vcombine.low %v7972_v26, %v7976_v2  ;;  %v3934_v20 = vrot.slane %v3932_v33, 4  ;;  %v8310_v5 = vrot.slane %v3941_v38, 5  ;;  %v8313_v55 = vld [vmem:[%s7254_s21 + $0xa0] sm:$0xf] }
 0x149   : > { %v3947_v23 = vrot.slane %v3945_v28, 4  ;;  %9145 = vst [vmem:[#allocation31_spill] sm:$0xff] %v8313_v55  ;;  %v9146_v42 = vcombine.low %v7986_v51, %v8002_v19  ;;  %v8320_v59 = vld [vmem:[%s7254_s21 + $0x80] sm:$0x1]  ;;  %v3958_v26 = vrot.slane %v3956_v44, 4  ;;  %v3961_v2 = vrot.slane %v3959_v43, 5 }
 0x14a   : > { %v8325_v33 = vld [vmem:[%s7254_s21 + $0x8c] sm:$0x1]  ;;  %v3985_v38 = vrot.slane %v3983_v35, 5  ;;  %v8327_v45 = vrot.slane %v3989_v58, 5  ;;  %v4004_v28 = vshrl.u32 %v5706_v6, 16  ;;  %v3995_v15 = vrot.slane %v3993_v40, 4 }
 0x14b   : > { %v4007_v51 = vshll.u32 %v5706_v6, 16  ;;  %v4013_v19 = vshll.u32 %v8313_v55, 16  ;;  %v3914_v44 = vor.u32 %v3913_v3, %v3910_v54  ;;  %v3924_v43 = vor.u32 %v3923_v53, %v8300_v4  ;;  %v6778_v40 = vld [vmem:[#allocation5 + $0x88] sm:$0xff]  }
 0x14c   : > { %6303 = vmatmul.mubr.msk.bf16.gmra.mrb[28].mxu0 %vm749_vm3, %v6774_v49  ;;  %v3937_v49 = vrot.slane %v3935_v60, 5  ;;  %v3982_v60 = vrot.slane %v3980_v12, 4  ;;  %v3951_v12 = vshll.u32 %v8320_v59, 16  ;;  %v3948_v58 = vor.u32 %v3947_v23, %v8310_v5  ;;  %v8345_v3 = vld [vmem:[%s7254_s21 + $0xa4] sm:$0x1] }
 0x14d   : > { %6143 = vmatmul.mubr.msk.bf16.gmra.mrb[12].mxu1 %vm749_vm3, %v9144_v61  ;;  %6310 = vmatprep.mubr.msk.bf16.mxu0 %vm749_vm3, %v8076_v31  ;;  %v8322_v61 = vrot.slane %v3965_v30, 5  ;;  %v3971_v31 = vrot.slane %v3969_v52, 4  ;;  %v3927_v30 = vshll.u32 %v8298_v48, 16  ;;  %v3962_v52 = vor.u32 %v3961_v2, %v3958_v26 }
 0x14e   : > { %6146 = vmatprep.mubr.msk.bf16.mxu1 %vm749_vm3, %v9146_v42  ;;  %v4017_v42 = vshrl.u32 %v8313_v55, 16  ;;  %v3938_v35 = vor.u32 %v3937_v49, %v3934_v20  ;;  %v3975_v50 = vshll.u32 %v8325_v33, 16  ;;  %v3986_v22 = vor.u32 %v3985_v38, %v3982_v60  ;;  %v5709_v38 = vld [vmem:[%s7254_s21 + $0xa8] sm:$0xf] }
 0x14f   : > { %v3972_v6 = vor.u32 %v3971_v31, %v8322_v61  ;;  %v3999_v55 = vshll.u32 %v8330_v8, 16  ;;  %v4006_v17 = vrot.slane %v4004_v28, 4  ;;  %v3996_v54 = vor.u32 %v3995_v15, %v8327_v45 }
 0x150   : > { %v4009_v53 = vrot.slane %v4007_v51, 5  ;;  %v8347_v20 = vrot.slane %v4013_v19, 5  ;;  %v4019_v49 = vrot.slane %v4017_v42, 4  ;;  %v9147_v23 = vcombine.low %v8025_v21, %v8031_v18 }
 0x151   : > { %v9148_v26 = vrot.slane %v8265_v14, 5  ;;  %v3925_v2 = vrot.slane %v3924_v43, 4  ;;  %v3929_v31 = vrot.slane %v3927_v30, 5  ;;  %v9149_v60 = vcombine.low %v8035_v24, %v8062_v10  ;;  %v8371_v43 = vld [vmem:[%s7254_s21 + $0xac] sm:$0xf] }
 0x152   : > { %v3949_v21 = vrot.slane %v3948_v58, 4  ;;  %v3953_v18 = vrot.slane %v3951_v12, 5  ;;  %v3963_v14 = vrot.slane %v3962_v52, 4  ;;  %v3977_v28 = vrot.slane %v3975_v50, 5 }
 0x153   : > { %v8359_v15 = vsel %vm7500_vm6, %v8276_v7, %v9148_v26  ;;  %v3973_v7 = vrot.slane %v3972_v6, 4  ;;  %v3987_v51 = vrot.slane %v3986_v22, 4  ;;  %v4023_v19 = vshll.u32 %v8345_v3, 16 }
 0x154   : > { %6311 = vmatmul.mubr.msk.bf16.vlgmr.msra.gmra.mrb[0].mxu0 %vm749_vm3, %v8085_v37  ;;  %v3915_v37 = vrot.slane %v3914_v44, 4  ;;  %v3997_v42 = vrot.slane %v3996_v54, 4  ;;  %v4001_v24 = vrot.slane %v3999_v55, 5  ;;  %v4010_v10 = vor.u32 %v4009_v53, %v4006_v17 }
 0x155   : > { %6147 = vmatmul.mubr.msk.bf16.gmra.mrb[16].mxu1 %vm749_vm3, %v9147_v23  ;;  %6343 = vmatpush3.bf16.msra.mxu0 %v7899_v11  ;;  %v3939_v11 = vrot.slane %v3938_v35, 4  ;;  %v4020_v44 = vor.u32 %v4019_v49, %v8347_v20  ;;  %v4028_v22 = vshrl.u32 %v5709_v38, 16  ;;  %v4031_v30 = vshll.u32 %v5709_v38, 16 }
 0x156   : > { %6150 = vmatprep.mubr.msk.bf16.mxu1 %vm749_vm3, %v9149_v60  ;;  %6314 = vmatprep.mubr.msk.bf16.mxu0 %vm749_vm3, %v8132_v63  ;;  %v3906_v63 = vsel %vm7283_vm2, %v8284_v32, %v8262_v56  ;;  %v3920_v50 = vsel %vm7283_vm2, %v3915_v37, %v8300_v4  ;;  %v3930_v55 = vsel %vm7283_vm2, %v3925_v2, %v3929_v31  ;;  %v8391_v32 = vld [vmem:[%s7254_s21 + $0xb0] sm:$0x1]  ;;  %v4025_v58 = vrot.slane %v4023_v19, 5  ;;  %v5761_v19 = vld [vmem:[%s7254_s21 + $0x60] sm:$0xe] }
 0x157   : > { %6344 = vmatprep.subr.bf16.mxu0 %v6778_v40  ;;  %v3944_v17 = vsel %vm7283_vm2, %v3939_v11, %v8310_v5  ;;  %v3954_v12 = vsel %vm7283_vm2, %v3949_v21, %v3953_v18  ;;  %v3968_v56 = vsel %vm7283_vm2, %v3963_v14, %v8322_v61  ;;  %v3978_v4 = vsel %vm7283_vm2, %v3973_v7, %v3977_v28  ;;  %v9157_v37 = vld [vmem:[#allocation29_spill] sm:$0xff] }
 0x158   : > { %v3992_v35 = vsel %vm7283_vm2, %v3987_v51, %v8327_v45  ;;  %v4037_v52 = vshll.u32 %v8371_v43, 16  ;;  %v4002_v5 = vsel %vm7283_vm2, %v3997_v42, %v4001_v24  ;;  %v4011_v61 = vrot.slane %v4010_v10, 4  ;;  %v8455_v14 = vld [vmem:[%s7254_s21 + $0xb8] sm:$0xf]  ;;  %v9158_v24 = vld [vmem:[#allocation16_spill] sm:$0xff] }
 0x159   : > { %6345 = vmatpush3.bf16.msra.mxu0 %v6778_v40  ;;  %v4021_v40 = vrot.slane %v4020_v44, 4  ;;  %v4041_v6 = vshrl.u32 %v8371_v43, 16  ;;  %v9150_v54 = vcombine.low %v8094_v57, %v8098_v29  ;;  %v5372_v45 = vcombine.low %v8218_v47, %v8222_v34  ;;  %v9159_v44 = vld [vmem:[#allocation19_spill] sm:$0xff] }
 0x15a   : > { %v4033_v53 = vrot.slane %v4031_v30, 5  ;;  %v4047_v49 = vshll.u32 %v8391_v32, 16  ;;  %v9151_v23 = vcombine.low %v8154_v41, %v8186_v25  ;;  %v9152_v57 = vsel %vm7283_vm2, %v8206_v1, %v8204_v16  ;;  %v9154_v41 = vld [vmem:[#allocation25_spill] sm:$0xff]  ;;  %v9155_v25 = vld [vmem:[#allocation24_spill] sm:$0xff]  ;;  %v9160_v30 = vld [vmem:[#allocation18_spill] sm:$0xff] }
 0x15b   : > { %v9153_v29 = vsel %vm7283_vm2, %v8202_v46, %v8150_v36  ;;  %v5373_v34 = vcombine.low %v8241_v39, %v8260_v13  ;;  %v5374_v2 = vcombine.low %v9157_v37, %v8359_v15  ;;  %v5712_v1 = vld [vmem:[%s7254_s21 + $0xb4] sm:$0xf]  ;;  %v5759_v16 = vld [vmem:[%s7254_s21 + $0x48] sm:$0xe]  ;;  %v8438_v31 = vcombine.low %v3920_v50, %v3930_v55 }
 0x15c   : > { %6315 = vmatmul.mubr.msk.bf16.gmra.mrb[4].mxu0 %vm749_vm3, %v8210_v9  ;;  %v4030_v9 = vrot.slane %v4028_v22, 4  ;;  %v5726_v47 = vcombine.low %v9153_v29, %v9152_v57  ;;  %v8440_v36 = vcombine.low %v3944_v17, %v3954_v12  ;;  %v8442_v46 = vcombine.low %v3968_v56, %v3978_v4  ;;  %v5760_v39 = vld [vmem:[%s7254_s21 + $0x54] sm:$0xe]  ;;  %v5762_v56 = vld [vmem:[%s7254_s21 + $0x6c] sm:$0xe] }
 0x15d   : > { %6151 = vmatmul.mubr.msk.bf16.gmra.mrb[20].mxu1 %vm749_vm3, %v9150_v54  ;;  %6318 = vmatprep.mubr.msk.bf16.mxu0 %vm749_vm3, %v8233_v62  ;;  %v9156_v62 = vsel %vm7283_vm2, %v9154_v41, %v9155_v25  ;;  %v8444_v60 = vcombine.low %v3992_v35, %v4002_v5  ;;  %v4016_v13 = vsel %vm7283_vm2, %v4011_v61, %v8347_v20  ;;  %v8452_v21 = vrot.slane %v4037_v52, 5  ;;  %v9161_v17 = vld [vmem:[#allocation21_spill] sm:$0xff]  ;;  %v9163_v54 = vld [vmem:[#allocation23_spill] sm:$0xff] }
 0x15e   : > { %6154 = vmatprep.mubr.msk.bf16.mxu1 %vm749_vm3, %v9151_v23  ;;  %v5727_v26 = vcombine.low %v9156_v62, %v3906_v63  ;;  %v4026_v11 = vsel %vm7283_vm2, %v4021_v40, %v4025_v58  ;;  %v4043_v18 = vrot.slane %v4041_v6, 4  ;;  %v4034_v38 = vor.u32 %v4033_v53, %v4030_v9  ;;  %v9162_v40 = vld [vmem:[#allocation20_spill] sm:$0xff]  ;;  %v8490_v29 = vld [vmem:[%s7254_s21 + $0xbc] sm:$0x1]  ;;  %v9166_v37 = vld [vmem:[#allocation13_spill] sm:$0xff] }
 0x15f   : > { %v8457_v7 = vrot.slane %v4047_v49, 5  ;;  %v4052_v28 = vshrl.u32 %v5712_v1, 16  ;;  %v5775_v51 = vrot.slane %v5759_v16, 9  ;;  %v4055_v42 = vshll.u32 %v5712_v1, 16  ;;  %v9164_v49 = vld [vmem:[#allocation26_spill] sm:$0xff] }
 0x160   : > { %v4523_v10 = vrot.slane %v9158_v24, 5  ;;  %v4526_v20 = vrot.slane %v9159_v44, 5  ;;  %v5776_v63 = vrot.slane %v5760_v39, 9  ;;  %v8462_v50 = vcombine.low %v4016_v13, %v4026_v11  ;;  %v6777_v39 = vld [vmem:[%s7254_s21 + $0xc] sm:$0xff]   ;;  %v8526_v44 = vld [vmem:[%s7254_s21 + $0xc4] sm:$0xf] }
 0x161   : > { %v4061_v22 = vshll.u32 %v8455_v14, 16  ;;  %v4530_v55 = vrot.slane %v9160_v30, 5  ;;  %v4533_v12 = vrot.slane %v9161_v17, 5  ;;  %v4044_v4 = vor.u32 %v4043_v18, %v8452_v21 }
 0x162   : > { %v8472_v35 = vsel %vm7500_vm6, %v5775_v51, %v4523_v10  ;;  %v4525_v58 = vrot.slane %v4523_v10, 4  ;;  %v5777_v52 = vrot.slane %v5761_v19, 9  ;;  %v4537_v6 = vrot.slane %v9162_v40, 5  ;;  %v5763_v19 = vld [vmem:[%s7254_s21 + $0x78] sm:$0xe] }
 0x163   : > { %v8478_v5 = vsel %vm7500_vm6, %v5776_v63, %v4530_v55  ;;  %v4532_v61 = vrot.slane %v4530_v55, 4  ;;  %v4540_v9 = vrot.slane %v9163_v54, 5  ;;  %v4544_v23 = vrot.slane %v9164_v49, 5  ;;  %v5764_v55 = vld [vmem:[%s7254_s21 + $0x84] sm:$0xe] }
 0x164   : > { %6319 = vmatmul.mubr.msk.bf16.gmra.mrb[8].mxu0 %vm749_vm3, %v5726_v47  ;;  %v8485_v53 = vsel %vm7500_vm6, %v4525_v58, %v4526_v20  ;;  %v4547_v57 = vrot.slane %v8298_v48, 5  ;;  %v4539_v25 = vrot.slane %v4537_v6, 4  ;;  %v4065_v62 = vshrl.u32 %v8455_v14, 16  ;;  %v5715_v48 = vld [vmem:[%s7254_s21 + $0xc0] sm:$0xf] }
 0x165   : > { %6155 = vmatmul.mubr.msk.bf16.gmra.mrb[24].mxu1 %vm749_vm3, %v5372_v45  ;;  %6322 = vmatprep.mubr.msk.bf16.mxu0 %vm749_vm3, %v5727_v26  ;;  %v5778_v45 = vrot.slane %v5762_v56, 9  ;;  %v5791_v47 = vcombine.low %v8472_v35, %v8485_v53  ;;  %v8496_v41 = vsel %vm7500_vm6, %v4532_v61, %v4533_v12  ;;  %v4546_v16 = vrot.slane %v4544_v23, 4  ;;  %v9165_v56 = vld [vmem:[#allocation27_spill] sm:$0xff] }
 0x166   : > { %6158 = vmatprep.mubr.msk.bf16.mxu1 %vm749_vm3, %v5373_v34  ;;  %v8500_v34 = vsel %vm7500_vm6, %v5777_v52, %v4537_v6  ;;  %v5792_v26 = vcombine.low %v8478_v5, %v8496_v41  ;;  %v8511_v13 = vrot.slane %v4034_v38, 4  ;;  %v8513_v11 = vrot.slane %v4052_v28, 4  ;;  %v5486_v28 = vld [vmem:[%s7254_s21 + $0x78] sm:$0xf]  ;;  %v6846_v41 = vld [vmem:[%s7254_s21 + $0x8c] sm:$0x1] }
 0x167   : > { %v8508_v1 = vsel %vm7500_vm6, %v5778_v45, %v4544_v23  ;;  %v8515_v18 = vrot.slane %v4055_v42, 5  ;;  %v8519_v51 = vsel %vm7500_vm6, %v4539_v25, %v4540_v9  ;;  %v8522_v24 = vrot.slane %v4061_v22, 5 }
 0x168   : > { %v4071_v10 = vshll.u32 %v8490_v29, 16  ;;  %v5793_v20 = vcombine.low %v8500_v34, %v8519_v51  ;;  %v8532_v38 = vsel %vm7500_vm6, %v4546_v16, %v4547_v57  ;;  %v8535_v42 = vrot.slane %v4044_v4, 4  ;;  %v5718_v57 = vld [vmem:[%s7254_s21 + $0xcc] sm:$0xf] }
 0x169   : > { %v4076_v63 = vshrl.u32 %v5715_v48, 16  ;;  %v4079_v30 = vshll.u32 %v5715_v48, 16  ;;  %v5794_v22 = vcombine.low %v8508_v1, %v8532_v38  ;;  %v8542_v17 = vrot.slane %v4065_v62, 4  ;;  %v9168_v62 = vld [vmem:[#allocation28_spill] sm:$0xff] }
 0x16a   : > { %v5779_v12 = vrot.slane %v5763_v19, 9  ;;  %v4551_v58 = vrot.slane %v9165_v56, 5  ;;  %v4554_v52 = vrot.slane %v8320_v59, 5  ;;  %v4085_v4 = vshll.u32 %v8526_v44, 16  ;;  %v8588_v56 = vld [vmem:[%s7254_s21 + $0xd0] sm:$0xf] }
 0x16b   : > { %v2365_v61 = vshrl.u32 %v5486_v28, 16  ;;  %v2368_v40 = vshll.u32 %v5486_v28, 16  ;;  %v4078_v54 = vrot.slane %v4076_v63, 4  ;;  %v4081_v9 = vrot.slane %v4079_v30, 5  ;;  %v5765_v63 = vld [vmem:[%s7254_s21 + $0x90] sm:$0xe] }
 0x16c   : > { %6323 = vmatmul.mubr.msk.bf16.gmra.mrb[12].mxu0 %vm749_vm3, %v8438_v31  ;;  %v4089_v31 = vshrl.u32 %v8526_v44, 16  ;;  %v8557_v59 = vsel %vm7500_vm6, %v5779_v12, %v4551_v58  ;;  %v4553_v15 = vrot.slane %v4551_v58, 4  ;;  %v4040_v23 = vsel %vm7283_vm2, %v8511_v13, %v8452_v21  ;;  %v6780_v30 = vld [vmem:[%s7254_s21 + $0x24] sm:$0xff]   ;;  %v6849_v38 = vld [vmem:[%s7254_s21 + $0xac] sm:$0xf] }
 0x16d   : > { %6159 = vmatmul.mubr.msk.bf16.gmra.mrb[28].mxu1 %vm749_vm3, %v5374_v2  ;;  %6326 = vmatprep.mubr.msk.bf16.mxu0 %vm749_vm3, %v8440_v36  ;;  %v9167_v2 = vld [vmem:[#allocation15_spill] sm:$0xff]  ;;  %v5780_v36 = vrot.slane %v5764_v55, 9  ;;  %v2367_v45 = vrot.slane %v2365_v61, 4  ;;  %v2370_v49 = vrot.slane %v2368_v40, 5  ;;  %v4558_v48 = vrot.slane %v9168_v62, 5  ;;  %v9169_v40 = vld [vmem:[#allocation30_spill] sm:$0xff] }
 0x16e   : > { %6166 = vmatprep.mubr.msk.bf16.mxu1 %vm749_vm3, %v6777_v39  ;;  %v2387_v6 = vsel %vm7283_vm2, %v9167_v2, %v9166_v37  ;;  %v8570_v25 = vsel %vm7500_vm6, %v4553_v15, %v4554_v52  ;;  %v4561_v16 = vrot.slane %v8325_v33, 5  ;;  %v6779_v39 = vld [vmem:[%s7254_s21 + $0x18] sm:$0xff]   ;;  %v4050_v19 = vsel %vm7283_vm2, %v8535_v42, %v8457_v7  ;;  %v9170_v2 = vld [vmem:[#allocation12_spill] sm:$0xff] }
 0x16f   : > { %v4058_v28 = vor.u32 %v8515_v18, %v8513_v11  ;;  %v5795_v21 = vcombine.low %v8557_v59, %v8570_v25  ;;  %v2371_v13 = vor.u32 %v2370_v49, %v2367_v45  ;;  %v8585_v55 = vrot.slane %v4085_v4, 5  ;;  %v8597_v11 = vld [vmem:[%s7254_s21 + $0xc8] sm:$0x1]  ;;  %v6834_v62 = vld [vmem:[#allocation5 + $0x48] sm:$0xff]  }
 0x170   : > { %v4091_v12 = vrot.slane %v4089_v31, 4  ;;  %v8592_v33 = vsel %vm7500_vm6, %v5780_v36, %v4558_v48  ;;  %v4560_v58 = vrot.slane %v4558_v48, 4  ;;  %v4068_v7 = vor.u32 %v8542_v17, %v8522_v24  ;;  %v6850_v25 = vld [vmem:[%s7254_s21 + $0xb8] sm:$0xf] }
 0x171   : > { %v4082_v18 = vor.u32 %v4081_v9, %v4078_v54  ;;  %v4100_v42 = vshrl.u32 %v5718_v57, 16  ;;  %v2372_v52 = vrot.slane %v2371_v13, 4  ;;  %v4103_v4 = vshll.u32 %v5718_v57, 16  ;;  %v9171_v54 = vld [vmem:[#allocation22_spill] sm:$0xff] }
 0x172   : > { %v8603_v31 = vsel %vm7500_vm6, %v4560_v58, %v4561_v16  ;;  %v5781_v61 = vrot.slane %v5765_v63, 9  ;;  %v4565_v15 = vrot.slane %v9169_v40, 5  ;;  %v4109_v17 = vshll.u32 %v8588_v56, 16  ;;  %v6781_v58 = vld [vmem:[%s7254_s21 + $0x30] sm:$0xff]  }
 0x173   : > { %v4113_v37 = vshrl.u32 %v8588_v56, 16  ;;  %v5796_v36 = vcombine.low %v8592_v33, %v8603_v31  ;;  %v4092_v9 = vor.u32 %v4091_v12, %v8585_v55  ;;  %v4095_v45 = vshll.u32 %v8597_v11, 16  ;;  %v5766_v12 = vld [vmem:[%s7254_s21 + $0x9c] sm:$0xe] }
 0x174   : > { %6327 = vmatmul.mubr.msk.bf16.gmra.mrb[16].mxu0 %vm749_vm3, %v8442_v46  ;;  %v2377_v46 = vsel %vm7283_vm2, %v2372_v52, %v9170_v2  ;;  %v4059_v57 = vrot.slane %v4058_v28, 4  ;;  %v8626_v48 = vsel %vm7500_vm6, %v5781_v61, %v4565_v15  ;;  %v4567_v16 = vrot.slane %v4565_v15, 4  ;;  %v8632_v52 = vld [vmem:[%s7254_s21 + $0xd4] sm:$0x1]  ;;  %v6782_v61 = vld [vmem:[%s7254_s21 + $0x3c] sm:$0xff]  }
 0x175   : > { %6167 = vmatmul.mubr.msk.bf16.vlgmr.msra.gmra.mrb[0].mxu1 %vm749_vm3, %v6779_v39  ;;  %6330 = vmatprep.mubr.msk.bf16.mxu0 %vm749_vm3, %v8444_v60  ;;  %v4073_v60 = vrot.slane %v4071_v10, 5  ;;  %v8622_v49 = vcombine.low %v2377_v46, %v2387_v6  ;;  %v4568_v39 = vrot.slane %v8330_v8, 5  ;;  %v5733_v13 = vcombine.low %v4040_v23, %v4050_v19 }
 0x176   : > { %6380 = vmatpush3.bf16.msra.mxu1 %v9171_v54  ;;  %6170 = vmatprep.mubr.msk.bf16.mxu1 %vm749_vm3, %v6780_v30  ;;  %v4069_v10 = vrot.slane %v4068_v7, 4  ;;  %v4083_v63 = vrot.slane %v4082_v18, 4  ;;  %v4102_v30 = vrot.slane %v4100_v42, 4  ;;  %v4105_v6 = vrot.slane %v4103_v4, 5  ;;  %v9172_v4 = vld [vmem:[#allocation31_spill] sm:$0xff] }
 0x177   : > { %6379 = vmatprep.subr.bf16.mxu1 %v6834_v62  ;;  %v8634_v28 = vrot.slane %v4109_v17, 5  ;;  %v4115_v40 = vrot.slane %v4113_v37, 4  ;;  %v8638_v2 = vsel %vm7500_vm6, %v4567_v16, %v4568_v39  ;;  %v4093_v15 = vrot.slane %v4092_v9, 4  ;;  %v5755_v54 = vld [vmem:[%s7254_s21 + $0x18] sm:$0xe] }
 0x178   : > { %v4097_v8 = vrot.slane %v4095_v45, 5  ;;  %v5797_v23 = vcombine.low %v8626_v48, %v8638_v2  ;;  %v4064_v19 = vsel %vm7283_vm2, %v4059_v57, %v8522_v24  ;;  %v5782_v7 = vrot.slane %v5766_v12, 9 }
 0x179   : > { %v4074_v18 = vsel %vm7283_vm2, %v4069_v10, %v4073_v60  ;;  %v4119_v42 = vshll.u32 %v8632_v52, 16  ;;  %v4572_v17 = vrot.slane %v9172_v4, 5  ;;  %v4575_v37 = vrot.slane %v8345_v3, 5  ;;  %v6835_v3 = vld [vmem:[%s7254_s21 + $0x1c] sm:$0xf]  ;;  %v6783_v10 = vld [vmem:[%s7254_s21 + $0x48] sm:$0xff]  }
 0x17a   : > { %6381 = vmatpush3.bf16.msra.mxu1 %v6834_v62  ;;  %v4088_v24 = vsel %vm7283_vm2, %v4083_v63, %v8585_v55  ;;  %v4116_v46 = vor.u32 %v4115_v40, %v8634_v28  ;;  %v4098_v60 = vsel %vm7283_vm2, %v4093_v15, %v4097_v8  ;;  %v4495_v9 = vrot.slane %v6835_v3, 5  ;;  %v5767_v62 = vld [vmem:[%s7254_s21 + $0xa8] sm:$0xe] }
 0x17b   : > { %v8666_v45 = vsel %vm7500_vm6, %v5782_v7, %v4572_v17  ;;  %v4574_v57 = vrot.slane %v4572_v17, 4  ;;  %v5734_v55 = vcombine.low %v4064_v19, %v4074_v18  ;;  %v4121_v16 = vrot.slane %v4119_v42, 5  ;;  %v6837_v18 = vld [vmem:[%s7254_s21 + $0x28] sm:$0xf] }
 0x17c   : > { %6331 = vmatmul.mubr.msk.bf16.gmra.mrb[20].mxu0 %vm749_vm3, %v8462_v50  ;;  %v4106_v50 = vor.u32 %v4105_v6, %v4102_v30  ;;  %v5771_v39 = vrot.slane %v5755_v54, 9  ;;  %v5735_v63 = vcombine.low %v4088_v24, %v4098_v60  ;;  %v4117_v12 = vrot.slane %v4116_v46, 4  ;;  %v6784_v6 = vld [vmem:[%s7254_s21 + $0x54] sm:$0xff]   ;;  %v5756_v24 = vld [vmem:[%s7254_s21 + $0x24] sm:$0xe] }
 0x17d   : > { %6171 = vmatmul.mubr.msk.bf16.gmra.mrb[4].mxu1 %vm749_vm3, %v6781_v58  ;;  %6334 = vmatprep.mubr.msk.bf16.mxu0 %vm749_vm3, %v5733_v13  ;;  %v8671_v13 = vsel %vm7500_vm6, %v4574_v57, %v4575_v37  ;;  %v4497_v40 = vrot.slane %v4495_v9, 4  ;;  %v5783_v8 = vrot.slane %v5767_v62, 9  ;;  %v4579_v19 = vrot.slane %v8371_v43, 5  ;;  %v5768_v37 = vld [vmem:[%s7254_s21 + $0xb4] sm:$0xe] }
 0x17e   : > { %6174 = vmatprep.mubr.msk.bf16.mxu1 %vm749_vm3, %v6782_v61  ;;  %v4107_v30 = vrot.slane %v4106_v50, 4  ;;  %v5798_v58 = vcombine.low %v8666_v45, %v8671_v13  ;;  %v6836_v61 = vld [vmem:[%s7254_s21 + $0x20] sm:$0x1]  ;;  %v4582_v7 = vrot.slane %v8391_v32, 5  ;;  %v4502_v42 = vrot.slane %v6837_v18, 5 }
 0x17f   : > { %v4498_v15 = vrot.slane %v6836_v61, 5  ;;  %v8684_v4 = vsel %vm7500_vm6, %v5783_v8, %v4579_v19  ;;  %v4581_v17 = vrot.slane %v4579_v19, 4  ;;  %v4122_v32 = vsel %vm7283_vm2, %v4117_v12, %v4121_v16  ;;  %v5757_v54 = vld [vmem:[%s7254_s21 + $0x30] sm:$0xe]  ;;  %v6838_v60 = vld [vmem:[%s7254_s21 + $0x34] sm:$0xf] }
 0x180   : > { %v4112_v43 = vsel %vm7283_vm2, %v4107_v30, %v8634_v28  ;;  %v4496_v50 = vsel %vm7500_vm6, %v5771_v39, %v4495_v9  ;;  %v4509_v3 = vrot.slane %v6838_v60, 5  ;;  %v5784_v62 = vrot.slane %v5768_v37, 9  ;;  %v6839_v30 = vld [vmem:[%s7254_s21 + $0x2c] sm:$0x1]  ;;  %v6840_v8 = vld [vmem:[%s7254_s21 + $0x38] sm:$0x1] }
 0x181   : > { %v4499_v46 = vsel %vm7500_vm6, %v4497_v40, %v4498_v15  ;;  %v8704_v28 = vsel %vm7500_vm6, %v4581_v17, %v4582_v7  ;;  %v5772_v16 = vrot.slane %v5756_v24, 9  ;;  %v4504_v9 = vrot.slane %v4502_v42, 4  ;;  %v6786_v61 = vld [vmem:[%s7254_s21 + $0x6c] sm:$0xff]   ;;  %v5769_v17 = vld [vmem:[%s7254_s21 + $0xc0] sm:$0xe] }
 0x182   : > { %v5799_v57 = vcombine.low %v8684_v4, %v8704_v28  ;;  %v4586_v39 = vrot.slane %v8455_v14, 5  ;;  %v4505_v12 = vrot.slane %v6839_v30, 5  ;;  %v4589_v40 = vrot.slane %v8490_v29, 5  ;;  %v5758_v14 = vld [vmem:[%s7254_s21 + $0x3c] sm:$0xe] }
 0x183   : > { %v4511_v15 = vrot.slane %v4509_v3, 4  ;;  %v4512_v19 = vrot.slane %v6840_v8, 5  ;;  %v9173_v37 = vld [vmem:[#allocation14_spill] sm:$0xff]  ;;  %v4503_v29 = vsel %vm7500_vm6, %v5772_v16, %v4502_v42  ;;  %v5785_v60 = vrot.slane %v5769_v17, 9  ;;  %v6854_v45 = vld [vmem:[%s7254_s21 + $0xc8] sm:$0x1] }
 0x184   : > { %6335 = vmatmul.mubr.msk.bf16.gmra.mrb[24].mxu0 %vm749_vm3, %v5734_v55  ;;  %v5736_v55 = vcombine.low %v4112_v43, %v4122_v32  ;;  %v8716_v7 = vsel %vm7500_vm6, %v5784_v62, %v4586_v39  ;;  %v4588_v18 = vrot.slane %v4586_v39, 4  ;;  %v4516_v43 = vrot.slane %v9173_v37, 5  ;;  %v6841_v37 = vld [vmem:[%s7254_s21 + $0x70] sm:$0xf] }
 0x185   : > { %6175 = vmatmul.mubr.msk.bf16.gmra.mrb[8].mxu1 %vm749_vm3, %v6783_v10  ;;  %6338 = vmatprep.mubr.msk.bf16.mxu0 %vm749_vm3, %v5735_v63  ;;  %v6785_v10 = vld [vmem:[%s7254_s21 + $0x60] sm:$0xff]   ;;  %v5787_v63 = vcombine.low %v4496_v50, %v4499_v46  ;;  %v4506_v24 = vsel %vm7500_vm6, %v4504_v9, %v4505_v12  ;;  %v4593_v42 = vrot.slane %v8526_v44, 5  ;;  %v5774_v62 = vrot.slane %v5758_v14, 9  ;;  %v5770_v12 = vld [vmem:[%s7254_s21 + $0xcc] sm:$0xe] }
 0x186   : > { %6178 = vmatprep.mubr.msk.bf16.mxu1 %vm749_vm3, %v6784_v6  ;;  %v5773_v6 = vrot.slane %v5757_v54, 9  ;;  %v8724_v32 = vsel %vm7500_vm6, %v4588_v18, %v4589_v40  ;;  %v4513_v54 = vsel %vm7500_vm6, %v4511_v15, %v4512_v19  ;;  %v4596_v9 = vrot.slane %v8597_v11, 5  ;;  %v5483_v40 = vld [vmem:[%s7254_s21 + $0x6c] sm:$0xf] }
 0x187   : > { %v5800_v50 = vcombine.low %v8716_v7, %v8724_v32  ;;  %v5788_v39 = vcombine.low %v4503_v29, %v4506_v24  ;;  %v4595_v30 = vrot.slane %v4593_v42, 4  ;;  %v5786_v15 = vrot.slane %v5770_v12, 9 }
 0x188   : > { %v4510_v46 = vsel %vm7500_vm6, %v5773_v6, %v4509_v3  ;;  %v6787_v3 = vld [vmem:[%s7254_s21 + $0x78] sm:$0xff]   ;;  %v4517_v8 = vsel %vm7500_vm6, %v5774_v62, %v4516_v43  ;;  %v2341_v18 = vshrl.u32 %v5483_v40, 16  ;;  %v4600_v17 = vrot.slane %v8588_v56, 5  ;;  %v6789_v62 = vld [vmem:[%s7254_s21 + $0x90] sm:$0xff]  }
 0x189   : > { %v5789_v6 = vcombine.low %v4510_v46, %v4513_v54  ;;  %v8752_v44 = vsel %vm7500_vm6, %v4595_v30, %v4596_v9  ;;  %v2344_v14 = vshll.u32 %v5483_v40, 16  ;;  %v2350_v29 = vshll.u32 %v6841_v37, 16  ;;  %v6842_v30 = vld [vmem:[%s7254_s21 + $0x74] sm:$0x1] }
 0x18a   : > { %v2354_v24 = vshrl.u32 %v6841_v37, 16  ;;  %v8769_v46 = vsel %vm7500_vm6, %v5786_v15, %v4600_v17  ;;  %v4602_v56 = vrot.slane %v4600_v17, 4  ;;  %v2360_v12 = vshll.u32 %v6842_v30, 16  ;;  %v5495_v37 = vld [vmem:[%s7254_s21 + $0x9c] sm:$0xf] }
 0x18b   : > { %v2528_v13 = vshll.u32 %v6854_v45, 16 }
 0x18c   : > { %6339 = vmatmul.mubr.msk.bf16.gmra.mrb[28].mxu0 %vm749_vm3, %v5736_v55  ;;  %v9174_v55 = vld [vmem:[#allocation17_spill] sm:$0xff]  ;;  %v2356_v9 = vrot.slane %v2354_v24, 4  ;;  %v2362_v17 = vrot.slane %v2360_v12, 5 }
 0x18d   : > { %6179 = vmatmul.mubr.msk.bf16.gmra.mrb[12].mxu1 %vm749_vm3, %v6785_v10  ;;  %6346 = vmatprep.mubr.msk.bf16.mxu0 %vm749_vm3, %v5787_v63  ;;  %v4519_v16 = vrot.slane %v9174_v55, 5  ;;  %v4518_v10 = vrot.slane %v4516_v43, 4  ;;  %v8744_v63 = vsel %vm7500_vm6, %v5785_v60, %v4593_v42  ;;  %v4603_v43 = vrot.slane %v8632_v52, 5 }
 0x18e   : > { %6182 = vmatprep.mubr.msk.bf16.mxu1 %vm749_vm3, %v6786_v61  ;;  %v6788_v61 = vld [vmem:[%s7254_s21 + $0x84] sm:$0xff]   ;;  %v5801_v11 = vcombine.low %v8744_v63, %v8752_v44  ;;  %v2343_v60 = vrot.slane %v2341_v18, 4  ;;  %v2346_v55 = vrot.slane %v2344_v14, 5 }
 0x18f   : > { %v4520_v19 = vsel %vm7500_vm6, %v4518_v10, %v4519_v16  ;;  %v8773_v42 = vsel %vm7500_vm6, %v4602_v56, %v4603_v43  ;;  %v2352_v16 = vrot.slane %v2350_v29, 5  ;;  %v5489_v10 = vld [vmem:[%s7254_s21 + $0x84] sm:$0xf]  ;;  %v6791_v18 = vld [vmem:[%s7254_s21 + $0xa8] sm:$0xff]   ;;  %v6792_v29 = vld [vmem:[%s7254_s21 + $0xb4] sm:$0xff]  }
 0x190   : > { %v5790_v54 = vcombine.low %v4517_v8, %v4520_v19  ;;  %v5802_v52 = vcombine.low %v8769_v46, %v8773_v42  ;;  %v2347_v0 = vor.u32 %v2346_v55, %v2343_v60  ;;  %v2392_v40 = vshll.u32 %v5489_v10, 16  ;;  %v5492_v19 = vld [vmem:[%s7254_s21 + $0x90] sm:$0xf]  ;;  %v6844_v60 = vld [vmem:[%s7254_s21 + $0x94] sm:$0xf] }
 0x191   : > { %v2413_v56 = vshrl.u32 %v5492_v19, 16  ;;  %v2426_v55 = vshrl.u32 %v6844_v60, 16 }
 0x192   : > { %v2348_v14 = vrot.slane %v2347_v0, 4 }
 0x194   : > { %6347 = vmatmul.mubr.msk.bf16.vlgmr.msra.gmra.mrb[0].mxu0 %vm749_vm3, %v5788_v39  ;;  %v6790_v39 = vld [vmem:[%s7254_s21 + $0x9c] sm:$0xff]   ;;  %v2353_v0 = vsel %vm7283_vm2, %v2348_v14, %v2352_v16 }
 0x195   : > { %6183 = vmatmul.mubr.msk.bf16.gmra.mrb[16].mxu1 %vm749_vm3, %v6787_v3  ;;  %6350 = vmatprep.mubr.msk.bf16.mxu0 %vm749_vm3, %v5789_v6  ;;  %v2357_v3 = vor.u32 %v2356_v9, %v2352_v16  ;;  %v2389_v6 = vshrl.u32 %v5489_v10, 16  ;;  %v2437_v9 = vshrl.u32 %v5495_v37, 16  ;;  %v6845_v10 = vld [vmem:[%s7254_s21 + $0xa0] sm:$0xf] }
 0x196   : > { %6186 = vmatprep.mubr.msk.bf16.mxu1 %vm749_vm3, %v6788_v61  ;;  %v6843_v61 = vld [vmem:[%s7254_s21 + $0x88] sm:$0xf]  ;;  %v2446_v30 = vshll.u32 %v6845_v10, 16  ;;  %v2450_v12 = vshrl.u32 %v6845_v10, 16 }
 0x197   : > { %v2398_v15 = vshll.u32 %v6843_v61, 16  ;;  %v2402_v8 = vshrl.u32 %v6843_v61, 16  ;;  %v2358_v35 = vrot.slane %v2357_v3, 4  ;;  %v2391_v53 = vrot.slane %v2389_v6, 4 }
 0x198   : > { %v2439_v61 = vrot.slane %v2437_v9, 4  ;;  %v8815_v16 = vrot.slane %v2446_v30, 5 }
 0x199   : > { %v8793_v24 = vrot.slane %v2398_v15, 5  ;;  %v2404_v43 = vrot.slane %v2402_v8, 4  ;;  %v2363_v5 = vsel %vm7283_vm2, %v2358_v35, %v2362_v17  ;;  %v2452_v8 = vrot.slane %v2450_v12, 4 }
 0x19b   : > { %v2405_v6 = vor.u32 %v2404_v43, %v8793_v24 }
 0x19c   : > { %6351 = vmatmul.mubr.msk.bf16.gmra.mrb[4].mxu0 %vm749_vm3, %v5790_v54  ;;  %v2416_v54 = vshll.u32 %v5492_v19, 16  ;;  %v6793_v19 = vld [vmem:[%s7254_s21 + $0xc0] sm:$0xff]  }
 0x19d   : > { %6187 = vmatmul.mubr.msk.bf16.gmra.mrb[20].mxu1 %vm749_vm3, %v6789_v62  ;;  %6354 = vmatprep.mubr.msk.bf16.mxu0 %vm749_vm3, %v5791_v47  ;;  %v2394_v47 = vrot.slane %v2392_v40, 5  ;;  %v2422_v62 = vshll.u32 %v6844_v60, 16  ;;  %v2415_v40 = vrot.slane %v2413_v56, 4  ;;  %v2406_v35 = vrot.slane %v2405_v6, 4  ;;  %v6848_v60 = vld [vmem:[%s7254_s21 + $0xa4] sm:$0x1] }
 0x19e   : > { %6190 = vmatprep.mubr.msk.bf16.mxu1 %vm749_vm3, %v6790_v39  ;;  %v2440_v39 = vshll.u32 %v5495_v37, 16  ;;  %v2418_v34 = vrot.slane %v2416_v54, 5  ;;  %v2453_v54 = vor.u32 %v2452_v8, %v8815_v16 }
 0x19f   : > { %v2395_v3 = vor.u32 %v2394_v47, %v2391_v53  ;;  %v8813_v51 = vrot.slane %v2422_v62, 5  ;;  %v6847_v47 = vld [vmem:[%s7254_s21 + $0x98] sm:$0x1]  ;;  %v2456_v62 = vshll.u32 %v6848_v60, 16 }
 0x1a0   : > { %v2442_v15 = vrot.slane %v2440_v39, 5  ;;  %v2419_v53 = vor.u32 %v2418_v34, %v2415_v40  ;;  %v2432_v37 = vshll.u32 %v6847_v47, 16  ;;  %v2474_v39 = vshrl.u32 %v6849_v38, 16 }
 0x1a1   : > { %v2396_v14 = vrot.slane %v2395_v3, 4  ;;  %v2454_v6 = vrot.slane %v2453_v54, 4  ;;  %v2458_v40 = vrot.slane %v2456_v62, 5  ;;  %v6853_v62 = vld [vmem:[%s7254_s21 + $0xbc] sm:$0x1] }
 0x1a2   : > { %v2443_v56 = vor.u32 %v2442_v15, %v2439_v61  ;;  %v2420_v12 = vrot.slane %v2419_v53, 4  ;;  %v2476_v15 = vrot.slane %v2474_v39, 4  ;;  %v2504_v48 = vshll.u32 %v6853_v62, 16 }
 0x1a3   : > { %v2401_v10 = vsel %vm7283_vm2, %v2396_v14, %v8793_v24  ;;  %v5504_v14 = vld [vmem:[%s7254_s21 + $0xc0] sm:$0xf]  ;;  %v2459_v33 = vsel %vm7283_vm2, %v2454_v6, %v2458_v40 }
 0x1a4   : > { %6355 = vmatmul.mubr.msk.bf16.gmra.mrb[8].mxu0 %vm749_vm3, %v5792_v26  ;;  %v2408_v26 = vshll.u32 %v6846_v41, 16  ;;  %v2498_v41 = vshrl.u32 %v6850_v25, 16  ;;  %v2444_v3 = vrot.slane %v2443_v56, 4 }
 0x1a5   : > { %6191 = vmatmul.mubr.msk.bf16.gmra.mrb[24].mxu1 %vm749_vm3, %v6791_v18  ;;  %6358 = vmatprep.mubr.msk.bf16.mxu0 %vm749_vm3, %v5793_v20  ;;  %v2428_v20 = vrot.slane %v2426_v55, 4  ;;  %v5515_v18 = vcombine.low %v2353_v0, %v2363_v5  ;;  %v5501_v55 = vld [vmem:[%s7254_s21 + $0xb4] sm:$0xf]  ;;  %v2434_v0 = vrot.slane %v2432_v37, 5 }
 0x1a6   : > { %6194 = vmatprep.mubr.msk.bf16.mxu1 %vm749_vm3, %v6792_v29  ;;  %v2410_v17 = vrot.slane %v2408_v26, 5  ;;  %v5498_v29 = vld [vmem:[%s7254_s21 + $0xa8] sm:$0xf]  ;;  %v2485_v5 = vshrl.u32 %v5501_v55, 16  ;;  %v2488_v59 = vshll.u32 %v5501_v55, 16  ;;  %v2449_v47 = vsel %vm7283_vm2, %v2444_v3, %v8815_v16 }
 0x1a7   : > { %v2429_v43 = vor.u32 %v2428_v20, %v8813_v51  ;;  %v2461_v9 = vshrl.u32 %v5498_v29, 16  ;;  %v2464_v1 = vshll.u32 %v5498_v29, 16  ;;  %v2509_v29 = vshrl.u32 %v5504_v14, 16 }
 0x1a8   : > { %v2411_v30 = vsel %vm7283_vm2, %v2406_v35, %v2410_v17  ;;  %v2487_v8 = vrot.slane %v2485_v5, 4  ;;  %v2500_v17 = vrot.slane %v2498_v41, 4  ;;  %v2425_v35 = vsel %vm7283_vm2, %v2420_v12, %v8813_v51  ;;  %v6851_v51 = vld [vmem:[%s7254_s21 + $0xb0] sm:$0x1] }
 0x1a9   : > { %v2430_v26 = vrot.slane %v2429_v43, 4  ;;  %v2463_v34 = vrot.slane %v2461_v9, 4  ;;  %v2466_v20 = vrot.slane %v2464_v1, 5  ;;  %v5517_v24 = vcombine.low %v2401_v10, %v2411_v30  ;;  %v6852_v43 = vld [vmem:[%s7254_s21 + $0xc4] sm:$0xf] }
 0x1aa   : > { %v2480_v37 = vshll.u32 %v6851_v51, 16  ;;  %v2512_v16 = vshll.u32 %v5504_v14, 16  ;;  %v2518_v56 = vshll.u32 %v6852_v43, 16  ;;  %v2522_v54 = vshrl.u32 %v6852_v43, 16 }
 0x1ab   : > { %v2435_v53 = vsel %vm7283_vm2, %v2430_v26, %v2434_v0  ;;  %v2467_v31 = vor.u32 %v2466_v20, %v2463_v34  ;;  %v2506_v0 = vrot.slane %v2504_v48, 5  ;;  %v2530_v3 = vrot.slane %v2528_v13, 5 }
 0x1ac   : > { %6359 = vmatmul.mubr.msk.bf16.gmra.mrb[12].mxu0 %vm749_vm3, %v5794_v22  ;;  %v2470_v22 = vshll.u32 %v6849_v38, 16  ;;  %v5518_v2 = vcombine.low %v2425_v35, %v2435_v53  ;;  %v2482_v1 = vrot.slane %v2480_v37, 5  ;;  %v2511_v38 = vrot.slane %v2509_v29, 4 }
 0x1ad   : > { %6195 = vmatmul.mubr.msk.bf16.gmra.mrb[28].mxu1 %vm749_vm3, %v6793_v19  ;;  %6362 = vmatprep.mubr.msk.bf16.mxu0 %vm749_vm3, %v5795_v21  ;;  %v2494_v21 = vshll.u32 %v6850_v25, 16  ;;  %v2490_v19 = vrot.slane %v2488_v59, 5  ;;  %v2468_v55 = vrot.slane %v2467_v31, 4  ;;  %v2520_v39 = vrot.slane %v2518_v56, 5 }
 0x1ae   : > { %6218 = vmatprep.mubr.msk.bf16.mxu1 %vm749_vm3, %v5515_v18  ;;  %v2472_v61 = vrot.slane %v2470_v22, 5  ;;  %v2514_v22 = vrot.slane %v2512_v16, 5  ;;  %v2524_v10 = vrot.slane %v2522_v54, 4 }
 0x1af   : > { %v2496_v18 = vrot.slane %v2494_v21, 5 }
 0x1b0   : > { %v2473_v5 = vsel %vm7283_vm2, %v2468_v55, %v2472_v61  ;;  %v2515_v25 = vor.u32 %v2514_v22, %v2511_v38  ;;  %v2525_v21 = vor.u32 %v2524_v10, %v2520_v39 }
 0x1b1   : > { %v2501_v60 = vor.u32 %v2500_v17, %v2496_v18  ;;  %v8916_v17 = vld [vmem:[#allocation7] ss:$0 sm:$0xff] }
 0x1b2   : > { %v2516_v41 = vrot.slane %v2515_v25, 4  ;;  %v2526_v26 = vrot.slane %v2525_v21, 4 }
 0x1b3   : > { %v2502_v12 = vrot.slane %v2501_v60, 4 }
 0x1b4   : > { %6363 = vmatmul.mubr.msk.bf16.gmra.mrb[16].mxu0 %vm749_vm3, %v5796_v36  ;;  %v2477_v36 = vor.u32 %v2476_v15, %v2472_v61  ;;  %v2521_v6 = vsel %vm7283_vm2, %v2516_v41, %v2520_v39  ;;  %v2531_v40 = vsel %vm7283_vm2, %v2526_v26, %v2530_v3 }
 0x1b5   : > { %6219 = vmatmul.mubr.msk.bf16.vlgmr.msra.gmra.mrb[16].mxu1 %vm749_vm3, %v8622_v49  ;;  %6366 = vmatprep.mubr.msk.bf16.mxu0 %vm749_vm3, %v5797_v23  ;;  %v2491_v49 = vor.u32 %v2490_v19, %v2487_v8  ;;  %v5519_v23 = vcombine.low %v2449_v47, %v2459_v33  ;;  %v2507_v4 = vsel %vm7283_vm2, %v2502_v12, %v2506_v0 }
 0x1b6   : > { %6222 = vmatprep.mubr.msk.bf16.mxu1 %vm749_vm3, %v5517_v24  ;;  %v2478_v9 = vrot.slane %v2477_v36, 4  ;;  %v5522_v34 = vcombine.low %v2521_v6, %v2531_v40 }
 0x1b7   : > { %v2492_v30 = vrot.slane %v2491_v49, 4 }
 0x1b8   : > { %v2483_v59 = vsel %vm7283_vm2, %v2478_v9, %v2482_v1 }
 0x1b9   : > { %v5520_v28 = vcombine.low %v2473_v5, %v2483_v59 }
 0x1bc   : > { %6367 = vmatmul.mubr.msk.bf16.gmra.mrb[20].mxu0 %vm749_vm3, %v5798_v58  ;;  %v2497_v58 = vsel %vm7283_vm2, %v2492_v30, %v2496_v18 }
 0x1bd   : > { %6223 = vmatmul.mubr.msk.bf16.gmra.mrb[20].mxu1 %vm749_vm3, %v5518_v2  ;;  %6370 = vmatprep.mubr.msk.bf16.mxu0 %vm749_vm3, %v5799_v57  ;;  %v5521_v57 = vcombine.low %v2497_v58, %v2507_v4 }
 0x1be   : > { %6226 = vmatprep.mubr.msk.bf16.mxu1 %vm749_vm3, %v5519_v23 }
 0x1c4   : > { %6371 = vmatmul.mubr.msk.bf16.gmra.mrb[24].mxu0 %vm749_vm3, %v5800_v50 }
 0x1c5   : > { %6227 = vmatmul.mubr.msk.bf16.gmra.mrb[24].mxu1 %vm749_vm3, %v5520_v28  ;;  %6374 = vmatprep.mubr.msk.bf16.mxu0 %vm749_vm3, %v5801_v11 }
 0x1c6   : > { %6230 = vmatprep.mubr.msk.bf16.mxu1 %vm749_vm3, %v5521_v57 }
 0x1cc   : > { %6375 = vmatmul.mubr.msk.bf16.gmra.mrb[28].mxu0 %vm749_vm3, %v5802_v52 }
 0x1cd   : > { %6231 = vmatmul.mubr.msk.bf16.gmra.mrb[28].mxu1 %vm749_vm3, %v5522_v34 }
 0x248   : > { %v6168_v7 = vpop.f32.mrb[0].mxu1 }
 0x249   : > { %v1941_v32 = vpop.f32.mrb[1].mxu1 }
 0x24a   : > { %v6169_v50 = vpop.f32.mrb[2].mxu1 }
 0x24b   : > { %v1944_v63 = vpop.f32.mrb[3].mxu1 }
 0x250   : > { %v6172_v44 = vpop.f32.mrb[4].mxu1 }
 0x251   : > { %v1957_v11 = vpop.f32.mrb[5].mxu1 }
 0x252   : > { %v6173_v20 = vpop.f32.mrb[6].mxu1 }
 0x253   : > { %v1960_v61 = vpop.f32.mrb[7].mxu1 }
 0x258   : > { %v6176_v15 = vpop.f32.mrb[8].mxu1 }
 0x259   : > { %v1973_v27 = vpop.f32.mrb[9].mxu1 }
 0x25a   : > { %v8904_v24 = vpop.f32.mrb[10].mxu1 }
 0x25b   : > { %v8906_v8 = vpop.f32.mrb[11].mxu1 }
 0x260   : > { %v8908_v46 = vpop.f32.mrb[12].mxu1 }
 0x261   : > { %v8910_v42 = vpop.f32.mrb[13].mxu1 }
 0x262   : > { %v8912_v52 = vpop.f32.mrb[14].mxu1 }
 0x263   : > { %v8914_v19 = vpop.f32.mrb[15].mxu1 }
 0x267   : > { %v6348_v18 = vpop.f32.mrb[0].mxu0 }
 0x268   : > { %v6382_v14 = vadd.f32 %v6348_v18, %v6168_v7  ;;  %v4752_v35 = vpop.f32.mrb[1].mxu0 }
 0x269   : > { %v6383_v53 = vadd.f32 %v4752_v35, %v1941_v32  ;;  %v6349_v47 = vpop.f32.mrb[2].mxu0 }
 0x26a   : > { %v4920_v33 = vadd.f32 %v6382_v14, %v8916_v17  ;;  %v6384_v31 = vadd.f32 %v6349_v47, %v6169_v50  ;;  %v4755_v36 = vpop.f32.mrb[3].mxu0 }
 0x26b   : > { %v4918_v51 = vadd.f32 %v6383_v53, %v8916_v17  ;;  %v6385_v37 = vadd.f32 %v4755_v36, %v1944_v63 }
 0x26c   : > { %v4952_v29 = vmax.f32 %v4920_v33, 0.0  ;;  %v4921_v16 = vadd.f32 %v6384_v31, %v8916_v17 }
 0x26d   : > { %v4950_v43 = vmax.f32 %v4918_v51, 0.0  ;;  %v4919_v56 = vadd.f32 %v6385_v37, %v8916_v17 }
 0x26e   : > { %v5861_v54 = vpack.c.bf16 %v4952_v29, %v4952_v29  ;;  %v4953_v49 = vmax.f32 %v4921_v16, 0.0 }
 0x26f   : > { %v5859_v60 = vpack.c.bf16 %v4950_v43, %v4950_v43  ;;  %v4951_v62 = vmax.f32 %v4919_v56, 0.0  ;;  %v6352_v48 = vpop.f32.mrb[4].mxu0 }
 0x270   : > { %5113 = vst.msk [vmem:[%s8923_s22 + $0x8] sm:$0xf] %vm5110_vm7, %v5861_v54  ;;  %v5862_v2 = vpack.c.bf16 %v4953_v49, %v4953_v49  ;;  %v6386_v23 = vadd.f32 %v6352_v48, %v6172_v44  ;;  %v4768_v55 = vpop.f32.mrb[5].mxu0 }
 0x271   : > { %5111 = vst.msk [vmem:[%s8923_s22] sm:$0xf] %vm5110_vm7, %v5859_v60  ;;  %v5860_v9 = vpack.c.bf16 %v4951_v62, %v4951_v62  ;;  %v6387_v1 = vadd.f32 %v4768_v55, %v1957_v11  ;;  %v6353_v38 = vpop.f32.mrb[6].mxu0 }
 0x272   : > { %5114 = vst.msk [vmem:[%s8923_s22 + $0xc] sm:$0xf] %vm5110_vm7, %v5862_v2  ;;  %v4924_v22 = vadd.f32 %v6386_v23, %v8916_v17  ;;  %v6388_v39 = vadd.f32 %v6353_v38, %v6173_v20  ;;  %v4771_v10 = vpop.f32.mrb[7].mxu0 }
 0x273   : > { %5112 = vst.msk [vmem:[%s8923_s22 + $0x4] sm:$0xf] %vm5110_vm7, %v5860_v9  ;;  %v4922_v30 = vadd.f32 %v6387_v1, %v8916_v17  ;;  %v6389_v12 = vadd.f32 %v4771_v10, %v1960_v61 }
 0x274   : > { %v4956_v0 = vmax.f32 %v4924_v22, 0.0  ;;  %v4925_v5 = vadd.f32 %v6388_v39, %v8916_v17 }
 0x275   : > { %v4954_v59 = vmax.f32 %v4922_v30, 0.0  ;;  %v4923_v25 = vadd.f32 %v6389_v12, %v8916_v17 }
 0x276   : > { %v5865_v21 = vpack.c.bf16 %v4956_v0, %v4956_v0  ;;  %v4957_v45 = vmax.f32 %v4925_v5, 0.0 }
 0x277   : > { %v5863_v13 = vpack.c.bf16 %v4954_v59, %v4954_v59  ;;  %v4955_v58 = vmax.f32 %v4923_v25, 0.0  ;;  %v6356_v4 = vpop.f32.mrb[8].mxu0 }
 0x278   : > { %5117 = vst.msk [vmem:[%s8923_s22 + $0x18] sm:$0xf] %vm5110_vm7, %v5865_v21  ;;  %v5866_v28 = vpack.c.bf16 %v4957_v45, %v4957_v45  ;;  %v6390_v57 = vadd.f32 %v6356_v4, %v6176_v15  ;;  %v4784_v41 = vpop.f32.mrb[9].mxu0 }
 0x279   : > { %5115 = vst.msk [vmem:[%s8923_s22 + $0x10] sm:$0xf] %vm5110_vm7, %v5863_v13  ;;  %v5864_v26 = vpack.c.bf16 %v4955_v58, %v4955_v58  ;;  %v6391_v3 = vadd.f32 %v4784_v41, %v1973_v27  ;;  %v6357_v6 = vpop.f32.mrb[10].mxu0 }
 0x27a   : > { %5118 = vst.msk [vmem:[%s8923_s22 + $0x1c] sm:$0xf] %vm5110_vm7, %v5866_v28  ;;  %v4928_v40 = vadd.f32 %v6390_v57, %v8916_v17  ;;  %v6392_v34 = vadd.f32 %v6357_v6, %v8904_v24  ;;  %v4787_v7 = vpop.f32.mrb[11].mxu0 }
 0x27b   : > { %5116 = vst.msk [vmem:[%s8923_s22 + $0x14] sm:$0xf] %vm5110_vm7, %v5864_v26  ;;  %v4926_v32 = vadd.f32 %v6391_v3, %v8916_v17  ;;  %v6393_v50 = vadd.f32 %v4787_v7, %v8906_v8 }
 0x27c   : > { %v4960_v63 = vmax.f32 %v4928_v40, 0.0  ;;  %v4929_v44 = vadd.f32 %v6392_v34, %v8916_v17 }
 0x27d   : > { %v4958_v11 = vmax.f32 %v4926_v32, 0.0  ;;  %v4927_v20 = vadd.f32 %v6393_v50, %v8916_v17 }
 0x27e   : > { %v5869_v61 = vpack.c.bf16 %v4960_v63, %v4960_v63  ;;  %v4961_v15 = vmax.f32 %v4929_v44, 0.0 }
 0x27f   : > { %v5867_v27 = vpack.c.bf16 %v4958_v11, %v4958_v11  ;;  %v4959_v24 = vmax.f32 %v4927_v20, 0.0  ;;  %v6360_v18 = vpop.f32.mrb[12].mxu0 }
 0x280   : > { %5121 = vst.msk [vmem:[%s8923_s22 + $0x28] sm:$0xf] %vm5110_vm7, %v5869_v61  ;;  %v5870_v14 = vpack.c.bf16 %v4961_v15, %v4961_v15  ;;  %v6394_v35 = vadd.f32 %v6360_v18, %v8908_v46  ;;  %v4800_v53 = vpop.f32.mrb[13].mxu0 }
 0x281   : > { %5119 = vst.msk [vmem:[%s8923_s22 + $0x20] sm:$0xf] %vm5110_vm7, %v5867_v27  ;;  %v5868_v8 = vpack.c.bf16 %v4959_v24, %v4959_v24  ;;  %v6395_v47 = vadd.f32 %v4800_v53, %v8910_v42  ;;  %v6361_v33 = vpop.f32.mrb[14].mxu0 }
 0x282   : > { %5122 = vst.msk [vmem:[%s8923_s22 + $0x2c] sm:$0xf] %vm5110_vm7, %v5870_v14  ;;  %v4932_v31 = vadd.f32 %v6394_v35, %v8916_v17  ;;  %v6396_v36 = vadd.f32 %v6361_v33, %v8912_v52  ;;  %v4803_v51 = vpop.f32.mrb[15].mxu0 }
 0x283   : > { %5120 = vst.msk [vmem:[%s8923_s22 + $0x24] sm:$0xf] %vm5110_vm7, %v5868_v8  ;;  %v4930_v46 = vadd.f32 %v6395_v47, %v8916_v17  ;;  %v6397_v37 = vadd.f32 %v4803_v51, %v8914_v19 }
 0x284   : > { %v4964_v29 = vmax.f32 %v4932_v31, 0.0  ;;  %v4933_v16 = vadd.f32 %v6396_v36, %v8916_v17 }
 0x285   : > { %v4962_v42 = vmax.f32 %v4930_v46, 0.0  ;;  %v4931_v43 = vadd.f32 %v6397_v37, %v8916_v17 }
 0x286   : > { %v5873_v56 = vpack.c.bf16 %v4964_v29, %v4964_v29  ;;  %v4965_v54 = vmax.f32 %v4933_v16, 0.0 }
 0x287   : > { %v5871_v49 = vpack.c.bf16 %v4962_v42, %v4962_v42  ;;  %v4963_v52 = vmax.f32 %v4931_v43, 0.0  ;;  %v6364_v60 = vpop.f32.mrb[16].mxu0 }
 0x288   : > { %5125 = vst.msk [vmem:[%s8923_s22 + $0x38] sm:$0xf] %vm5110_vm7, %v5873_v56  ;;  %v5874_v62 = vpack.c.bf16 %v4965_v54, %v4965_v54  ;;  %v6220_v48 = vpop.f32.mrb[16].mxu1  ;;  %v4816_v2 = vpop.f32.mrb[17].mxu0 }
 0x289   : > { %5123 = vst.msk [vmem:[%s8923_s22 + $0x30] sm:$0xf] %vm5110_vm7, %v5871_v49  ;;  %v5872_v19 = vpack.c.bf16 %v4963_v52, %v4963_v52  ;;  %v6398_v23 = vadd.f32 %v6364_v60, %v6220_v48  ;;  %v2743_v55 = vpop.f32.mrb[17].mxu1  ;;  %v6365_v9 = vpop.f32.mrb[18].mxu0 }
 0x28a   : > { %5126 = vst.msk [vmem:[%s8923_s22 + $0x3c] sm:$0xf] %vm5110_vm7, %v5874_v62  ;;  %v6399_v1 = vadd.f32 %v4816_v2, %v2743_v55  ;;  %v6221_v38 = vpop.f32.mrb[18].mxu1  ;;  %v4819_v22 = vpop.f32.mrb[19].mxu0 }
 0x28b   : > { %5124 = vst.msk [vmem:[%s8923_s22 + $0x34] sm:$0xf] %vm5110_vm7, %v5872_v19  ;;  %v4936_v39 = vadd.f32 %v6398_v23, %v8916_v17  ;;  %v6400_v10 = vadd.f32 %v6365_v9, %v6221_v38  ;;  %v2746_v30 = vpop.f32.mrb[19].mxu1 }
 0x28c   : > { %v4934_v12 = vadd.f32 %v6399_v1, %v8916_v17  ;;  %v6401_v0 = vadd.f32 %v4819_v22, %v2746_v30 }
 0x28d   : > { %v4968_v5 = vmax.f32 %v4936_v39, 0.0  ;;  %v4937_v59 = vadd.f32 %v6400_v10, %v8916_v17 }
 0x28e   : > { %v4966_v25 = vmax.f32 %v4934_v12, 0.0  ;;  %v4935_v21 = vadd.f32 %v6401_v0, %v8916_v17 }
 0x28f   : > { %v5877_v45 = vpack.c.bf16 %v4968_v5, %v4968_v5  ;;  %v4969_v13 = vmax.f32 %v4937_v59, 0.0  ;;  %v6368_v58 = vpop.f32.mrb[20].mxu0 }
 0x290   : > { %v5875_v4 = vpack.c.bf16 %v4966_v25, %v4966_v25  ;;  %v4967_v28 = vmax.f32 %v4935_v21, 0.0  ;;  %v6224_v57 = vpop.f32.mrb[20].mxu1  ;;  %v4832_v41 = vpop.f32.mrb[21].mxu0 }
 0x291   : > { %5129 = vst.msk [vmem:[%s8923_s22 + $0x48] sm:$0xf] %vm5110_vm7, %v5877_v45  ;;  %v5878_v26 = vpack.c.bf16 %v4969_v13, %v4969_v13  ;;  %v6402_v3 = vadd.f32 %v6368_v58, %v6224_v57  ;;  %v2759_v6 = vpop.f32.mrb[21].mxu1  ;;  %v6369_v40 = vpop.f32.mrb[22].mxu0 }
 0x292   : > { %5127 = vst.msk [vmem:[%s8923_s22 + $0x40] sm:$0xf] %vm5110_vm7, %v5875_v4  ;;  %v5876_v34 = vpack.c.bf16 %v4967_v28, %v4967_v28  ;;  %v6403_v7 = vadd.f32 %v4832_v41, %v2759_v6  ;;  %v6225_v32 = vpop.f32.mrb[22].mxu1  ;;  %v4835_v50 = vpop.f32.mrb[23].mxu0 }
 0x293   : > { %5130 = vst.msk [vmem:[%s8923_s22 + $0x4c] sm:$0xf] %vm5110_vm7, %v5878_v26  ;;  %v4940_v63 = vadd.f32 %v6402_v3, %v8916_v17  ;;  %v6404_v44 = vadd.f32 %v6369_v40, %v6225_v32  ;;  %v2762_v11 = vpop.f32.mrb[23].mxu1 }
 0x294   : > { %5128 = vst.msk [vmem:[%s8923_s22 + $0x44] sm:$0xf] %vm5110_vm7, %v5876_v34  ;;  %v4938_v20 = vadd.f32 %v6403_v7, %v8916_v17  ;;  %v6405_v61 = vadd.f32 %v4835_v50, %v2762_v11 }
 0x295   : > { %v4972_v15 = vmax.f32 %v4940_v63, 0.0  ;;  %v4941_v27 = vadd.f32 %v6404_v44, %v8916_v17 }
 0x296   : > { %v4970_v24 = vmax.f32 %v4938_v20, 0.0  ;;  %v4939_v18 = vadd.f32 %v6405_v61, %v8916_v17 }
 0x297   : > { %v5881_v14 = vpack.c.bf16 %v4972_v15, %v4972_v15  ;;  %v4973_v35 = vmax.f32 %v4941_v27, 0.0  ;;  %v6372_v53 = vpop.f32.mrb[24].mxu0 }
 0x298   : > { %v5879_v8 = vpack.c.bf16 %v4970_v24, %v4970_v24  ;;  %v4971_v47 = vmax.f32 %v4939_v18, 0.0  ;;  %v6228_v33 = vpop.f32.mrb[24].mxu1  ;;  %v4848_v31 = vpop.f32.mrb[25].mxu0 }
 0x299   : > { %5133 = vst.msk [vmem:[%s8923_s22 + $0x58] sm:$0xf] %vm5110_vm7, %v5881_v14  ;;  %v5882_v36 = vpack.c.bf16 %v4973_v35, %v4973_v35  ;;  %v6406_v51 = vadd.f32 %v6372_v53, %v6228_v33  ;;  %v2775_v46 = vpop.f32.mrb[25].mxu1  ;;  %v6373_v37 = vpop.f32.mrb[26].mxu0 }
 0x29a   : > { %5131 = vst.msk [vmem:[%s8923_s22 + $0x50] sm:$0xf] %vm5110_vm7, %v5879_v8  ;;  %v5880_v29 = vpack.c.bf16 %v4971_v47, %v4971_v47  ;;  %v6407_v16 = vadd.f32 %v4848_v31, %v2775_v46  ;;  %v6229_v42 = vpop.f32.mrb[26].mxu1  ;;  %v4851_v43 = vpop.f32.mrb[27].mxu0 }
 0x29b   : > { %5134 = vst.msk [vmem:[%s8923_s22 + $0x5c] sm:$0xf] %vm5110_vm7, %v5882_v36  ;;  %v4944_v56 = vadd.f32 %v6406_v51, %v8916_v17  ;;  %v6408_v54 = vadd.f32 %v6373_v37, %v6229_v42  ;;  %v2778_v49 = vpop.f32.mrb[27].mxu1 }
 0x29c   : > { %5132 = vst.msk [vmem:[%s8923_s22 + $0x54] sm:$0xf] %vm5110_vm7, %v5880_v29  ;;  %v4942_v52 = vadd.f32 %v6407_v16, %v8916_v17  ;;  %v6409_v60 = vadd.f32 %v4851_v43, %v2778_v49 }
 0x29d   : > { %v4976_v62 = vmax.f32 %v4944_v56, 0.0  ;;  %v4945_v48 = vadd.f32 %v6408_v54, %v8916_v17 }
 0x29e   : > { %v4974_v2 = vmax.f32 %v4942_v52, 0.0  ;;  %v4943_v19 = vadd.f32 %v6409_v60, %v8916_v17 }
 0x29f   : > { %v5885_v23 = vpack.c.bf16 %v4976_v62, %v4976_v62  ;;  %v4977_v55 = vmax.f32 %v4945_v48, 0.0  ;;  %v6376_v9 = vpop.f32.mrb[28].mxu0 }
 0x2a0   : > { %v5883_v1 = vpack.c.bf16 %v4974_v2, %v4974_v2  ;;  %v4975_v38 = vmax.f32 %v4943_v19, 0.0  ;;  %v6232_v22 = vpop.f32.mrb[28].mxu1  ;;  %v4864_v39 = vpop.f32.mrb[29].mxu0 }
 0x2a1   : > { %5137 = vst.msk [vmem:[%s8923_s22 + $0x68] sm:$0xf] %vm5110_vm7, %v5885_v23  ;;  %v5886_v10 = vpack.c.bf16 %v4977_v55, %v4977_v55  ;;  %v6410_v30 = vadd.f32 %v6376_v9, %v6232_v22  ;;  %v2791_v12 = vpop.f32.mrb[29].mxu1  ;;  %v6377_v0 = vpop.f32.mrb[30].mxu0 }
 0x2a2   : > { %5135 = vst.msk [vmem:[%s8923_s22 + $0x60] sm:$0xf] %vm5110_vm7, %v5883_v1  ;;  %v5884_v5 = vpack.c.bf16 %v4975_v38, %v4975_v38  ;;  %v6411_v59 = vadd.f32 %v4864_v39, %v2791_v12  ;;  %v6233_v25 = vpop.f32.mrb[30].mxu1  ;;  %v4867_v21 = vpop.f32.mrb[31].mxu0 }
 0x2a3   : > { %5138 = vst.msk [vmem:[%s8923_s22 + $0x6c] sm:$0xf] %vm5110_vm7, %v5886_v10  ;;  %v4948_v45 = vadd.f32 %v6410_v30, %v8916_v17  ;;  %v6412_v13 = vadd.f32 %v6377_v0, %v6233_v25  ;;  %v2794_v58 = vpop.f32.mrb[31].mxu1 }
 0x2a4   : > { %5136 = vst.msk [vmem:[%s8923_s22 + $0x64] sm:$0xf] %vm5110_vm7, %v5884_v5  ;;  %v4946_v4 = vadd.f32 %v6411_v59, %v8916_v17  ;;  %v6413_v28 = vadd.f32 %v4867_v21, %v2794_v58 }
 0x2a5   : > { %v4980_v57 = vmax.f32 %v4948_v45, 0.0  ;;  %v4949_v41 = vadd.f32 %v6412_v13, %v8916_v17 }
 0x2a6   : > { %v4978_v26 = vmax.f32 %v4946_v4, 0.0  ;;  %v4947_v3 = vadd.f32 %v6413_v28, %v8916_v17 }
 0x2a7   : > { %v5889_v6 = vpack.c.bf16 %v4980_v57, %v4980_v57  ;;  %v4981_v40 = vmax.f32 %v4949_v41, 0.0 }
 0x2a8   : > { %v5887_v34 = vpack.c.bf16 %v4978_v26, %v4978_v26  ;;  %v4979_v7 = vmax.f32 %v4947_v3, 0.0 }
 0x2a9   : > { %5141 = vst.msk [vmem:[%s8923_s22 + $0x78] sm:$0xf] %vm5110_vm7, %v5889_v6  ;;  %v5890_v32 = vpack.c.bf16 %v4981_v40, %v4981_v40 }
 0x2aa   : > { %5139 = vst.msk [vmem:[%s8923_s22 + $0x70] sm:$0xf] %vm5110_vm7, %v5887_v34  ;;  %v5888_v17 = vpack.c.bf16 %v4979_v7, %v4979_v7 }
 0x2ab   : > { %5142 = vst.msk [vmem:[%s8923_s22 + $0x7c] sm:$0xf] %vm5110_vm7, %v5890_v32 }
 0x2ac   : > { %5140 = vst.msk [vmem:[%s8923_s22 + $0x74] sm:$0xf] %vm5110_vm7, %v5888_v17 }
 0x2ad   : > { %6954 = shalt.err (!%p6951_p2)
}
 0x2ae   : > { %s6955_s28 = scalar_lea.hbm %s9022_s26, 2048  ;;  %s6959_s8 = scalar_lea.hbm %s9082_s3, 4096 }
 0x2af   : > { %p6956_p0 = scmp.ne.s32.totalorder %s9022_s26, %s6955_s28  ;;  %p6960_p6 = scmp.lt.u32.totalorder %s9022_s26, %s9082_s3 }
 0x2b0   : > { %p6961_p7 = scmp.lt.u32.totalorder %s6959_s8, %s6955_s28  ;;  %p6963_p8 = scmp.lt.u32.totalorder %s6955_s28, %s9022_s26 }
 0x2b1   : > { %p6957_p4 = pnand %p6956_p0, %p9175_p12 }
 0x2b2   : > { %p6962_p11 = por %p6961_p7, %p6960_p6 }
 0x2b3   : > { %p6958_p13 = pneg %p6957_p4 }
 0x2b4   : > { %p6964_p1 = por %p6963_p8, %p6962_p11 }
 0x2b6   : > { %p6965_p10 = pnand %p6964_p1, %p6958_p13 }
 0x2b8   : > { %6968 = shalt.err (!%p6965_p10)
}
 0x2b9   : > { %s7035_s22 = smov 64   ;;  %s7036_s24 = smov 4  }
 0x2ba   : > { %6651 = dma.vmem_to_hbm [thread:$0]  (%p9175_p12), %s9024_s11, 2048, %s9022_s26, %s5144_s15, %s7035_s22, %s7035_s22, %s7036_s24  }
 0x2bb PF: > { %s5173_s18 = sand.u32 1, %s7007_s12   ;;  %p9176_p3 = scmp.ne.s32.totalorder %s9108_s23, 0 }
 0x2bc   : > { %p9177_p5 = scmp.ge.s32.totalorder %s7027_s17, 2  ;;  %s5174_s5 = scalar_lea.sflag [#allocation4], %s5173_s18 }
 0x2be   : > { %p6665_p9 = pnand %p9177_p5, %p9176_p3 }
 0x2c0   : > { %7002 = dma.done.wait (!%p6665_p9), %s5174_s5, 2048  }
 0x2c1   : > { %7004 = vsyncadd (!%p6665_p9), %s5174_s5, 4294965248  ;;  %s20_s17 = sadd.s32 1, %s7027_s17   ;;  %s9178_s12 = smov %s7011_s13 }
 0x2c2   : > { %p17_p2 = scmp.ge.s32.totalorder %s20_s17, 4   ;;  %s9179_s13 = smov %s7015_s14 }
 0x2c3   : > { %s9180_s14 = smov %s7206_s6  ;;  %s9181_s15 = smov %s7023_s16 }
 0x2c4   : > { %s9182_s16 = smov %s9184_s25  ;;  %19 = sbr.rel (!%p17_p2) target bundleno = 7 (0x7), region = 97 }
 0x2cb   :  { %5179 = vsyncpa [#allocation3], 1 }
 0x2cc   :  { %5181 = vsyncpa [#allocation3 + $0x1], 1 }
 0x2cd   :  { %5182 = vsyncpa [#allocation6], 1 }
 0x2ce   :  { %5183 = vsyncpa [#allocation4], 1 }
 0x2cf   :  { %5185 = vsyncpa [#allocation4 + $0x1], 1 }

// kernel: fwd.6
= control target key start
LH: loop header
LB: loop body
LE: loop exit
PB: predicated region body
PF: predicated region fallthrough
CT: control target
= control target key end

     0   :  { %s9479_s0 = inlined_call_operand.hbm [shape: bf16[2,18,18,32], index: 0, kind: input, shape index: {}]   ;;  %s9480_s1 = inlined_call_operand.hbm [shape: bf16[9,32,32], index: 1, kind: input, shape index: {}]   ;;  %s9481_s2 = inlined_call_operand.hbm [shape: f32[1,32], index: 2, kind: input, shape index: {}]   ;;  %s9482_s3 = inlined_call_operand.hbm [shape: bf16[2,16,16,32], index: 3, kind: input, shape index: {}]   ;;  %s9483_s4 = inlined_call_operand.hbm [shape: bf16[2,16,16,32], index: 4, kind: output, shape index: {}]  }
   0x1   :  { %9508 = sst [smem:[#allocation35_spill]] %s9479_s0 }
   0x2   :  { %9509 = sst [smem:[#allocation36_spill]] %s9480_s1 }
   0x3   :  { %9510 = sst [smem:[#allocation37_spill]] %s9481_s2 }
   0x4   :  { %9 = vsyncpa [#allocation3], 0 }
   0x5   :  { %11 = vsyncpa [#allocation3 + $0x1], 0 }
   0x6   :  { %12 = vsyncpa [#allocation6], 0 }
   0x7   :  { %13 = vsyncpa [#allocation9], 0 }
   0x8   :  { %15 = vsyncpa [#allocation9 + $0x1], 0 }
   0x9   :  { %16 = vsyncpa [#allocation4], 0 }
   0xa   :  { %18 = vsyncpa [#allocation4 + $0x1], 0  ;;  %s7377_s15 = smov 0   ;;  %s7379_s16 = smov 0  }
   0xb   :  { %s7381_s17 = smov 0   ;;  %s7383_s18 = smov 0  }
   0xc   :  { %s7385_s19 = smov 0   ;;  %s7387_s20 = smov 0  }
   0xd LB: > { %s5455_s21 = sadd.s32 4294967295, %s7341_s20   ;;  %s5456_s22 = sadd.s32 4294967294, %s7341_s20   ;;  %s7341_s20 = sphi %s7387_s20, %s24_s20   ;;  %s7337_s19 = sphi %s7385_s19, %s9595_s19   ;;  %s7333_s18 = sphi %s7383_s18, %s9594_s18   ;;  %s7329_s17 = sphi %s7381_s17, %s9593_s17   ;;  %s7325_s16 = sphi %s7379_s16, %s9592_s16   ;;  %s7321_s15 = sphi %s7377_s15, %s9591_s15  }
   0xe   : > { %p50_p0 = scmp.ne.s32.totalorder %s7329_s17, %s7325_s16  ;;  %p51_p1 = scmp.eq.s32.totalorder %s7341_s20, 0 }
   0xf   : > { %p56_p2 = scmp.ne.s32.totalorder %s7325_s16, %s7321_s15  ;;  %p7415_p3 = scmp.eq.s32.totalorder %s5455_s21, 0 }
  0x10   : > { %p162_p4 = scmp.eq.s32.totalorder %s5455_s21, 1  ;;  %p7419_p5 = por %p51_p1, %p50_p0 }
  0x11   : > { %s9511_s24 = scalar_select %p7415_p3, 1, 0 }
  0x12   : > { %p168_p6 = scmp.eq.s32.totalorder %s5456_s22, 1  ;;  %p7425_p7 = por %p7415_p3, %p56_p2 }
  0x13   : > { %p7429_p8 = por %p162_p4, %p50_p0  ;;  %p5457_p10 = scmp.ge.s32.totalorder %s7341_s20, 1 }
  0x14   : > { %s9513_s26 = scalar_select %p7425_p7, 1, 0 }
  0x15   : > { %s9514_s27 = scalar_select %p7429_p8, 1, 0 }
  0x16   : > { %p7433_p9 = por %p168_p6, %p56_p2  ;;  %p175_p11 = scmp.lt.s32.totalorder %s7341_s20, 3 }
  0x17   : > { %s7343_s30 = smov [#allocation5]   ;;  %s7344_s7 = smov [#allocation7]  }
  0x18   : > { %s9515_s28 = scalar_select %p7433_p9, 1, 0 }
  0x19   : > { %p7439_p12 = pnand %p5457_p10, %p175_p11  ;;  %s189_s5 = sshll.u32 %s7343_s30, 4  ;;  %s7443_s5 = int_to_ptr.vmem [resolvable:$true] %s189_s5 }
  0x1a   : > { %s205_s8 = sshll.u32 %s7344_s7, 4  ;;  %s9518_s1 = sld [smem:[#allocation36_spill]]  ;;  %s7454_s8 = int_to_ptr.vmem [resolvable:$true] %s205_s8 }
  0x1b   : > { %p6930_p13 = pneg %p7439_p12 }
  0x1d   : > { %p7450_p1 = pnand %p6930_p13, %p7415_p3 }
  0x1f   : > { %p7137_p4 = pneg %p7450_p1 }
  0x20   : > { %s7135_s12 = scalar_lea.hbm %s9518_s1, 2304 }
  0x21   : > { %p7136_p2 = scmp.ne.s32.totalorder %s9518_s1, %s7135_s12  ;;  %p7142_p11 = scmp.lt.u32.totalorder %s7135_s12, %s9518_s1 }
  0x23   : > { %p7138_p6 = pnand %p7137_p4, %p7136_p2 }
  0x25   : > { %p7139_p10 = pneg %p7138_p6 }
  0x27   : > { %p7144_p13 = pnand %p7142_p11, %p7139_p10 }
  0x29   : > { %7147 = shalt.err (!%p7144_p13)
}
  0x2a   : > { %s7148_s30 = scalar_lea.vmem %s7443_s5, 2304  ;;  %p7156_p3 = scmp.lt.s32.totalorder %s7443_s5, %s7443_s5 }
  0x2b   : > { %p7149_p0 = scmp.ne.s32.totalorder %s7443_s5, %s7148_s30  ;;  %p7157_p2 = scmp.lt.s32.totalorder %s7148_s30, %s7148_s30 }
  0x2d   : > { %p7151_p9 = pnand %p7149_p0, %p7137_p4  ;;  %p7158_p6 = por %p7157_p2, %p7156_p3 }
  0x2f   : > { %p7152_p8 = pneg %p7151_p9 }
  0x31   : > { %p7159_p7 = pnand %p7158_p6, %p7152_p8 }
  0x33   : > { %7162 = shalt.err (!%p7159_p7)
}
  0x34   : > { %s9488_s7 = smov 64   ;;  %s7346_s10 = smov 4  }
  0x35   : > { %6933 = dma.hbm_to_vmem [thread:$0]  (!%p7450_p1), %s9518_s1, 2304, %s7443_s5, [#allocation6], %s9488_s7, %s9488_s7, %s7346_s10  }
  0x36   : > { %s9519_s2 = sld [smem:[#allocation37_spill]] }
  0x3c   : > { %s7163_s21 = scalar_lea.hbm %s9519_s2, 16 }
  0x3d   : > { %p7164_p3 = scmp.ne.s32.totalorder %s9519_s2, %s7163_s21  ;;  %p7170_p9 = scmp.lt.u32.totalorder %s7163_s21, %s9519_s2 }
  0x3f   : > { %p7166_p7 = pnand %p7164_p3, %p7137_p4 }
  0x41   : > { %p7167_p8 = pneg %p7166_p7 }
  0x43   : > { %p7172_p0 = pnand %p7170_p9, %p7167_p8 }
  0x45   : > { %7175 = shalt.err (!%p7172_p0)
}
  0x46   : > { %s7176_s5 = scalar_lea.vmem %s7454_s8, 16  ;;  %s7183_s11 = scalar_lea.vmem %s7454_s8, 32 }
  0x47   : > { %p7177_p10 = scmp.ne.s32.totalorder %s7454_s8, %s7176_s5  ;;  %p7184_p2 = scmp.lt.s32.totalorder %s7454_s8, %s7454_s8 }
  0x48   : > { %p7185_p6 = scmp.lt.s32.totalorder %s7183_s11, %s7176_s5 }
  0x49   : > { %p7179_p11 = pnand %p7177_p10, %p7137_p4 }
  0x4a   : > { %p7186_p3 = por %p7185_p6, %p7184_p2 }
  0x4b   : > { %p7180_p13 = pneg %p7179_p11 }
  0x4d   : > { %p7187_p7 = pnand %p7186_p3, %p7180_p13 }
  0x4f   : > { %7190 = shalt.err (!%p7187_p7)
}
  0x50   : > { %6936 = dma.hbm_to_vmem [thread:$0]  (!%p7450_p1), %s9519_s2, 16, %s7454_s8, [#allocation6]  }
  0x51   : > { %s9520_s12 = sadd.s32 1, %s7337_s19  ;;  %p6950_p8 = scmp.lt.s32.totalorder %s7341_s20, 2 }
  0x52   : > { %p38_p4 = scmp.ge.s32.totalorder %s9520_s12, 2  ;;  %s7517_s13 = sand.u32 1, %s7329_s17  }
  0x53   : > { %s6914_s6 = smul.u32 3456, %s7337_s19  ;;  %s9521_s14 = smov %s9520_s12 }
  0x54   : > { %s9597_s14 = smov (%p38_p4, %s9521_s14), 0  ;;  %s6913_s21 = smul.u32 216, %s7517_s13 }
  0x55   : > { %s40_s22 = ssub.s32 %s7337_s19, %s9597_s14  ;;  %s9522_s0 = sld [smem:[#allocation35_spill]] }
  0x56   : > { %p41_p1 = scmp.eq.s32.totalorder %s40_s22, 0  ;;  %s220_s8 = scalar_lea.vmem [#allocation2], %s6913_s21 }
  0x57   : > { %s227_s23 = sshll.u32 %s220_s8, 4  ;;  %p7534_p9 = pnand %p6950_p8, %p7419_p5  ;;  %s7543_s23 = int_to_ptr.vmem [resolvable:$true] %s227_s23 }
  0x58   : > { %s9524_s12 = sadd.s32 1, %s7329_s17 }
  0x59   : > { %s7541_s7 = scalar_select %p41_p1, %s7329_s17, %s9524_s12  }
  0x5a   : > { %p7193_p10 = pneg %p7534_p9 }
  0x5b   : > { %s7530_s11 = scalar_lea.hbm %s9522_s0, %s6914_s6  ;;  %s217_s6 = scalar_lea.sflag [#allocation3], %s7517_s13 }
  0x5c   : > { %s7191_s30 = scalar_lea.hbm %s7530_s11, 3456  ;;  %s7196_s22 = scalar_lea.hbm %s9522_s0, 6912 }
  0x5d   : > { %p7192_p0 = scmp.ne.s32.totalorder %s7530_s11, %s7191_s30  ;;  %p7197_p5 = scmp.lt.u32.totalorder %s7530_s11, %s9522_s0 }
  0x5e   : > { %p7198_p2 = scmp.lt.u32.totalorder %s7196_s22, %s7191_s30  ;;  %p7200_p3 = scmp.lt.u32.totalorder %s7191_s30, %s7530_s11 }
  0x5f   : > { %p7194_p11 = pnand %p7193_p10, %p7192_p0 }
  0x60   : > { %p7199_p6 = por %p7198_p2, %p7197_p5 }
  0x61   : > { %p7195_p13 = pneg %p7194_p11 }
  0x62   : > { %p7201_p7 = por %p7200_p3, %p7199_p6 }
  0x64   : > { %p7202_p4 = pnand %p7201_p7, %p7195_p13 }
  0x66   : > { %7205 = shalt.err (!%p7202_p4)
}
  0x67   : > { %s7206_s12 = scalar_lea.vmem %s7543_s23, 3456  ;;  %s7347_s25 = smov [#allocation2]  }
  0x68   : > { %p7207_p8 = scmp.ne.s32.totalorder %s7543_s23, %s7206_s12  ;;  %s7211_s21 = sshll.u32 %s7347_s25, 4  ;;  %s7212_s21 = int_to_ptr.vmem [resolvable:$false] %s7211_s21 }
  0x69   : > { %s7213_s5 = scalar_lea.vmem %s7212_s21, 6912  ;;  %p7214_p11 = scmp.lt.s32.totalorder %s7543_s23, %s7212_s21 }
  0x6a   : > { %p7209_p1 = pnand %p7207_p8, %p7193_p10  ;;  %p7215_p5 = scmp.lt.s32.totalorder %s7213_s5, %s7206_s12 }
  0x6c   : > { %p7210_p0 = pneg %p7209_p1  ;;  %p7216_p2 = por %p7215_p5, %p7214_p11 }
  0x6e   : > { %p7217_p6 = pnand %p7216_p2, %p7210_p0 }
  0x70   : > { %7220 = shalt.err (!%p7217_p6)
}
  0x71   : > { %s9525_s30 = smov 64   ;;  %s5462_s22 = sshll.u32 %s7517_s13, 7 }
  0x72   : > { %6940 = dma.hbm_to_vmem [thread:$0]  (!%p7534_p9), %s7530_s11, 3456, %s7543_s23, %s217_s6, %s9525_s30, %s9525_s30, %s7346_s10  }
  0x73   : > { %s6054_s8 = sshll.u32 %s7337_s19, 11  ;;  %s241_s5 = scalar_lea.vmem [#allocation8], %s5462_s22 }
  0x74   : > { %s7581_s21 = scalar_lea.hbm %s9482_s3, %s6054_s8  ;;  %s249_s0 = sshll.u32 %s241_s5, 4  ;;  %s7583_s0 = int_to_ptr.vmem [resolvable:$true] %s249_s0 }
  0x75   : > { %s238_s1 = scalar_lea.sflag [#allocation9], %s7517_s13  ;;  %s7221_s2 = scalar_lea.hbm %s7581_s21, 2048 }
  0x76   : > { %p7222_p13 = scmp.ne.s32.totalorder %s7581_s21, %s7221_s2  ;;  %s7226_s6 = scalar_lea.hbm %s9482_s3, 4096 }
  0x77   : > { %p7227_p4 = scmp.lt.u32.totalorder %s7581_s21, %s9482_s3  ;;  %p7228_p8 = scmp.lt.u32.totalorder %s7226_s6, %s7221_s2 }
  0x78   : > { %p7224_p3 = pnand %p7222_p13, %p7193_p10  ;;  %p7230_p0 = scmp.lt.u32.totalorder %s7221_s2, %s7581_s21 }
  0x79   : > { %p7229_p1 = por %p7228_p8, %p7227_p4 }
  0x7a   : > { %p7225_p7 = pneg %p7224_p3 }
  0x7b   : > { %p7231_p11 = por %p7230_p0, %p7229_p1 }
  0x7d   : > { %p7232_p5 = pnand %p7231_p11, %p7225_p7 }
  0x7f   : > { %7235 = shalt.err (!%p7232_p5)
}
  0x80   : > { %s7236_s22 = scalar_lea.vmem %s7583_s0, 2048  ;;  %s7348_s25 = smov [#allocation8]  }
  0x81   : > { %p7237_p2 = scmp.ne.s32.totalorder %s7583_s0, %s7236_s22  ;;  %s7241_s5 = sshll.u32 %s7348_s25, 4  ;;  %s7242_s5 = int_to_ptr.vmem [resolvable:$false] %s7241_s5 }
  0x82   : > { %s7243_s11 = scalar_lea.vmem %s7242_s5, 4096  ;;  %p7244_p3 = scmp.lt.s32.totalorder %s7583_s0, %s7242_s5 }
  0x83   : > { %p7239_p6 = pnand %p7237_p2, %p7193_p10  ;;  %p7245_p4 = scmp.lt.s32.totalorder %s7243_s11, %s7236_s22 }
  0x85   : > { %p7240_p13 = pneg %p7239_p6  ;;  %p7246_p8 = por %p7245_p4, %p7244_p3 }
  0x87   : > { %p7247_p1 = pnand %p7246_p8, %p7240_p13 }
  0x89   : > { %7250 = shalt.err (!%p7247_p1)
}
  0x8a   : > { %6943 = dma.hbm_to_vmem [thread:$0]  (!%p7534_p9), %s7581_s21, 2048, %s7583_s0, %s238_s1, %s9525_s30, %s9525_s30, %s7346_s10  }
  0x8b   : > { %261 = sbr.rel (%p7439_p12) target bundleno = 745 (0x2e9), region = 36 }
  0x92   : > { %s7617_s2 = sand.u32 1, %s7325_s16   ;;  %p9526_p10 = scmp.ne.s32.totalorder %s9513_s26, 0 }
  0x93   : > { %s6915_s23 = smul.u32 216, %s7617_s2  ;;  %s264_s6 = scalar_lea.sflag [#allocation3], %s7617_s2 }
  0x95   : > { %s7621_s9 = scalar_lea.vmem [#allocation2], %s6915_s23 }
  0x96   : > { %7304 = dma.done.wait (%p9526_p10), %s264_s6, 3456  }
  0x97   : > { %7306 = vsyncadd (%p9526_p10), %s264_s6, 4294963840  ;;  %p9527_p9 = scmp.ne.s32.totalorder %s9511_s24, 0 }
  0x99   : > { %7308 = dma.done.wait (%p9527_p9), [#allocation6], 2320  }
  0x9a   : > { %7310 = vsyncadd (%p9527_p9), [#allocation6], 4294964976  ;;  %s5468_s0 = sshll.u32 %s7617_s2, 7  ;;  %s281_s1 = scalar_lea.sflag [#allocation9], %s7617_s2 }
  0x9b   : > { %s7635_s29 = scalar_lea.vmem [#allocation8], %s5468_s0 }
  0x9c   : > { %7312 = dma.done.wait (%p9526_p10), %s281_s1, 2048  }
  0x9d   : > { %7314 = vsyncadd (%p9526_p10), %s281_s1, 4294965248  ;;  %vm367_vm0 = vsmask.f32 3328  ;;  %vm368_vm1 = vsmask.f32 7440  ;;  %v7008_v0 = vld [vmem:[#allocation5 + $0x10] sm:$0xff]  }
  0x9e   : > { %v7009_v1 = vld [vmem:[#allocation5 + $0x40] sm:$0xff]   ;;  %6329 = vmatprep.subr.bf16.mxu1 %v7008_v0  ;;  %v7010_v2 = vld [vmem:[#allocation5 + $0x18] sm:$0xff]   ;;  %v7011_v3 = vld [vmem:[#allocation5 + $0x48] sm:$0xff]   ;;  %vm819_vm3 = vcmask 261120   ;;  %vm1378_vm4 = vcmask 1042432   ;;  %vm1379_vm5 = vcmask 1046532  }
  0x9f   : > { %6473 = vmatprep.subr.bf16.mxu0 %v7009_v1  ;;  %6330 = vmatpush3.bf16.msra.mxu1 %v7008_v0  ;;  %v315_v4 = vld [vmem:[%s7621_s9] sm:$0xf]  ;;  %v316_v5 = vld [vmem:[%s7621_s9 + $0x4] sm:$0xf]  ;;  %v351_v6 = vld [vmem:[%s7621_s9 + $0x8] sm:$0x1] }
  0xa0   : > { %6474 = vmatpush3.bf16.msra.mxu0 %v7009_v1  ;;  %6331 = vmatprep.subr.bf16.mxu1 %v7010_v2  ;;  %v371_v7 = vshrl.u32 %v315_v4, 16  ;;  %v374_v8 = vshll.u32 %v315_v4, 16  ;;  %v380_v9 = vshll.u32 %v316_v5, 16  ;;  %v384_v10 = vshrl.u32 %v316_v5, 16  ;;  %v7644_v12 = vld [vmem:[#allocation5] sm:$0xff]   ;;  %v7646_v13 = vld [vmem:[#allocation5 + $0x50] sm:$0xff]   ;;  %vm7660_vm2 = vmor %vm367_vm0, %vm368_vm1 }
  0xa1   : > { %6475 = vmatprep.subr.bf16.mxu0 %v7011_v3  ;;  %v390_v11 = vshll.u32 %v351_v6, 16  ;;  %v5654_v18 = vld [vmem:[%s7621_s9 + $0xc] sm:$0xf]  ;;  %v7651_v20 = vld [vmem:[%s7621_s9 + $0x10] sm:$0xf]  ;;  %vm7877_vm6 = vmor %vm1378_vm4, %vm1379_vm5  ;;  %vm5276_vm7 = vcmask 257024  }
  0xa2   : > { %v373_v14 = vrot.slane %v371_v7, 4  ;;  %v376_v15 = vrot.slane %v374_v8, 5  ;;  %v382_v16 = vrot.slane %v380_v9, 5  ;;  %v386_v17 = vrot.slane %v384_v10, 4  ;;  %v7654_v21 = vld [vmem:[%s7621_s9 + $0x14] sm:$0x1] }
  0xa3   : > { %6332 = vmatpush3.bf16.msra.mxu1 %v7010_v2  ;;  %v392_v19 = vrot.slane %v390_v11, 5  ;;  %v2219_v22 = vshrl.u32 %v5654_v18, 16  ;;  %v2222_v25 = vshll.u32 %v5654_v18, 16  ;;  %v2228_v26 = vshll.u32 %v7651_v20, 16  ;;  %v317_v31 = vld [vmem:[%s7621_s9 + $0xc] sm:$0xf] }
  0xa4   : > { %6476 = vmatpush3.bf16.msra.mxu0 %v7011_v3  ;;  %6365 = vmatprep.subr.bf16.mxu1 %v7644_v12  ;;  %v377_v23 = vor.u32 %v376_v15, %v373_v14  ;;  %v387_v24 = vor.u32 %v386_v17, %v382_v16  ;;  %v2232_v29 = vshrl.u32 %v7651_v20, 16  ;;  %v2238_v30 = vshll.u32 %v7654_v21, 16  ;;  %v318_v36 = vld [vmem:[%s7621_s9 + $0x10] sm:$0xf]  ;;  %v352_v39 = vld [vmem:[%s7621_s9 + $0x14] sm:$0x1] }
  0xa5   : > { %6509 = vmatprep.subr.bf16.mxu0 %v7646_v13  ;;  %v2221_v28 = vrot.slane %v2219_v22, 4  ;;  %v2224_v34 = vrot.slane %v2222_v25, 5  ;;  %v2230_v35 = vrot.slane %v2228_v26, 5  ;;  %v395_v40 = vshrl.u32 %v317_v31, 16  ;;  %v5657_v49 = vld [vmem:[%s7621_s9 + $0x18] sm:$0xf] }
  0xa6   : > { %v378_v32 = vrot.slane %v377_v23, 4  ;;  %v388_v33 = vrot.slane %v387_v24, 4  ;;  %v2234_v37 = vrot.slane %v2232_v29, 4  ;;  %v2240_v38 = vrot.slane %v2238_v30, 5  ;;  %v7675_v54 = vld [vmem:[%s7621_s9 + $0x1c] sm:$0xf] }
  0xa7   : > { %v2225_v43 = vor.u32 %v2224_v34, %v2221_v28  ;;  %v398_v44 = vshll.u32 %v317_v31, 16  ;;  %v397_v47 = vrot.slane %v395_v40, 4  ;;  %v404_v48 = vshll.u32 %v318_v36, 16  ;;  %v7683_v63 = vld [vmem:[%s7621_s9 + $0x20] sm:$0x1]  ;;  %s9309_s24 = scalar_lea.vmem [#allocation10], %s5468_s0 }
  0xa8   : > { %v383_v41 = vsel %vm7660_vm2, %v378_v32, %v382_v16  ;;  %v393_v42 = vsel %vm7660_vm2, %v388_v33, %v392_v19  ;;  %v2235_v46 = vor.u32 %v2234_v37, %v2230_v35  ;;  %v408_v52 = vshrl.u32 %v318_v36, 16  ;;  %v319_v8 = vld [vmem:[%s7621_s9 + $0x18] sm:$0xf]  ;;  %v320_v19 = vld [vmem:[%s7621_s9 + $0x1c] sm:$0xf]  ;;  %s6087_s26 = sshll.u32 %s7333_s18, 11 }
  0xa9   : > { %v5470_v45 = vcombine.low %v383_v41, %v393_v42  ;;  %v2226_v50 = vrot.slane %v2225_v43, 4  ;;  %v400_v51 = vrot.slane %v398_v44, 5  ;;  %v414_v53 = vshll.u32 %v352_v39, 16  ;;  %v353_v25 = vld [vmem:[%s7621_s9 + $0x20] sm:$0x1]  ;;  %s5324_s10 = sshll.u32 %s9309_s24, 4  ;;  %s9422_s21 = scalar_lea.hbm %s9483_s4, %s6087_s26  ;;  %s9424_s10 = int_to_ptr.vmem [resolvable:$true] %s5324_s10 }
  0xaa   : > { %v2236_v55 = vrot.slane %v2235_v46, 4  ;;  %v2974_v56 = vrot.slane %v7651_v20, 5  ;;  %v2977_v57 = vrot.slane %v7654_v21, 5  ;;  %v406_v58 = vrot.slane %v404_v48, 5  ;;  %v5660_v32 = vld [vmem:[%s7621_s9 + $0x24] sm:$0xf] }
  0xab   : > { %6333 = vmatprep.mubr.msk.bf16.mxu1 %vm819_vm3, %v5470_v45  ;;  %v2231_v59 = vsel %vm7660_vm2, %v2226_v50, %v2230_v35  ;;  %v401_v60 = vor.u32 %v400_v51, %v397_v47  ;;  %v410_v61 = vrot.slane %v408_v52, 4  ;;  %v416_v62 = vrot.slane %v414_v53, 5  ;;  %v7015_v37 = vld [vmem:[#allocation5 + $0x8] sm:$0xff]   ;;  %v7706_v42 = vld [vmem:[%s7621_s9 + $0x28] sm:$0xf]  ;;  %s5310_s18 = scalar_lea.sflag [#allocation4], %s7617_s2 }
  0xac   : > { %v2241_v0 = vsel %vm7660_vm2, %v2236_v55, %v2240_v38  ;;  %v2243_v1 = vshrl.u32 %v5657_v49, 16  ;;  %v2246_v2 = vshll.u32 %v5657_v49, 16  ;;  %v2252_v3 = vshll.u32 %v7675_v54, 16  ;;  %v7712_v45 = vld [vmem:[%s7621_s9 + $0x2c] sm:$0x1]  ;;  %s7251_s8 = scalar_lea.vmem %s9424_s10, 2048 }
  0xad   : > { %v5702_v4 = vcombine.low %v2231_v59, %v2241_v0  ;;  %v402_v5 = vrot.slane %v401_v60, 4  ;;  %v411_v6 = vor.u32 %v410_v61, %v406_v58  ;;  %v2256_v7 = vshrl.u32 %v7675_v54, 16  ;;  %v7014_v48 = vld [vmem:[#allocation5 + $0x58] sm:$0xff]   ;;  %v321_v53 = vld [vmem:[%s7621_s9 + $0x24] sm:$0xf]  ;;  %p7252_p12 = scmp.ne.s32.totalorder %s9424_s10, %s7251_s8  ;;  %p9588_p7 = scmp.ne.s32.totalorder %s9514_s27, 0 }
  0xae   : > { %v2245_v9 = vrot.slane %v2243_v1, 4  ;;  %v2248_v10 = vrot.slane %v2246_v2, 5  ;;  %v2254_v11 = vrot.slane %v2252_v3, 5  ;;  %v2262_v14 = vshll.u32 %v7683_v63, 16  ;;  %v322_v55 = vld [vmem:[%s7621_s9 + $0x28] sm:$0xf] }
  0xaf   : > { %6477 = vmatprep.mubr.msk.bf16.mxu0 %vm819_vm3, %v5702_v4  ;;  %v407_v15 = vsel %vm7660_vm2, %v402_v5, %v406_v58  ;;  %v412_v16 = vrot.slane %v411_v6, 4  ;;  %v2258_v17 = vrot.slane %v2256_v7, 4  ;;  %v2981_v18 = vrot.slane %v7675_v54, 5  ;;  %v354_v5 = vld [vmem:[%s7621_s9 + $0x2c] sm:$0x1]  ;;  %p7253_p0 = pnand %p7252_p12, %p9588_p7  ;;  %s7349_s12 = smov [#allocation10]  }
  0xb0   : > { %v2249_v22 = vor.u32 %v2248_v10, %v2245_v9  ;;  %v2264_v23 = vrot.slane %v2262_v14, 5  ;;  %v2984_v24 = vrot.slane %v7683_v63, 5  ;;  %v419_v26 = vshrl.u32 %v319_v8, 16  ;;  %v5663_v14 = vld [vmem:[%s7621_s9 + $0x30] sm:$0xf]  ;;  %s7255_s22 = sshll.u32 %s7349_s12, 4  ;;  %s7256_s22 = int_to_ptr.vmem [resolvable:$false] %s7255_s22 }
  0xb1   : > { %v417_v28 = vsel %vm7660_vm2, %v412_v16, %v416_v62  ;;  %v2259_v29 = vor.u32 %v2258_v17, %v2254_v11  ;;  %v7702_v30 = vrot.slane %v2981_v18, 4  ;;  %v422_v31 = vshll.u32 %v319_v8, 16  ;;  %v7018_v62 = vld [vmem:[#allocation5 + $0x20] sm:$0xff]   ;;  %v5738_v63 = vld [vmem:[%s7621_s9 + $0x24] sm:$0xe]  ;;  %p7254_p11 = pneg %p7253_p0  ;;  %s7257_s25 = scalar_lea.vmem %s7256_s22, 4096 }
  0xb2   : > { %v5471_v33 = vcombine.low %v407_v15, %v417_v28  ;;  %v2250_v34 = vrot.slane %v2249_v22, 4  ;;  %v421_v35 = vrot.slane %v419_v26, 4  ;;  %v428_v36 = vshll.u32 %v320_v19, 16  ;;  %v7728_v22 = vld [vmem:[#allocation5 + $0x60] sm:$0xff]   ;;  %p7258_p5 = scmp.lt.s32.totalorder %s9424_s10, %s7256_s22  ;;  %p7259_p2 = scmp.lt.s32.totalorder %s7257_s25, %s7251_s8 }
  0xb3   : > { %v2260_v38 = vrot.slane %v2259_v29, 4  ;;  %v424_v39 = vrot.slane %v422_v31, 5  ;;  %v432_v40 = vshrl.u32 %v320_v19, 16  ;;  %v438_v41 = vshll.u32 %v353_v25, 16  ;;  %v7733_v28 = vld [vmem:[%s7621_s9 + $0x34] sm:$0xf] }
  0xb4   : > { %6334 = vmatmul.mubr.msk.bf16.vlgmr.msra.gmra.mrb[0].mxu1 %vm819_vm3, %v5471_v33  ;;  %v2255_v43 = vsel %vm7660_vm2, %v2250_v34, %v2254_v11  ;;  %v430_v44 = vrot.slane %v428_v36, 5  ;;  %v2267_v46 = vshrl.u32 %v5660_v32, 16  ;;  %v2270_v47 = vshll.u32 %v5660_v32, 16  ;;  %v7738_v34 = vld [vmem:[%s7621_s9 + $0x38] sm:$0x1]  ;;  %p7260_p6 = por %p7259_p2, %p7258_p5 }
  0xb5   : > { %6366 = vmatpush3.bf16.msra.mxu1 %v7644_v12  ;;  %v2265_v49 = vsel %vm7660_vm2, %v2260_v38, %v2264_v23  ;;  %v425_v50 = vor.u32 %v424_v39, %v421_v35  ;;  %v434_v51 = vrot.slane %v432_v40, 4  ;;  %v440_v52 = vrot.slane %v438_v41, 5  ;;  %v7906_v21 = vld [vmem:[%s7621_s9 + $0x78] sm:$0xf] }
  0xb6   : > { %v5703_v58 = vcombine.low %v2255_v43, %v2265_v49  ;;  %v2269_v59 = vrot.slane %v2267_v46, 4  ;;  %v2272_v60 = vrot.slane %v2270_v47, 5  ;;  %v2276_v61 = vshll.u32 %v7706_v42, 16  ;;  %6367 = vmatprep.subr.bf16.mxu1 %v7015_v37  ;;  %p7261_p13 = pnand %p7260_p6, %p7254_p11 }
  0xb7   : > { %v426_v0 = vrot.slane %v425_v50, 4  ;;  %v435_v1 = vor.u32 %v434_v51, %v430_v44  ;;  %v2280_v12 = vshrl.u32 %v7706_v42, 16  ;;  %v2286_v2 = vshll.u32 %v7712_v45, 16 }
  0xb8   : > { %6478 = vmatmul.mubr.msk.bf16.vlgmr.msra.gmra.mrb[0].mxu0 %vm819_vm3, %v5703_v58  ;;  %v2273_v3 = vor.u32 %v2272_v60, %v2269_v59  ;;  %v2278_v4 = vrot.slane %v2276_v61, 5  ;;  %v443_v6 = vshrl.u32 %v321_v53, 16  ;;  %v446_v7 = vshll.u32 %v321_v53, 16  ;;  %v355_v58 = vld [vmem:[%s7621_s9 + $0x38] sm:$0x1] }
  0xb9   : > { %6510 = vmatpush3.bf16.msra.mxu0 %v7646_v13  ;;  %v431_v8 = vsel %vm7660_vm2, %v426_v0, %v430_v44  ;;  %v436_v9 = vrot.slane %v435_v1, 4  ;;  %v2282_v10 = vrot.slane %v2280_v12, 4  ;;  %v2288_v11 = vrot.slane %v2286_v2, 5  ;;  %6368 = vmatpush3.bf16.msra.mxu1 %v7015_v37  ;;  %v323_v44 = vld [vmem:[%s7621_s9 + $0x30] sm:$0xf] }
  0xba   : > { %v2274_v15 = vrot.slane %v2273_v3, 4  ;;  %v445_v16 = vrot.slane %v443_v6, 4  ;;  %v448_v17 = vrot.slane %v446_v7, 5  ;;  %v452_v19 = vshll.u32 %v322_v55, 16  ;;  %6511 = vmatprep.subr.bf16.mxu0 %v7014_v48  ;;  %6401 = vmatprep.subr.bf16.mxu1 %v7018_v62  ;;  %v5666_v3 = vld [vmem:[%s7621_s9 + $0x3c] sm:$0xf] }
  0xbb   : > { %v441_v13 = vsel %vm7660_vm2, %v436_v9, %v440_v52  ;;  %v2283_v23 = vor.u32 %v2282_v10, %v2278_v4  ;;  %v456_v25 = vshrl.u32 %v322_v55, 16  ;;  %v462_v26 = vshll.u32 %v354_v5, 16 }
  0xbc   : > { %v5472_v29 = vcombine.low %v431_v8, %v441_v13  ;;  %v2279_v31 = vsel %vm7660_vm2, %v2274_v15, %v2278_v4  ;;  %v449_v32 = vor.u32 %v448_v17, %v445_v16  ;;  %v454_v33 = vrot.slane %v452_v19, 5  ;;  %v7757_v8 = vld [vmem:[%s7621_s9 + $0x40] sm:$0xf]  ;;  %v7760_v19 = vld [vmem:[%s7621_s9 + $0x44] sm:$0x1] }
  0xbd   : > { %v2284_v35 = vrot.slane %v2283_v23, 4  ;;  %v458_v36 = vrot.slane %v456_v25, 4  ;;  %v464_v37 = vrot.slane %v462_v26, 5  ;;  %v2291_v38 = vshrl.u32 %v5663_v14, 16  ;;  %6512 = vmatpush3.bf16.msra.mxu0 %v7014_v48  ;;  %v324_v48 = vld [vmem:[%s7621_s9 + $0x34] sm:$0xf] }
  0xbe   : > { %6337 = vmatprep.mubr.msk.bf16.mxu1 %vm819_vm3, %v5472_v29  ;;  %v450_v39 = vrot.slane %v449_v32, 4  ;;  %v2294_v40 = vshll.u32 %v5663_v14, 16  ;;  %v2300_v41 = vshll.u32 %v7733_v28, 16  ;;  %v2304_v43 = vshrl.u32 %v7733_v28, 16  ;;  %6545 = vmatprep.subr.bf16.mxu0 %v7728_v22  ;;  %v326_v32 = vld [vmem:[%s7621_s9 + $0x40] sm:$0xf] }
  0xbf   : > { %v2289_v46 = vsel %vm7660_vm2, %v2284_v35, %v2288_v11  ;;  %v459_v47 = vor.u32 %v458_v36, %v454_v33  ;;  %v2293_v49 = vrot.slane %v2291_v38, 4  ;;  %v2310_v50 = vshll.u32 %v7738_v34, 16 }
  0xc0   : > { %v5704_v51 = vcombine.low %v2279_v31, %v2289_v46  ;;  %v455_v52 = vsel %vm7660_vm2, %v450_v39, %v454_v33  ;;  %v2296_v53 = vrot.slane %v2294_v40, 5  ;;  %v2302_v55 = vrot.slane %v2300_v41, 5  ;;  %v325_v31 = vld [vmem:[%s7621_s9 + $0x3c] sm:$0xf] }
  0xc1   : > { %v460_v59 = vrot.slane %v459_v47, 4  ;;  %v2306_v60 = vrot.slane %v2304_v43, 4  ;;  %v2312_v61 = vrot.slane %v2310_v50, 5  ;;  %v467_v62 = vshrl.u32 %v323_v44, 16  ;;  %v356_v43 = vld [vmem:[%s7621_s9 + $0x44] sm:$0x1] }
  0xc2   : > { %6481 = vmatprep.mubr.msk.bf16.mxu0 %vm819_vm3, %v5704_v51  ;;  %v2297_v0 = vor.u32 %v2296_v53, %v2293_v49  ;;  %v470_v1 = vshll.u32 %v323_v44, 16  ;;  %v476_v12 = vshll.u32 %v324_v48, 16  ;;  %v480_v2 = vshrl.u32 %v324_v48, 16  ;;  %v5669_v53 = vld [vmem:[%s7621_s9 + $0x48] sm:$0xf] }
  0xc3   : > { %v465_v4 = vsel %vm7660_vm2, %v460_v59, %v464_v37  ;;  %v2307_v5 = vor.u32 %v2306_v60, %v2302_v55  ;;  %v469_v6 = vrot.slane %v467_v62, 4  ;;  %v486_v7 = vshll.u32 %v355_v58, 16 }
  0xc4   : > { %v5473_v9 = vcombine.low %v455_v52, %v465_v4  ;;  %v2298_v10 = vrot.slane %v2297_v0, 4  ;;  %v472_v11 = vrot.slane %v470_v1, 5  ;;  %v478_v14 = vrot.slane %v476_v12, 5 }
  0xc5   : > { %v2308_v15 = vrot.slane %v2307_v5, 4  ;;  %v482_v16 = vrot.slane %v480_v2, 4  ;;  %v488_v17 = vrot.slane %v486_v7, 5  ;;  %v2315_v13 = vshrl.u32 %v5666_v3, 16 }
  0xc6   : > { %6338 = vmatmul.mubr.msk.bf16.gmra.mrb[4].mxu1 %vm819_vm3, %v5473_v9  ;;  %v2303_v23 = vsel %vm7660_vm2, %v2298_v10, %v2302_v55  ;;  %v473_v25 = vor.u32 %v472_v11, %v469_v6  ;;  %v2318_v26 = vshll.u32 %v5666_v3, 16  ;;  %v2324_v29 = vshll.u32 %v7757_v8, 16  ;;  %v7786_v9 = vld [vmem:[%s7621_s9 + $0x50] sm:$0x1] }
  0xc7   : > { %v2313_v33 = vsel %vm7660_vm2, %v2308_v15, %v2312_v61  ;;  %v483_v35 = vor.u32 %v482_v16, %v478_v14  ;;  %v2317_v36 = vrot.slane %v2315_v13, 4  ;;  %v2328_v37 = vshrl.u32 %v7757_v8, 16  ;;  %v7780_v61 = vld [vmem:[%s7621_s9 + $0x4c] sm:$0xf] }
  0xc8   : > { %v5705_v38 = vcombine.low %v2303_v23, %v2313_v33  ;;  %v474_v39 = vrot.slane %v473_v25, 4  ;;  %v2320_v40 = vrot.slane %v2318_v26, 5  ;;  %v2326_v41 = vrot.slane %v2324_v29, 5  ;;  %v7795_v23 = vld [vmem:[%s7621_s9 + $0x4c] sm:$0xf] }
  0xc9   : > { %v484_v44 = vrot.slane %v483_v35, 4  ;;  %v2330_v46 = vrot.slane %v2328_v37, 4  ;;  %v2334_v47 = vshll.u32 %v7760_v19, 16  ;;  %v491_v49 = vshrl.u32 %v325_v31, 16 }
  0xca   : > { %6482 = vmatmul.mubr.msk.bf16.gmra.mrb[4].mxu0 %vm819_vm3, %v5705_v38  ;;  %v479_v50 = vsel %vm7660_vm2, %v474_v39, %v478_v14  ;;  %v2321_v48 = vor.u32 %v2320_v40, %v2317_v36  ;;  %v494_v51 = vshll.u32 %v325_v31, 16  ;;  %v500_v52 = vshll.u32 %v326_v32, 16  ;;  %v7790_v14 = vld [vmem:[%s7621_s9 + $0x48] sm:$0xf]  ;;  %v357_v39 = vld [vmem:[%s7621_s9 + $0x50] sm:$0x1] }
  0xcb   : > { %v489_v55 = vsel %vm7660_vm2, %v484_v44, %v488_v17  ;;  %v2331_v58 = vor.u32 %v2330_v46, %v2326_v41  ;;  %v2336_v59 = vrot.slane %v2334_v47, 5  ;;  %v493_v60 = vrot.slane %v491_v49, 4 }
  0xcc   : > { %v5474_v62 = vcombine.low %v479_v50, %v489_v55  ;;  %v2322_v0 = vrot.slane %v2321_v48, 4  ;;  %v496_v1 = vrot.slane %v494_v51, 5  ;;  %v502_v12 = vrot.slane %v500_v52, 5 }
  0xcd   : > { %v2332_v2 = vrot.slane %v2331_v58, 4  ;;  %v504_v3 = vshrl.u32 %v326_v32, 16  ;;  %v510_v4 = vshll.u32 %v356_v43, 16  ;;  %v2339_v5 = vshrl.u32 %v5669_v53, 16  ;;  %v5672_v43 = vld [vmem:[%s7621_s9 + $0x54] sm:$0xf] }
  0xce   : > { %6341 = vmatprep.mubr.msk.bf16.mxu1 %vm819_vm3, %v5474_v62  ;;  %v2327_v6 = vsel %vm7660_vm2, %v2322_v0, %v2326_v41  ;;  %v497_v7 = vor.u32 %v496_v1, %v493_v60  ;;  %v2342_v10 = vshll.u32 %v5669_v53, 16  ;;  %v2348_v11 = vshll.u32 %v7780_v61, 16 }
  0xcf   : > { %v2337_v15 = vsel %vm7660_vm2, %v2332_v2, %v2336_v59  ;;  %v506_v16 = vrot.slane %v504_v3, 4  ;;  %v512_v17 = vrot.slane %v510_v4, 5  ;;  %v2341_v13 = vrot.slane %v2339_v5, 4  ;;  %v7811_v59 = vld [vmem:[%s7621_s9 + $0x58] sm:$0xf] }
  0xd0   : > { %v5706_v25 = vcombine.low %v2327_v6, %v2337_v15  ;;  %v498_v26 = vrot.slane %v497_v7, 4  ;;  %v2344_v29 = vrot.slane %v2342_v10, 5  ;;  %v2350_v31 = vrot.slane %v2348_v11, 5  ;;  %v7816_v2 = vld [vmem:[%s7621_s9 + $0x5c] sm:$0x1] }
  0xd1   : > { %v507_v32 = vor.u32 %v506_v16, %v502_v12  ;;  %v2352_v33 = vshrl.u32 %v7780_v61, 16  ;;  %v2358_v35 = vshll.u32 %v7786_v9, 16  ;;  %v515_v36 = vshrl.u32 %v7790_v14, 16  ;;  %v7819_v3 = vld [vmem:[%s7621_s9 + $0x54] sm:$0xf] }
  0xd2   : > { %6485 = vmatprep.mubr.msk.bf16.mxu0 %vm819_vm3, %v5706_v25  ;;  %v503_v37 = vsel %vm7660_vm2, %v498_v26, %v502_v12  ;;  %v2345_v38 = vor.u32 %v2344_v29, %v2341_v13  ;;  %v518_v40 = vshll.u32 %v7790_v14, 16  ;;  %v524_v41 = vshll.u32 %v7795_v23, 16  ;;  %v7828_v26 = vld [vmem:[%s7621_s9 + $0x58] sm:$0xf] }
  0xd3   : > { %v508_v44 = vrot.slane %v507_v32, 4  ;;  %v2354_v46 = vrot.slane %v2352_v33, 4  ;;  %v2360_v47 = vrot.slane %v2358_v35, 5  ;;  %v517_v49 = vrot.slane %v515_v36, 4  ;;  %v358_v36 = vld [vmem:[%s7621_s9 + $0x5c] sm:$0x1] }
  0xd4   : > { %v2346_v50 = vrot.slane %v2345_v38, 4  ;;  %v520_v48 = vrot.slane %v518_v40, 5  ;;  %v526_v51 = vrot.slane %v524_v41, 5  ;;  %v528_v52 = vshrl.u32 %v7795_v23, 16  ;;  %v5675_v41 = vld [vmem:[%s7621_s9 + $0x60] sm:$0xf] }
  0xd5   : > { %v513_v53 = vsel %vm7660_vm2, %v508_v44, %v512_v17  ;;  %v2355_v55 = vor.u32 %v2354_v46, %v2350_v31  ;;  %v534_v58 = vshll.u32 %v357_v39, 16  ;;  %v2363_v60 = vshrl.u32 %v5672_v43, 16 }
  0xd6   : > { %v5475_v62 = vcombine.low %v503_v37, %v513_v53  ;;  %v2351_v0 = vsel %vm7660_vm2, %v2346_v50, %v2350_v31  ;;  %v521_v1 = vor.u32 %v520_v48, %v517_v49  ;;  %v530_v12 = vrot.slane %v528_v52, 4  ;;  %v7842_v52 = vld [vmem:[%s7621_s9 + $0x64] sm:$0xf] }
  0xd7   : > { %v2356_v4 = vrot.slane %v2355_v55, 4  ;;  %v536_v5 = vrot.slane %v534_v58, 5  ;;  %v2365_v6 = vrot.slane %v2363_v60, 4  ;;  %v2366_v7 = vshll.u32 %v5672_v43, 16  ;;  %v7845_v60 = vld [vmem:[%s7621_s9 + $0x68] sm:$0x1] }
  0xd8   : > { %6342 = vmatmul.mubr.msk.bf16.gmra.mrb[8].mxu1 %vm819_vm3, %v5475_v62  ;;  %v522_v10 = vrot.slane %v521_v1, 4  ;;  %v531_v11 = vor.u32 %v530_v12, %v526_v51  ;;  %v2372_v15 = vshll.u32 %v7811_v59, 16  ;;  %v2376_v16 = vshrl.u32 %v7811_v59, 16 }
  0xd9   : > { %v2361_v17 = vsel %vm7660_vm2, %v2356_v4, %v2360_v47  ;;  %v2368_v13 = vrot.slane %v2366_v7, 5  ;;  %v2382_v25 = vshll.u32 %v7816_v2, 16  ;;  %v539_v29 = vshrl.u32 %v7819_v3, 16 }
  0xda   : > { %v5707_v31 = vcombine.low %v2351_v0, %v2361_v17  ;;  %v527_v32 = vsel %vm7660_vm2, %v522_v10, %v526_v51  ;;  %v532_v33 = vrot.slane %v531_v11, 4  ;;  %v2374_v35 = vrot.slane %v2372_v15, 5  ;;  %v7852_v11 = vld [vmem:[%s7621_s9 + $0x60] sm:$0xf] }
  0xdb   : > { %v2369_v37 = vor.u32 %v2368_v13, %v2365_v6  ;;  %v2378_v38 = vrot.slane %v2376_v16, 4  ;;  %v2384_v39 = vrot.slane %v2382_v25, 5  ;;  %v541_v40 = vrot.slane %v539_v29, 4  ;;  %v7859_v25 = vld [vmem:[%s7621_s9 + $0x64] sm:$0xf] }
  0xdc   : > { %6486 = vmatmul.mubr.msk.bf16.gmra.mrb[8].mxu0 %vm819_vm3, %v5707_v31  ;;  %v537_v43 = vsel %vm7660_vm2, %v532_v33, %v536_v5  ;;  %v542_v44 = vshll.u32 %v7819_v3, 16  ;;  %v548_v46 = vshll.u32 %v7828_v26, 16  ;;  %v552_v47 = vshrl.u32 %v7828_v26, 16 }
  0xdd   : > { %v5476_v49 = vcombine.low %v527_v32, %v537_v43  ;;  %v2370_v50 = vrot.slane %v2369_v37, 4  ;;  %v2379_v48 = vor.u32 %v2378_v38, %v2374_v35  ;;  %v558_v51 = vshll.u32 %v358_v36, 16 }
  0xde   : > { %v544_v53 = vrot.slane %v542_v44, 5  ;;  %v550_v55 = vrot.slane %v548_v46, 5  ;;  %v554_v58 = vrot.slane %v552_v47, 4  ;;  %v2387_v62 = vshrl.u32 %v5675_v41, 16  ;;  %v5736_v46 = vld [vmem:[%s7621_s9 + $0xc] sm:$0xe] }
  0xdf   : > { %6345 = vmatprep.mubr.msk.bf16.mxu1 %vm819_vm3, %v5476_v49  ;;  %v2375_v0 = vsel %vm7660_vm2, %v2370_v50, %v2374_v35  ;;  %v2380_v1 = vrot.slane %v2379_v48, 4  ;;  %v560_v12 = vrot.slane %v558_v51, 5  ;;  %v2390_v4 = vshll.u32 %v5675_v41, 16  ;;  %v359_v35 = vld [vmem:[%s7621_s9 + $0x68] sm:$0x1] }
  0xe0   : > { %v545_v5 = vor.u32 %v544_v53, %v541_v40  ;;  %v555_v6 = vor.u32 %v554_v58, %v550_v55  ;;  %v2389_v7 = vrot.slane %v2387_v62, 4  ;;  %v2396_v10 = vshll.u32 %v7842_v52, 16  ;;  %v7872_v51 = vld [vmem:[%s7621_s9 + $0x6c] sm:$0xf] }
  0xe1   : > { %v2385_v15 = vsel %vm7660_vm2, %v2380_v1, %v2384_v39  ;;  %v2392_v16 = vrot.slane %v2390_v4, 5  ;;  %v2400_v17 = vshrl.u32 %v7842_v52, 16  ;;  %v2406_v13 = vshll.u32 %v7845_v60, 16 }
  0xe2   : > { %v5708_v29 = vcombine.low %v2375_v0, %v2385_v15  ;;  %v546_v31 = vrot.slane %v545_v5, 4  ;;  %v556_v32 = vrot.slane %v555_v6, 4  ;;  %v2398_v33 = vrot.slane %v2396_v10, 5  ;;  %v7887_v15 = vld [vmem:[%s7621_s9 + $0x70] sm:$0xf] }
  0xe3   : > { %v2393_v36 = vor.u32 %v2392_v16, %v2389_v7  ;;  %v2402_v37 = vrot.slane %v2400_v17, 4  ;;  %v2408_v38 = vrot.slane %v2406_v13, 5  ;;  %v563_v40 = vshrl.u32 %v7852_v11, 16 }
  0xe4   : > { %6489 = vmatprep.mubr.msk.bf16.mxu0 %vm819_vm3, %v5708_v29  ;;  %v551_v39 = vsel %vm7660_vm2, %v546_v31, %v550_v55  ;;  %v561_v41 = vsel %vm7660_vm2, %v556_v32, %v560_v12  ;;  %v566_v43 = vshll.u32 %v7852_v11, 16  ;;  %v572_v44 = vshll.u32 %v7859_v25, 16  ;;  %v360_v31 = vld [vmem:[%s7621_s9 + $0x74] sm:$0x1] }
  0xe5   : > { %v5477_v47 = vcombine.low %v551_v39, %v561_v41  ;;  %v2394_v49 = vrot.slane %v2393_v36, 4  ;;  %v2403_v50 = vor.u32 %v2402_v37, %v2398_v33  ;;  %v565_v48 = vrot.slane %v563_v40, 4 }
  0xe6   : > { %v568_v53 = vrot.slane %v566_v43, 5  ;;  %v574_v58 = vrot.slane %v572_v44, 5  ;;  %v576_v62 = vshrl.u32 %v7859_v25, 16  ;;  %v582_v55 = vshll.u32 %v359_v35, 16 }
  0xe7   : > { %6346 = vmatmul.mubr.msk.bf16.gmra.mrb[12].mxu1 %vm819_vm3, %v5477_v47  ;;  %v2399_v1 = vsel %vm7660_vm2, %v2394_v49, %v2398_v33  ;;  %v2404_v12 = vrot.slane %v2403_v50, 4  ;;  %v5752_v4 = vrot.slane %v5736_v46, 9  ;;  %v2976_v5 = vrot.slane %v2974_v56, 4  ;;  %v5737_v33 = vld [vmem:[%s7621_s9 + $0x18] sm:$0xe] }
  0xe8   : > { %v569_v6 = vor.u32 %v568_v53, %v565_v48  ;;  %v578_v7 = vrot.slane %v576_v62, 4  ;;  %v584_v10 = vrot.slane %v582_v55, 5  ;;  %v587_v16 = vshrl.u32 %v7872_v51, 16  ;;  %v7918_v48 = vld [vmem:[%s7621_s9 + $0x7c] sm:$0xf] }
  0xe9   : > { %v2409_v17 = vsel %vm7660_vm2, %v2404_v12, %v2408_v38  ;;  %v2975_v13 = vsel %vm7877_vm6, %v5752_v4, %v2974_v56  ;;  %v2978_v29 = vsel %vm7877_vm6, %v2976_v5, %v2977_v57  ;;  %v590_v32 = vshll.u32 %v7872_v51, 16  ;;  %v361_v55 = vld [vmem:[%s7621_s9 + $0x80] sm:$0x1]  ;;  %v7930_v5 = vld [vmem:[%s7621_s9 + $0x84] sm:$0xf] }
  0xea   : > { %v5709_v35 = vcombine.low %v2399_v1, %v2409_v17  ;;  %v570_v36 = vrot.slane %v569_v6, 4  ;;  %v579_v37 = vor.u32 %v578_v7, %v574_v58  ;;  %v5768_v40 = vcombine.low %v2975_v13, %v2978_v29 }
  0xeb   : > { %v589_v38 = vrot.slane %v587_v16, 4  ;;  %v592_v39 = vrot.slane %v590_v32, 5  ;;  %v596_v20 = vshll.u32 %v7887_v15, 16  ;;  %v600_v56 = vshrl.u32 %v7887_v15, 16  ;;  %v7019_v32 = vld [vmem:[#allocation5 + $0x68] sm:$0xff]  }
  0xec   : > { %6490 = vmatmul.mubr.msk.bf16.gmra.mrb[12].mxu0 %vm819_vm3, %v5709_v35  ;;  %v575_v57 = vsel %vm7660_vm2, %v570_v36, %v574_v58  ;;  %v580_v41 = vrot.slane %v579_v37, 4  ;;  %v606_v43 = vshll.u32 %v360_v31, 16  ;;  %v5753_v44 = vrot.slane %v5737_v33, 9  ;;  %v362_v31 = vld [vmem:[%s7621_s9 + $0x8c] sm:$0x1] }
  0xed   : > { %6513 = vmatprep.mubr.msk.bf16.mxu0 %vm819_vm3, %v5768_v40  ;;  %v593_v46 = vor.u32 %v592_v39, %v589_v38  ;;  %v598_v47 = vrot.slane %v596_v20, 5  ;;  %v602_v49 = vrot.slane %v600_v56, 4  ;;  %v2985_v50 = vsel %vm7877_vm6, %v7702_v30, %v2984_v24  ;;  %v5739_v40 = vld [vmem:[%s7621_s9 + $0x30] sm:$0xe] }
  0xee   : > { %v585_v53 = vsel %vm7660_vm2, %v580_v41, %v584_v10  ;;  %v608_v58 = vrot.slane %v606_v43, 5  ;;  %v2982_v62 = vsel %vm7877_vm6, %v5753_v44, %v2981_v18  ;;  %v611_v1 = vshrl.u32 %v7906_v21, 16  ;;  %v7936_v18 = vld [vmem:[%s7621_s9 + $0x88] sm:$0xf] }
  0xef   : > { %v5478_v12 = vcombine.low %v575_v57, %v585_v53  ;;  %v594_v4 = vrot.slane %v593_v46, 4  ;;  %v603_v24 = vor.u32 %v602_v49, %v598_v47  ;;  %v5769_v30 = vcombine.low %v2982_v62, %v2985_v50  ;;  %v7957_v50 = vld [vmem:[%s7621_s9 + $0x90] sm:$0xf] }
  0xf0   : > { %v613_v6 = vrot.slane %v611_v1, 4  ;;  %v614_v7 = vshll.u32 %v7906_v21, 16  ;;  %v620_v54 = vshll.u32 %v7918_v48, 16  ;;  %v624_v10 = vshrl.u32 %v7918_v48, 16  ;;  %v7962_v1 = vld [vmem:[%s7621_s9 + $0x94] sm:$0xf] }
  0xf1   : > { %6349 = vmatprep.mubr.msk.bf16.mxu1 %vm819_vm3, %v5478_v12  ;;  %v599_v16 = vsel %vm7660_vm2, %v594_v4, %v598_v47  ;;  %v604_v17 = vrot.slane %v603_v24, 4  ;;  %v630_v13 = vshll.u32 %v361_v55, 16  ;;  %v5754_v29 = vrot.slane %v5738_v63, 9 }
  0xf2   : > { %v616_v33 = vrot.slane %v614_v7, 5  ;;  %v622_v35 = vrot.slane %v620_v54, 5  ;;  %v626_v36 = vrot.slane %v624_v10, 4  ;;  %v2988_v37 = vrot.slane %v7706_v42, 5  ;;  %v7951_v42 = vld [vmem:[#allocation5 + $0x70] sm:$0xff]  }
  0xf3   : > { %v609_v38 = vsel %vm7660_vm2, %v604_v17, %v608_v58  ;;  %v632_v39 = vrot.slane %v630_v13, 5  ;;  %v2991_v20 = vrot.slane %v7712_v45, 5  ;;  %v635_v56 = vshrl.u32 %v7930_v5, 16  ;;  %v363_v54 = vld [vmem:[%s7621_s9 + $0x98] sm:$0x1] }
  0xf4   : > { %v5479_v57 = vcombine.low %v599_v16, %v609_v38  ;;  %6514 = vmatmul.mubr.msk.bf16.vlgmr.msra.gmra.mrb[0].mxu0 %vm819_vm3, %v5769_v30  ;;  %v617_v41 = vor.u32 %v616_v33, %v613_v6  ;;  %v627_v43 = vor.u32 %v626_v36, %v622_v35  ;;  %v2989_v44 = vsel %vm7877_vm6, %v5754_v29, %v2988_v37  ;;  %v5740_v36 = vld [vmem:[%s7621_s9 + $0x3c] sm:$0xe] }
  0xf5   : > { %6546 = vmatpush3.bf16.msra.mxu0 %v7728_v22  ;;  %v2990_v46 = vrot.slane %v2988_v37, 4  ;;  %v637_v47 = vrot.slane %v635_v56, 4  ;;  %v638_v49 = vshll.u32 %v7930_v5, 16  ;;  %v644_v45 = vshll.u32 %v7936_v18, 16  ;;  %v7983_v38 = vld [vmem:[%s7621_s9 + $0x9c] sm:$0xf] }
  0xf6   : > { %6350 = vmatmul.mubr.msk.bf16.gmra.mrb[16].mxu1 %vm819_vm3, %v5479_v57  ;;  %v618_v53 = vrot.slane %v617_v41, 4  ;;  %v628_v58 = vrot.slane %v627_v43, 4  ;;  %v648_v62 = vshrl.u32 %v7936_v18, 16  ;;  %v654_v55 = vshll.u32 %v362_v31, 16  ;;  %6547 = vmatprep.subr.bf16.mxu0 %v7019_v32  ;;  %v7987_v57 = vld [vmem:[%s7621_s9 + $0xa0] sm:$0xf] }
  0xf7   : > { %v2992_v22 = vsel %vm7877_vm6, %v2990_v46, %v2991_v20  ;;  %v640_v63 = vrot.slane %v638_v49, 5  ;;  %v646_v12 = vrot.slane %v644_v45, 5  ;;  %v5755_v4 = vrot.slane %v5739_v40, 9 }
  0xf8   : > { %v623_v24 = vsel %vm7660_vm2, %v618_v53, %v622_v35  ;;  %v633_v30 = vsel %vm7660_vm2, %v628_v58, %v632_v39  ;;  %v5770_v6 = vcombine.low %v2989_v44, %v2992_v22  ;;  %v650_v7 = vrot.slane %v648_v62, 4  ;;  %v364_v58 = vld [vmem:[%s7621_s9 + $0xa4] sm:$0x1] }
  0xf9   : > { %v5480_v10 = vcombine.low %v623_v24, %v633_v30  ;;  %v641_v16 = vor.u32 %v640_v63, %v637_v47  ;;  %v656_v17 = vrot.slane %v654_v55, 5  ;;  %v2995_v13 = vrot.slane %v7733_v28, 5  ;;  %6548 = vmatpush3.bf16.msra.mxu0 %v7019_v32 }
  0xfa   : > { %6517 = vmatprep.mubr.msk.bf16.mxu0 %vm819_vm3, %v5770_v6  ;;  %v651_v29 = vor.u32 %v650_v7, %v646_v12  ;;  %v2998_v31 = vrot.slane %v7738_v34, 5  ;;  %v659_v33 = vshrl.u32 %v7957_v50, 16  ;;  %v662_v35 = vshll.u32 %v7957_v50, 16  ;;  %6581 = vmatprep.subr.bf16.mxu0 %v7951_v42 }
  0xfb   : > { %6353 = vmatprep.mubr.msk.bf16.mxu1 %vm819_vm3, %v5480_v10  ;;  %v642_v37 = vrot.slane %v641_v16, 4  ;;  %v2996_v28 = vsel %vm7877_vm6, %v5755_v4, %v2995_v13  ;;  %v2997_v32 = vrot.slane %v2995_v13, 4  ;;  %v668_v40 = vshll.u32 %v7962_v1, 16  ;;  %v5741_v4 = vld [vmem:[%s7621_s9 + $0x48] sm:$0xe] }
  0xfc   : > { %v652_v34 = vrot.slane %v651_v29, 4  ;;  %v661_v39 = vrot.slane %v659_v33, 4  ;;  %v664_v20 = vrot.slane %v662_v35, 5  ;;  %v672_v56 = vshrl.u32 %v7962_v1, 16  ;;  %v8007_v16 = vld [vmem:[%s7621_s9 + $0xa8] sm:$0xf] }
  0xfd   : > { %v647_v41 = vsel %vm7660_vm2, %v642_v37, %v646_v12  ;;  %v2999_v43 = vsel %vm7877_vm6, %v2997_v32, %v2998_v31  ;;  %v670_v44 = vrot.slane %v668_v40, 5  ;;  %v678_v46 = vshll.u32 %v363_v54, 16  ;;  %v8013_v31 = vld [vmem:[%s7621_s9 + $0xac] sm:$0xf] }
  0xfe   : > { %v657_v47 = vsel %vm7660_vm2, %v652_v34, %v656_v17  ;;  %v5771_v49 = vcombine.low %v2996_v28, %v2999_v43  ;;  %v665_v45 = vor.u32 %v664_v20, %v661_v39  ;;  %v674_v53 = vrot.slane %v672_v56, 4  ;;  %v365_v39 = vld [vmem:[%s7621_s9 + $0xb0] sm:$0x1] }
  0xff   : > { %v5481_v62 = vcombine.low %v647_v41, %v657_v47  ;;  %v680_v55 = vrot.slane %v678_v46, 5  ;;  %v5756_v22 = vrot.slane %v5740_v36, 9  ;;  %v3002_v63 = vrot.slane %v7757_v8, 5 }
 0x100   : > { %6518 = vmatmul.mubr.msk.bf16.gmra.mrb[4].mxu0 %vm819_vm3, %v5771_v49  ;;  %v666_v12 = vrot.slane %v665_v45, 4  ;;  %v675_v24 = vor.u32 %v674_v53, %v670_v44  ;;  %v3005_v30 = vrot.slane %v7760_v19, 5  ;;  %v683_v6 = vshrl.u32 %v7983_v38, 16  ;;  %v5742_v45 = vld [vmem:[%s7621_s9 + $0x54] sm:$0xe] }
 0x101   : > { %6354 = vmatmul.mubr.msk.bf16.gmra.mrb[20].mxu1 %vm819_vm3, %v5481_v62  ;;  %v3003_v7 = vsel %vm7877_vm6, %v5756_v22, %v3002_v63  ;;  %v3004_v54 = vrot.slane %v3002_v63, 4  ;;  %v686_v10 = vshll.u32 %v7983_v38, 16  ;;  %v692_v8 = vshll.u32 %v7987_v57, 16 }
 0x102   : > { %v671_v17 = vsel %vm7660_vm2, %v666_v12, %v670_v44  ;;  %v676_v13 = vrot.slane %v675_v24, 4  ;;  %v685_v19 = vrot.slane %v683_v6, 4  ;;  %v696_v29 = vshrl.u32 %v7987_v57, 16 }
 0x103   : > { %v3006_v33 = vsel %vm7877_vm6, %v3004_v54, %v3005_v30  ;;  %v688_v35 = vrot.slane %v686_v10, 5  ;;  %v694_v36 = vrot.slane %v692_v8, 5  ;;  %v702_v37 = vshll.u32 %v364_v58, 16 }
 0x104   : > { %v681_v28 = vsel %vm7660_vm2, %v676_v13, %v680_v55  ;;  %v5772_v32 = vcombine.low %v3003_v7, %v3006_v33  ;;  %v698_v40 = vrot.slane %v696_v29, 4  ;;  %v5757_v34 = vrot.slane %v5741_v4, 9  ;;  %v8031_v55 = vld [vmem:[%s7621_s9 + $0xb4] sm:$0xf]  ;;  %v8039_v7 = vld [vmem:[%s7621_s9 + $0xb8] sm:$0xf] }
 0x105   : > { %v5482_v20 = vcombine.low %v671_v17, %v681_v28  ;;  %v689_v56 = vor.u32 %v688_v35, %v685_v19  ;;  %v704_v41 = vrot.slane %v702_v37, 5  ;;  %v3009_v43 = vrot.slane %v7780_v61, 5  ;;  %v366_v13 = vld [vmem:[%s7621_s9 + $0xbc] sm:$0x1] }
 0x106   : > { %6521 = vmatprep.mubr.msk.bf16.mxu0 %vm819_vm3, %v5772_v32  ;;  %v699_v44 = vor.u32 %v698_v40, %v694_v36  ;;  %v3012_v46 = vrot.slane %v7786_v9, 5  ;;  %v707_v47 = vshrl.u32 %v8007_v16, 16  ;;  %v710_v49 = vshll.u32 %v8007_v16, 16 }
 0x107   : > { %6357 = vmatprep.mubr.msk.bf16.mxu1 %vm819_vm3, %v5482_v20  ;;  %v690_v53 = vrot.slane %v689_v56, 4  ;;  %v3010_v58 = vsel %vm7877_vm6, %v5757_v34, %v3009_v43  ;;  %v3011_v62 = vrot.slane %v3009_v43, 4  ;;  %v716_v61 = vshll.u32 %v8013_v31, 16  ;;  %v5679_v56 = vld [vmem:[%s7621_s9 + $0x70] sm:$0xf] }
 0x108   : > { %v700_v22 = vrot.slane %v699_v44, 4  ;;  %v709_v9 = vrot.slane %v707_v47, 4  ;;  %v712_v63 = vrot.slane %v710_v49, 5  ;;  %v720_v4 = vshrl.u32 %v8013_v31, 16 }
 0x109   : > { %v695_v12 = vsel %vm7660_vm2, %v690_v53, %v694_v36  ;;  %v3013_v24 = vsel %vm7877_vm6, %v3011_v62, %v3012_v46  ;;  %v718_v30 = vrot.slane %v716_v61, 5  ;;  %v726_v6 = vshll.u32 %v365_v39, 16  ;;  %v5743_v36 = vld [vmem:[%s7621_s9 + $0x60] sm:$0xe] }
 0x10a   : > { %v705_v54 = vsel %vm7660_vm2, %v700_v22, %v704_v41  ;;  %v5773_v10 = vcombine.low %v3010_v58, %v3013_v24  ;;  %v713_v8 = vor.u32 %v712_v63, %v709_v9  ;;  %v722_v17 = vrot.slane %v720_v4, 4  ;;  %v5744_v41 = vld [vmem:[%s7621_s9 + $0x6c] sm:$0xe]  ;;  %v5680_v9 = vld [vmem:[%s7621_s9 + $0x74] sm:$0x1] }
 0x10b   : > { %v5483_v19 = vcombine.low %v695_v12, %v705_v54  ;;  %v728_v29 = vrot.slane %v726_v6, 5  ;;  %v5758_v33 = vrot.slane %v5742_v45, 9  ;;  %v3016_v35 = vrot.slane %v7811_v59, 5 }
 0x10c   : > { %6522 = vmatmul.mubr.msk.bf16.gmra.mrb[8].mxu0 %vm819_vm3, %v5773_v10  ;;  %v714_v37 = vrot.slane %v713_v8, 4  ;;  %v723_v28 = vor.u32 %v722_v17, %v718_v30  ;;  %v3019_v32 = vrot.slane %v7816_v2, 5  ;;  %v731_v40 = vshrl.u32 %v8031_v55, 16 }
 0x10d   : > { %6358 = vmatmul.mubr.msk.bf16.gmra.mrb[24].mxu1 %vm819_vm3, %v5483_v19  ;;  %v3017_v34 = vsel %vm7877_vm6, %v5758_v33, %v3016_v35  ;;  %v3018_v39 = vrot.slane %v3016_v35, 4  ;;  %v734_v20 = vshll.u32 %v8031_v55, 16  ;;  %v740_v59 = vshll.u32 %v8039_v7, 16  ;;  %v8076_v35 = vld [vmem:[%s7621_s9 + $0x80] sm:$0x1] }
 0x10e   : > { %v719_v43 = vsel %vm7660_vm2, %v714_v37, %v718_v30  ;;  %v724_v44 = vrot.slane %v723_v28, 4  ;;  %v733_v2 = vrot.slane %v731_v40, 4  ;;  %v744_v46 = vshrl.u32 %v8039_v7, 16  ;;  %v5745_v28 = vld [vmem:[%s7621_s9 + $0x78] sm:$0xe] }
 0x10f   : > { %v3020_v47 = vsel %vm7877_vm6, %v3018_v39, %v3019_v32  ;;  %v736_v49 = vrot.slane %v734_v20, 5  ;;  %v742_v45 = vrot.slane %v740_v59, 5  ;;  %v750_v53 = vshll.u32 %v366_v13, 16  ;;  %v5685_v32 = vld [vmem:[%s7621_s9 + $0x88] sm:$0xf] }
 0x110   : > { %v729_v58 = vsel %vm7660_vm2, %v724_v44, %v728_v29  ;;  %v5774_v62 = vcombine.low %v3017_v34, %v3020_v47  ;;  %v746_v61 = vrot.slane %v744_v46, 4  ;;  %v5759_v22 = vrot.slane %v5743_v36, 9  ;;  %v7074_v39 = vld [vmem:[%s7621_s9] sm:$0xf]  ;;  %v8088_v20 = vld [vmem:[%s7621_s9 + $0x4] sm:$0xf] }
 0x111   : > { %v5484_v63 = vcombine.low %v719_v43, %v729_v58  ;;  %v737_v4 = vor.u32 %v736_v49, %v733_v2  ;;  %v752_v12 = vrot.slane %v750_v53, 5  ;;  %v3023_v24 = vrot.slane %v7842_v52, 5  ;;  %v8071_v52 = vld [vmem:[%s7621_s9 + $0x7c] sm:$0xf]  ;;  %v5686_v2 = vld [vmem:[%s7621_s9 + $0x8c] sm:$0x1] }
 0x112   : > { %6525 = vmatprep.mubr.msk.bf16.mxu0 %vm819_vm3, %v5774_v62  ;;  %v747_v30 = vor.u32 %v746_v61, %v742_v45  ;;  %v3026_v6 = vrot.slane %v7845_v60, 5  ;;  %v5760_v54 = vrot.slane %v5744_v41, 9  ;;  %v3030_v10 = vrot.slane %v5679_v56, 5  ;;  %v5746_v41 = vld [vmem:[%s7621_s9 + $0x84] sm:$0xe] }
 0x113   : > { %6361 = vmatprep.mubr.msk.bf16.mxu1 %vm819_vm3, %v5484_v63  ;;  %v738_v8 = vrot.slane %v737_v4, 4  ;;  %v3024_v17 = vsel %vm7877_vm6, %v5759_v22, %v3023_v24  ;;  %v3025_v13 = vrot.slane %v3023_v24, 4  ;;  %v3033_v19 = vrot.slane %v5680_v9, 5  ;;  %v5688_v46 = vld [vmem:[%s7621_s9 + $0x94] sm:$0xf] }
 0x114   : > { %v748_v29 = vrot.slane %v747_v30, 4  ;;  %v3031_v60 = vsel %vm7877_vm6, %v5760_v54, %v3030_v10  ;;  %v3032_v33 = vrot.slane %v3030_v10, 4  ;;  %v5504_v59 = vcombine.low %v7074_v39, %v8088_v20  ;;  %v5747_v53 = vld [vmem:[%s7621_s9 + $0x90] sm:$0xe]  ;;  %v5689_v63 = vld [vmem:[%s7621_s9 + $0x98] sm:$0x1] }
 0x115   : > { %v743_v36 = vsel %vm7660_vm2, %v738_v8, %v742_v45  ;;  %v3027_v37 = vsel %vm7877_vm6, %v3025_v13, %v3026_v6  ;;  %v5761_v47 = vrot.slane %v5745_v28, 9  ;;  %v3037_v49 = vrot.slane %v8071_v52, 5  ;;  %v5691_v4 = vld [vmem:[%s7621_s9 + $0xa0] sm:$0xf]  ;;  %v8109_v24 = vld [vmem:[%s7621_s9 + $0x10] sm:$0xf] }
 0x116   : > { %v753_v40 = vsel %vm7660_vm2, %v748_v29, %v752_v12  ;;  %v5775_v34 = vcombine.low %v3024_v17, %v3027_v37  ;;  %v3034_v56 = vsel %vm7877_vm6, %v3032_v33, %v3033_v19  ;;  %v3040_v45 = vrot.slane %v8076_v35, 5  ;;  %v7076_v12 = vld [vmem:[%s7621_s9 + $0xc] sm:$0xf]  ;;  %v5692_v10 = vld [vmem:[%s7621_s9 + $0xa4] sm:$0x1] }
 0x117   : > { %v5485_v43 = vcombine.low %v743_v36, %v753_v40  ;;  %v5776_v44 = vcombine.low %v3031_v60, %v3034_v56  ;;  %v5762_v58 = vrot.slane %v5746_v41, 9  ;;  %v3044_v62 = vrot.slane %v5685_v32, 5  ;;  %v5748_v8 = vld [vmem:[%s7621_s9 + $0x9c] sm:$0xe]  ;;  %v7078_v13 = vld [vmem:[%s7621_s9 + $0x18] sm:$0xf] }
 0x118   : > { %6526 = vmatmul.mubr.msk.bf16.gmra.mrb[12].mxu0 %vm819_vm3, %v5775_v34  ;;  %v3038_v61 = vsel %vm7877_vm6, %v5761_v47, %v3037_v49  ;;  %v3039_v22 = vrot.slane %v3037_v49, 4  ;;  %v3047_v9 = vrot.slane %v5686_v2, 5  ;;  %v5505_v30 = vcombine.low %v7076_v12, %v8109_v24  ;;  %v8120_v19 = vld [vmem:[%s7621_s9 + $0x1c] sm:$0xf]  ;;  %v5694_v56 = vld [vmem:[%s7621_s9 + $0xac] sm:$0xf] }
 0x119   : > { %6362 = vmatmul.mubr.msk.bf16.gmra.mrb[28].mxu1 %vm819_vm3, %v5485_v43  ;;  %6529 = vmatprep.mubr.msk.bf16.mxu0 %vm819_vm3, %v5776_v44  ;;  %v3045_v6 = vsel %vm7877_vm6, %v5762_v58, %v3044_v62  ;;  %v3046_v54 = vrot.slane %v3044_v62, 4  ;;  %v5506_v29 = vcombine.low %v7078_v13, %v8120_v19  ;;  %v5763_v60 = vrot.slane %v5747_v53, 9  ;;  %v5697_v43 = vld [vmem:[%s7621_s9 + $0xb8] sm:$0xf]  ;;  %v5695_v58 = vld [vmem:[%s7621_s9 + $0xb0] sm:$0x1] }
 0x11a   : > { %6369 = vmatprep.mubr.msk.bf16.mxu1 %vm819_vm3, %v5504_v59  ;;  %v3041_v17 = vsel %vm7877_vm6, %v3039_v22, %v3040_v45  ;;  %v3051_v33 = vrot.slane %v5688_v46, 5  ;;  %v3054_v28 = vrot.slane %v5689_v63, 5  ;;  %v3058_v32 = vrot.slane %v5691_v4, 5  ;;  %v7028_v44 = vld [vmem:[#allocation5 + $0x28] sm:$0xff]   ;;  %v7080_v49 = vld [vmem:[#allocation5 + $0x20] sm:$0xff]   ;;  %v8143_v63 = vld [vmem:[#allocation5 + $0x30] sm:$0xff]  }
 0x11b   : > { %v5777_v36 = vcombine.low %v3038_v61, %v3041_v17  ;;  %v3048_v37 = vsel %vm7877_vm6, %v3046_v54, %v3047_v9  ;;  %v5764_v39 = vrot.slane %v5748_v8, 9  ;;  %v3061_v59 = vrot.slane %v5692_v10, 5  ;;  %v5749_v62 = vld [vmem:[%s7621_s9 + $0xa8] sm:$0xe]  ;;  %v5698_v22 = vld [vmem:[%s7621_s9 + $0xbc] sm:$0x1] }
 0x11c   : > { %v5778_v40 = vcombine.low %v3045_v6, %v3048_v37  ;;  %v3053_v34 = vrot.slane %v3051_v33, 4  ;;  %v3060_v41 = vrot.slane %v3058_v32, 4  ;;  %v3052_v2 = vsel %vm7877_vm6, %v5763_v60, %v3051_v33  ;;  %v5750_v9 = vld [vmem:[%s7621_s9 + $0xb4] sm:$0xe]  ;;  %v7081_v4 = vld [vmem:[%s7621_s9 + $0x24] sm:$0xf] }
 0x11d   : > { %v3065_v47 = vrot.slane %v5694_v56, 5  ;;  %v3059_v45 = vsel %vm7877_vm6, %v5764_v39, %v3058_v32  ;;  %v3072_v61 = vrot.slane %v5697_v43, 5  ;;  %v8147_v12 = vld [vmem:[%s7621_s9 + $0x28] sm:$0xf]  ;;  %v5765_v10 = vrot.slane %v5749_v62, 9 }
 0x11e   : > { %v3055_v46 = vsel %vm7877_vm6, %v3053_v34, %v3054_v28  ;;  %v3062_v53 = vsel %vm7877_vm6, %v3060_v41, %v3061_v59  ;;  %v3068_v17 = vrot.slane %v5695_v58, 5  ;;  %v7083_v13 = vld [vmem:[%s7621_s9 + $0x30] sm:$0xf]  ;;  %v5766_v33 = vrot.slane %v5750_v9, 9  ;;  %v5700_v28 = vld [vmem:[%s7621_s9 + $0xc4] sm:$0xf] }
 0x11f   : > { %v5779_v6 = vcombine.low %v3052_v2, %v3055_v46  ;;  %v5780_v54 = vcombine.low %v3059_v45, %v3062_v53  ;;  %v3067_v8 = vrot.slane %v3065_v47, 4  ;;  %v3075_v37 = vrot.slane %v5698_v22, 5  ;;  %v5701_v56 = vld [vmem:[%s7621_s9 + $0xc8] sm:$0x1]  ;;  %v5751_v41 = vld [vmem:[%s7621_s9 + $0xc0] sm:$0xe] }
 0x120   : > { %6530 = vmatmul.mubr.msk.bf16.gmra.mrb[16].mxu0 %vm819_vm3, %v5777_v36  ;;  %v3074_v36 = vrot.slane %v3072_v61, 4  ;;  %v3066_v32 = vsel %vm7877_vm6, %v5765_v10, %v3065_v47  ;;  %v3079_v34 = vrot.slane %v5700_v28, 5  ;;  %v3073_v39 = vsel %vm7877_vm6, %v5766_v33, %v3072_v61  ;;  %v7085_v43 = vld [vmem:[%s7621_s9 + $0x3c] sm:$0xf] }
 0x121   : > { %6370 = vmatmul.mubr.msk.bf16.vlgmr.msra.gmra.mrb[0].mxu1 %vm819_vm3, %v5505_v30  ;;  %6533 = vmatprep.mubr.msk.bf16.mxu0 %vm819_vm3, %v5778_v40  ;;  %v5507_v30 = vcombine.low %v7081_v4, %v8147_v12  ;;  %v3069_v40 = vsel %vm7877_vm6, %v3067_v8, %v3068_v17  ;;  %v3082_v53 = vrot.slane %v5701_v56, 5  ;;  %v5510_v58 = vcombine.low %v7790_v14, %v7795_v23  ;;  %v7029_v4 = vld [vmem:[%s7621_s9 + $0x18] sm:$0xff]   ;;  %v7087_v8 = vld [vmem:[%s7621_s9 + $0x8] sm:$0x1]  ;;  %v1334_v56 = vld [vmem:[%s7621_s9 + $0x30] sm:$0xe] }
 0x122   : > { %6402 = vmatpush3.bf16.msra.mxu1 %v7080_v49  ;;  %6373 = vmatprep.mubr.msk.bf16.mxu1 %vm819_vm3, %v5506_v29  ;;  %v8152_v29 = vld [vmem:[%s7621_s9 + $0x34] sm:$0xf]  ;;  %v3076_v59 = vsel %vm7877_vm6, %v3074_v36, %v3075_v37  ;;  %v5781_v46 = vcombine.low %v3066_v32, %v3069_v40  ;;  %v5767_v49 = vrot.slane %v5751_v41, 9  ;;  %v3081_v45 = vrot.slane %v3079_v34, 4  ;;  %v7032_v37 = vld [vmem:[%s7621_s9 + $0x24] sm:$0xff]  }
 0x123   : > { %6403 = vmatprep.subr.bf16.mxu1 %v7028_v44  ;;  %v5508_v60 = vcombine.low %v7083_v13, %v8152_v29  ;;  %v5782_v47 = vcombine.low %v3073_v39, %v3076_v59  ;;  %v2444_v22 = vshll.u32 %v8071_v52, 16  ;;  %v2448_v14 = vshrl.u32 %v8071_v52, 16  ;;  %v1330_v52 = vld [vmem:[%s7621_s9] sm:$0xe]  ;;  %v1333_v32 = vld [vmem:[%s7621_s9 + $0x24] sm:$0xe] }
 0x124   : > { %v3080_v62 = vsel %vm7877_vm6, %v5767_v49, %v3079_v34  ;;  %v3083_v61 = vsel %vm7877_vm6, %v3081_v45, %v3082_v53  ;;  %v5511_v9 = vcombine.low %v7819_v3, %v7828_v26  ;;  %v1386_v17 = vrot.slane %v7087_v8, 5  ;;  %v1331_v26 = vld [vmem:[%s7621_s9 + $0xc] sm:$0xe]  ;;  %v7034_v34 = vld [vmem:[%s7621_s9 + $0x30] sm:$0xff]  }
 0x125   : > { %v5783_v23 = vcombine.low %v3080_v62, %v3083_v61  ;;  %v8196_v10 = vrot.slane %v2448_v14, 4  ;;  %v1390_v13 = vrot.slane %v8109_v24, 5  ;;  %v1383_v3 = vrot.slane %v8088_v20, 5  ;;  %v7047_v45 = vld [vmem:[#allocation5 + $0x78] sm:$0xff]   ;;  %v7091_v62 = vld [vmem:[%s7621_s9 + $0x38] sm:$0x1] }
 0x126   : > { %6404 = vmatpush3.bf16.msra.mxu1 %v7028_v44  ;;  %v8173_v44 = vld [vmem:[%s7621_s9 + $0x40] sm:$0xf]  ;;  %v1397_v24 = vrot.slane %v8120_v19, 5  ;;  %v1404_v33 = vrot.slane %v8147_v12, 5  ;;  %v5513_v20 = vcombine.low %v7872_v51, %v7887_v15  ;;  %v5514_v28 = vcombine.low %v7906_v21, %v7918_v48  ;;  %v1335_v51 = vld [vmem:[%s7621_s9 + $0x3c] sm:$0xe] }
 0x127   : > { %6437 = vmatprep.subr.bf16.mxu1 %v8143_v63  ;;  %v5509_v2 = vcombine.low %v7085_v43, %v8173_v44  ;;  %v1411_v40 = vrot.slane %v8152_v29, 5  ;;  %v5515_v19 = vcombine.low %v7930_v5, %v7936_v18  ;;  %v5516_v12 = vcombine.low %v7957_v50, %v7962_v1  ;;  %v7089_v21 = vld [vmem:[%s7621_s9 + $0x20] sm:$0x1] }
 0x128   : > { %6534 = vmatmul.mubr.msk.bf16.gmra.mrb[20].mxu0 %vm819_vm3, %v5779_v6  ;;  %v5512_v6 = vcombine.low %v7852_v11, %v7859_v25  ;;  %v7088_v11 = vld [vmem:[%s7621_s9 + $0x14] sm:$0x1]  ;;  %v5538_v39 = vrot.slane %v1330_v52, 9  ;;  %v5539_v59 = vrot.slane %v1331_v26, 9  ;;  %v1385_v15 = vrot.slane %v1383_v3, 4 }
 0x129   : > { %6374 = vmatmul.mubr.msk.bf16.gmra.mrb[4].mxu1 %vm819_vm3, %v5507_v30  ;;  %6537 = vmatprep.mubr.msk.bf16.mxu0 %vm819_vm3, %v5780_v54  ;;  %v2454_v30 = vshll.u32 %v8076_v35, 16  ;;  %v8194_v54 = vrot.slane %v2444_v22, 5  ;;  %v1393_v25 = vrot.slane %v7088_v11, 5  ;;  %v1392_v41 = vrot.slane %v1390_v13, 4  ;;  %v8276_v11 = vld [vmem:[#allocation5 + $0x80] sm:$0xff]  }
 0x12a   : > { %6377 = vmatprep.mubr.msk.bf16.mxu1 %vm819_vm3, %v5508_v60  ;;  %v1332_v60 = vld [vmem:[%s7621_s9 + $0x18] sm:$0xe]  ;;  %v1400_v48 = vrot.slane %v7089_v21, 5  ;;  %v5541_v29 = vrot.slane %v1333_v32, 9  ;;  %v5542_v53 = vrot.slane %v1334_v56, 9  ;;  %v1414_v61 = vrot.slane %v7091_v62, 5 }
 0x12b   : > { %9532 = vst [vmem:[#allocation15_spill] sm:$0xff] %v8194_v54  ;;  %v8207_v35 = vrot.slane %v2454_v30, 5  ;;  %v2451_v36 = vor.u32 %v8196_v10, %v8194_v54  ;;  %v5540_v43 = vrot.slane %v1332_v60, 9  ;;  %v1418_v22 = vrot.slane %v8173_v44, 5  ;;  %v5869_v32 = vld [vmem:[%s7621_s9 + $0x1c] sm:$0xf] }
 0x12c   : > { %v5517_v14 = vcombine.low %v7983_v38, %v7987_v57  ;;  %v8250_v44 = vsel %vm7877_vm6, %v1385_v15, %v1386_v17  ;;  %v8254_v30 = vsel %vm7877_vm6, %v1392_v41, %v1393_v25  ;;  %v5543_v8 = vrot.slane %v1335_v51, 9  ;;  %v7094_v56 = vld [vmem:[%s7621_s9 + $0x58] sm:$0xf]  ;;  %v5871_v15 = vld [vmem:[%s7621_s9 + $0x24] sm:$0xf]  ;;  %v7038_v41 = vld [vmem:[%s7621_s9 + $0x48] sm:$0xff]  }
 0x12d   : > { %9533 = vst [vmem:[#allocation16_spill] sm:$0xff] %v8207_v35  ;;  %v8268_v17 = vsel %vm7877_vm6, %v5541_v29, %v1404_v33  ;;  %v8280_v25 = vsel %vm7877_vm6, %v5542_v53, %v1411_v40  ;;  %v1432_v51 = vrot.slane %v7094_v56, 5  ;;  %v5872_v29 = vld [vmem:[%s7621_s9 + $0x28] sm:$0xf]  ;;  %v7044_v38 = vld [vmem:[%s7621_s9 + $0x6c] sm:$0xff]  }
 0x130   : > { %6538 = vmatmul.mubr.msk.bf16.gmra.mrb[24].mxu0 %vm819_vm3, %v5781_v46  ;;  %v1406_v46 = vrot.slane %v1404_v33, 4  ;;  %v7093_v33 = vld [vmem:[%s7621_s9 + $0x44] sm:$0x1] }
 0x131   : > { %6378 = vmatmul.mubr.msk.bf16.gmra.mrb[8].mxu1 %vm819_vm3, %v5509_v2  ;;  %6541 = vmatprep.mubr.msk.bf16.mxu0 %vm819_vm3, %v5782_v47  ;;  %v1399_v2 = vrot.slane %v1397_v24, 4  ;;  %v7090_v47 = vld [vmem:[%s7621_s9 + $0x2c] sm:$0x1] }
 0x132   : > { %6381 = vmatprep.mubr.msk.bf16.mxu1 %vm819_vm3, %v5510_v58  ;;  %v1407_v49 = vrot.slane %v7090_v47, 5  ;;  %v1413_v58 = vrot.slane %v1411_v40, 4  ;;  %v5877_v40 = vld [vmem:[%s7621_s9 + $0x3c] sm:$0xf] }
 0x134   : > { %v8272_v52 = vsel %vm7877_vm6, %v1406_v46, %v1407_v49  ;;  %v8284_v60 = vsel %vm7877_vm6, %v1413_v58, %v1414_v61  ;;  %v7095_v58 = vld [vmem:[%s7621_s9 + $0x50] sm:$0x1]  ;;  %v1338_v61 = vld [vmem:[%s7621_s9 + $0x60] sm:$0xe] }
 0x135   : > { %v1428_v62 = vrot.slane %v7095_v58, 5  ;;  %v7040_v58 = vld [vmem:[%s7621_s9 + $0x54] sm:$0xff]   ;;  %v5546_v18 = vrot.slane %v1338_v61, 9 }
 0x138   : > { %6542 = vmatmul.mubr.msk.bf16.gmra.mrb[28].mxu0 %vm819_vm3, %v5783_v23  ;;  %v5518_v23 = vcombine.low %v8007_v16, %v8013_v31 }
 0x139   : > { %6382 = vmatmul.mubr.msk.bf16.gmra.mrb[12].mxu1 %vm819_vm3, %v5511_v9  ;;  %6549 = vmatprep.mubr.msk.bf16.mxu0 %vm819_vm3, %v7029_v4  ;;  %v8240_v9 = vsel %vm7877_vm6, %v5538_v39, %v1383_v3  ;;  %v8244_v4 = vsel %vm7877_vm6, %v5539_v59, %v1390_v13  ;;  %v1336_v13 = vld [vmem:[%s7621_s9 + $0x48] sm:$0xe]  ;;  %v7092_v3 = vld [vmem:[%s7621_s9 + $0x4c] sm:$0xf]  ;;  %v5519_v39 = vcombine.low %v8031_v55, %v8039_v7 }
 0x13a   : > { %6385 = vmatprep.mubr.msk.bf16.mxu1 %vm819_vm3, %v5512_v6  ;;  %v8258_v6 = vsel %vm7877_vm6, %v5540_v43, %v1397_v24  ;;  %v1425_v26 = vrot.slane %v7092_v3, 5  ;;  %v1420_v24 = vrot.slane %v1418_v22, 4  ;;  %v5554_v59 = vcombine.low %v8240_v9, %v8250_v44  ;;  %v1340_v43 = vld [vmem:[%s7621_s9 + $0x78] sm:$0xe] }
 0x13b   : > { %v1434_v3 = vrot.slane %v1432_v51, 4 }
 0x13c   : > { %v1427_v47 = vrot.slane %v1425_v26, 4 }
 0x13e   : > { %v8342_v50 = vsel %vm7877_vm6, %v1427_v47, %v1428_v62  ;;  %v5875_v47 = vld [vmem:[%s7621_s9 + $0x34] sm:$0xf] }
 0x140   : > { %6550 = vmatmul.mubr.msk.bf16.vlgmr.msra.gmra.mrb[0].mxu0 %vm819_vm3, %v7032_v37  ;;  %v1337_v37 = vld [vmem:[%s7621_s9 + $0x54] sm:$0xe] }
 0x141   : > { %6386 = vmatmul.mubr.msk.bf16.gmra.mrb[16].mxu1 %vm819_vm3, %v5513_v20  ;;  %6582 = vmatpush3.bf16.msra.mxu0 %v7951_v42  ;;  %v8264_v42 = vsel %vm7877_vm6, %v1399_v2, %v1400_v48  ;;  %v1421_v20 = vrot.slane %v7093_v33, 5  ;;  %v8306_v48 = vsel %vm7877_vm6, %v5543_v8, %v1418_v22  ;;  %v5544_v2 = vrot.slane %v1336_v13, 9  ;;  %v7096_v33 = vld [vmem:[%s7621_s9 + $0x5c] sm:$0x1] }
 0x142   : > { %6389 = vmatprep.mubr.msk.bf16.mxu1 %vm819_vm3, %v5514_v28  ;;  %6553 = vmatprep.mubr.msk.bf16.mxu0 %vm819_vm3, %v7034_v34  ;;  %v5868_v28 = vld [vmem:[%s7621_s9 + $0x18] sm:$0xf]  ;;  %v7036_v34 = vld [vmem:[%s7621_s9 + $0x3c] sm:$0xff]   ;;  %v3819_v22 = vshll.u32 %v5869_v32, 16  ;;  %v3823_v8 = vshrl.u32 %v5869_v32, 16  ;;  %v5545_v13 = vrot.slane %v1337_v37, 9 }
 0x143   : > { %6583 = vmatprep.subr.bf16.mxu0 %v7047_v45  ;;  %v3810_v49 = vshrl.u32 %v5868_v28, 16  ;;  %v8314_v53 = vsel %vm7877_vm6, %v1420_v24, %v1421_v20  ;;  %v1435_v56 = vrot.slane %v7096_v33, 5  ;;  %v5870_v24 = vld [vmem:[%s7621_s9 + $0x20] sm:$0x1]  ;;  %v3834_v20 = vshrl.u32 %v5871_v15, 16 }
 0x144   : > { %v3837_v32 = vshll.u32 %v5871_v15, 16  ;;  %v3847_v37 = vshrl.u32 %v5872_v29, 16  ;;  %v8334_v5 = vsel %vm7877_vm6, %v5544_v2, %v1425_v26  ;;  %v5873_v33 = vld [vmem:[%s7621_s9 + $0x2c] sm:$0x1]  ;;  %v8344_v1 = vrot.slane %v3819_v22, 5 }
 0x145   : > { %6584 = vmatpush3.bf16.msra.mxu0 %v7047_v45  ;;  %v3813_v45 = vshll.u32 %v5868_v28, 16  ;;  %v7097_v28 = vld [vmem:[%s7621_s9 + $0x64] sm:$0xf]  ;;  %v8349_v26 = vsel %vm7877_vm6, %v5545_v13, %v1432_v51  ;;  %v8353_v2 = vsel %vm7877_vm6, %v1434_v3, %v1435_v56  ;;  %v3836_v62 = vrot.slane %v3834_v20, 4  ;;  %v1339_v56 = vld [vmem:[%s7621_s9 + $0x6c] sm:$0xe] }
 0x146   : > { %6617 = vmatprep.subr.bf16.mxu0 %v8276_v11  ;;  %v1439_v46 = vrot.slane %v7097_v28, 5  ;;  %v7042_v28 = vld [vmem:[%s7621_s9 + $0x60] sm:$0xff]   ;;  %v3839_v22 = vrot.slane %v3837_v32, 5  ;;  %v3829_v3 = vshll.u32 %v5870_v24, 16  ;;  %v7099_v32 = vld [vmem:[%s7621_s9 + $0x70] sm:$0xf] }
 0x147   : > { %v3871_v24 = vshrl.u32 %v5875_v47, 16 }
 0x148   : > { %6554 = vmatmul.mubr.msk.bf16.gmra.mrb[4].mxu0 %vm819_vm3, %v7036_v34  ;;  %v3843_v34 = vshll.u32 %v5872_v29, 16  ;;  %v5874_v29 = vld [vmem:[%s7621_s9 + $0x30] sm:$0xf]  ;;  %v8363_v51 = vsel %vm7877_vm6, %v5546_v18, %v1439_v46  ;;  %v3867_v18 = vshll.u32 %v5875_v47, 16 }
 0x149   : > { %6390 = vmatmul.mubr.msk.bf16.gmra.mrb[20].mxu1 %vm819_vm3, %v5515_v19  ;;  %6557 = vmatprep.mubr.msk.bf16.mxu0 %vm819_vm3, %v7038_v41  ;;  %v3812_v19 = vrot.slane %v3810_v49, 4  ;;  %v3815_v41 = vrot.slane %v3813_v45, 5  ;;  %v1441_v49 = vrot.slane %v1439_v46, 4  ;;  %v7098_v45 = vld [vmem:[%s7621_s9 + $0x68] sm:$0x1]  ;;  %v3858_v21 = vshrl.u32 %v5874_v29, 16 }
 0x14a   : > { %6393 = vmatprep.mubr.msk.bf16.mxu1 %vm819_vm3, %v5516_v12  ;;  %v3825_v12 = vrot.slane %v3823_v8, 4  ;;  %v1442_v61 = vrot.slane %v7098_v45, 5  ;;  %v8357_v15 = vrot.slane %v3843_v34, 5  ;;  %v3849_v8 = vrot.slane %v3847_v37, 4 }
 0x14b   : > { %v3816_v13 = vor.u32 %v3815_v41, %v3812_v19  ;;  %v1446_v34 = vrot.slane %v7099_v32, 5  ;;  %v3853_v37 = vshll.u32 %v5873_v33, 16  ;;  %v3861_v46 = vshll.u32 %v5874_v29, 16  ;;  %v7100_v33 = vld [vmem:[%s7621_s9 + $0x7c] sm:$0xf] }
 0x14c   : > { %v3826_v20 = vor.u32 %v3825_v12, %v8344_v1  ;;  %v8379_v19 = vsel %vm7877_vm6, %v1441_v49, %v1442_v61  ;;  %v3840_v41 = vor.u32 %v3839_v22, %v3836_v62  ;;  %v1453_v12 = vrot.slane %v7100_v33, 5  ;;  %v5876_v49 = vld [vmem:[%s7621_s9 + $0x38] sm:$0x1] }
 0x14d   : > { %v3817_v57 = vrot.slane %v3816_v13, 4  ;;  %v3831_v29 = vrot.slane %v3829_v3, 5  ;;  %v7046_v61 = vld [vmem:[%s7621_s9 + $0x78] sm:$0xff]   ;;  %v1448_v22 = vrot.slane %v1446_v34, 4  ;;  %v5548_v32 = vrot.slane %v1340_v43, 9 }
 0x14e   : > { %v3827_v62 = vrot.slane %v3826_v20, 4  ;;  %v3860_v33 = vrot.slane %v3858_v21, 4  ;;  %v3863_v45 = vrot.slane %v3861_v46, 5  ;;  %v8391_v16 = vrot.slane %v3867_v18, 5  ;;  %v8534_v20 = vld [vmem:[#allocation5 + $0x40] sm:$0xff]  }
 0x14f   : > { %v3873_v31 = vrot.slane %v3871_v24, 4  ;;  %v1455_v3 = vrot.slane %v1453_v12, 4  ;;  %v3822_v43 = vsel %vm7660_vm2, %v3817_v57, %v8344_v1  ;;  %v8412_v24 = vsel %vm7877_vm6, %v5548_v32, %v1453_v12  ;;  %v8417_v1 = vld [vmem:[%s7621_s9 + $0x40] sm:$0xf]  ;;  %9544 = vst [vmem:[#allocation25_spill] sm:$0xff] %v8534_v20 }
 0x150   : > { %6558 = vmatmul.mubr.msk.bf16.gmra.mrb[8].mxu0 %vm819_vm3, %v7040_v58  ;;  %v3850_v58 = vor.u32 %v3849_v8, %v8357_v15  ;;  %v3855_v8 = vrot.slane %v3853_v37, 5  ;;  %v3877_v37 = vshll.u32 %v5876_v49, 16  ;;  %v3832_v46 = vsel %vm7660_vm2, %v3827_v62, %v3831_v29  ;;  %9534 = vst [vmem:[#allocation17_spill] sm:$0xff] %v8417_v1  ;;  %v7104_v49 = vld [vmem:[%s7621_s9 + $0x8c] sm:$0x1] }
 0x151   : > { %6394 = vmatmul.mubr.msk.bf16.gmra.mrb[24].mxu1 %vm819_vm3, %v5517_v14  ;;  %6561 = vmatprep.mubr.msk.bf16.mxu0 %vm819_vm3, %v7042_v28  ;;  %v5547_v14 = vrot.slane %v1339_v56, 9  ;;  %v7101_v28 = vld [vmem:[%s7621_s9 + $0x74] sm:$0x1]  ;;  %v7102_v56 = vld [vmem:[%s7621_s9 + $0x80] sm:$0x1]  ;;  %v3874_v57 = vor.u32 %v3873_v31, %v8391_v16  ;;  %v3882_v29 = vshrl.u32 %v5877_v40, 16  ;;  %v8453_v31 = vcombine.low %v3822_v43, %v3832_v46 }
 0x152   : > { %6397 = vmatprep.mubr.msk.bf16.mxu1 %vm819_vm3, %v5518_v23  ;;  %v1449_v47 = vrot.slane %v7101_v28, 5  ;;  %v3841_v23 = vrot.slane %v3840_v41, 4  ;;  %v3851_v13 = vrot.slane %v3850_v58, 4  ;;  %v1456_v28 = vrot.slane %v7102_v56, 5  ;;  %v1341_v41 = vld [vmem:[%s7621_s9 + $0x84] sm:$0xe] }
 0x153   : > { %v8402_v21 = vsel %vm7877_vm6, %v5547_v14, %v1446_v34  ;;  %v7103_v58 = vld [vmem:[%s7621_s9 + $0x88] sm:$0xf]  ;;  %v3864_v34 = vor.u32 %v3863_v45, %v3860_v33  ;;  %v3885_v14 = vshll.u32 %v5877_v40, 16  ;;  %v8425_v12 = vrot.slane %v2451_v36, 4  ;;  %v7049_v33 = vld [vmem:[%s7621_s9 + $0x90] sm:$0xff]  }
 0x154   : > { %v8408_v18 = vsel %vm7877_vm6, %v1448_v22, %v1449_v47  ;;  %v1460_v56 = vrot.slane %v7103_v58, 5  ;;  %v5880_v47 = vld [vmem:[%s7621_s9 + $0x48] sm:$0xf]  ;;  %v3846_v45 = vsel %vm7660_vm2, %v3841_v23, %v8357_v15  ;;  %v3856_v40 = vsel %vm7660_vm2, %v3851_v13, %v3855_v8  ;;  %v8448_v15 = vld [vmem:[%s7621_s9 + $0x4c] sm:$0xf] }
 0x155   : > { %9535 = vst [vmem:[#allocation18_spill] sm:$0xff] %v8425_v12  ;;  %v8439_v10 = vsel %vm7877_vm6, %v1455_v3, %v1456_v28  ;;  %v3879_v55 = vrot.slane %v3877_v37, 5  ;;  %v5549_v7 = vrot.slane %v1341_v41, 9  ;;  %v3891_v36 = vshll.u32 %v8417_v1, 16  ;;  %9536 = vst [vmem:[#allocation19_spill] sm:$0xff] %v8448_v15  ;;  %v7048_v8 = vld [vmem:[%s7621_s9 + $0x84] sm:$0xff]  }
 0x156   : > { %v3906_v62 = vshrl.u32 %v5880_v47, 16  ;;  %v3909_v22 = vshll.u32 %v5880_v47, 16  ;;  %v3865_v9 = vrot.slane %v3864_v34, 4  ;;  %v3875_v44 = vrot.slane %v3874_v57, 4  ;;  %v8458_v13 = vld [vmem:[%s7621_s9 + $0x44] sm:$0x1] }
 0x157   : > { %v3887_v32 = vrot.slane %v3885_v14, 5  ;;  %9537 = vst [vmem:[#allocation20_spill] sm:$0xff] %v8458_v13  ;;  %v3915_v3 = vshll.u32 %v8448_v15, 16  ;;  %v3919_v28 = vshrl.u32 %v8448_v15, 16  ;;  %v8462_v37 = vcombine.low %v3846_v45, %v3856_v40  ;;  %v5883_v43 = vld [vmem:[%s7621_s9 + $0x54] sm:$0xf] }
 0x158   : > { %6562 = vmatmul.mubr.msk.bf16.gmra.mrb[12].mxu0 %vm819_vm3, %v7044_v38  ;;  %v1462_v38 = vrot.slane %v1460_v56, 4  ;;  %v8466_v58 = vrot.slane %v3891_v36, 5  ;;  %v7055_v46 = vld [vmem:[#allocation5 + $0x38] sm:$0xff]   ;;  %v8471_v57 = vsel %vm7877_vm6, %v5549_v7, %v1460_v56  ;;  %v3908_v14 = vrot.slane %v3906_v62, 4  ;;  %v8478_v45 = vld [vmem:[%s7621_s9 + $0x58] sm:$0xf] }
 0x159   : > { %6398 = vmatmul.mubr.msk.bf16.gmra.mrb[28].mxu1 %vm819_vm3, %v5519_v39  ;;  %6565 = vmatprep.mubr.msk.bf16.mxu0 %vm819_vm3, %v7046_v61  ;;  %v3895_v39 = vshrl.u32 %v8417_v1, 16  ;;  %v1463_v61 = vrot.slane %v7104_v49, 5  ;;  %v3911_v47 = vrot.slane %v3909_v22, 5  ;;  %9538 = vst [vmem:[#allocation21_spill] sm:$0xff] %v8478_v45  ;;  %v3870_v40 = vsel %vm7660_vm2, %v3865_v9, %v8391_v16  ;;  %v5886_v22 = vld [vmem:[%s7621_s9 + $0x60] sm:$0xf] }
 0x15a   : > { %6405 = vmatprep.mubr.msk.bf16.mxu1 %vm819_vm3, %v5554_v59  ;;  %v3884_v59 = vrot.slane %v3882_v29, 4  ;;  %v3880_v56 = vsel %vm7660_vm2, %v3875_v44, %v3879_v55  ;;  %v3901_v36 = vshll.u32 %v8458_v13, 16  ;;  %v8493_v49 = vrot.slane %v3915_v3, 5 }
 0x15b   : > { %v3897_v34 = vrot.slane %v3895_v39, 4  ;;  %v8475_v29 = vsel %vm7877_vm6, %v1462_v38, %v1463_v61  ;;  %v1342_v39 = vld [vmem:[%s7621_s9 + $0x90] sm:$0xe]  ;;  %v9539_v38 = vcombine.low %v8244_v4, %v8254_v30  ;;  %v3921_v61 = vrot.slane %v3919_v28, 4  ;;  %v8521_v4 = vld [vmem:[%s7621_s9 + $0x64] sm:$0xf] }
 0x15c   : > { %v3888_v7 = vor.u32 %v3887_v32, %v3884_v59  ;;  %v3930_v16 = vshrl.u32 %v5883_v43, 16  ;;  %v3933_v62 = vshll.u32 %v5883_v43, 16  ;;  %v9540_v55 = vcombine.low %v8258_v6, %v8264_v42  ;;  %v7105_v6 = vld [vmem:[%s7621_s9 + $0x94] sm:$0xf]  ;;  %9542 = vst [vmem:[#allocation23_spill] sm:$0xff] %v8521_v4 }
 0x15d   : > { %v3898_v30 = vor.u32 %v3897_v34, %v8466_v58  ;;  %v3939_v9 = vshll.u32 %v8478_v45, 16  ;;  %v3943_v44 = vshrl.u32 %v8478_v45, 16  ;;  %v5550_v59 = vrot.slane %v1342_v39, 9 }
 0x15e   : > { %v1467_v42 = vrot.slane %v7105_v6, 5  ;;  %v3912_v32 = vor.u32 %v3911_v47, %v3908_v14  ;;  %v8513_v3 = vrot.slane %v3888_v7, 4  ;;  %v8515_v28 = vrot.slane %v3901_v36, 5  ;;  %v7106_v47 = vld [vmem:[%s7621_s9 + $0x98] sm:$0x1] }
 0x15f   : > { %v3954_v34 = vshrl.u32 %v5886_v22, 16  ;;  %v3957_v43 = vshll.u32 %v5886_v22, 16  ;;  %v3935_v39 = vrot.slane %v3933_v62, 5  ;;  %v3899_v14 = vrot.slane %v3898_v30, 4  ;;  %v8525_v6 = vld [vmem:[%s7621_s9 + $0x5c] sm:$0x1] }
 0x160   : > { %6566 = vmatmul.mubr.msk.bf16.gmra.mrb[16].mxu0 %vm819_vm3, %v7048_v8  ;;  %v8505_v8 = vld [vmem:[%s7621_s9 + $0x50] sm:$0x1]  ;;  %v1470_v7 = vrot.slane %v7106_v47, 5  ;;  %9543 = vst [vmem:[#allocation24_spill] sm:$0xff] %v8525_v6  ;;  %v8527_v36 = vrot.slane %v3939_v9, 5  ;;  %v3945_v22 = vrot.slane %v3943_v44, 4  ;;  %v8531_v41 = vsel %vm7877_vm6, %v5550_v59, %v1467_v42 }
 0x161   : > { %6406 = vmatmul.mubr.msk.bf16.vlgmr.msra.gmra.mrb[0].mxu1 %vm819_vm3, %v9539_v38  ;;  %6569 = vmatprep.mubr.msk.bf16.mxu0 %vm819_vm3, %v7049_v33  ;;  %9541 = vst [vmem:[#allocation22_spill] sm:$0xff] %v8505_v8  ;;  %v7050_v33 = vld [vmem:[%s7621_s9 + $0x9c] sm:$0xff]   ;;  %v7051_v38 = vld [vmem:[%s7621_s9 + $0xa8] sm:$0xff]   ;;  %v3913_v23 = vrot.slane %v3912_v32, 4  ;;  %v3956_v30 = vrot.slane %v3954_v34, 4  ;;  %v3959_v9 = vrot.slane %v3957_v43, 5  ;;  %v9546_v43 = vcombine.low %v8280_v25, %v8284_v60 }
 0x162   : > { %6438 = vmatpush3.bf16.msra.mxu1 %v8143_v63  ;;  %6409 = vmatprep.mubr.msk.bf16.mxu1 %vm819_vm3, %v9540_v55  ;;  %v8509_v63 = vcombine.low %v3870_v40, %v3880_v56  ;;  %v3922_v55 = vor.u32 %v3921_v61, %v8493_v49  ;;  %v3925_v40 = vshll.u32 %v8505_v8, 16  ;;  %v3932_v56 = vrot.slane %v3930_v16, 4  ;;  %v7107_v16 = vld [vmem:[%s7621_s9 + $0xa0] sm:$0xf]  ;;  %v8707_v8 = vld [vmem:[%s7621_s9 + $0x98] sm:$0x1] }
 0x163   : > { %6439 = vmatprep.subr.bf16.mxu1 %v7055_v46  ;;  %v1469_v61 = vrot.slane %v1467_v42, 4  ;;  %v1474_v62 = vrot.slane %v7107_v16, 5  ;;  %v3963_v44 = vshll.u32 %v8521_v4, 16  ;;  %v3967_v59 = vshrl.u32 %v8521_v4, 16  ;;  %v7110_v16 = vld [vmem:[%s7621_s9 + $0xa4] sm:$0x1] }
 0x164   : > { %v9545_v42 = vcombine.low %v8268_v17, %v8272_v52  ;;  %v3923_v32 = vrot.slane %v3922_v55, 4  ;;  %v3936_v47 = vor.u32 %v3935_v39, %v3932_v56  ;;  %v3949_v34 = vshll.u32 %v8525_v6, 16  ;;  %v1344_v55 = vld [vmem:[%s7621_s9 + $0xa8] sm:$0xe]  ;;  %v5901_v6 = vld [vmem:[%s7621_s9 + $0x9c] sm:$0xf] }
 0x165   : > { %v3894_v17 = vsel %vm7660_vm2, %v8513_v3, %v8466_v58  ;;  %v3904_v52 = vsel %vm7660_vm2, %v3899_v14, %v8515_v28  ;;  %v8563_v25 = vsel %vm7877_vm6, %v1469_v61, %v1470_v7  ;;  %v1476_v39 = vrot.slane %v1474_v62, 4  ;;  %v8567_v3 = vld [vmem:[%s7621_s9 + $0x68] sm:$0x1]  ;;  %v7053_v7 = vld [vmem:[%s7621_s9 + $0xc0] sm:$0xff]  }
 0x166   : > { %6440 = vmatpush3.bf16.msra.mxu1 %v7055_v46  ;;  %v1343_v46 = vld [vmem:[%s7621_s9 + $0x9c] sm:$0xe]  ;;  %v1477_v58 = vrot.slane %v7110_v16, 5  ;;  %9547 = vst [vmem:[#allocation26_spill] sm:$0xff] %v8567_v3  ;;  %v3918_v28 = vsel %vm7660_vm2, %v3913_v23, %v8493_v49  ;;  %v3960_v14 = vor.u32 %v3959_v9, %v3956_v30  ;;  %v8581_v16 = vrot.slane %v3949_v34, 5 }
 0x167   : > { %6653 = vmatprep.subr.bf16.mxu1 %v8534_v20  ;;  %v5551_v60 = vrot.slane %v1343_v46, 9  ;;  %v8579_v46 = vrot.slane %v3936_v47, 4  ;;  %v5552_v13 = vrot.slane %v1344_v55, 9  ;;  %v7111_v23 = vld [vmem:[%s7621_s9 + $0xb0] sm:$0x1]  ;;  %v3973_v30 = vshll.u32 %v8567_v3, 16 }
 0x168   : > { %6570 = vmatmul.mubr.msk.bf16.gmra.mrb[20].mxu0 %vm819_vm3, %v7050_v33  ;;  %v3927_v33 = vrot.slane %v3925_v40, 5  ;;  %v7109_v40 = vld [vmem:[%s7621_s9 + $0xac] sm:$0xf]  ;;  %v1484_v49 = vrot.slane %v7111_v23, 5  ;;  %v8587_v9 = vcombine.low %v3894_v17, %v3904_v52  ;;  %v8599_v34 = vsel %vm7877_vm6, %v1476_v39, %v1477_v58  ;;  %v8621_v58 = vld [vmem:[%s7621_s9 + $0x70] sm:$0xf] }
 0x169   : > { %6410 = vmatmul.mubr.msk.bf16.gmra.mrb[4].mxu1 %vm819_vm3, %v9545_v42  ;;  %6573 = vmatprep.mubr.msk.bf16.mxu0 %vm819_vm3, %v7051_v38  ;;  %v3946_v38 = vor.u32 %v3945_v22, %v8527_v36  ;;  %v1481_v56 = vrot.slane %v7109_v40, 5  ;;  %v7052_v42 = vld [vmem:[%s7621_s9 + $0xb4] sm:$0xff]   ;;  %v8573_v22 = vrot.slane %v3963_v44, 5  ;;  %v8595_v47 = vsel %vm7877_vm6, %v5551_v60, %v1474_v62  ;;  %9551 = vst [vmem:[#allocation29_spill] sm:$0xff] %v8621_v58 }
 0x16a   : > { %6413 = vmatprep.mubr.msk.bf16.mxu1 %vm819_vm3, %v9546_v43  ;;  %v3969_v43 = vrot.slane %v3967_v59, 4  ;;  %v1345_v40 = vld [vmem:[%s7621_s9 + $0xb4] sm:$0xe]  ;;  %v3928_v61 = vsel %vm7660_vm2, %v3923_v32, %v3927_v33  ;;  %v7112_v32 = vld [vmem:[%s7621_s9 + $0xb8] sm:$0xf]  ;;  %v8601_v17 = vrot.slane %v3960_v14, 4  ;;  %v9550_v55 = vcombine.low %v8306_v48, %v8314_v53 }
 0x16b   : > { %9548 = vst [vmem:[#allocation27_spill] sm:$0xff] %v8573_v22  ;;  %v8583_v1 = vrot.slane %v3946_v38, 4  ;;  %v1483_v20 = vrot.slane %v1481_v56, 4  ;;  %v5553_v59 = vrot.slane %v1345_v40, 9  ;;  %v1488_v33 = vrot.slane %v7112_v32, 5 }
 0x16c   : > { %9549 = vst [vmem:[#allocation28_spill] sm:$0xff] %v8601_v17  ;;  %v3970_v52 = vor.u32 %v3969_v43, %v8573_v22  ;;  %v5889_v38 = vld [vmem:[%s7621_s9 + $0x6c] sm:$0xf]  ;;  %v8610_v62 = vcombine.low %v3918_v28, %v3928_v61  ;;  %v8618_v39 = vsel %vm7877_vm6, %v5552_v13, %v1481_v56  ;;  %v5892_v48 = vld [vmem:[%s7621_s9 + $0x78] sm:$0xf]  ;;  %v8639_v56 = vrot.slane %v3973_v30, 5 }
 0x16d   : > { %v8625_v53 = vld [vmem:[%s7621_s9 + $0x7c] sm:$0xf]  ;;  %v8637_v13 = vsel %vm7877_vm6, %v1483_v20, %v1484_v49  ;;  %v5895_v40 = vld [vmem:[%s7621_s9 + $0x84] sm:$0xf]  ;;  %v3978_v61 = vshrl.u32 %v5889_v38, 16  ;;  %v3981_v23 = vshll.u32 %v5889_v38, 16 }
 0x16e   : > { %9552 = vst [vmem:[#allocation30_spill] sm:$0xff] %v8625_v53  ;;  %v8642_v14 = vld [vmem:[%s7621_s9 + $0xbc] sm:$0x1]  ;;  %v5898_v20 = vld [vmem:[%s7621_s9 + $0x90] sm:$0xf]  ;;  %v8661_v32 = vrot.slane %v3970_v52, 4 }
 0x16f   : > { %v7054_v49 = vld [vmem:[%s7621_s9 + $0xcc] sm:$0xff]   ;;  %v4005_v60 = vshll.u32 %v5892_v48, 16  ;;  %v4011_v38 = vshll.u32 %v8625_v53, 16  ;;  %v4015_v28 = vshrl.u32 %v8625_v53, 16  ;;  %v4026_v44 = vshrl.u32 %v5895_v40, 16 }
 0x170   : > { %6574 = vmatmul.mubr.msk.bf16.gmra.mrb[24].mxu0 %vm819_vm3, %v7052_v42  ;;  %v9553_v42 = vcombine.low %v8334_v5, %v8342_v50  ;;  %v8647_v5 = vld [vmem:[%s7621_s9 + $0x88] sm:$0xf]  ;;  %v8651_v50 = vsel %vm7877_vm6, %v5553_v59, %v1488_v33  ;;  %v8666_v59 = vld [vmem:[%s7621_s9 + $0x94] sm:$0xf]  ;;  %v4029_v43 = vshll.u32 %v5895_v40, 16  ;;  %v3980_v54 = vrot.slane %v3978_v61, 4 }
 0x171   : > { %6414 = vmatmul.mubr.msk.bf16.gmra.mrb[8].mxu1 %vm819_vm3, %v9550_v55  ;;  %6577 = vmatprep.mubr.msk.bf16.mxu0 %vm819_vm3, %v7053_v7  ;;  %9554 = vst [vmem:[#allocation31_spill] sm:$0xff] %v8647_v5  ;;  %9555 = vst [vmem:[#allocation32_spill] sm:$0xff] %v8651_v50  ;;  %v8653_v7 = vrot.slane %v1488_v33, 4  ;;  %v3987_v55 = vshll.u32 %v8621_v58, 16  ;;  %v4002_v33 = vshrl.u32 %v5892_v48, 16  ;;  %v4035_v30 = vshll.u32 %v8647_v5, 16 }
 0x172   : > { %6417 = vmatprep.mubr.msk.bf16.mxu1 %vm819_vm3, %v9553_v42  ;;  %v3991_v42 = vshrl.u32 %v8621_v58, 16  ;;  %9556 = vst [vmem:[#allocation33_spill] sm:$0xff] %v8666_v59  ;;  %v4039_v52 = vshrl.u32 %v8647_v5, 16  ;;  %v4050_v12 = vshrl.u32 %v5898_v20, 16  ;;  %v4053_v35 = vshll.u32 %v5898_v20, 16 }
 0x173   : > { %v4059_v58 = vshll.u32 %v8666_v59, 16  ;;  %v8675_v48 = vld [vmem:[%s7621_s9 + $0x74] sm:$0x1]  ;;  %v3983_v3 = vrot.slane %v3981_v23, 5  ;;  %v8677_v4 = vrot.slane %v3987_v55, 5  ;;  %v4063_v40 = vshrl.u32 %v8666_v59, 16 }
 0x174   : > { %v3993_v53 = vrot.slane %v3991_v42, 4  ;;  %v9557_v61 = vcombine.low %v8349_v26, %v8353_v2  ;;  %v4004_v20 = vrot.slane %v4002_v33, 4  ;;  %v8687_v5 = vrot.slane %v4011_v38, 5  ;;  %v8690_v55 = vld [vmem:[%s7621_s9 + $0xa0] sm:$0xf] }
 0x175   : > { %v4017_v23 = vrot.slane %v4015_v28, 4  ;;  %9558 = vst [vmem:[#allocation34_spill] sm:$0xff] %v8690_v55  ;;  %v9559_v42 = vcombine.low %v8363_v51, %v8379_v19  ;;  %v8697_v59 = vld [vmem:[%s7621_s9 + $0x80] sm:$0x1]  ;;  %v4028_v26 = vrot.slane %v4026_v44, 4  ;;  %v4031_v2 = vrot.slane %v4029_v43, 5 }
 0x176   : > { %v8702_v33 = vld [vmem:[%s7621_s9 + $0x8c] sm:$0x1]  ;;  %v4055_v38 = vrot.slane %v4053_v35, 5  ;;  %v8704_v45 = vrot.slane %v4059_v58, 5  ;;  %v4074_v28 = vshrl.u32 %v5901_v6, 16  ;;  %v4065_v15 = vrot.slane %v4063_v40, 4 }
 0x177   : > { %v4077_v51 = vshll.u32 %v5901_v6, 16  ;;  %v4083_v19 = vshll.u32 %v8690_v55, 16  ;;  %v3984_v44 = vor.u32 %v3983_v3, %v3980_v54  ;;  %v3994_v43 = vor.u32 %v3993_v53, %v8677_v4  ;;  %v7058_v40 = vld [vmem:[#allocation5 + $0x88] sm:$0xff]  }
 0x178   : > { %6578 = vmatmul.mubr.msk.bf16.gmra.mrb[28].mxu0 %vm819_vm3, %v7054_v49  ;;  %v4007_v49 = vrot.slane %v4005_v60, 5  ;;  %v4052_v60 = vrot.slane %v4050_v12, 4  ;;  %v4021_v12 = vshll.u32 %v8697_v59, 16  ;;  %v4018_v58 = vor.u32 %v4017_v23, %v8687_v5  ;;  %v8722_v3 = vld [vmem:[%s7621_s9 + $0xa4] sm:$0x1] }
 0x179   : > { %6418 = vmatmul.mubr.msk.bf16.gmra.mrb[12].mxu1 %vm819_vm3, %v9557_v61  ;;  %6585 = vmatprep.mubr.msk.bf16.mxu0 %vm819_vm3, %v8453_v31  ;;  %v8699_v61 = vrot.slane %v4035_v30, 5  ;;  %v4041_v31 = vrot.slane %v4039_v52, 4  ;;  %v3997_v30 = vshll.u32 %v8675_v48, 16  ;;  %v4032_v52 = vor.u32 %v4031_v2, %v4028_v26 }
 0x17a   : > { %6421 = vmatprep.mubr.msk.bf16.mxu1 %vm819_vm3, %v9559_v42  ;;  %v4087_v42 = vshrl.u32 %v8690_v55, 16  ;;  %v4008_v35 = vor.u32 %v4007_v49, %v4004_v20  ;;  %v4045_v50 = vshll.u32 %v8702_v33, 16  ;;  %v4056_v22 = vor.u32 %v4055_v38, %v4052_v60  ;;  %v5904_v38 = vld [vmem:[%s7621_s9 + $0xa8] sm:$0xf] }
 0x17b   : > { %v4042_v6 = vor.u32 %v4041_v31, %v8699_v61  ;;  %v4069_v55 = vshll.u32 %v8707_v8, 16  ;;  %v4076_v17 = vrot.slane %v4074_v28, 4  ;;  %v4066_v54 = vor.u32 %v4065_v15, %v8704_v45 }
 0x17c   : > { %v4079_v53 = vrot.slane %v4077_v51, 5  ;;  %v8724_v20 = vrot.slane %v4083_v19, 5  ;;  %v4089_v49 = vrot.slane %v4087_v42, 4  ;;  %v9560_v23 = vcombine.low %v8402_v21, %v8408_v18 }
 0x17d   : > { %v9561_v26 = vrot.slane %v8642_v14, 5  ;;  %v3995_v2 = vrot.slane %v3994_v43, 4  ;;  %v3999_v31 = vrot.slane %v3997_v30, 5  ;;  %v9562_v60 = vcombine.low %v8412_v24, %v8439_v10  ;;  %v8748_v43 = vld [vmem:[%s7621_s9 + $0xac] sm:$0xf] }
 0x17e   : > { %v4019_v21 = vrot.slane %v4018_v58, 4  ;;  %v4023_v18 = vrot.slane %v4021_v12, 5  ;;  %v4033_v14 = vrot.slane %v4032_v52, 4  ;;  %v4047_v28 = vrot.slane %v4045_v50, 5 }
 0x17f   : > { %v8736_v15 = vsel %vm7877_vm6, %v8653_v7, %v9561_v26  ;;  %v4043_v7 = vrot.slane %v4042_v6, 4  ;;  %v4057_v51 = vrot.slane %v4056_v22, 4  ;;  %v4093_v19 = vshll.u32 %v8722_v3, 16 }
 0x180   : > { %6586 = vmatmul.mubr.msk.bf16.vlgmr.msra.gmra.mrb[0].mxu0 %vm819_vm3, %v8462_v37  ;;  %v3985_v37 = vrot.slane %v3984_v44, 4  ;;  %v4067_v42 = vrot.slane %v4066_v54, 4  ;;  %v4071_v24 = vrot.slane %v4069_v55, 5  ;;  %v4080_v10 = vor.u32 %v4079_v53, %v4076_v17 }
 0x181   : > { %6422 = vmatmul.mubr.msk.bf16.gmra.mrb[16].mxu1 %vm819_vm3, %v9560_v23  ;;  %6618 = vmatpush3.bf16.msra.mxu0 %v8276_v11  ;;  %v4009_v11 = vrot.slane %v4008_v35, 4  ;;  %v4090_v44 = vor.u32 %v4089_v49, %v8724_v20  ;;  %v4098_v22 = vshrl.u32 %v5904_v38, 16  ;;  %v4101_v30 = vshll.u32 %v5904_v38, 16 }
 0x182   : > { %6425 = vmatprep.mubr.msk.bf16.mxu1 %vm819_vm3, %v9562_v60  ;;  %6589 = vmatprep.mubr.msk.bf16.mxu0 %vm819_vm3, %v8509_v63  ;;  %v3976_v63 = vsel %vm7660_vm2, %v8661_v32, %v8639_v56  ;;  %v3990_v50 = vsel %vm7660_vm2, %v3985_v37, %v8677_v4  ;;  %v4000_v55 = vsel %vm7660_vm2, %v3995_v2, %v3999_v31  ;;  %v8768_v32 = vld [vmem:[%s7621_s9 + $0xb0] sm:$0x1]  ;;  %v4095_v58 = vrot.slane %v4093_v19, 5  ;;  %v5956_v19 = vld [vmem:[%s7621_s9 + $0x60] sm:$0xe] }
 0x183   : > { %6619 = vmatprep.subr.bf16.mxu0 %v7058_v40  ;;  %v4014_v17 = vsel %vm7660_vm2, %v4009_v11, %v8687_v5  ;;  %v4024_v12 = vsel %vm7660_vm2, %v4019_v21, %v4023_v18  ;;  %v4038_v56 = vsel %vm7660_vm2, %v4033_v14, %v8699_v61  ;;  %v4048_v4 = vsel %vm7660_vm2, %v4043_v7, %v4047_v28  ;;  %v9570_v37 = vld [vmem:[#allocation32_spill] sm:$0xff] }
 0x184   : > { %v4062_v35 = vsel %vm7660_vm2, %v4057_v51, %v8704_v45  ;;  %v4107_v52 = vshll.u32 %v8748_v43, 16  ;;  %v4072_v5 = vsel %vm7660_vm2, %v4067_v42, %v4071_v24  ;;  %v4081_v61 = vrot.slane %v4080_v10, 4  ;;  %v8832_v14 = vld [vmem:[%s7621_s9 + $0xb8] sm:$0xf]  ;;  %v9571_v24 = vld [vmem:[#allocation19_spill] sm:$0xff] }
 0x185   : > { %6620 = vmatpush3.bf16.msra.mxu0 %v7058_v40  ;;  %v4091_v40 = vrot.slane %v4090_v44, 4  ;;  %v4111_v6 = vshrl.u32 %v8748_v43, 16  ;;  %v9563_v54 = vcombine.low %v8471_v57, %v8475_v29  ;;  %v5567_v45 = vcombine.low %v8595_v47, %v8599_v34  ;;  %v9572_v44 = vld [vmem:[#allocation22_spill] sm:$0xff] }
 0x186   : > { %v4103_v53 = vrot.slane %v4101_v30, 5  ;;  %v4117_v49 = vshll.u32 %v8768_v32, 16  ;;  %v9564_v23 = vcombine.low %v8531_v41, %v8563_v25  ;;  %v9565_v57 = vsel %vm7660_vm2, %v8583_v1, %v8581_v16  ;;  %v9567_v41 = vld [vmem:[#allocation28_spill] sm:$0xff]  ;;  %v9568_v25 = vld [vmem:[#allocation27_spill] sm:$0xff]  ;;  %v9573_v30 = vld [vmem:[#allocation21_spill] sm:$0xff] }
 0x187   : > { %v9566_v29 = vsel %vm7660_vm2, %v8579_v46, %v8527_v36  ;;  %v5568_v34 = vcombine.low %v8618_v39, %v8637_v13  ;;  %v5569_v2 = vcombine.low %v9570_v37, %v8736_v15  ;;  %v5907_v1 = vld [vmem:[%s7621_s9 + $0xb4] sm:$0xf]  ;;  %v5954_v16 = vld [vmem:[%s7621_s9 + $0x48] sm:$0xe]  ;;  %v8815_v31 = vcombine.low %v3990_v50, %v4000_v55 }
 0x188   : > { %6590 = vmatmul.mubr.msk.bf16.gmra.mrb[4].mxu0 %vm819_vm3, %v8587_v9  ;;  %v4100_v9 = vrot.slane %v4098_v22, 4  ;;  %v5921_v47 = vcombine.low %v9566_v29, %v9565_v57  ;;  %v8817_v36 = vcombine.low %v4014_v17, %v4024_v12  ;;  %v8819_v46 = vcombine.low %v4038_v56, %v4048_v4  ;;  %v5955_v39 = vld [vmem:[%s7621_s9 + $0x54] sm:$0xe]  ;;  %v5957_v56 = vld [vmem:[%s7621_s9 + $0x6c] sm:$0xe] }
 0x189   : > { %6426 = vmatmul.mubr.msk.bf16.gmra.mrb[20].mxu1 %vm819_vm3, %v9563_v54  ;;  %6593 = vmatprep.mubr.msk.bf16.mxu0 %vm819_vm3, %v8610_v62  ;;  %v9569_v62 = vsel %vm7660_vm2, %v9567_v41, %v9568_v25  ;;  %v8821_v60 = vcombine.low %v4062_v35, %v4072_v5  ;;  %v4086_v13 = vsel %vm7660_vm2, %v4081_v61, %v8724_v20  ;;  %v8829_v21 = vrot.slane %v4107_v52, 5  ;;  %v9574_v17 = vld [vmem:[#allocation24_spill] sm:$0xff]  ;;  %v9576_v54 = vld [vmem:[#allocation26_spill] sm:$0xff] }
 0x18a   : > { %6429 = vmatprep.mubr.msk.bf16.mxu1 %vm819_vm3, %v9564_v23  ;;  %v5922_v26 = vcombine.low %v9569_v62, %v3976_v63  ;;  %v4096_v11 = vsel %vm7660_vm2, %v4091_v40, %v4095_v58  ;;  %v4113_v18 = vrot.slane %v4111_v6, 4  ;;  %v4104_v38 = vor.u32 %v4103_v53, %v4100_v9  ;;  %v9575_v40 = vld [vmem:[#allocation23_spill] sm:$0xff]  ;;  %v8867_v29 = vld [vmem:[%s7621_s9 + $0xbc] sm:$0x1]  ;;  %v9579_v37 = vld [vmem:[#allocation16_spill] sm:$0xff] }
 0x18b   : > { %v8834_v7 = vrot.slane %v4117_v49, 5  ;;  %v4122_v28 = vshrl.u32 %v5907_v1, 16  ;;  %v5970_v51 = vrot.slane %v5954_v16, 9  ;;  %v4125_v42 = vshll.u32 %v5907_v1, 16  ;;  %v9577_v49 = vld [vmem:[#allocation29_spill] sm:$0xff] }
 0x18c   : > { %v4593_v10 = vrot.slane %v9571_v24, 5  ;;  %v4596_v20 = vrot.slane %v9572_v44, 5  ;;  %v5971_v63 = vrot.slane %v5955_v39, 9  ;;  %v8839_v50 = vcombine.low %v4086_v13, %v4096_v11  ;;  %v7057_v39 = vld [vmem:[%s7621_s9 + $0xc] sm:$0xff]   ;;  %v8903_v44 = vld [vmem:[%s7621_s9 + $0xc4] sm:$0xf] }
 0x18d   : > { %v4131_v22 = vshll.u32 %v8832_v14, 16  ;;  %v4600_v55 = vrot.slane %v9573_v30, 5  ;;  %v4603_v12 = vrot.slane %v9574_v17, 5  ;;  %v4114_v4 = vor.u32 %v4113_v18, %v8829_v21 }
 0x18e   : > { %v8849_v35 = vsel %vm7877_vm6, %v5970_v51, %v4593_v10  ;;  %v4595_v58 = vrot.slane %v4593_v10, 4  ;;  %v5972_v52 = vrot.slane %v5956_v19, 9  ;;  %v4607_v6 = vrot.slane %v9575_v40, 5  ;;  %v5958_v19 = vld [vmem:[%s7621_s9 + $0x78] sm:$0xe] }
 0x18f   : > { %v8855_v5 = vsel %vm7877_vm6, %v5971_v63, %v4600_v55  ;;  %v4602_v61 = vrot.slane %v4600_v55, 4  ;;  %v4610_v9 = vrot.slane %v9576_v54, 5  ;;  %v4614_v23 = vrot.slane %v9577_v49, 5  ;;  %v5959_v55 = vld [vmem:[%s7621_s9 + $0x84] sm:$0xe] }
 0x190   : > { %6594 = vmatmul.mubr.msk.bf16.gmra.mrb[8].mxu0 %vm819_vm3, %v5921_v47  ;;  %v8862_v53 = vsel %vm7877_vm6, %v4595_v58, %v4596_v20  ;;  %v4617_v57 = vrot.slane %v8675_v48, 5  ;;  %v4609_v25 = vrot.slane %v4607_v6, 4  ;;  %v4135_v62 = vshrl.u32 %v8832_v14, 16  ;;  %v5910_v48 = vld [vmem:[%s7621_s9 + $0xc0] sm:$0xf] }
 0x191   : > { %6430 = vmatmul.mubr.msk.bf16.gmra.mrb[24].mxu1 %vm819_vm3, %v5567_v45  ;;  %6597 = vmatprep.mubr.msk.bf16.mxu0 %vm819_vm3, %v5922_v26  ;;  %v5973_v45 = vrot.slane %v5957_v56, 9  ;;  %v5986_v47 = vcombine.low %v8849_v35, %v8862_v53  ;;  %v8873_v41 = vsel %vm7877_vm6, %v4602_v61, %v4603_v12  ;;  %v4616_v16 = vrot.slane %v4614_v23, 4  ;;  %v9578_v56 = vld [vmem:[#allocation30_spill] sm:$0xff] }
 0x192   : > { %6433 = vmatprep.mubr.msk.bf16.mxu1 %vm819_vm3, %v5568_v34  ;;  %v8877_v34 = vsel %vm7877_vm6, %v5972_v52, %v4607_v6  ;;  %v5987_v26 = vcombine.low %v8855_v5, %v8873_v41  ;;  %v8888_v13 = vrot.slane %v4104_v38, 4  ;;  %v8890_v11 = vrot.slane %v4122_v28, 4  ;;  %v5681_v28 = vld [vmem:[%s7621_s9 + $0x78] sm:$0xf]  ;;  %v7126_v41 = vld [vmem:[%s7621_s9 + $0x8c] sm:$0x1] }
 0x193   : > { %v8885_v1 = vsel %vm7877_vm6, %v5973_v45, %v4614_v23  ;;  %v8892_v18 = vrot.slane %v4125_v42, 5  ;;  %v8896_v51 = vsel %vm7877_vm6, %v4609_v25, %v4610_v9  ;;  %v8899_v24 = vrot.slane %v4131_v22, 5 }
 0x194   : > { %v4141_v10 = vshll.u32 %v8867_v29, 16  ;;  %v5988_v20 = vcombine.low %v8877_v34, %v8896_v51  ;;  %v8909_v38 = vsel %vm7877_vm6, %v4616_v16, %v4617_v57  ;;  %v8912_v42 = vrot.slane %v4114_v4, 4  ;;  %v5913_v57 = vld [vmem:[%s7621_s9 + $0xcc] sm:$0xf] }
 0x195   : > { %v4146_v63 = vshrl.u32 %v5910_v48, 16  ;;  %v4149_v30 = vshll.u32 %v5910_v48, 16  ;;  %v5989_v22 = vcombine.low %v8885_v1, %v8909_v38  ;;  %v8919_v17 = vrot.slane %v4135_v62, 4  ;;  %v9581_v62 = vld [vmem:[#allocation31_spill] sm:$0xff] }
 0x196   : > { %v5974_v12 = vrot.slane %v5958_v19, 9  ;;  %v4621_v58 = vrot.slane %v9578_v56, 5  ;;  %v4624_v52 = vrot.slane %v8697_v59, 5  ;;  %v4155_v4 = vshll.u32 %v8903_v44, 16  ;;  %v8965_v56 = vld [vmem:[%s7621_s9 + $0xd0] sm:$0xf] }
 0x197   : > { %v2435_v61 = vshrl.u32 %v5681_v28, 16  ;;  %v2438_v40 = vshll.u32 %v5681_v28, 16  ;;  %v4148_v54 = vrot.slane %v4146_v63, 4  ;;  %v4151_v9 = vrot.slane %v4149_v30, 5  ;;  %v5960_v63 = vld [vmem:[%s7621_s9 + $0x90] sm:$0xe] }
 0x198   : > { %6598 = vmatmul.mubr.msk.bf16.gmra.mrb[12].mxu0 %vm819_vm3, %v8815_v31  ;;  %v4159_v31 = vshrl.u32 %v8903_v44, 16  ;;  %v8934_v59 = vsel %vm7877_vm6, %v5974_v12, %v4621_v58  ;;  %v4623_v15 = vrot.slane %v4621_v58, 4  ;;  %v4110_v23 = vsel %vm7660_vm2, %v8888_v13, %v8829_v21  ;;  %v7060_v30 = vld [vmem:[%s7621_s9 + $0x24] sm:$0xff]   ;;  %v7129_v38 = vld [vmem:[%s7621_s9 + $0xac] sm:$0xf] }
 0x199   : > { %6434 = vmatmul.mubr.msk.bf16.gmra.mrb[28].mxu1 %vm819_vm3, %v5569_v2  ;;  %6601 = vmatprep.mubr.msk.bf16.mxu0 %vm819_vm3, %v8817_v36  ;;  %v9580_v2 = vld [vmem:[#allocation18_spill] sm:$0xff]  ;;  %v5975_v36 = vrot.slane %v5959_v55, 9  ;;  %v2437_v45 = vrot.slane %v2435_v61, 4  ;;  %v2440_v49 = vrot.slane %v2438_v40, 5  ;;  %v4628_v48 = vrot.slane %v9581_v62, 5  ;;  %v9582_v40 = vld [vmem:[#allocation33_spill] sm:$0xff] }
 0x19a   : > { %6441 = vmatprep.mubr.msk.bf16.mxu1 %vm819_vm3, %v7057_v39  ;;  %v2457_v6 = vsel %vm7660_vm2, %v9580_v2, %v9579_v37  ;;  %v8947_v25 = vsel %vm7877_vm6, %v4623_v15, %v4624_v52  ;;  %v4631_v16 = vrot.slane %v8702_v33, 5  ;;  %v7059_v39 = vld [vmem:[%s7621_s9 + $0x18] sm:$0xff]   ;;  %v4120_v19 = vsel %vm7660_vm2, %v8912_v42, %v8834_v7  ;;  %v9583_v2 = vld [vmem:[#allocation15_spill] sm:$0xff] }
 0x19b   : > { %v4128_v28 = vor.u32 %v8892_v18, %v8890_v11  ;;  %v5990_v21 = vcombine.low %v8934_v59, %v8947_v25  ;;  %v2441_v13 = vor.u32 %v2440_v49, %v2437_v45  ;;  %v8962_v55 = vrot.slane %v4155_v4, 5  ;;  %v8974_v11 = vld [vmem:[%s7621_s9 + $0xc8] sm:$0x1]  ;;  %v7114_v62 = vld [vmem:[#allocation5 + $0x48] sm:$0xff]  }
 0x19c   : > { %v4161_v12 = vrot.slane %v4159_v31, 4  ;;  %v8969_v33 = vsel %vm7877_vm6, %v5975_v36, %v4628_v48  ;;  %v4630_v58 = vrot.slane %v4628_v48, 4  ;;  %v4138_v7 = vor.u32 %v8919_v17, %v8899_v24  ;;  %v7130_v25 = vld [vmem:[%s7621_s9 + $0xb8] sm:$0xf] }
 0x19d   : > { %v4152_v18 = vor.u32 %v4151_v9, %v4148_v54  ;;  %v4170_v42 = vshrl.u32 %v5913_v57, 16  ;;  %v2442_v52 = vrot.slane %v2441_v13, 4  ;;  %v4173_v4 = vshll.u32 %v5913_v57, 16  ;;  %v9584_v54 = vld [vmem:[#allocation25_spill] sm:$0xff] }
 0x19e   : > { %v8980_v31 = vsel %vm7877_vm6, %v4630_v58, %v4631_v16  ;;  %v5976_v61 = vrot.slane %v5960_v63, 9  ;;  %v4635_v15 = vrot.slane %v9582_v40, 5  ;;  %v4179_v17 = vshll.u32 %v8965_v56, 16  ;;  %v7061_v58 = vld [vmem:[%s7621_s9 + $0x30] sm:$0xff]  }
 0x19f   : > { %v4183_v37 = vshrl.u32 %v8965_v56, 16  ;;  %v5991_v36 = vcombine.low %v8969_v33, %v8980_v31  ;;  %v4162_v9 = vor.u32 %v4161_v12, %v8962_v55  ;;  %v4165_v45 = vshll.u32 %v8974_v11, 16  ;;  %v5961_v12 = vld [vmem:[%s7621_s9 + $0x9c] sm:$0xe] }
 0x1a0   : > { %6602 = vmatmul.mubr.msk.bf16.gmra.mrb[16].mxu0 %vm819_vm3, %v8819_v46  ;;  %v2447_v46 = vsel %vm7660_vm2, %v2442_v52, %v9583_v2  ;;  %v4129_v57 = vrot.slane %v4128_v28, 4  ;;  %v9003_v48 = vsel %vm7877_vm6, %v5976_v61, %v4635_v15  ;;  %v4637_v16 = vrot.slane %v4635_v15, 4  ;;  %v9009_v52 = vld [vmem:[%s7621_s9 + $0xd4] sm:$0x1]  ;;  %v7062_v61 = vld [vmem:[%s7621_s9 + $0x3c] sm:$0xff]  }
 0x1a1   : > { %6442 = vmatmul.mubr.msk.bf16.vlgmr.msra.gmra.mrb[0].mxu1 %vm819_vm3, %v7059_v39  ;;  %6605 = vmatprep.mubr.msk.bf16.mxu0 %vm819_vm3, %v8821_v60  ;;  %v4143_v60 = vrot.slane %v4141_v10, 5  ;;  %v8999_v49 = vcombine.low %v2447_v46, %v2457_v6  ;;  %v4638_v39 = vrot.slane %v8707_v8, 5  ;;  %v5928_v13 = vcombine.low %v4110_v23, %v4120_v19 }
 0x1a2   : > { %6655 = vmatpush3.bf16.msra.mxu1 %v9584_v54  ;;  %6445 = vmatprep.mubr.msk.bf16.mxu1 %vm819_vm3, %v7060_v30  ;;  %v4139_v10 = vrot.slane %v4138_v7, 4  ;;  %v4153_v63 = vrot.slane %v4152_v18, 4  ;;  %v4172_v30 = vrot.slane %v4170_v42, 4  ;;  %v4175_v6 = vrot.slane %v4173_v4, 5  ;;  %v9585_v4 = vld [vmem:[#allocation34_spill] sm:$0xff] }
 0x1a3   : > { %6654 = vmatprep.subr.bf16.mxu1 %v7114_v62  ;;  %v9011_v28 = vrot.slane %v4179_v17, 5  ;;  %v4185_v40 = vrot.slane %v4183_v37, 4  ;;  %v9015_v2 = vsel %vm7877_vm6, %v4637_v16, %v4638_v39  ;;  %v4163_v15 = vrot.slane %v4162_v9, 4  ;;  %v5950_v54 = vld [vmem:[%s7621_s9 + $0x18] sm:$0xe] }
 0x1a4   : > { %v4167_v8 = vrot.slane %v4165_v45, 5  ;;  %v5992_v23 = vcombine.low %v9003_v48, %v9015_v2  ;;  %v4134_v19 = vsel %vm7660_vm2, %v4129_v57, %v8899_v24  ;;  %v5977_v7 = vrot.slane %v5961_v12, 9 }
 0x1a5   : > { %v4144_v18 = vsel %vm7660_vm2, %v4139_v10, %v4143_v60  ;;  %v4189_v42 = vshll.u32 %v9009_v52, 16  ;;  %v4642_v17 = vrot.slane %v9585_v4, 5  ;;  %v4645_v37 = vrot.slane %v8722_v3, 5  ;;  %v7115_v3 = vld [vmem:[%s7621_s9 + $0x1c] sm:$0xf]  ;;  %v7063_v10 = vld [vmem:[%s7621_s9 + $0x48] sm:$0xff]  }
 0x1a6   : > { %6656 = vmatpush3.bf16.msra.mxu1 %v7114_v62  ;;  %v4158_v24 = vsel %vm7660_vm2, %v4153_v63, %v8962_v55  ;;  %v4186_v46 = vor.u32 %v4185_v40, %v9011_v28  ;;  %v4168_v60 = vsel %vm7660_vm2, %v4163_v15, %v4167_v8  ;;  %v4565_v9 = vrot.slane %v7115_v3, 5  ;;  %v5962_v62 = vld [vmem:[%s7621_s9 + $0xa8] sm:$0xe] }
 0x1a7   : > { %v9043_v45 = vsel %vm7877_vm6, %v5977_v7, %v4642_v17  ;;  %v4644_v57 = vrot.slane %v4642_v17, 4  ;;  %v5929_v55 = vcombine.low %v4134_v19, %v4144_v18  ;;  %v4191_v16 = vrot.slane %v4189_v42, 5  ;;  %v7117_v18 = vld [vmem:[%s7621_s9 + $0x28] sm:$0xf] }
 0x1a8   : > { %6606 = vmatmul.mubr.msk.bf16.gmra.mrb[20].mxu0 %vm819_vm3, %v8839_v50  ;;  %v4176_v50 = vor.u32 %v4175_v6, %v4172_v30  ;;  %v5966_v39 = vrot.slane %v5950_v54, 9  ;;  %v5930_v63 = vcombine.low %v4158_v24, %v4168_v60  ;;  %v4187_v12 = vrot.slane %v4186_v46, 4  ;;  %v7064_v6 = vld [vmem:[%s7621_s9 + $0x54] sm:$0xff]   ;;  %v5951_v24 = vld [vmem:[%s7621_s9 + $0x24] sm:$0xe] }
 0x1a9   : > { %6446 = vmatmul.mubr.msk.bf16.gmra.mrb[4].mxu1 %vm819_vm3, %v7061_v58  ;;  %6609 = vmatprep.mubr.msk.bf16.mxu0 %vm819_vm3, %v5928_v13  ;;  %v9048_v13 = vsel %vm7877_vm6, %v4644_v57, %v4645_v37  ;;  %v4567_v40 = vrot.slane %v4565_v9, 4  ;;  %v5978_v8 = vrot.slane %v5962_v62, 9  ;;  %v4649_v19 = vrot.slane %v8748_v43, 5  ;;  %v5963_v37 = vld [vmem:[%s7621_s9 + $0xb4] sm:$0xe] }
 0x1aa   : > { %6449 = vmatprep.mubr.msk.bf16.mxu1 %vm819_vm3, %v7062_v61  ;;  %v4177_v30 = vrot.slane %v4176_v50, 4  ;;  %v5993_v58 = vcombine.low %v9043_v45, %v9048_v13  ;;  %v7116_v61 = vld [vmem:[%s7621_s9 + $0x20] sm:$0x1]  ;;  %v4652_v7 = vrot.slane %v8768_v32, 5  ;;  %v4572_v42 = vrot.slane %v7117_v18, 5 }
 0x1ab   : > { %v4568_v15 = vrot.slane %v7116_v61, 5  ;;  %v9061_v4 = vsel %vm7877_vm6, %v5978_v8, %v4649_v19  ;;  %v4651_v17 = vrot.slane %v4649_v19, 4  ;;  %v4192_v32 = vsel %vm7660_vm2, %v4187_v12, %v4191_v16  ;;  %v5952_v54 = vld [vmem:[%s7621_s9 + $0x30] sm:$0xe]  ;;  %v7118_v60 = vld [vmem:[%s7621_s9 + $0x34] sm:$0xf] }
 0x1ac   : > { %v4182_v43 = vsel %vm7660_vm2, %v4177_v30, %v9011_v28  ;;  %v4566_v50 = vsel %vm7877_vm6, %v5966_v39, %v4565_v9  ;;  %v4579_v3 = vrot.slane %v7118_v60, 5  ;;  %v5979_v62 = vrot.slane %v5963_v37, 9  ;;  %v7119_v30 = vld [vmem:[%s7621_s9 + $0x2c] sm:$0x1]  ;;  %v7120_v8 = vld [vmem:[%s7621_s9 + $0x38] sm:$0x1] }
 0x1ad   : > { %v4569_v46 = vsel %vm7877_vm6, %v4567_v40, %v4568_v15  ;;  %v9081_v28 = vsel %vm7877_vm6, %v4651_v17, %v4652_v7  ;;  %v5967_v16 = vrot.slane %v5951_v24, 9  ;;  %v4574_v9 = vrot.slane %v4572_v42, 4  ;;  %v7066_v61 = vld [vmem:[%s7621_s9 + $0x6c] sm:$0xff]   ;;  %v5964_v17 = vld [vmem:[%s7621_s9 + $0xc0] sm:$0xe] }
 0x1ae   : > { %v5994_v57 = vcombine.low %v9061_v4, %v9081_v28  ;;  %v4656_v39 = vrot.slane %v8832_v14, 5  ;;  %v4575_v12 = vrot.slane %v7119_v30, 5  ;;  %v4659_v40 = vrot.slane %v8867_v29, 5  ;;  %v5953_v14 = vld [vmem:[%s7621_s9 + $0x3c] sm:$0xe] }
 0x1af   : > { %v4581_v15 = vrot.slane %v4579_v3, 4  ;;  %v4582_v19 = vrot.slane %v7120_v8, 5  ;;  %v9586_v37 = vld [vmem:[#allocation17_spill] sm:$0xff]  ;;  %v4573_v29 = vsel %vm7877_vm6, %v5967_v16, %v4572_v42  ;;  %v5980_v60 = vrot.slane %v5964_v17, 9  ;;  %v7134_v45 = vld [vmem:[%s7621_s9 + $0xc8] sm:$0x1] }
 0x1b0   : > { %6610 = vmatmul.mubr.msk.bf16.gmra.mrb[24].mxu0 %vm819_vm3, %v5929_v55  ;;  %v5931_v55 = vcombine.low %v4182_v43, %v4192_v32  ;;  %v9093_v7 = vsel %vm7877_vm6, %v5979_v62, %v4656_v39  ;;  %v4658_v18 = vrot.slane %v4656_v39, 4  ;;  %v4586_v43 = vrot.slane %v9586_v37, 5  ;;  %v7121_v37 = vld [vmem:[%s7621_s9 + $0x70] sm:$0xf] }
 0x1b1   : > { %6450 = vmatmul.mubr.msk.bf16.gmra.mrb[8].mxu1 %vm819_vm3, %v7063_v10  ;;  %6613 = vmatprep.mubr.msk.bf16.mxu0 %vm819_vm3, %v5930_v63  ;;  %v7065_v10 = vld [vmem:[%s7621_s9 + $0x60] sm:$0xff]   ;;  %v5982_v63 = vcombine.low %v4566_v50, %v4569_v46  ;;  %v4576_v24 = vsel %vm7877_vm6, %v4574_v9, %v4575_v12  ;;  %v4663_v42 = vrot.slane %v8903_v44, 5  ;;  %v5969_v62 = vrot.slane %v5953_v14, 9  ;;  %v5965_v12 = vld [vmem:[%s7621_s9 + $0xcc] sm:$0xe] }
 0x1b2   : > { %6453 = vmatprep.mubr.msk.bf16.mxu1 %vm819_vm3, %v7064_v6  ;;  %v5968_v6 = vrot.slane %v5952_v54, 9  ;;  %v9101_v32 = vsel %vm7877_vm6, %v4658_v18, %v4659_v40  ;;  %v4583_v54 = vsel %vm7877_vm6, %v4581_v15, %v4582_v19  ;;  %v4666_v9 = vrot.slane %v8974_v11, 5  ;;  %v5678_v40 = vld [vmem:[%s7621_s9 + $0x6c] sm:$0xf] }
 0x1b3   : > { %v5995_v50 = vcombine.low %v9093_v7, %v9101_v32  ;;  %v5983_v39 = vcombine.low %v4573_v29, %v4576_v24  ;;  %v4665_v30 = vrot.slane %v4663_v42, 4  ;;  %v5981_v15 = vrot.slane %v5965_v12, 9 }
 0x1b4   : > { %v4580_v46 = vsel %vm7877_vm6, %v5968_v6, %v4579_v3  ;;  %v7067_v3 = vld [vmem:[%s7621_s9 + $0x78] sm:$0xff]   ;;  %v4587_v8 = vsel %vm7877_vm6, %v5969_v62, %v4586_v43  ;;  %v2411_v18 = vshrl.u32 %v5678_v40, 16  ;;  %v4670_v17 = vrot.slane %v8965_v56, 5  ;;  %v7069_v62 = vld [vmem:[%s7621_s9 + $0x90] sm:$0xff]  }
 0x1b5   : > { %v5984_v6 = vcombine.low %v4580_v46, %v4583_v54  ;;  %v9129_v44 = vsel %vm7877_vm6, %v4665_v30, %v4666_v9  ;;  %v2414_v14 = vshll.u32 %v5678_v40, 16  ;;  %v2420_v29 = vshll.u32 %v7121_v37, 16  ;;  %v7122_v30 = vld [vmem:[%s7621_s9 + $0x74] sm:$0x1] }
 0x1b6   : > { %v2424_v24 = vshrl.u32 %v7121_v37, 16  ;;  %v9146_v46 = vsel %vm7877_vm6, %v5981_v15, %v4670_v17  ;;  %v4672_v56 = vrot.slane %v4670_v17, 4  ;;  %v2430_v12 = vshll.u32 %v7122_v30, 16  ;;  %v5690_v37 = vld [vmem:[%s7621_s9 + $0x9c] sm:$0xf] }
 0x1b7   : > { %v2598_v13 = vshll.u32 %v7134_v45, 16 }
 0x1b8   : > { %6614 = vmatmul.mubr.msk.bf16.gmra.mrb[28].mxu0 %vm819_vm3, %v5931_v55  ;;  %v9587_v55 = vld [vmem:[#allocation20_spill] sm:$0xff]  ;;  %v2426_v9 = vrot.slane %v2424_v24, 4  ;;  %v2432_v17 = vrot.slane %v2430_v12, 5 }
 0x1b9   : > { %6454 = vmatmul.mubr.msk.bf16.gmra.mrb[12].mxu1 %vm819_vm3, %v7065_v10  ;;  %6621 = vmatprep.mubr.msk.bf16.mxu0 %vm819_vm3, %v5982_v63  ;;  %v4589_v16 = vrot.slane %v9587_v55, 5  ;;  %v4588_v10 = vrot.slane %v4586_v43, 4  ;;  %v9121_v63 = vsel %vm7877_vm6, %v5980_v60, %v4663_v42  ;;  %v4673_v43 = vrot.slane %v9009_v52, 5 }
 0x1ba   : > { %6457 = vmatprep.mubr.msk.bf16.mxu1 %vm819_vm3, %v7066_v61  ;;  %v7068_v61 = vld [vmem:[%s7621_s9 + $0x84] sm:$0xff]   ;;  %v5996_v11 = vcombine.low %v9121_v63, %v9129_v44  ;;  %v2413_v60 = vrot.slane %v2411_v18, 4  ;;  %v2416_v55 = vrot.slane %v2414_v14, 5 }
 0x1bb   : > { %v4590_v19 = vsel %vm7877_vm6, %v4588_v10, %v4589_v16  ;;  %v9150_v42 = vsel %vm7877_vm6, %v4672_v56, %v4673_v43  ;;  %v2422_v16 = vrot.slane %v2420_v29, 5  ;;  %v5684_v10 = vld [vmem:[%s7621_s9 + $0x84] sm:$0xf]  ;;  %v7071_v18 = vld [vmem:[%s7621_s9 + $0xa8] sm:$0xff]   ;;  %v7072_v29 = vld [vmem:[%s7621_s9 + $0xb4] sm:$0xff]  }
 0x1bc   : > { %v5985_v54 = vcombine.low %v4587_v8, %v4590_v19  ;;  %v5997_v52 = vcombine.low %v9146_v46, %v9150_v42  ;;  %v2417_v0 = vor.u32 %v2416_v55, %v2413_v60  ;;  %v2462_v40 = vshll.u32 %v5684_v10, 16  ;;  %v5687_v19 = vld [vmem:[%s7621_s9 + $0x90] sm:$0xf]  ;;  %v7124_v60 = vld [vmem:[%s7621_s9 + $0x94] sm:$0xf] }
 0x1bd   : > { %v2483_v56 = vshrl.u32 %v5687_v19, 16  ;;  %v2496_v55 = vshrl.u32 %v7124_v60, 16 }
 0x1be   : > { %v2418_v14 = vrot.slane %v2417_v0, 4 }
 0x1c0   : > { %6622 = vmatmul.mubr.msk.bf16.vlgmr.msra.gmra.mrb[0].mxu0 %vm819_vm3, %v5983_v39  ;;  %v7070_v39 = vld [vmem:[%s7621_s9 + $0x9c] sm:$0xff]   ;;  %v2423_v0 = vsel %vm7660_vm2, %v2418_v14, %v2422_v16 }
 0x1c1   : > { %6458 = vmatmul.mubr.msk.bf16.gmra.mrb[16].mxu1 %vm819_vm3, %v7067_v3  ;;  %6625 = vmatprep.mubr.msk.bf16.mxu0 %vm819_vm3, %v5984_v6  ;;  %v2427_v3 = vor.u32 %v2426_v9, %v2422_v16  ;;  %v2459_v6 = vshrl.u32 %v5684_v10, 16  ;;  %v2507_v9 = vshrl.u32 %v5690_v37, 16  ;;  %v7125_v10 = vld [vmem:[%s7621_s9 + $0xa0] sm:$0xf] }
 0x1c2   : > { %6461 = vmatprep.mubr.msk.bf16.mxu1 %vm819_vm3, %v7068_v61  ;;  %v7123_v61 = vld [vmem:[%s7621_s9 + $0x88] sm:$0xf]  ;;  %v2516_v30 = vshll.u32 %v7125_v10, 16  ;;  %v2520_v12 = vshrl.u32 %v7125_v10, 16 }
 0x1c3   : > { %v2468_v15 = vshll.u32 %v7123_v61, 16  ;;  %v2472_v8 = vshrl.u32 %v7123_v61, 16  ;;  %v2428_v35 = vrot.slane %v2427_v3, 4  ;;  %v2461_v53 = vrot.slane %v2459_v6, 4 }
 0x1c4   : > { %v2509_v61 = vrot.slane %v2507_v9, 4  ;;  %v9192_v16 = vrot.slane %v2516_v30, 5 }
 0x1c5   : > { %v9170_v24 = vrot.slane %v2468_v15, 5  ;;  %v2474_v43 = vrot.slane %v2472_v8, 4  ;;  %v2433_v5 = vsel %vm7660_vm2, %v2428_v35, %v2432_v17  ;;  %v2522_v8 = vrot.slane %v2520_v12, 4 }
 0x1c7   : > { %v2475_v6 = vor.u32 %v2474_v43, %v9170_v24 }
 0x1c8   : > { %6626 = vmatmul.mubr.msk.bf16.gmra.mrb[4].mxu0 %vm819_vm3, %v5985_v54  ;;  %v2486_v54 = vshll.u32 %v5687_v19, 16  ;;  %v7073_v19 = vld [vmem:[%s7621_s9 + $0xc0] sm:$0xff]  }
 0x1c9   : > { %6462 = vmatmul.mubr.msk.bf16.gmra.mrb[20].mxu1 %vm819_vm3, %v7069_v62  ;;  %6629 = vmatprep.mubr.msk.bf16.mxu0 %vm819_vm3, %v5986_v47  ;;  %v2464_v47 = vrot.slane %v2462_v40, 5  ;;  %v2492_v62 = vshll.u32 %v7124_v60, 16  ;;  %v2485_v40 = vrot.slane %v2483_v56, 4  ;;  %v2476_v35 = vrot.slane %v2475_v6, 4  ;;  %v7128_v60 = vld [vmem:[%s7621_s9 + $0xa4] sm:$0x1] }
 0x1ca   : > { %6465 = vmatprep.mubr.msk.bf16.mxu1 %vm819_vm3, %v7070_v39  ;;  %v2510_v39 = vshll.u32 %v5690_v37, 16  ;;  %v2488_v34 = vrot.slane %v2486_v54, 5  ;;  %v2523_v54 = vor.u32 %v2522_v8, %v9192_v16 }
 0x1cb   : > { %v2465_v3 = vor.u32 %v2464_v47, %v2461_v53  ;;  %v9190_v51 = vrot.slane %v2492_v62, 5  ;;  %v7127_v47 = vld [vmem:[%s7621_s9 + $0x98] sm:$0x1]  ;;  %v2526_v62 = vshll.u32 %v7128_v60, 16 }
 0x1cc   : > { %v2512_v15 = vrot.slane %v2510_v39, 5  ;;  %v2489_v53 = vor.u32 %v2488_v34, %v2485_v40  ;;  %v2502_v37 = vshll.u32 %v7127_v47, 16  ;;  %v2544_v39 = vshrl.u32 %v7129_v38, 16 }
 0x1cd   : > { %v2466_v14 = vrot.slane %v2465_v3, 4  ;;  %v2524_v6 = vrot.slane %v2523_v54, 4  ;;  %v2528_v40 = vrot.slane %v2526_v62, 5  ;;  %v7133_v62 = vld [vmem:[%s7621_s9 + $0xbc] sm:$0x1] }
 0x1ce   : > { %v2513_v56 = vor.u32 %v2512_v15, %v2509_v61  ;;  %v2490_v12 = vrot.slane %v2489_v53, 4  ;;  %v2546_v15 = vrot.slane %v2544_v39, 4  ;;  %v2574_v48 = vshll.u32 %v7133_v62, 16 }
 0x1cf   : > { %v2471_v10 = vsel %vm7660_vm2, %v2466_v14, %v9170_v24  ;;  %v5699_v14 = vld [vmem:[%s7621_s9 + $0xc0] sm:$0xf]  ;;  %v2529_v33 = vsel %vm7660_vm2, %v2524_v6, %v2528_v40 }
 0x1d0   : > { %6630 = vmatmul.mubr.msk.bf16.gmra.mrb[8].mxu0 %vm819_vm3, %v5987_v26  ;;  %v2478_v26 = vshll.u32 %v7126_v41, 16  ;;  %v2568_v41 = vshrl.u32 %v7130_v25, 16  ;;  %v2514_v3 = vrot.slane %v2513_v56, 4 }
 0x1d1   : > { %6466 = vmatmul.mubr.msk.bf16.gmra.mrb[24].mxu1 %vm819_vm3, %v7071_v18  ;;  %6633 = vmatprep.mubr.msk.bf16.mxu0 %vm819_vm3, %v5988_v20  ;;  %v2498_v20 = vrot.slane %v2496_v55, 4  ;;  %v5710_v18 = vcombine.low %v2423_v0, %v2433_v5  ;;  %v5696_v55 = vld [vmem:[%s7621_s9 + $0xb4] sm:$0xf]  ;;  %v2504_v0 = vrot.slane %v2502_v37, 5 }
 0x1d2   : > { %6469 = vmatprep.mubr.msk.bf16.mxu1 %vm819_vm3, %v7072_v29  ;;  %v2480_v17 = vrot.slane %v2478_v26, 5  ;;  %v5693_v29 = vld [vmem:[%s7621_s9 + $0xa8] sm:$0xf]  ;;  %v2555_v5 = vshrl.u32 %v5696_v55, 16  ;;  %v2558_v59 = vshll.u32 %v5696_v55, 16  ;;  %v2519_v47 = vsel %vm7660_vm2, %v2514_v3, %v9192_v16 }
 0x1d3   : > { %v2499_v43 = vor.u32 %v2498_v20, %v9190_v51  ;;  %v2531_v9 = vshrl.u32 %v5693_v29, 16  ;;  %v2534_v1 = vshll.u32 %v5693_v29, 16  ;;  %v2579_v29 = vshrl.u32 %v5699_v14, 16 }
 0x1d4   : > { %v2481_v30 = vsel %vm7660_vm2, %v2476_v35, %v2480_v17  ;;  %v2557_v8 = vrot.slane %v2555_v5, 4  ;;  %v2570_v17 = vrot.slane %v2568_v41, 4  ;;  %v2495_v35 = vsel %vm7660_vm2, %v2490_v12, %v9190_v51  ;;  %v7131_v51 = vld [vmem:[%s7621_s9 + $0xb0] sm:$0x1] }
 0x1d5   : > { %v2500_v26 = vrot.slane %v2499_v43, 4  ;;  %v2533_v34 = vrot.slane %v2531_v9, 4  ;;  %v2536_v20 = vrot.slane %v2534_v1, 5  ;;  %v5712_v24 = vcombine.low %v2471_v10, %v2481_v30  ;;  %v7132_v43 = vld [vmem:[%s7621_s9 + $0xc4] sm:$0xf] }
 0x1d6   : > { %v2550_v37 = vshll.u32 %v7131_v51, 16  ;;  %v2582_v16 = vshll.u32 %v5699_v14, 16  ;;  %v2588_v56 = vshll.u32 %v7132_v43, 16  ;;  %v2592_v54 = vshrl.u32 %v7132_v43, 16 }
 0x1d7   : > { %v2505_v53 = vsel %vm7660_vm2, %v2500_v26, %v2504_v0  ;;  %v2537_v31 = vor.u32 %v2536_v20, %v2533_v34  ;;  %v2576_v0 = vrot.slane %v2574_v48, 5  ;;  %v2600_v3 = vrot.slane %v2598_v13, 5 }
 0x1d8   : > { %6634 = vmatmul.mubr.msk.bf16.gmra.mrb[12].mxu0 %vm819_vm3, %v5989_v22  ;;  %v2540_v22 = vshll.u32 %v7129_v38, 16  ;;  %v5713_v2 = vcombine.low %v2495_v35, %v2505_v53  ;;  %v2552_v1 = vrot.slane %v2550_v37, 5  ;;  %v2581_v38 = vrot.slane %v2579_v29, 4  ;;  %v9299_v35 = vld [vmem:[#allocation7] ss:$0 sm:$0xff] }
 0x1d9   : > { %6470 = vmatmul.mubr.msk.bf16.gmra.mrb[28].mxu1 %vm819_vm3, %v7073_v19  ;;  %6637 = vmatprep.mubr.msk.bf16.mxu0 %vm819_vm3, %v5990_v21  ;;  %v2564_v21 = vshll.u32 %v7130_v25, 16  ;;  %v2560_v19 = vrot.slane %v2558_v59, 5  ;;  %v2538_v55 = vrot.slane %v2537_v31, 4  ;;  %v2590_v39 = vrot.slane %v2588_v56, 5 }
 0x1da   : > { %6493 = vmatprep.mubr.msk.bf16.mxu1 %vm819_vm3, %v5710_v18  ;;  %v2542_v61 = vrot.slane %v2540_v22, 5  ;;  %v2584_v22 = vrot.slane %v2582_v16, 5  ;;  %v2594_v10 = vrot.slane %v2592_v54, 4 }
 0x1db   : > { %v2566_v18 = vrot.slane %v2564_v21, 5 }
 0x1dc   : > { %v2543_v5 = vsel %vm7660_vm2, %v2538_v55, %v2542_v61  ;;  %v2585_v25 = vor.u32 %v2584_v22, %v2581_v38  ;;  %v2595_v21 = vor.u32 %v2594_v10, %v2590_v39 }
 0x1dd   : > { %v2571_v60 = vor.u32 %v2570_v17, %v2566_v18  ;;  %v6089_v17 = vld [vmem:[%s7635_s29] sm:$0xff]  }
 0x1de   : > { %v2586_v41 = vrot.slane %v2585_v25, 4  ;;  %v2596_v26 = vrot.slane %v2595_v21, 4 }
 0x1df   : > { %v2572_v12 = vrot.slane %v2571_v60, 4 }
 0x1e0   : > { %6638 = vmatmul.mubr.msk.bf16.gmra.mrb[16].mxu0 %vm819_vm3, %v5991_v36  ;;  %v2547_v36 = vor.u32 %v2546_v15, %v2542_v61  ;;  %v2591_v6 = vsel %vm7660_vm2, %v2586_v41, %v2590_v39  ;;  %v2601_v40 = vsel %vm7660_vm2, %v2596_v26, %v2600_v3 }
 0x1e1   : > { %6494 = vmatmul.mubr.msk.bf16.vlgmr.msra.gmra.mrb[16].mxu1 %vm819_vm3, %v8999_v49  ;;  %6641 = vmatprep.mubr.msk.bf16.mxu0 %vm819_vm3, %v5992_v23  ;;  %v2561_v49 = vor.u32 %v2560_v19, %v2557_v8  ;;  %v5714_v23 = vcombine.low %v2519_v47, %v2529_v33  ;;  %v2577_v4 = vsel %vm7660_vm2, %v2572_v12, %v2576_v0 }
 0x1e2   : > { %6497 = vmatprep.mubr.msk.bf16.mxu1 %vm819_vm3, %v5712_v24  ;;  %v2548_v9 = vrot.slane %v2547_v36, 4  ;;  %v5717_v34 = vcombine.low %v2591_v6, %v2601_v40  ;;  %v6090_v36 = vunpack.c.l.bf16 %v6089_v17 }
 0x1e3   : > { %v2562_v30 = vrot.slane %v2561_v49, 4  ;;  %v6091_v49 = vunpack.c.h.bf16 %v6089_v17 }
 0x1e4   : > { %v2553_v59 = vsel %vm7660_vm2, %v2548_v9, %v2552_v1  ;;  %v6153_v1 = vld [vmem:[%s7635_s29 + $0x10] sm:$0xff]  }
 0x1e5   : > { %v5715_v28 = vcombine.low %v2543_v5, %v2553_v59  ;;  %v6098_v45 = vunpack.c.l.bf16 %v6153_v1  ;;  %v6099_v40 = vunpack.c.h.bf16 %v6153_v1 }
 0x1e8   : > { %6642 = vmatmul.mubr.msk.bf16.gmra.mrb[20].mxu0 %vm819_vm3, %v5993_v58  ;;  %v2567_v58 = vsel %vm7660_vm2, %v2562_v30, %v2566_v18  ;;  %v6152_v18 = vld [vmem:[%s7635_s29 + $0x8] sm:$0xff]  }
 0x1e9   : > { %6498 = vmatmul.mubr.msk.bf16.gmra.mrb[20].mxu1 %vm819_vm3, %v5713_v2  ;;  %6645 = vmatprep.mubr.msk.bf16.mxu0 %vm819_vm3, %v5994_v57  ;;  %v5716_v57 = vcombine.low %v2567_v58, %v2577_v4  ;;  %v6094_v47 = vunpack.c.l.bf16 %v6152_v18  ;;  %v6095_v16 = vunpack.c.h.bf16 %v6152_v18 }
 0x1ea   : > { %6501 = vmatprep.mubr.msk.bf16.mxu1 %vm819_vm3, %v5714_v23  ;;  %v6154_v23 = vld [vmem:[%s7635_s29 + $0x18] sm:$0xff]  }
 0x1eb   : > { %v6102_v0 = vunpack.c.l.bf16 %v6154_v23 }
 0x1f0   : > { %6646 = vmatmul.mubr.msk.bf16.gmra.mrb[24].mxu0 %vm819_vm3, %v5995_v50 }
 0x1f1   : > { %6502 = vmatmul.mubr.msk.bf16.gmra.mrb[24].mxu1 %vm819_vm3, %v5715_v28  ;;  %6649 = vmatprep.mubr.msk.bf16.mxu0 %vm819_vm3, %v5996_v11 }
 0x1f2   : > { %6505 = vmatprep.mubr.msk.bf16.mxu1 %vm819_vm3, %v5716_v57  ;;  %v6103_v57 = vunpack.c.h.bf16 %v6154_v23 }
 0x1f8   : > { %6650 = vmatmul.mubr.msk.bf16.gmra.mrb[28].mxu0 %vm819_vm3, %v5997_v52 }
 0x1f9   : > { %6506 = vmatmul.mubr.msk.bf16.gmra.mrb[28].mxu1 %vm819_vm3, %v5717_v34 }
 0x274   : > { %v6443_v7 = vpop.f32.mrb[0].mxu1 }
 0x275   : > { %v2011_v32 = vpop.f32.mrb[1].mxu1 }
 0x276   : > { %v6444_v50 = vpop.f32.mrb[2].mxu1 }
 0x277   : > { %v2014_v63 = vpop.f32.mrb[3].mxu1 }
 0x27c   : > { %v6447_v44 = vpop.f32.mrb[4].mxu1 }
 0x27d   : > { %v2027_v11 = vpop.f32.mrb[5].mxu1 }
 0x27e   : > { %v6448_v20 = vpop.f32.mrb[6].mxu1 }
 0x27f   : > { %v2030_v61 = vpop.f32.mrb[7].mxu1 }
 0x284   : > { %v9281_v27 = vpop.f32.mrb[8].mxu1 }
 0x285   : > { %v9283_v15 = vpop.f32.mrb[9].mxu1 }
 0x286   : > { %v9285_v24 = vpop.f32.mrb[10].mxu1 }
 0x287   : > { %v9287_v46 = vpop.f32.mrb[11].mxu1 }
 0x28c   : > { %v9289_v42 = vpop.f32.mrb[12].mxu1 }
 0x28d   : > { %v9291_v52 = vpop.f32.mrb[13].mxu1 }
 0x28e   : > { %v9293_v8 = vpop.f32.mrb[14].mxu1 }
 0x28f   : > { %v9295_v19 = vpop.f32.mrb[15].mxu1 }
 0x293   : > { %v6623_v14 = vpop.f32.mrb[0].mxu0 }
 0x294   : > { %v6657_v53 = vadd.f32 %v6623_v14, %v6443_v7  ;;  %v4822_v33 = vpop.f32.mrb[1].mxu0 }
 0x295   : > { %v6658_v31 = vadd.f32 %v4822_v33, %v2011_v32  ;;  %v6624_v51 = vpop.f32.mrb[2].mxu0 }
 0x296   : > { %v4990_v37 = vadd.f32 %v6657_v53, %v9299_v35  ;;  %v6659_v29 = vadd.f32 %v6624_v51, %v6444_v50  ;;  %v4825_v43 = vpop.f32.mrb[3].mxu0 }
 0x297   : > { %v4988_v56 = vadd.f32 %v6658_v31, %v9299_v35  ;;  %v6660_v54 = vadd.f32 %v4825_v43, %v2014_v63  ;;  %v6156_v63 = vld [vmem:[%s7635_s29 + $0x28] sm:$0xff]  }
 0x298   : > { %v5086_v60 = vadd.f32 %v6094_v47, %v4990_v37  ;;  %v4991_v62 = vadd.f32 %v6659_v29, %v9299_v35  ;;  %v6110_v33 = vunpack.c.l.bf16 %v6156_v63 }
 0x299   : > { %v5084_v48 = vadd.f32 %v6090_v36, %v4988_v56  ;;  %v4989_v2 = vadd.f32 %v6660_v54, %v9299_v35 }
 0x29a   : > { %v5118_v55 = vmax.f32 %v5086_v60, 0.0  ;;  %v5087_v9 = vadd.f32 %v6095_v16, %v4991_v62 }
 0x29b   : > { %v5116_v38 = vmax.f32 %v5084_v48, 0.0  ;;  %v5085_v22 = vadd.f32 %v6091_v49, %v4989_v2  ;;  %v6627_v39 = vpop.f32.mrb[4].mxu0  ;;  %v6111_v49 = vunpack.c.h.bf16 %v6156_v63  ;;  %v6160_v63 = vld [vmem:[%s7635_s29 + $0x48] sm:$0xff]  }
 0x29c   : > { %v6057_v10 = vpack.c.bf16 %v5118_v55, %v5118_v55  ;;  %v5119_v30 = vmax.f32 %v5087_v9, 0.0  ;;  %v6661_v12 = vadd.f32 %v6627_v39, %v6447_v44  ;;  %v4838_v5 = vpop.f32.mrb[5].mxu0  ;;  %v6158_v9 = vld [vmem:[%s7635_s29 + $0x38] sm:$0xff]  }
 0x29d   : > { %v6055_v59 = vpack.c.bf16 %v5116_v38, %v5116_v38  ;;  %v5117_v25 = vmax.f32 %v5085_v22, 0.0  ;;  %v6662_v21 = vadd.f32 %v4838_v5, %v2027_v11  ;;  %v6628_v13 = vpop.f32.mrb[6].mxu0  ;;  %v6157_v22 = vld [vmem:[%s7635_s29 + $0x30] sm:$0xff]   ;;  %v6118_v5 = vunpack.c.l.bf16 %v6158_v9 }
 0x29e   : > { %5279 = vst.msk [vmem:[%s9309_s24 + $0x8] sm:$0xf] %vm5276_vm7, %v6057_v10  ;;  %v6058_v58 = vpack.c.bf16 %v5119_v30, %v5119_v30  ;;  %v4994_v4 = vadd.f32 %v6661_v12, %v9299_v35  ;;  %v6663_v28 = vadd.f32 %v6628_v13, %v6448_v20  ;;  %v4841_v41 = vpop.f32.mrb[7].mxu0  ;;  %v6155_v20 = vld [vmem:[%s7635_s29 + $0x20] sm:$0xff]   ;;  %v6114_v13 = vunpack.c.l.bf16 %v6157_v22 }
 0x29f   : > { %5277 = vst.msk [vmem:[%s9309_s24] sm:$0xf] %vm5276_vm7, %v6055_v59  ;;  %v6056_v26 = vpack.c.bf16 %v5117_v25, %v5117_v25  ;;  %v4992_v3 = vadd.f32 %v6662_v21, %v9299_v35  ;;  %v6664_v6 = vadd.f32 %v4841_v41, %v2030_v61  ;;  %v6106_v29 = vunpack.c.l.bf16 %v6155_v20 }
 0x2a0   : > { %5280 = vst.msk [vmem:[%s9309_s24 + $0xc] sm:$0xf] %vm5276_vm7, %v6058_v58  ;;  %v5090_v34 = vadd.f32 %v6102_v0, %v4994_v4  ;;  %v4995_v7 = vadd.f32 %v6663_v28, %v9299_v35  ;;  %v6107_v48 = vunpack.c.h.bf16 %v6155_v20  ;;  %v6119_v41 = vunpack.c.h.bf16 %v6158_v9 }
 0x2a1   : > { %5278 = vst.msk [vmem:[%s9309_s24 + $0x4] sm:$0xf] %vm5276_vm7, %v6056_v26  ;;  %v5088_v32 = vadd.f32 %v6098_v45, %v4992_v3  ;;  %v4993_v50 = vadd.f32 %v6664_v6, %v9299_v35  ;;  %v6115_v6 = vunpack.c.h.bf16 %v6157_v22 }
 0x2a2   : > { %v5122_v44 = vmax.f32 %v5090_v34, 0.0  ;;  %v5091_v11 = vadd.f32 %v6103_v57, %v4995_v7 }
 0x2a3   : > { %v5120_v18 = vmax.f32 %v5088_v32, 0.0  ;;  %v5089_v17 = vadd.f32 %v6099_v40, %v4993_v50  ;;  %v6631_v14 = vpop.f32.mrb[8].mxu0 }
 0x2a4   : > { %v6061_v61 = vpack.c.bf16 %v5122_v44, %v5122_v44  ;;  %v5123_v53 = vmax.f32 %v5091_v11, 0.0  ;;  %v6665_v47 = vadd.f32 %v6631_v14, %v9281_v27  ;;  %v4854_v31 = vpop.f32.mrb[9].mxu0 }
 0x2a5   : > { %v6059_v36 = vpack.c.bf16 %v5120_v18, %v5120_v18  ;;  %v5121_v51 = vmax.f32 %v5089_v17, 0.0  ;;  %v6666_v37 = vadd.f32 %v4854_v31, %v9283_v15  ;;  %v6632_v16 = vpop.f32.mrb[10].mxu0  ;;  %v6159_v18 = vld [vmem:[%s7635_s29 + $0x40] sm:$0xff]   ;;  %v6126_v31 = vunpack.c.l.bf16 %v6160_v63 }
 0x2a6   : > { %5283 = vst.msk [vmem:[%s9309_s24 + $0x18] sm:$0xf] %vm5276_vm7, %v6061_v61  ;;  %v6062_v43 = vpack.c.bf16 %v5123_v53, %v5123_v53  ;;  %v4998_v56 = vadd.f32 %v6665_v47, %v9299_v35  ;;  %v6667_v54 = vadd.f32 %v6632_v16, %v9285_v24  ;;  %v4857_v27 = vpop.f32.mrb[11].mxu0  ;;  %v6122_v16 = vunpack.c.l.bf16 %v6159_v18 }
 0x2a7   : > { %5281 = vst.msk [vmem:[%s9309_s24 + $0x10] sm:$0xf] %vm5276_vm7, %v6059_v36  ;;  %v6060_v60 = vpack.c.bf16 %v5121_v51, %v5121_v51  ;;  %v4996_v62 = vadd.f32 %v6666_v37, %v9299_v35  ;;  %v6668_v15 = vadd.f32 %v4857_v27, %v9287_v46 }
 0x2a8   : > { %5284 = vst.msk [vmem:[%s9309_s24 + $0x1c] sm:$0xf] %vm5276_vm7, %v6062_v43  ;;  %v5094_v2 = vadd.f32 %v6110_v33, %v4998_v56  ;;  %v4999_v23 = vadd.f32 %v6667_v54, %v9299_v35 }
 0x2a9   : > { %5282 = vst.msk [vmem:[%s9309_s24 + $0x14] sm:$0xf] %vm5276_vm7, %v6060_v60  ;;  %v5092_v55 = vadd.f32 %v6106_v29, %v4996_v62  ;;  %v4997_v24 = vadd.f32 %v6668_v15, %v9299_v35  ;;  %v6127_v60 = vunpack.c.h.bf16 %v6160_v63 }
 0x2aa   : > { %v5126_v1 = vmax.f32 %v5094_v2, 0.0  ;;  %v5095_v38 = vadd.f32 %v6111_v49, %v4999_v23  ;;  %v6123_v2 = vunpack.c.h.bf16 %v6159_v18 }
 0x2ab   : > { %v5124_v39 = vmax.f32 %v5092_v55, 0.0  ;;  %v5093_v10 = vadd.f32 %v6107_v48, %v4997_v24  ;;  %v6635_v30 = vpop.f32.mrb[12].mxu0 }
 0x2ac   : > { %v6065_v46 = vpack.c.bf16 %v5126_v1, %v5126_v1  ;;  %v5127_v12 = vmax.f32 %v5095_v38, 0.0  ;;  %v6669_v0 = vadd.f32 %v6635_v30, %v9289_v42  ;;  %v4870_v59 = vpop.f32.mrb[13].mxu0  ;;  %v6162_v1 = vld [vmem:[%s7635_s29 + $0x58] sm:$0xff]  }
 0x2ad   : > { %v6063_v25 = vpack.c.bf16 %v5124_v39, %v5124_v39  ;;  %v5125_v21 = vmax.f32 %v5093_v10, 0.0  ;;  %v6670_v45 = vadd.f32 %v4870_v59, %v9291_v52  ;;  %v6636_v58 = vpop.f32.mrb[14].mxu0  ;;  %v6161_v10 = vld [vmem:[%s7635_s29 + $0x50] sm:$0xff]  }
 0x2ae   : > { %5287 = vst.msk [vmem:[%s9309_s24 + $0x28] sm:$0xf] %vm5276_vm7, %v6065_v46  ;;  %v6066_v4 = vpack.c.bf16 %v5127_v12, %v5127_v12  ;;  %v5002_v28 = vadd.f32 %v6669_v0, %v9299_v35  ;;  %v6671_v57 = vadd.f32 %v6636_v58, %v9293_v8  ;;  %v4873_v42 = vpop.f32.mrb[15].mxu0 }
 0x2af   : > { %5285 = vst.msk [vmem:[%s9309_s24 + $0x20] sm:$0xf] %vm5276_vm7, %v6063_v25  ;;  %v6064_v26 = vpack.c.bf16 %v5125_v21, %v5125_v21  ;;  %v5000_v3 = vadd.f32 %v6670_v45, %v9299_v35  ;;  %v6672_v52 = vadd.f32 %v4873_v42, %v9295_v19  ;;  %v6134_v21 = vunpack.c.l.bf16 %v6162_v1 }
 0x2b0   : > { %5288 = vst.msk [vmem:[%s9309_s24 + $0x2c] sm:$0xf] %vm5276_vm7, %v6066_v4  ;;  %v5098_v40 = vadd.f32 %v6118_v5, %v5002_v28  ;;  %v5003_v34 = vadd.f32 %v6671_v57, %v9299_v35  ;;  %v6130_v57 = vunpack.c.l.bf16 %v6161_v10 }
 0x2b1   : > { %5286 = vst.msk [vmem:[%s9309_s24 + $0x24] sm:$0xf] %vm5276_vm7, %v6064_v26  ;;  %v5096_v8 = vadd.f32 %v6114_v13, %v5000_v3  ;;  %v5001_v7 = vadd.f32 %v6672_v52, %v9299_v35 }
 0x2b2   : > { %v5130_v32 = vmax.f32 %v5098_v40, 0.0  ;;  %v5099_v50 = vadd.f32 %v6119_v41, %v5003_v34 }
 0x2b3   : > { %v5128_v44 = vmax.f32 %v5096_v8, 0.0  ;;  %v5097_v11 = vadd.f32 %v6115_v6, %v5001_v7  ;;  %v6639_v20 = vpop.f32.mrb[16].mxu0  ;;  %v6135_v6 = vunpack.c.h.bf16 %v6162_v1 }
 0x2b4   : > { %v6069_v19 = vpack.c.bf16 %v5130_v32, %v5130_v32  ;;  %v5131_v17 = vmax.f32 %v5099_v50, 0.0  ;;  %v6495_v14 = vpop.f32.mrb[16].mxu1  ;;  %v4886_v61 = vpop.f32.mrb[17].mxu0  ;;  %v6131_v32 = vunpack.c.h.bf16 %v6161_v10 }
 0x2b5   : > { %v6067_v53 = vpack.c.bf16 %v5128_v44, %v5128_v44  ;;  %v5129_v47 = vmax.f32 %v5097_v11, 0.0  ;;  %v6673_v33 = vadd.f32 %v6639_v20, %v6495_v14  ;;  %v2813_v36 = vpop.f32.mrb[17].mxu1  ;;  %v6640_v51 = vpop.f32.mrb[18].mxu0  ;;  %v6164_v20 = vld [vmem:[%s7635_s29 + $0x68] sm:$0xff]   ;;  %v6163_v14 = vld [vmem:[%s7635_s29 + $0x60] sm:$0xff]  }
 0x2b6   : > { %5291 = vst.msk [vmem:[%s9309_s24 + $0x38] sm:$0xf] %vm5276_vm7, %v6069_v19  ;;  %v6070_v37 = vpack.c.bf16 %v5131_v17, %v5131_v17  ;;  %v6674_v29 = vadd.f32 %v4886_v61, %v2813_v36  ;;  %v6496_v43 = vpop.f32.mrb[18].mxu1  ;;  %v4889_v56 = vpop.f32.mrb[19].mxu0  ;;  %v6139_v1 = vunpack.c.h.bf16 %v6163_v14 }
 0x2b7   : > { %5289 = vst.msk [vmem:[%s9309_s24 + $0x30] sm:$0xf] %vm5276_vm7, %v6067_v53  ;;  %v6068_v54 = vpack.c.bf16 %v5129_v47, %v5129_v47  ;;  %v5006_v49 = vadd.f32 %v6673_v33, %v9299_v35  ;;  %v6675_v27 = vadd.f32 %v6640_v51, %v6496_v43  ;;  %v2816_v62 = vpop.f32.mrb[19].mxu1 }
 0x2b8   : > { %5292 = vst.msk [vmem:[%s9309_s24 + $0x3c] sm:$0xf] %vm5276_vm7, %v6070_v37  ;;  %v5004_v15 = vadd.f32 %v6674_v29, %v9299_v35  ;;  %v6676_v48 = vadd.f32 %v4889_v56, %v2816_v62  ;;  %v6142_v37 = vunpack.c.l.bf16 %v6164_v20 }
 0x2b9   : > { %5290 = vst.msk [vmem:[%s9309_s24 + $0x34] sm:$0xf] %vm5276_vm7, %v6068_v54  ;;  %v5102_v23 = vadd.f32 %v6126_v31, %v5006_v49  ;;  %v5007_v55 = vadd.f32 %v6675_v27, %v9299_v35  ;;  %v6138_v49 = vunpack.c.l.bf16 %v6163_v14 }
 0x2ba   : > { %v5100_v24 = vadd.f32 %v6122_v16, %v5004_v15  ;;  %v5005_v9 = vadd.f32 %v6676_v48, %v9299_v35 }
 0x2bb   : > { %v5134_v38 = vmax.f32 %v5102_v23, 0.0  ;;  %v5103_v22 = vadd.f32 %v6127_v60, %v5007_v55  ;;  %v6643_v39 = vpop.f32.mrb[20].mxu0 }
 0x2bc   : > { %v5132_v30 = vmax.f32 %v5100_v24, 0.0  ;;  %v5101_v46 = vadd.f32 %v6123_v2, %v5005_v9  ;;  %v6499_v12 = vpop.f32.mrb[20].mxu1  ;;  %v4902_v0 = vpop.f32.mrb[21].mxu0  ;;  %v6143_v2 = vunpack.c.h.bf16 %v6164_v20 }
 0x2bd   : > { %v6073_v5 = vpack.c.bf16 %v5134_v38, %v5134_v38  ;;  %v5135_v59 = vmax.f32 %v5103_v22, 0.0  ;;  %v6677_v25 = vadd.f32 %v6643_v39, %v6499_v12  ;;  %v2829_v45 = vpop.f32.mrb[21].mxu1  ;;  %v6644_v13 = vpop.f32.mrb[22].mxu0 }
 0x2be   : > { %v6071_v58 = vpack.c.bf16 %v5132_v30, %v5132_v30  ;;  %v5133_v4 = vmax.f32 %v5101_v46, 0.0  ;;  %v6678_v28 = vadd.f32 %v4902_v0, %v2829_v45  ;;  %v6500_v41 = vpop.f32.mrb[22].mxu1  ;;  %v4905_v42 = vpop.f32.mrb[23].mxu0  ;;  %v6166_v30 = vld [vmem:[%s7635_s29 + $0x78] sm:$0xff]  }
 0x2bf   : > { %5295 = vst.msk [vmem:[%s9309_s24 + $0x48] sm:$0xf] %vm5276_vm7, %v6073_v5  ;;  %v6074_v26 = vpack.c.bf16 %v5135_v59, %v5135_v59  ;;  %v5010_v3 = vadd.f32 %v6677_v25, %v9299_v35  ;;  %v6679_v52 = vadd.f32 %v6644_v13, %v6500_v41  ;;  %v2832_v40 = vpop.f32.mrb[23].mxu1  ;;  %v6165_v5 = vld [vmem:[%s7635_s29 + $0x70] sm:$0xff]  }
 0x2c0   : > { %5293 = vst.msk [vmem:[%s9309_s24 + $0x40] sm:$0xf] %vm5276_vm7, %v6071_v58  ;;  %v6072_v34 = vpack.c.bf16 %v5133_v4, %v5133_v4  ;;  %v5008_v8 = vadd.f32 %v6678_v28, %v9299_v35  ;;  %v6680_v7 = vadd.f32 %v4905_v42, %v2832_v40  ;;  %v6150_v28 = vunpack.c.l.bf16 %v6166_v30 }
 0x2c1   : > { %5296 = vst.msk [vmem:[%s9309_s24 + $0x4c] sm:$0xf] %vm5276_vm7, %v6074_v26  ;;  %v5106_v50 = vadd.f32 %v6134_v21, %v5010_v3  ;;  %v5011_v63 = vadd.f32 %v6679_v52, %v9299_v35  ;;  %v6146_v52 = vunpack.c.l.bf16 %v6165_v5  ;;  %v6147_v20 = vunpack.c.h.bf16 %v6165_v5 }
 0x2c2   : > { %5294 = vst.msk [vmem:[%s9309_s24 + $0x44] sm:$0xf] %vm5276_vm7, %v6072_v34  ;;  %v5104_v44 = vadd.f32 %v6130_v57, %v5008_v8  ;;  %v5009_v11 = vadd.f32 %v6680_v7, %v9299_v35 }
 0x2c3   : > { %v5138_v18 = vmax.f32 %v5106_v50, 0.0  ;;  %v5107_v19 = vadd.f32 %v6135_v6, %v5011_v63  ;;  %v6647_v17 = vpop.f32.mrb[24].mxu0 }
 0x2c4   : > { %v5136_v61 = vmax.f32 %v5104_v44, 0.0  ;;  %v5105_v53 = vadd.f32 %v6131_v32, %v5009_v11  ;;  %v6503_v47 = vpop.f32.mrb[24].mxu1  ;;  %v4918_v33 = vpop.f32.mrb[25].mxu0  ;;  %v6151_v32 = vunpack.c.h.bf16 %v6166_v30 }
 0x2c5   : > { %v6077_v31 = vpack.c.bf16 %v5138_v18, %v5138_v18  ;;  %v5139_v36 = vmax.f32 %v5107_v19, 0.0  ;;  %v6681_v51 = vadd.f32 %v6647_v17, %v6503_v47  ;;  %v2845_v29 = vpop.f32.mrb[25].mxu1  ;;  %v6648_v16 = vpop.f32.mrb[26].mxu0 }
 0x2c6   : > { %v6075_v43 = vpack.c.bf16 %v5136_v61, %v5136_v61  ;;  %v5137_v56 = vmax.f32 %v5105_v53, 0.0  ;;  %v6682_v54 = vadd.f32 %v4918_v33, %v2845_v29  ;;  %v6504_v27 = vpop.f32.mrb[26].mxu1  ;;  %v4921_v60 = vpop.f32.mrb[27].mxu0 }
 0x2c7   : > { %5299 = vst.msk [vmem:[%s9309_s24 + $0x58] sm:$0xf] %vm5276_vm7, %v6077_v31  ;;  %v6078_v62 = vpack.c.bf16 %v5139_v36, %v5139_v36  ;;  %v5014_v15 = vadd.f32 %v6681_v51, %v9299_v35  ;;  %v6683_v48 = vadd.f32 %v6648_v16, %v6504_v27  ;;  %v2848_v23 = vpop.f32.mrb[27].mxu1 }
 0x2c8   : > { %5297 = vst.msk [vmem:[%s9309_s24 + $0x50] sm:$0xf] %vm5276_vm7, %v6075_v43  ;;  %v6076_v55 = vpack.c.bf16 %v5137_v56, %v5137_v56  ;;  %v5012_v24 = vadd.f32 %v6682_v54, %v9299_v35  ;;  %v6684_v9 = vadd.f32 %v4921_v60, %v2848_v23 }
 0x2c9   : > { %5300 = vst.msk [vmem:[%s9309_s24 + $0x5c] sm:$0xf] %vm5276_vm7, %v6078_v62  ;;  %v5110_v38 = vadd.f32 %v6142_v37, %v5014_v15  ;;  %v5015_v22 = vadd.f32 %v6683_v48, %v9299_v35 }
 0x2ca   : > { %5298 = vst.msk [vmem:[%s9309_s24 + $0x54] sm:$0xf] %vm5276_vm7, %v6076_v55  ;;  %v5108_v39 = vadd.f32 %v6138_v49, %v5012_v24  ;;  %v5013_v10 = vadd.f32 %v6684_v9, %v9299_v35 }
 0x2cb   : > { %v5142_v46 = vmax.f32 %v5110_v38, 0.0  ;;  %v5111_v12 = vadd.f32 %v6143_v2, %v5015_v22  ;;  %v6651_v0 = vpop.f32.mrb[28].mxu0 }
 0x2cc   : > { %v5140_v59 = vmax.f32 %v5108_v39, 0.0  ;;  %v5109_v25 = vadd.f32 %v6139_v1, %v5013_v10  ;;  %v6507_v21 = vpop.f32.mrb[28].mxu1  ;;  %v4934_v45 = vpop.f32.mrb[29].mxu0 }
 0x2cd   : > { %v6081_v13 = vpack.c.bf16 %v5142_v46, %v5142_v46  ;;  %v5143_v58 = vmax.f32 %v5111_v12, 0.0  ;;  %v6685_v4 = vadd.f32 %v6651_v0, %v6507_v21  ;;  %v2861_v57 = vpop.f32.mrb[29].mxu1  ;;  %v6652_v41 = vpop.f32.mrb[30].mxu0 }
 0x2ce   : > { %v6079_v42 = vpack.c.bf16 %v5140_v59, %v5140_v59  ;;  %v5141_v26 = vmax.f32 %v5109_v25, 0.0  ;;  %v6686_v3 = vadd.f32 %v4934_v45, %v2861_v57  ;;  %v6508_v6 = vpop.f32.mrb[30].mxu1  ;;  %v4937_v40 = vpop.f32.mrb[31].mxu0 }
 0x2cf   : > { %5303 = vst.msk [vmem:[%s9309_s24 + $0x68] sm:$0xf] %vm5276_vm7, %v6081_v13  ;;  %v6082_v34 = vpack.c.bf16 %v5143_v58, %v5143_v58  ;;  %v5018_v8 = vadd.f32 %v6685_v4, %v9299_v35  ;;  %v6687_v7 = vadd.f32 %v6652_v41, %v6508_v6  ;;  %v2864_v50 = vpop.f32.mrb[31].mxu1 }
 0x2d0   : > { %5301 = vst.msk [vmem:[%s9309_s24 + $0x60] sm:$0xf] %vm5276_vm7, %v6079_v42  ;;  %v6080_v63 = vpack.c.bf16 %v5141_v26, %v5141_v26  ;;  %v5016_v44 = vadd.f32 %v6686_v3, %v9299_v35  ;;  %v6688_v11 = vadd.f32 %v4937_v40, %v2864_v50 }
 0x2d1   : > { %5304 = vst.msk [vmem:[%s9309_s24 + $0x6c] sm:$0xf] %vm5276_vm7, %v6082_v34  ;;  %v5114_v18 = vadd.f32 %v6150_v28, %v5018_v8  ;;  %v5019_v19 = vadd.f32 %v6687_v7, %v9299_v35 }
 0x2d2   : > { %5302 = vst.msk [vmem:[%s9309_s24 + $0x64] sm:$0xf] %vm5276_vm7, %v6080_v63  ;;  %v5112_v17 = vadd.f32 %v6146_v52, %v5016_v44  ;;  %v5017_v14 = vadd.f32 %v6688_v11, %v9299_v35 }
 0x2d3   : > { %v5146_v61 = vmax.f32 %v5114_v18, 0.0  ;;  %v5115_v53 = vadd.f32 %v6151_v32, %v5019_v19 }
 0x2d4   : > { %v5144_v47 = vmax.f32 %v5112_v17, 0.0  ;;  %v5113_v33 = vadd.f32 %v6147_v20, %v5017_v14 }
 0x2d5   : > { %v6085_v31 = vpack.c.bf16 %v5146_v61, %v5146_v61  ;;  %v5147_v36 = vmax.f32 %v5115_v53, 0.0 }
 0x2d6   : > { %v6083_v51 = vpack.c.bf16 %v5144_v47, %v5144_v47  ;;  %v5145_v37 = vmax.f32 %v5113_v33, 0.0 }
 0x2d7   : > { %5307 = vst.msk [vmem:[%s9309_s24 + $0x78] sm:$0xf] %vm5276_vm7, %v6085_v31  ;;  %v6086_v29 = vpack.c.bf16 %v5147_v36, %v5147_v36 }
 0x2d8   : > { %5305 = vst.msk [vmem:[%s9309_s24 + $0x70] sm:$0xf] %vm5276_vm7, %v6083_v51  ;;  %v6084_v35 = vpack.c.bf16 %v5145_v37, %v5145_v37 }
 0x2d9   : > { %5308 = vst.msk [vmem:[%s9309_s24 + $0x7c] sm:$0xf] %vm5276_vm7, %v6086_v29 }
 0x2da   : > { %5306 = vst.msk [vmem:[%s9309_s24 + $0x74] sm:$0xf] %vm5276_vm7, %v6084_v35 }
 0x2db   : > { %7264 = shalt.err (!%p7261_p13)
}
 0x2dc   : > { %s7265_s5 = scalar_lea.hbm %s9422_s21, 2048  ;;  %s7269_s6 = scalar_lea.hbm %s9483_s4, 4096 }
 0x2dd   : > { %p7266_p3 = scmp.ne.s32.totalorder %s9422_s21, %s7265_s5  ;;  %p7270_p1 = scmp.lt.u32.totalorder %s9422_s21, %s9483_s4 }
 0x2de   : > { %p7271_p10 = scmp.lt.u32.totalorder %s7269_s6, %s7265_s5  ;;  %p7273_p12 = scmp.lt.u32.totalorder %s7265_s5, %s9422_s21 }
 0x2df   : > { %p7267_p4 = pnand %p7266_p3, %p9588_p7 }
 0x2e0   : > { %p7272_p9 = por %p7271_p10, %p7270_p1 }
 0x2e1   : > { %p7268_p8 = pneg %p7267_p4 }
 0x2e2   : > { %p7274_p0 = por %p7273_p12, %p7272_p9 }
 0x2e4   : > { %p7275_p11 = pnand %p7274_p0, %p7268_p8 }
 0x2e6   : > { %7278 = shalt.err (!%p7275_p11)
}
 0x2e7   : > { %s7350_s1 = smov 64   ;;  %s7351_s29 = smov 4  }
 0x2e8   : > { %6928 = dma.vmem_to_hbm [thread:$0]  (%p9588_p7), %s9424_s10, 2048, %s9422_s21, %s5310_s18, %s7350_s1, %s7350_s1, %s7351_s29  }
 0x2e9 PF: > { %s5339_s24 = sand.u32 1, %s7321_s15   ;;  %p9589_p5 = scmp.ne.s32.totalorder %s9515_s28, 0 }
 0x2ea   : > { %p9590_p2 = scmp.ge.s32.totalorder %s7341_s20, 2  ;;  %s5340_s26 = scalar_lea.sflag [#allocation4], %s5339_s24 }
 0x2ec   : > { %p6945_p6 = pnand %p9590_p2, %p9589_p5 }
 0x2ee   : > { %7316 = dma.done.wait (!%p6945_p6), %s5340_s26, 2048  }
 0x2ef   : > { %7318 = vsyncadd (!%p6945_p6), %s5340_s26, 4294965248  ;;  %s24_s20 = sadd.s32 1, %s7341_s20   ;;  %s9591_s15 = smov %s7325_s16 }
 0x2f0   : > { %p21_p13 = scmp.ge.s32.totalorder %s24_s20, 4   ;;  %s9592_s16 = smov %s7329_s17 }
 0x2f1   : > { %s9593_s17 = smov %s7541_s7  ;;  %s9594_s18 = smov %s7337_s19 }
 0x2f2   : > { %s9595_s19 = smov %s9597_s14  ;;  %23 = sbr.rel (!%p21_p13) target bundleno = 13 (0xd), region = 114 }
 0x2f9   :  { %5345 = vsyncpa [#allocation3], 1 }
 0x2fa   :  { %5347 = vsyncpa [#allocation3 + $0x1], 1 }
 0x2fb   :  { %5348 = vsyncpa [#allocation6], 1 }
 0x2fc   :  { %5349 = vsyncpa [#allocation9], 1 }
 0x2fd   :  { %5351 = vsyncpa [#allocation9 + $0x1], 1 }
 0x2fe   :  { %5352 = vsyncpa [#allocation4], 1 }
 0x2ff   :  { %5354 = vsyncpa [#allocation4 + $0x1], 1 }

// kernel: fwd.9
= control target key start
LH: loop header
LB: loop body
LE: loop exit
PB: predicated region body
PF: predicated region fallthrough
CT: control target
= control target key end

     0   :  { %s3921_s0 = inlined_call_operand.hbm [shape: bf16[2,10,10,64], index: 0, kind: input, shape index: {}]   ;;  %s3922_s1 = inlined_call_operand.hbm [shape: bf16[9,64,64], index: 1, kind: input, shape index: {}]   ;;  %s3923_s2 = inlined_call_operand.hbm [shape: f32[1,64], index: 2, kind: input, shape index: {}]   ;;  %s3924_s3 = inlined_call_operand.hbm [shape: bf16[2,8,8,64], index: 3, kind: input, shape index: {}]   ;;  %s3925_s4 = inlined_call_operand.hbm [shape: bf16[2,8,8,64], index: 4, kind: output, shape index: {}]  }
   0x1   :  { %3932 = sst [smem:[#allocation15_spill]] %s3921_s0 }
   0x2   :  { %3933 = sst [smem:[#allocation16_spill]] %s3922_s1 }
   0x3   :  { %3934 = sst [smem:[#allocation17_spill]] %s3923_s2 }
   0x4   :  { %9 = vsyncpa [#allocation3], 0 }
   0x5   :  { %11 = vsyncpa [#allocation3 + $0x1], 0 }
   0x6   :  { %12 = vsyncpa [#allocation6], 0 }
   0x7   :  { %13 = vsyncpa [#allocation9], 0 }
   0x8   :  { %15 = vsyncpa [#allocation9 + $0x1], 0 }
   0x9   :  { %16 = vsyncpa [#allocation4], 0 }
   0xa   :  { %18 = vsyncpa [#allocation4 + $0x1], 0  ;;  %s3190_s15 = smov 0   ;;  %s3192_s16 = smov 0  }
   0xb   :  { %s3194_s17 = smov 0   ;;  %s3196_s18 = smov 0  }
   0xc   :  { %s3198_s19 = smov 0   ;;  %s3200_s20 = smov 0  }
   0xd LB: > { %s2279_s21 = sadd.s32 4294967295, %s3154_s20   ;;  %s2280_s22 = sadd.s32 4294967294, %s3154_s20   ;;  %s3154_s20 = sphi %s3200_s20, %s24_s20   ;;  %s3150_s19 = sphi %s3198_s19, %s3963_s19   ;;  %s3146_s18 = sphi %s3196_s18, %s3962_s18   ;;  %s3142_s17 = sphi %s3194_s17, %s3961_s17   ;;  %s3138_s16 = sphi %s3192_s16, %s3960_s16   ;;  %s3134_s15 = sphi %s3190_s15, %s3959_s15  }
   0xe   : > { %p50_p0 = scmp.ne.s32.totalorder %s3142_s17, %s3138_s16  ;;  %p51_p1 = scmp.eq.s32.totalorder %s3154_s20, 0 }
   0xf   : > { %p56_p2 = scmp.ne.s32.totalorder %s3138_s16, %s3134_s15  ;;  %p3228_p3 = scmp.eq.s32.totalorder %s2279_s21, 0 }
  0x10   : > { %p162_p4 = scmp.eq.s32.totalorder %s2279_s21, 1  ;;  %p3232_p5 = por %p51_p1, %p50_p0 }
  0x11   : > { %s3935_s24 = scalar_select %p3228_p3, 1, 0 }
  0x12   : > { %p168_p6 = scmp.eq.s32.totalorder %s2280_s22, 1  ;;  %p3238_p7 = por %p3228_p3, %p56_p2 }
  0x13   : > { %p3242_p8 = por %p162_p4, %p50_p0  ;;  %p2281_p10 = scmp.ge.s32.totalorder %s3154_s20, 1 }
  0x14   : > { %s3937_s26 = scalar_select %p3238_p7, 1, 0 }
  0x15   : > { %s3938_s27 = scalar_select %p3242_p8, 1, 0 }
  0x16   : > { %p3246_p9 = por %p168_p6, %p56_p2  ;;  %p175_p11 = scmp.lt.s32.totalorder %s3154_s20, 3 }
  0x17   : > { %s3156_s30 = smov [#allocation5]   ;;  %s3157_s7 = smov [#allocation7]  }
  0x18   : > { %s3939_s28 = scalar_select %p3246_p9, 1, 0 }
  0x19   : > { %p3252_p12 = pnand %p2281_p10, %p175_p11  ;;  %s189_s5 = sshll.u32 %s3156_s30, 4  ;;  %s3256_s5 = int_to_ptr.vmem [resolvable:$true] %s189_s5 }
  0x1a   : > { %s205_s8 = sshll.u32 %s3157_s7, 4  ;;  %s3942_s1 = sld [smem:[#allocation16_spill]]  ;;  %s3267_s8 = int_to_ptr.vmem [resolvable:$true] %s205_s8 }
  0x1b   : > { %p2822_p13 = pneg %p3252_p12 }
  0x1d   : > { %p3263_p1 = pnand %p2822_p13, %p3228_p3 }
  0x1f   : > { %p2950_p4 = pneg %p3263_p1 }
  0x20   : > { %s2948_s12 = scalar_lea.hbm %s3942_s1, 4608 }
  0x21   : > { %p2949_p2 = scmp.ne.s32.totalorder %s3942_s1, %s2948_s12  ;;  %p2955_p11 = scmp.lt.u32.totalorder %s2948_s12, %s3942_s1 }
  0x23   : > { %p2951_p6 = pnand %p2950_p4, %p2949_p2 }
  0x25   : > { %p2952_p10 = pneg %p2951_p6 }
  0x27   : > { %p2957_p13 = pnand %p2955_p11, %p2952_p10 }
  0x29   : > { %2960 = shalt.err (!%p2957_p13)
}
  0x2a   : > { %s2961_s30 = scalar_lea.vmem %s3256_s5, 4608  ;;  %p2969_p3 = scmp.lt.s32.totalorder %s3256_s5, %s3256_s5 }
  0x2b   : > { %p2962_p0 = scmp.ne.s32.totalorder %s3256_s5, %s2961_s30  ;;  %p2970_p2 = scmp.lt.s32.totalorder %s2961_s30, %s2961_s30 }
  0x2d   : > { %p2964_p9 = pnand %p2962_p0, %p2950_p4  ;;  %p2971_p6 = por %p2970_p2, %p2969_p3 }
  0x2f   : > { %p2965_p8 = pneg %p2964_p9 }
  0x31   : > { %p2972_p7 = pnand %p2971_p6, %p2965_p8 }
  0x33   : > { %2975 = shalt.err (!%p2972_p7)
}
  0x34   : > { %s3930_s7 = smov 64   ;;  %s3159_s10 = smov 4  }
  0x35   : > { %2825 = dma.hbm_to_vmem [thread:$0]  (!%p3263_p1), %s3942_s1, 4608, %s3256_s5, [#allocation6], %s3930_s7, %s3930_s7, %s3159_s10  }
  0x36   : > { %s3943_s2 = sld [smem:[#allocation17_spill]] }
  0x3c   : > { %s2976_s21 = scalar_lea.hbm %s3943_s2, 16 }
  0x3d   : > { %p2977_p3 = scmp.ne.s32.totalorder %s3943_s2, %s2976_s21  ;;  %p2983_p9 = scmp.lt.u32.totalorder %s2976_s21, %s3943_s2 }
  0x3f   : > { %p2979_p7 = pnand %p2977_p3, %p2950_p4 }
  0x41   : > { %p2980_p8 = pneg %p2979_p7 }
  0x43   : > { %p2985_p0 = pnand %p2983_p9, %p2980_p8 }
  0x45   : > { %2988 = shalt.err (!%p2985_p0)
}
  0x46   : > { %s2989_s5 = scalar_lea.vmem %s3267_s8, 16  ;;  %s2996_s11 = scalar_lea.vmem %s3267_s8, 32 }
  0x47   : > { %p2990_p10 = scmp.ne.s32.totalorder %s3267_s8, %s2989_s5  ;;  %p2997_p2 = scmp.lt.s32.totalorder %s3267_s8, %s3267_s8 }
  0x48   : > { %p2998_p6 = scmp.lt.s32.totalorder %s2996_s11, %s2989_s5 }
  0x49   : > { %p2992_p11 = pnand %p2990_p10, %p2950_p4 }
  0x4a   : > { %p2999_p3 = por %p2998_p6, %p2997_p2 }
  0x4b   : > { %p2993_p13 = pneg %p2992_p11 }
  0x4d   : > { %p3000_p7 = pnand %p2999_p3, %p2993_p13 }
  0x4f   : > { %3003 = shalt.err (!%p3000_p7)
}
  0x50   : > { %2828 = dma.hbm_to_vmem [thread:$0]  (!%p3263_p1), %s3943_s2, 16, %s3267_s8, [#allocation6]  }
  0x51   : > { %s3944_s12 = sadd.s32 1, %s3150_s19  ;;  %p2842_p8 = scmp.lt.s32.totalorder %s3154_s20, 2 }
  0x52   : > { %p38_p4 = scmp.ge.s32.totalorder %s3944_s12, 2  ;;  %s3330_s13 = sand.u32 1, %s3142_s17  }
  0x53   : > { %s2806_s6 = smul.u32 1280, %s3150_s19  ;;  %s3945_s14 = smov %s3944_s12 }
  0x54   : > { %s3965_s14 = smov (%p38_p4, %s3945_s14), 0  ;;  %s2805_s21 = smul.u32 80, %s3330_s13 }
  0x55   : > { %s40_s22 = ssub.s32 %s3150_s19, %s3965_s14  ;;  %s3946_s0 = sld [smem:[#allocation15_spill]] }
  0x56   : > { %p41_p1 = scmp.eq.s32.totalorder %s40_s22, 0  ;;  %s220_s8 = scalar_lea.vmem [#allocation2], %s2805_s21 }
  0x57   : > { %s227_s23 = sshll.u32 %s220_s8, 4  ;;  %p3347_p9 = pnand %p2842_p8, %p3232_p5  ;;  %s3356_s23 = int_to_ptr.vmem [resolvable:$true] %s227_s23 }
  0x58   : > { %s3948_s12 = sadd.s32 1, %s3142_s17 }
  0x59   : > { %s3354_s7 = scalar_select %p41_p1, %s3142_s17, %s3948_s12  }
  0x5a   : > { %p3006_p10 = pneg %p3347_p9 }
  0x5b   : > { %s3343_s11 = scalar_lea.hbm %s3946_s0, %s2806_s6  ;;  %s217_s6 = scalar_lea.sflag [#allocation3], %s3330_s13 }
  0x5c   : > { %s3004_s30 = scalar_lea.hbm %s3343_s11, 1280  ;;  %s3009_s22 = scalar_lea.hbm %s3946_s0, 2560 }
  0x5d   : > { %p3005_p0 = scmp.ne.s32.totalorder %s3343_s11, %s3004_s30  ;;  %p3010_p5 = scmp.lt.u32.totalorder %s3343_s11, %s3946_s0 }
  0x5e   : > { %p3011_p2 = scmp.lt.u32.totalorder %s3009_s22, %s3004_s30  ;;  %p3013_p3 = scmp.lt.u32.totalorder %s3004_s30, %s3343_s11 }
  0x5f   : > { %p3007_p11 = pnand %p3006_p10, %p3005_p0 }
  0x60   : > { %p3012_p6 = por %p3011_p2, %p3010_p5 }
  0x61   : > { %p3008_p13 = pneg %p3007_p11 }
  0x62   : > { %p3014_p7 = por %p3013_p3, %p3012_p6 }
  0x64   : > { %p3015_p4 = pnand %p3014_p7, %p3008_p13 }
  0x66   : > { %3018 = shalt.err (!%p3015_p4)
}
  0x67   : > { %s3019_s12 = scalar_lea.vmem %s3356_s23, 1280  ;;  %s3160_s25 = smov [#allocation2]  }
  0x68   : > { %p3020_p8 = scmp.ne.s32.totalorder %s3356_s23, %s3019_s12  ;;  %s3024_s21 = sshll.u32 %s3160_s25, 4  ;;  %s3025_s21 = int_to_ptr.vmem [resolvable:$false] %s3024_s21 }
  0x69   : > { %s3026_s5 = scalar_lea.vmem %s3025_s21, 2560  ;;  %p3027_p11 = scmp.lt.s32.totalorder %s3356_s23, %s3025_s21 }
  0x6a   : > { %p3022_p1 = pnand %p3020_p8, %p3006_p10  ;;  %p3028_p5 = scmp.lt.s32.totalorder %s3026_s5, %s3019_s12 }
  0x6c   : > { %p3023_p0 = pneg %p3022_p1  ;;  %p3029_p2 = por %p3028_p5, %p3027_p11 }
  0x6e   : > { %p3030_p6 = pnand %p3029_p2, %p3023_p0 }
  0x70   : > { %3033 = shalt.err (!%p3030_p6)
}
  0x71   : > { %s3949_s30 = smov 64   ;;  %s2286_s22 = sshll.u32 %s3330_s13, 5 }
  0x72   : > { %2832 = dma.hbm_to_vmem [thread:$0]  (!%p3347_p9), %s3343_s11, 1280, %s3356_s23, %s217_s6, %s3949_s30, %s3949_s30, %s3159_s10  }
  0x73   : > { %s2496_s8 = sshll.u32 %s3150_s19, 9  ;;  %s241_s5 = scalar_lea.vmem [#allocation8], %s2286_s22 }
  0x74   : > { %s3394_s21 = scalar_lea.hbm %s3924_s3, %s2496_s8  ;;  %s249_s0 = sshll.u32 %s241_s5, 4  ;;  %s3396_s0 = int_to_ptr.vmem [resolvable:$true] %s249_s0 }
  0x75   : > { %s238_s1 = scalar_lea.sflag [#allocation9], %s3330_s13  ;;  %s3034_s2 = scalar_lea.hbm %s3394_s21, 512 }
  0x76   : > { %p3035_p13 = scmp.ne.s32.totalorder %s3394_s21, %s3034_s2  ;;  %s3039_s6 = scalar_lea.hbm %s3924_s3, 1024 }
  0x77   : > { %p3040_p4 = scmp.lt.u32.totalorder %s3394_s21, %s3924_s3  ;;  %p3041_p8 = scmp.lt.u32.totalorder %s3039_s6, %s3034_s2 }
  0x78   : > { %p3037_p3 = pnand %p3035_p13, %p3006_p10  ;;  %p3043_p0 = scmp.lt.u32.totalorder %s3034_s2, %s3394_s21 }
  0x79   : > { %p3042_p1 = por %p3041_p8, %p3040_p4 }
  0x7a   : > { %p3038_p7 = pneg %p3037_p3 }
  0x7b   : > { %p3044_p11 = por %p3043_p0, %p3042_p1 }
  0x7d   : > { %p3045_p5 = pnand %p3044_p11, %p3038_p7 }
  0x7f   : > { %3048 = shalt.err (!%p3045_p5)
}
  0x80   : > { %s3049_s22 = scalar_lea.vmem %s3396_s0, 512  ;;  %s3161_s25 = smov [#allocation8]  }
  0x81   : > { %p3050_p2 = scmp.ne.s32.totalorder %s3396_s0, %s3049_s22  ;;  %s3054_s5 = sshll.u32 %s3161_s25, 4  ;;  %s3055_s5 = int_to_ptr.vmem [resolvable:$false] %s3054_s5 }
  0x82   : > { %s3056_s11 = scalar_lea.vmem %s3055_s5, 1024  ;;  %p3057_p3 = scmp.lt.s32.totalorder %s3396_s0, %s3055_s5 }
  0x83   : > { %p3052_p6 = pnand %p3050_p2, %p3006_p10  ;;  %p3058_p4 = scmp.lt.s32.totalorder %s3056_s11, %s3049_s22 }
  0x85   : > { %p3053_p13 = pneg %p3052_p6  ;;  %p3059_p8 = por %p3058_p4, %p3057_p3 }
  0x87   : > { %p3060_p1 = pnand %p3059_p8, %p3053_p13 }
  0x89   : > { %3063 = shalt.err (!%p3060_p1)
}
  0x8a   : > { %2835 = dma.hbm_to_vmem [thread:$0]  (!%p3347_p9), %s3394_s21, 512, %s3396_s0, %s238_s1, %s3949_s30, %s3949_s30, %s3159_s10  }
  0x8b   : > { %261 = sbr.rel (%p3252_p12) target bundleno = 500 (0x1f4), region = 36  ;;  %s3430_s2 = sand.u32 (!%p3252_p12), 1, %s3138_s16  }
  0x8c   : > { %s2807_s23 = smul.u32 (!%p3252_p12), 80, %s3430_s2  ;;  %s264_s6 = scalar_lea.sflag (!%p3252_p12), [#allocation3], %s3430_s2 }
  0x8d   : > { %p3950_p10 = scmp.ne.s32.totalorder (!%p3252_p12), %s3937_s26, 0 }
  0x8e   : > { %s3434_s9 = scalar_lea.vmem (!%p3252_p12), [#allocation2], %s2807_s23 }
  0x92   : > { %3117 = dma.done.wait (%p3950_p10), %s264_s6, 1280  }
  0x93   : > { %3119 = vsyncadd (%p3950_p10), %s264_s6, 4294966016  ;;  %p3951_p9 = scmp.ne.s32.totalorder %s3935_s24, 0 }
  0x95   : > { %3121 = dma.done.wait (%p3951_p9), [#allocation6], 4624  }
  0x96   : > { %3123 = vsyncadd (%p3951_p9), [#allocation6], 4294962672  ;;  %s2292_s0 = sshll.u32 %s3430_s2, 5  ;;  %s281_s1 = scalar_lea.sflag [#allocation9], %s3430_s2 }
  0x97   : > { %s3448_s29 = scalar_lea.vmem [#allocation8], %s2292_s0 }
  0x98   : > { %3125 = dma.done.wait (%p3950_p10), %s281_s1, 512  }
  0x99   : > { %3127 = vsyncadd (%p3950_p10), %s281_s1, 4294966784  ;;  %v2900_v0 = vld [vmem:[#allocation5 + $0x20] sm:$0xff]   ;;  %v2902_v2 = vld [vmem:[#allocation5 + $0x28] sm:$0xff]   ;;  %vm339_vm0 = vsmask.f32 3328  ;;  %vm499_vm3 = vcmask 523264  }
  0x9a   : > { %v2901_v1 = vld [vmem:[#allocation5 + $0x80] sm:$0xff]   ;;  %2589 = vmatprep.subr.bf16.mxu1 %v2900_v0  ;;  %v2903_v3 = vld [vmem:[#allocation5 + $0x88] sm:$0xff]   ;;  %v2904_v4 = vld [vmem:[#allocation5 + $0x30] sm:$0xff]   ;;  %vm340_vm1 = vsmask.f32 7440  ;;  %vm722_vm4 = vcmask 1042432  }
  0x9b   : > { %2653 = vmatprep.subr.bf16.mxu0 %v2901_v1  ;;  %2590 = vmatpush3.bf16.msra.mxu1 %v2900_v0  ;;  %v2905_v5 = vld [vmem:[#allocation5 + $0x90] sm:$0xff]   ;;  %v2906_v6 = vld [vmem:[#allocation5 + $0x38] sm:$0xff]   ;;  %v3481_v32 = vld [vmem:[#allocation5] sm:$0xff]   ;;  %vm723_vm5 = vcmask 1046532   ;;  %vm2124_vm7 = vcmask 519168   ;;  %s313_s24 = scalar_lea.vmem [#allocation10], %s2292_s0 }
  0x9c   : > { %2654 = vmatpush3.bf16.msra.mxu0 %v2901_v1  ;;  %2591 = vmatprep.subr.bf16.mxu1 %v2902_v2  ;;  %v2907_v7 = vld [vmem:[#allocation5 + $0x98] sm:$0xff]   ;;  %v3455_v8 = vld [vmem:[%s3434_s9] sm:$0xf]  ;;  %v3461_v10 = vld [vmem:[%s3434_s9 + $0x4] sm:$0x1]  ;;  %s2497_s26 = sshll.u32 %s3146_s18, 9 }
  0x9d   : > { %2655 = vmatprep.subr.bf16.mxu0 %v2903_v3  ;;  %v3458_v9 = vld [vmem:[%s3434_s9 + $0x8] sm:$0xf]  ;;  %v3464_v11 = vld [vmem:[%s3434_s9 + $0xc] sm:$0x1]  ;;  %v343_v12 = vshrl.u32 %v3455_v8, 16  ;;  %v346_v13 = vshll.u32 %v3455_v8, 16  ;;  %vm3485_vm2 = vmor %vm339_vm0, %vm340_vm1  ;;  %s3867_s21 = scalar_lea.hbm %s3925_s4, %s2497_s26 }
  0x9e   : > { %v352_v14 = vshll.u32 %v3461_v10, 16  ;;  %v357_v15 = vshrl.u32 %v3458_v9, 16  ;;  %v360_v16 = vshll.u32 %v3458_v9, 16  ;;  %v366_v17 = vshll.u32 %v3464_v11, 16  ;;  %v2358_v18 = vld [vmem:[%s3434_s9 + $0x8] sm:$0xf]  ;;  %vm3619_vm6 = vmor %vm722_vm4, %vm723_vm5 }
  0x9f   : > { %2592 = vmatpush3.bf16.msra.mxu1 %v2902_v2  ;;  %v345_v19 = vrot.slane %v343_v12, 4  ;;  %v348_v20 = vrot.slane %v346_v13, 5  ;;  %v3474_v23 = vld [vmem:[%s3434_s9 + $0xc] sm:$0x1]  ;;  %v2360_v26 = vld [vmem:[%s3434_s9 + $0x10] sm:$0xf] }
  0xa0   : > { %2656 = vmatpush3.bf16.msra.mxu0 %v2903_v3  ;;  %2593 = vmatprep.subr.bf16.mxu1 %v2904_v4  ;;  %v354_v21 = vrot.slane %v352_v14, 5  ;;  %v359_v22 = vrot.slane %v357_v15, 4  ;;  %v362_v24 = vrot.slane %v360_v16, 5  ;;  %v368_v25 = vrot.slane %v366_v17, 5  ;;  %v3478_v27 = vld [vmem:[%s3434_s9 + $0x14] sm:$0x1] }
  0xa1   : > { %2657 = vmatprep.subr.bf16.mxu0 %v2905_v5  ;;  %v349_v28 = vor.u32 %v348_v20, %v345_v19  ;;  %v1051_v29 = vshrl.u32 %v2358_v18, 16  ;;  %v1054_v30 = vshll.u32 %v2358_v18, 16  ;;  %v1060_v31 = vshll.u32 %v3474_v23, 16  ;;  %v3491_v38 = vld [vmem:[%s3434_s9 + $0x10] sm:$0xf]  ;;  %s2148_s10 = sshll.u32 %s313_s24, 4  ;;  %s3869_s10 = int_to_ptr.vmem [resolvable:$true] %s2148_s10 }
  0xa2   : > { %v363_v34 = vor.u32 %v362_v24, %v359_v22  ;;  %v1065_v35 = vshrl.u32 %v2360_v26, 16  ;;  %v1068_v36 = vshll.u32 %v2360_v26, 16  ;;  %v1074_v37 = vshll.u32 %v3478_v27, 16  ;;  %v3493_v39 = vld [vmem:[#allocation5 + $0xa0] sm:$0xff]   ;;  %v3496_v43 = vld [vmem:[%s3434_s9 + $0x18] sm:$0xf] }
  0xa3   : > { %2594 = vmatpush3.bf16.msra.mxu1 %v2904_v4  ;;  %v350_v40 = vrot.slane %v349_v28, 4  ;;  %v1053_v41 = vrot.slane %v1051_v29, 4  ;;  %v1056_v42 = vrot.slane %v1054_v30, 5  ;;  %v727_v45 = vrot.slane %v3461_v10, 5  ;;  %v3500_v48 = vld [vmem:[%s3434_s9 + $0x14] sm:$0x1] }
  0xa4   : > { %2658 = vmatpush3.bf16.msra.mxu0 %v2905_v5  ;;  %2595 = vmatprep.subr.bf16.mxu1 %v2906_v6  ;;  %v364_v44 = vrot.slane %v363_v34, 4  ;;  %v1067_v46 = vrot.slane %v1065_v35, 4  ;;  %v1070_v47 = vrot.slane %v1068_v36, 5  ;;  %v1062_v51 = vrot.slane %v1060_v31, 5  ;;  %v3509_v55 = vld [vmem:[%s3434_s9 + $0x1c] sm:$0x1] }
  0xa5   : > { %2659 = vmatprep.subr.bf16.mxu0 %v2907_v7  ;;  %v355_v49 = vsel %vm3485_vm2, %v350_v40, %v354_v21  ;;  %v1057_v50 = vor.u32 %v1056_v42, %v1053_v41  ;;  %v1076_v52 = vrot.slane %v1074_v37, 5  ;;  %v371_v56 = vshrl.u32 %v3491_v38, 16  ;;  %v2362_v58 = vld [vmem:[%s3434_s9 + $0x18] sm:$0xf]  ;;  %v3517_v63 = vld [vmem:[%s3434_s9 + $0x1c] sm:$0x1] }
  0xa6   : > { %v369_v53 = vsel %vm3485_vm2, %v364_v44, %v368_v25  ;;  %v1071_v54 = vor.u32 %v1070_v47, %v1067_v46  ;;  %v374_v57 = vshll.u32 %v3491_v38, 16  ;;  %v380_v61 = vshll.u32 %v3500_v48, 16  ;;  %v2364_v4 = vld [vmem:[%s3434_s9 + $0x20] sm:$0xf]  ;;  %v3526_v12 = vld [vmem:[%s3434_s9 + $0x24] sm:$0x1] }
  0xa7   : > { %2596 = vmatpush3.bf16.msra.mxu1 %v2906_v6  ;;  %v2294_v59 = vcombine.low %v355_v49, %v369_v53  ;;  %v1058_v60 = vrot.slane %v1057_v50, 4  ;;  %v385_v62 = vshrl.u32 %v3496_v43, 16  ;;  %v373_v1 = vrot.slane %v371_v56, 4  ;;  %v3538_v37 = vld [vmem:[%s3434_s9 + $0x20] sm:$0xf]  ;;  %s2134_s18 = scalar_lea.sflag [#allocation4], %s3430_s2 }
  0xa8   : > { %2660 = vmatpush3.bf16.msra.mxu0 %v2907_v7  ;;  %2605 = vmatprep.subr.bf16.mxu1 %v3481_v32  ;;  %v1072_v0 = vrot.slane %v1071_v54, 4  ;;  %v376_v2 = vrot.slane %v374_v57, 5  ;;  %v388_v3 = vshll.u32 %v3496_v43, 16  ;;  %v394_v7 = vshll.u32 %v3509_v55, 16  ;;  %v3542_v46 = vld [vmem:[%s3434_s9 + $0x28] sm:$0xf] }
  0xa9   : > { %2669 = vmatprep.subr.bf16.mxu0 %v3493_v39  ;;  %2597 = vmatprep.mubr.msk.bf16.mxu1 %vm499_vm3, %v2294_v59  ;;  %v1063_v5 = vsel %vm3485_vm2, %v1058_v60, %v1062_v51  ;;  %v387_v6 = vrot.slane %v385_v62, 4  ;;  %v382_v15 = vrot.slane %v380_v61, 5  ;;  %v731_v17 = vrot.slane %v3464_v11, 5  ;;  %v3547_v51 = vld [vmem:[%s3434_s9 + $0x24] sm:$0x1]  ;;  %v2910_v57 = vld [vmem:[#allocation5 + $0x8] sm:$0xff]  }
  0xaa   : > { %v1077_v13 = vsel %vm3485_vm2, %v1072_v0, %v1076_v52  ;;  %v377_v14 = vor.u32 %v376_v2, %v373_v1  ;;  %v390_v16 = vrot.slane %v388_v3, 5  ;;  %v396_v19 = vrot.slane %v394_v7, 5  ;;  %v3550_v52 = vld [vmem:[%s3434_s9 + $0x2c] sm:$0x1]  ;;  %v2366_v60 = vld [vmem:[%s3434_s9 + $0x28] sm:$0xf] }
  0xab   : > { %v2374_v18 = vcombine.low %v1063_v5, %v1077_v13  ;;  %v1079_v20 = vshrl.u32 %v2362_v58, 16  ;;  %v1082_v24 = vshll.u32 %v2362_v58, 16  ;;  %v1088_v25 = vshll.u32 %v3517_v63, 16  ;;  %s3064_s8 = scalar_lea.vmem %s3869_s10, 512  ;;  %p3956_p7 = scmp.ne.s32.totalorder %s3938_s27, 0 }
  0xac   : > { %v378_v21 = vrot.slane %v377_v14, 4  ;;  %v391_v22 = vor.u32 %v390_v16, %v387_v6  ;;  %v1093_v28 = vshrl.u32 %v2364_v4, 16  ;;  %v1096_v29 = vshll.u32 %v2364_v4, 16  ;;  %v3561_v6 = vld [vmem:[%s3434_s9 + $0x2c] sm:$0x1]  ;;  %p3065_p12 = scmp.ne.s32.totalorder %s3869_s10, %s3064_s8  ;;  %s3162_s12 = smov [#allocation10]  }
  0xad   : > { %2661 = vmatprep.mubr.msk.bf16.mxu0 %vm499_vm3, %v2374_v18  ;;  %v1081_v26 = vrot.slane %v1079_v20, 4  ;;  %v1102_v30 = vshll.u32 %v3526_v12, 16  ;;  %v1318_v31 = vrot.slane %v3474_v23, 5  ;;  %v1084_v36 = vrot.slane %v1082_v24, 5  ;;  %v2912_v18 = vld [vmem:[#allocation5 + $0x10] sm:$0xff]   ;;  %s3068_s22 = sshll.u32 %s3162_s12, 4  ;;  %s3069_s22 = int_to_ptr.vmem [resolvable:$false] %s3068_s22 }
  0xae   : > { %v383_v34 = vsel %vm3485_vm2, %v378_v21, %v382_v15  ;;  %v392_v35 = vrot.slane %v391_v22, 4  ;;  %v1322_v40 = vrot.slane %v3478_v27, 5  ;;  %v1090_v41 = vrot.slane %v1088_v25, 5  ;;  %v2368_v15 = vld [vmem:[%s3434_s9 + $0x30] sm:$0xf]  ;;  %p3066_p0 = pnand %p3065_p12, %p3956_p7  ;;  %s3070_s25 = scalar_lea.vmem %s3069_s22, 1024 }
  0xaf   : > { %v1095_v42 = vrot.slane %v1093_v28, 4  ;;  %v1098_v44 = vrot.slane %v1096_v29, 5  ;;  %v1085_v49 = vor.u32 %v1084_v36, %v1081_v26  ;;  %v1104_v50 = vrot.slane %v1102_v30, 5  ;;  %v3570_v22 = vld [vmem:[%s3434_s9 + $0x34] sm:$0x1]  ;;  %v2911_v28 = vld [vmem:[#allocation5 + $0xa8] sm:$0xff]   ;;  %p3071_p5 = scmp.lt.s32.totalorder %s3869_s10, %s3069_s22  ;;  %p3072_p2 = scmp.lt.s32.totalorder %s3070_s25, %s3064_s8 }
  0xb0   : > { %v397_v47 = vsel %vm3485_vm2, %v392_v35, %v396_v19  ;;  %v399_v53 = vshrl.u32 %v3538_v37, 16  ;;  %v402_v58 = vshll.u32 %v3538_v37, 16  ;;  %v408_v59 = vshll.u32 %v3547_v51, 16  ;;  %v3573_v25 = vld [vmem:[%s3434_s9 + $0x30] sm:$0xf]  ;;  %p3067_p11 = pneg %p3066_p0 }
  0xb1   : > { %v2295_v54 = vcombine.low %v383_v34, %v397_v47  ;;  %v1099_v56 = vor.u32 %v1098_v44, %v1095_v42  ;;  %v1086_v61 = vrot.slane %v1085_v49, 4  ;;  %v413_v0 = vshrl.u32 %v3542_v46, 16  ;;  %v3577_v42 = vld [vmem:[%s3434_s9 + $0x38] sm:$0xf]  ;;  %p3073_p6 = por %p3072_p2, %p3071_p5 }
  0xb2   : > { %v401_v62 = vrot.slane %v399_v53, 4  ;;  %v416_v1 = vshll.u32 %v3542_v46, 16  ;;  %v404_v3 = vrot.slane %v402_v58, 5  ;;  %v410_v4 = vrot.slane %v408_v59, 5 }
  0xb3   : > { %2598 = vmatmul.mubr.msk.bf16.vlgmr.msra.gmra.mrb[0].mxu1 %vm499_vm3, %v2295_v54  ;;  %v1100_v2 = vrot.slane %v1099_v56, 4  ;;  %v422_v5 = vshll.u32 %v3550_v52, 16  ;;  %v1091_v7 = vsel %vm3485_vm2, %v1086_v61, %v1090_v41  ;;  %v415_v13 = vrot.slane %v413_v0, 4  ;;  %v2913_v54 = vld [vmem:[#allocation5 + $0xb0] sm:$0xff]   ;;  %v2370_v61 = vld [vmem:[%s3434_s9 + $0x38] sm:$0xf]  ;;  %p3074_p13 = pnand %p3073_p6, %p3067_p11 }
  0xb4   : > { %2606 = vmatpush3.bf16.msra.mxu1 %v3481_v32  ;;  %v418_v14 = vrot.slane %v416_v1, 5  ;;  %v1107_v16 = vshrl.u32 %v2366_v60, 16  ;;  %v405_v20 = vor.u32 %v404_v3, %v401_v62  ;;  %v1110_v24 = vshll.u32 %v2366_v60, 16  ;;  %v2914_v3 = vld [vmem:[#allocation5 + $0x18] sm:$0xff]  }
  0xb5   : > { %v1105_v19 = vsel %vm3485_vm2, %v1100_v2, %v1104_v50  ;;  %2607 = vmatprep.subr.bf16.mxu1 %v2910_v57  ;;  %v424_v21 = vrot.slane %v422_v5, 5  ;;  %v1116_v30 = vshll.u32 %v3561_v6, 16  ;;  %v1121_v36 = vshrl.u32 %v2368_v15, 16  ;;  %v3582_v50 = vld [vmem:[%s3434_s9 + $0x34] sm:$0x1] }
  0xb6   : > { %v2375_v26 = vcombine.low %v1091_v7, %v1105_v19  ;;  %v419_v32 = vor.u32 %v418_v14, %v415_v13  ;;  %v1109_v29 = vrot.slane %v1107_v16, 4  ;;  %v406_v34 = vrot.slane %v405_v20, 4  ;;  %v3596_v2 = vld [vmem:[%s3434_s9 + $0x3c] sm:$0x1]  ;;  %v2372_v14 = vld [vmem:[%s3434_s9 + $0x40] sm:$0xf] }
  0xb7   : > { %v1112_v35 = vrot.slane %v1110_v24, 5  ;;  %v1124_v41 = vshll.u32 %v2368_v15, 16  ;;  %v1118_v47 = vrot.slane %v1116_v30, 5  ;;  %v1130_v49 = vshll.u32 %v3570_v22, 16  ;;  %v3609_v30 = vld [vmem:[#allocation5 + $0x40] sm:$0xff]  }
  0xb8   : > { %2662 = vmatmul.mubr.msk.bf16.vlgmr.msra.gmra.mrb[0].mxu0 %vm499_vm3, %v2375_v26  ;;  %2608 = vmatpush3.bf16.msra.mxu1 %v2910_v57  ;;  %v420_v44 = vrot.slane %v419_v32, 4  ;;  %v427_v53 = vshrl.u32 %v3573_v25, 16  ;;  %v411_v56 = vsel %vm3485_vm2, %v406_v34, %v410_v4  ;;  %v1123_v59 = vrot.slane %v1121_v36, 4  ;;  %v3589_v57 = vld [vmem:[%s3434_s9 + $0x3c] sm:$0x1] }
  0xb9   : > { %2670 = vmatpush3.bf16.msra.mxu0 %v3493_v39  ;;  %v1113_v58 = vor.u32 %v1112_v35, %v1109_v29  ;;  %v1126_v60 = vrot.slane %v1124_v41, 5  ;;  %2609 = vmatprep.subr.bf16.mxu1 %v2912_v18  ;;  %v1132_v0 = vrot.slane %v1130_v49, 5  ;;  %v430_v39 = vshll.u32 %v3573_v25, 16 }
  0xba   : > { %2671 = vmatprep.subr.bf16.mxu0 %v2911_v28  ;;  %v425_v62 = vsel %vm3485_vm2, %v420_v44, %v424_v21  ;;  %v429_v1 = vrot.slane %v427_v53, 4  ;;  %v436_v13 = vshll.u32 %v3582_v50, 16  ;;  %v441_v16 = vshrl.u32 %v3577_v42, 16  ;;  %v3604_v21 = vld [vmem:[%s3434_s9 + $0x44] sm:$0x1] }
  0xbb   : > { %v2296_v4 = vcombine.low %v411_v56, %v425_v62  ;;  %v1114_v5 = vrot.slane %v1113_v58, 4  ;;  %v1127_v7 = vor.u32 %v1126_v60, %v1123_v59  ;;  %v432_v15 = vrot.slane %v430_v39, 5  ;;  %v2386_v60 = vld [vmem:[%s3434_s9 + $0x8] sm:$0xe]  ;;  %v2387_v62 = vld [vmem:[%s3434_s9 + $0x10] sm:$0xe] }
  0xbc   : > { %v444_v19 = vshll.u32 %v3577_v42, 16  ;;  %v450_v20 = vshll.u32 %v3589_v57, 16  ;;  %2610 = vmatpush3.bf16.msra.mxu1 %v2912_v18  ;;  %v438_v32 = vrot.slane %v436_v13, 5  ;;  %v1135_v29 = vshrl.u32 %v2370_v61, 16  ;;  %v2915_v18 = vld [vmem:[#allocation5 + $0xb8] sm:$0xff]  }
  0xbd   : > { %2672 = vmatpush3.bf16.msra.mxu0 %v2911_v28  ;;  %2601 = vmatprep.mubr.msk.bf16.mxu1 %vm499_vm3, %v2296_v4  ;;  %v1119_v24 = vsel %vm3485_vm2, %v1114_v5, %v1118_v47  ;;  %v1128_v26 = vrot.slane %v1127_v7, 4  ;;  %v433_v34 = vor.u32 %v432_v15, %v429_v1  ;;  %v443_v35 = vrot.slane %v441_v16, 4 }
  0xbe   : > { %v446_v36 = vrot.slane %v444_v19, 5  ;;  %v452_v41 = vrot.slane %v450_v20, 5  ;;  %2673 = vmatprep.subr.bf16.mxu0 %v2913_v54  ;;  %2611 = vmatprep.subr.bf16.mxu1 %v2914_v3  ;;  %v1137_v44 = vrot.slane %v1135_v29, 4  ;;  %v1138_v49 = vshll.u32 %v2370_v61, 16  ;;  %v2389_v29 = vld [vmem:[%s3434_s9 + $0x20] sm:$0xe] }
  0xbf   : > { %v1133_v28 = vsel %vm3485_vm2, %v1128_v26, %v1132_v0  ;;  %v1144_v47 = vshll.u32 %v3596_v2, 16  ;;  %v434_v56 = vrot.slane %v433_v34, 4  ;;  %v1149_v59 = vshrl.u32 %v2372_v14, 16 }
  0xc0   : > { %v2376_v53 = vcombine.low %v1119_v24, %v1133_v28  ;;  %v447_v58 = vor.u32 %v446_v36, %v443_v35  ;;  %2612 = vmatpush3.bf16.msra.mxu1 %v2914_v3  ;;  %v1140_v1 = vrot.slane %v1138_v49, 5  ;;  %v1152_v4 = vshll.u32 %v2372_v14, 16  ;;  %v2390_v28 = vld [vmem:[%s3434_s9 + $0x28] sm:$0xe]  ;;  %v2391_v49 = vld [vmem:[%s3434_s9 + $0x30] sm:$0xe] }
  0xc1   : > { %v1146_v39 = vrot.slane %v1144_v47, 5  ;;  %v1158_v5 = vshll.u32 %v3604_v21, 16  ;;  %2674 = vmatpush3.bf16.msra.mxu0 %v2913_v54  ;;  %2621 = vmatprep.subr.bf16.mxu1 %v3609_v30  ;;  %v439_v61 = vsel %vm3485_vm2, %v434_v56, %v438_v32  ;;  %v1151_v7 = vrot.slane %v1149_v59, 4  ;;  %v3627_v54 = vld [vmem:[#allocation5 + $0xc0] sm:$0xff]   ;;  %v2388_v32 = vld [vmem:[%s3434_s9 + $0x18] sm:$0xe] }
  0xc2   : > { %2665 = vmatprep.mubr.msk.bf16.mxu0 %vm499_vm3, %v2376_v53  ;;  %v448_v3 = vrot.slane %v447_v58, 4  ;;  %2675 = vmatprep.subr.bf16.mxu0 %v2915_v18  ;;  %v2394_v13 = vrot.slane %v2386_v60, 9  ;;  %v1141_v14 = vor.u32 %v1140_v1, %v1137_v44  ;;  %v1154_v15 = vrot.slane %v1152_v4, 5  ;;  %v2392_v59 = vld [vmem:[%s3434_s9 + $0x38] sm:$0xe] }
  0xc3   : > { %v1160_v16 = vrot.slane %v1158_v5, 5  ;;  %v2395_v19 = vrot.slane %v2387_v62, 9  ;;  %v2306_v24 = vcombine.low %v3455_v8, %v3458_v9  ;;  %v735_v8 = vrot.slane %v3500_v48, 5  ;;  %v2920_v1 = vld [vmem:[#allocation5 + $0x48] sm:$0xff]  }
  0xc4   : > { %v453_v20 = vsel %vm3485_vm2, %v448_v3, %v452_v41  ;;  %v1319_v26 = vsel %vm3619_vm6, %v2394_v13, %v1318_v31  ;;  %v1142_v35 = vrot.slane %v1141_v14, 4  ;;  %v1155_v36 = vor.u32 %v1154_v15, %v1151_v7  ;;  %v700_v13 = vld [vmem:[%s3434_s9 + $0x10] sm:$0xe]  ;;  %v2921_v15 = vld [vmem:[#allocation5 + $0xc8] sm:$0xff]  }
  0xc5   : > { %v2297_v34 = vcombine.low %v439_v61, %v453_v20  ;;  %2676 = vmatpush3.bf16.msra.mxu0 %v2915_v18  ;;  %v1323_v41 = vsel %vm3619_vm6, %v2395_v19, %v1322_v40  ;;  %v1326_v9 = vrot.slane %v3517_v63, 5  ;;  %v1330_v23 = vrot.slane %v3526_v12, 5 }
  0xc6   : > { %2685 = vmatprep.subr.bf16.mxu0 %v3627_v54  ;;  %v1147_v31 = vsel %vm3485_vm2, %v1142_v35, %v1146_v39  ;;  %v1156_v18 = vrot.slane %v1155_v36, 4  ;;  %v2402_v27 = vcombine.low %v1319_v26, %v1323_v41  ;;  %v2396_v40 = vrot.slane %v2388_v32, 9  ;;  %v2393_v39 = vld [vmem:[%s3434_s9 + $0x40] sm:$0xe]  ;;  %v2926_v32 = vld [vmem:[#allocation5 + $0x58] sm:$0xff]  }
  0xc7   : > { %2602 = vmatmul.mubr.msk.bf16.gmra.mrb[4].mxu1 %vm499_vm3, %v2297_v34  ;;  %v2397_v44 = vrot.slane %v2389_v29, 9  ;;  %v2398_v47 = vrot.slane %v2390_v28, 9  ;;  %v1334_v12 = vrot.slane %v3561_v6, 5  ;;  %v1338_v53 = vrot.slane %v3570_v22, 5  ;;  %v2925_v41 = vld [vmem:[#allocation5 + $0xd0] sm:$0xff]   ;;  %v2929_v28 = vld [vmem:[#allocation5 + $0x60] sm:$0xff]  }
  0xc8   : > { %2613 = vmatprep.mubr.msk.bf16.mxu1 %vm499_vm3, %v2306_v24  ;;  %v1161_v63 = vsel %vm3485_vm2, %v1156_v18, %v1160_v16  ;;  %v2399_v58 = vrot.slane %v2391_v49, 9  ;;  %v1342_v60 = vrot.slane %v3596_v2, 5  ;;  %v2307_v62 = vcombine.low %v3491_v38, %v3496_v43  ;;  %v698_v43 = vld [vmem:[%s3434_s9] sm:$0xe]  ;;  %v699_v2 = vld [vmem:[%s3434_s9 + $0x8] sm:$0xe] }
  0xc9   : > { %v2377_v56 = vcombine.low %v1147_v31, %v1161_v63  ;;  %v2308_v4 = vcombine.low %v3538_v37, %v3542_v46  ;;  %v1327_v6 = vsel %vm3619_vm6, %v2396_v40, %v1326_v9  ;;  %v1331_v22 = vsel %vm3619_vm6, %v2397_v44, %v1330_v23  ;;  %v701_v16 = vld [vmem:[%s3434_s9 + $0x18] sm:$0xe]  ;;  %v2924_v24 = vld [vmem:[#allocation5 + $0x50] sm:$0xff]  }
  0xca   : > { %v1335_v38 = vsel %vm3619_vm6, %v2398_v47, %v1334_v12  ;;  %v1339_v5 = vsel %vm3619_vm6, %v2399_v58, %v1338_v53  ;;  %v2400_v61 = vrot.slane %v2392_v59, 9  ;;  %v2318_v3 = vrot.slane %v698_v43, 9  ;;  %v704_v9 = vld [vmem:[%s3434_s9 + $0x30] sm:$0xe]  ;;  %v705_v23 = vld [vmem:[%s3434_s9 + $0x38] sm:$0xe] }
  0xcb   : > { %2666 = vmatmul.mubr.msk.bf16.gmra.mrb[4].mxu0 %vm499_vm3, %v2377_v56  ;;  %v2319_v37 = vrot.slane %v699_v2, 9  ;;  %v2401_v46 = vrot.slane %v2393_v39, 9  ;;  %v1346_v7 = vrot.slane %v3604_v21, 5  ;;  %v2403_v14 = vcombine.low %v1327_v6, %v1331_v22  ;;  %v2927_v18 = vld [vmem:[#allocation5 + $0xd8] sm:$0xff]   ;;  %v2932_v12 = vld [vmem:[#allocation5 + $0x68] sm:$0xff]  }
  0xcc   : > { %2677 = vmatprep.mubr.msk.bf16.mxu0 %vm499_vm3, %v2402_v27  ;;  %v739_v19 = vrot.slane %v3509_v55, 5  ;;  %v2404_v20 = vcombine.low %v1335_v38, %v1339_v5  ;;  %v728_v21 = vsel %vm3619_vm6, %v2318_v3, %v727_v45  ;;  %v2309_v26 = vcombine.low %v3573_v25, %v3577_v42  ;;  %v702_v45 = vld [vmem:[%s3434_s9 + $0x20] sm:$0xe]  ;;  %v2434_v53 = vld [vmem:[%s3434_s9 + $0x10] sm:$0xf]  ;;  %v2933_v2 = vld [vmem:[#allocation5 + $0xe8] sm:$0xff]  }
  0xcd   : > { %v1343_v55 = vsel %vm3619_vm6, %v2400_v61, %v1342_v60  ;;  %v2320_v29 = vrot.slane %v700_v13, 9  ;;  %v2321_v34 = vrot.slane %v701_v16, 9  ;;  %v1347_v10 = vsel %vm3619_vm6, %v2401_v46, %v1346_v7  ;;  %v3725_v56 = vld [vmem:[%s3434_s9 + $0x14] sm:$0x1]  ;;  %v2436_v60 = vld [vmem:[%s3434_s9 + $0x18] sm:$0xf] }
  0xce   : > { %v743_v35 = vrot.slane %v3547_v51, 5  ;;  %v747_v25 = vrot.slane %v3550_v52, 5  ;;  %v2322_v42 = vrot.slane %v702_v45, 9  ;;  %v2405_v31 = vcombine.low %v1343_v55, %v1347_v10  ;;  %v2928_v51 = vld [vmem:[%s3434_s9 + $0x10] ss:$8 sps:$4 sm:$0xff]  }
  0xcf   : > { %2614 = vmatmul.mubr.msk.bf16.vlgmr.msra.gmra.mrb[0].mxu1 %vm499_vm3, %v2307_v62  ;;  %v736_v52 = vsel %vm3619_vm6, %v2320_v29, %v735_v8  ;;  %v2324_v27 = vrot.slane %v704_v9, 9  ;;  %v751_v40 = vrot.slane %v3582_v50, 5  ;;  %v2325_v49 = vrot.slane %v705_v23, 9  ;;  %v2931_v50 = vld [vmem:[#allocation5 + $0xe0] sm:$0xff]   ;;  %v3734_v62 = vld [vmem:[%s3434_s9 + $0x1c] sm:$0x1] }
  0xd0   : > { %2622 = vmatpush3.bf16.msra.mxu1 %v3609_v30  ;;  %2617 = vmatprep.mubr.msk.bf16.mxu1 %vm499_vm3, %v2308_v4  ;;  %v732_v30 = vsel %vm3619_vm6, %v2319_v37, %v731_v17  ;;  %v703_v17 = vld [vmem:[%s3434_s9 + $0x28] sm:$0xe]  ;;  %v744_v44 = vsel %vm3619_vm6, %v2322_v42, %v743_v35  ;;  %v755_v8 = vrot.slane %v3589_v57, 5  ;;  %v1645_v39 = vshll.u32 %v2434_v53, 16  ;;  %v2934_v4 = vld [vmem:[%s3434_s9 + $0x30] ss:$8 sps:$4 sm:$0xff]  }
  0xd1   : > { %2623 = vmatprep.subr.bf16.mxu1 %v2920_v1  ;;  %v2326_v11 = vcombine.low %v728_v21, %v732_v30  ;;  %v2323_v36 = vrot.slane %v703_v17, 9  ;;  %v2930_v57 = vld [vmem:[%s3434_s9 + $0x20] ss:$8 sps:$4 sm:$0xff]   ;;  %v752_v58 = vsel %vm3619_vm6, %v2324_v27, %v751_v40  ;;  %v1651_v6 = vshll.u32 %v3725_v56, 16  ;;  %v3748_v21 = vld [vmem:[%s3434_s9 + $0x2c] sm:$0x1] }
  0xd2   : > { %v756_v59 = vsel %vm3619_vm6, %v2325_v49, %v755_v8  ;;  %v1656_v22 = vshrl.u32 %v2436_v60, 16  ;;  %v1659_v38 = vshll.u32 %v2436_v60, 16  ;;  %v1665_v43 = vshll.u32 %v3734_v62, 16  ;;  %v2935_v5 = vld [vmem:[#allocation5 + $0x70] sm:$0xff]   ;;  %v2938_v17 = vld [vmem:[#allocation5 + $0x78] sm:$0xff]   ;;  %v3761_v40 = vld [vmem:[#allocation5 + $0x100] sm:$0xff]  }
  0xd3   : > { %2678 = vmatmul.mubr.msk.bf16.vlgmr.msra.gmra.mrb[0].mxu0 %vm499_vm3, %v2403_v14  ;;  %v748_v48 = vsel %vm3619_vm6, %v2323_v36, %v747_v25  ;;  %v1647_v3 = vrot.slane %v1645_v39, 5  ;;  %v1653_v37 = vrot.slane %v1651_v6, 5  ;;  %v2438_v14 = vld [vmem:[%s3434_s9 + $0x20] sm:$0xf]  ;;  %v2940_v16 = vld [vmem:[%s3434_s9 + $0x8] ss:$8 sps:$4 sm:$0xff]  }
  0xd4   : > { %2624 = vmatpush3.bf16.msra.mxu1 %v2920_v1  ;;  %2686 = vmatpush3.bf16.msra.mxu0 %v3627_v54  ;;  %v740_v54 = vsel %vm3619_vm6, %v2321_v34, %v739_v19  ;;  %v2328_v47 = vcombine.low %v744_v44, %v748_v48  ;;  %v1642_v1 = vshrl.u32 %v2434_v53, 16  ;;  %v1658_v46 = vrot.slane %v1656_v22, 4  ;;  %v2937_v29 = vld [vmem:[#allocation5 + $0xf0] sm:$0xff]   ;;  %v2444_v49 = vld [vmem:[%s3434_s9 + $0x38] sm:$0xf] }
  0xd5   : > { %2681 = vmatprep.mubr.msk.bf16.mxu0 %vm499_vm3, %v2404_v20  ;;  %2687 = vmatprep.subr.bf16.mxu0 %v2921_v15  ;;  %v2327_v63 = vcombine.low %v736_v52, %v740_v54  ;;  %v1661_v7 = vrot.slane %v1659_v38, 5  ;;  %v1667_v13 = vrot.slane %v1665_v43, 5  ;;  %v3744_v20 = vld [vmem:[%s3434_s9 + $0x24] sm:$0x1]  ;;  %v1673_v55 = vshll.u32 %v2438_v14, 16  ;;  %v2939_v54 = vld [vmem:[#allocation5 + $0xf8] sm:$0xff]  }
  0xd6   : > { %2625 = vmatprep.subr.bf16.mxu1 %v2924_v24  ;;  %v1644_v61 = vrot.slane %v1642_v1, 4  ;;  %v1693_v45 = vshll.u32 %v3748_v21, 16  ;;  %v2936_v36 = vld [vmem:[%s3434_s9 + $0x40] ss:$8 sps:$4 sm:$0xff]   ;;  %v2442_v44 = vld [vmem:[%s3434_s9 + $0x30] sm:$0xf] }
  0xd7   : > { %2618 = vmatmul.mubr.msk.bf16.gmra.mrb[4].mxu1 %vm499_vm3, %v2309_v26  ;;  %v1662_v30 = vor.u32 %v1661_v7, %v1658_v46  ;;  %v1670_v26 = vshrl.u32 %v2438_v14, 16  ;;  %v1675_v42 = vrot.slane %v1673_v55, 5  ;;  %v3765_v48 = vld [vmem:[%s3434_s9 + $0x34] sm:$0x1]  ;;  %v2941_v8 = vld [vmem:[%s3434_s9 + $0x18] ss:$8 sps:$4 sm:$0xff]  }
  0xd8   : > { %2626 = vmatpush3.bf16.msra.mxu1 %v2924_v24  ;;  %2629 = vmatprep.mubr.msk.bf16.mxu1 %vm499_vm3, %v2326_v11  ;;  %v1648_v19 = vor.u32 %v1647_v3, %v1644_v61  ;;  %v2440_v24 = vld [vmem:[%s3434_s9 + $0x28] sm:$0xf]  ;;  %v1695_v52 = vrot.slane %v1693_v45, 5  ;;  %v1707_v53 = vshll.u32 %v3765_v48, 16  ;;  %v3785_v46 = vld [vmem:[%s3434_s9 + $0x44] sm:$0x1] }
  0xd9   : > { %2688 = vmatpush3.bf16.msra.mxu0 %v2921_v15  ;;  %2627 = vmatprep.subr.bf16.mxu1 %v2926_v32  ;;  %v2329_v15 = vcombine.low %v752_v58, %v756_v59  ;;  %v1684_v10 = vshrl.u32 %v2440_v24, 16  ;;  %v1687_v11 = vshll.u32 %v2440_v24, 16  ;;  %v1663_v35 = vrot.slane %v1662_v30, 4  ;;  %v3774_v1 = vld [vmem:[#allocation5 + $0x108] sm:$0xff]  }
  0xda   : > { %2689 = vmatprep.subr.bf16.mxu0 %v2925_v41  ;;  %v1649_v34 = vrot.slane %v1648_v19, 4  ;;  %v1672_v25 = vrot.slane %v1670_v26, 4  ;;  %v1712_v58 = vshrl.u32 %v2444_v49, 16  ;;  %v1715_v59 = vshll.u32 %v2444_v49, 16  ;;  %v2944_v6 = vld [vmem:[%s3434_s9 + $0x28] ss:$8 sps:$4 sm:$0xff]  }
  0xdb   : > { %2682 = vmatmul.mubr.msk.bf16.gmra.mrb[4].mxu0 %vm499_vm3, %v2405_v31  ;;  %v1686_v9 = vrot.slane %v1684_v10, 4  ;;  %v1689_v23 = vrot.slane %v1687_v11, 5  ;;  %v1668_v31 = vsel %vm3485_vm2, %v1663_v35, %v1667_v13  ;;  %v1709_v22 = vrot.slane %v1707_v53, 5  ;;  %v2448_v7 = vld [vmem:[%s3434_s9 + $0x48] sm:$0xf] }
  0xdc   : > { %2628 = vmatpush3.bf16.msra.mxu1 %v2926_v32  ;;  %2693 = vmatprep.mubr.msk.bf16.mxu0 %vm499_vm3, %v2928_v51  ;;  %v1679_v32 = vshll.u32 %v3744_v20, 16  ;;  %v1714_v38 = vrot.slane %v1712_v58, 4  ;;  %v1717_v43 = vrot.slane %v1715_v59, 5  ;;  %v3790_v14 = vld [vmem:[%s3434_s9 + $0x4c] sm:$0x1]  ;;  %v1735_v19 = vshll.u32 %v3785_v46, 16 }
  0xdd   : > { %2690 = vmatpush3.bf16.msra.mxu0 %v2925_v41  ;;  %2637 = vmatprep.subr.bf16.mxu1 %v2929_v28  ;;  %v1654_v41 = vsel %vm3485_vm2, %v1649_v34, %v1653_v37  ;;  %v1690_v27 = vor.u32 %v1689_v23, %v1686_v9  ;;  %v2446_v37 = vld [vmem:[%s3434_s9 + $0x40] sm:$0xf]  ;;  %v1740_v30 = vshrl.u32 %v2448_v7, 16  ;;  %v1743_v26 = vshll.u32 %v2448_v7, 16 }
  0xde   : > { %2691 = vmatprep.subr.bf16.mxu0 %v2927_v18  ;;  %v1681_v51 = vrot.slane %v1679_v32, 5  ;;  %v1718_v13 = vor.u32 %v1717_v43, %v1714_v38  ;;  %v1749_v55 = vshll.u32 %v3790_v14, 16  ;;  %v2945_v45 = vld [vmem:[%s3434_s9 + $0x38] ss:$8 sps:$4 sm:$0xff]   ;;  %v1933_v23 = vrot.slane %v3785_v46, 5 }
  0xdf   : > { %2630 = vmatmul.mubr.msk.bf16.vlgmr.msra.gmra.mrb[0].mxu1 %vm499_vm3, %v2327_v63  ;;  %v1742_v35 = vrot.slane %v1740_v30, 4  ;;  %v2464_v59 = vld [vmem:[%s3434_s9 + $0x20] sm:$0xe]  ;;  %v1921_v33 = vrot.slane %v3748_v21, 5 }
  0xe0   : > { %2638 = vmatpush3.bf16.msra.mxu1 %v2929_v28  ;;  %2633 = vmatprep.mubr.msk.bf16.mxu1 %vm499_vm3, %v2328_v47  ;;  %v2450_v28 = vcombine.low %v1654_v41, %v1668_v31  ;;  %v1698_v47 = vshrl.u32 %v2442_v44, 16  ;;  %v1751_v9 = vrot.slane %v1749_v55, 5  ;;  %v2462_v31 = vld [vmem:[%s3434_s9 + $0x10] sm:$0xe]  ;;  %v2472_v43 = vrot.slane %v2464_v59, 9 }
  0xe1   : > { %2692 = vmatpush3.bf16.msra.mxu0 %v2927_v18  ;;  %2639 = vmatprep.subr.bf16.mxu1 %v2932_v12  ;;  %v1676_v18 = vor.u32 %v1675_v42, %v1672_v25  ;;  %v1745_v25 = vrot.slane %v1743_v26, 5  ;;  %v2946_v42 = vld [vmem:[#allocation5 + $0x110] sm:$0xff]  }
  0xe2   : > { %2701 = vmatprep.subr.bf16.mxu0 %v2931_v50  ;;  %v1700_v39 = vrot.slane %v1698_v47, 4 }
  0xe3   : > { %v1677_v63 = vrot.slane %v1676_v18, 4 }
  0xe4   : > { %2694 = vmatmul.mubr.msk.bf16.vlgmr.msra.gmra.mrb[0].mxu0 %vm499_vm3, %v2930_v57  ;;  %2640 = vmatpush3.bf16.msra.mxu1 %v2932_v12  ;;  %v1701_v12 = vshll.u32 %v2442_v44, 16  ;;  %v1691_v57 = vrot.slane %v1690_v27, 4  ;;  %v2466_v27 = vld [vmem:[%s3434_s9 + $0x30] sm:$0xe] }
  0xe5   : > { %2702 = vmatpush3.bf16.msra.mxu0 %v2931_v50  ;;  %2697 = vmatprep.mubr.msk.bf16.mxu0 %vm499_vm3, %v2934_v4  ;;  %v3770_v50 = vld [vmem:[%s3434_s9 + $0x3c] sm:$0x1]  ;;  %v2474_v47 = vrot.slane %v2466_v27, 9 }
  0xe6   : > { %2703 = vmatprep.subr.bf16.mxu0 %v2933_v2  ;;  %2641 = vmatprep.subr.bf16.mxu1 %v2935_v5  ;;  %v1721_v60 = vshll.u32 %v3770_v50, 16  ;;  %v1703_v4 = vrot.slane %v1701_v12, 5  ;;  %v1696_v61 = vsel %vm3485_vm2, %v1691_v57, %v1695_v52  ;;  %v2463_v52 = vld [vmem:[%s3434_s9 + $0x18] sm:$0xe]  ;;  %v1925_v57 = vrot.slane %v3765_v48, 5 }
  0xe7   : > { %2634 = vmatmul.mubr.msk.bf16.gmra.mrb[4].mxu1 %vm499_vm3, %v2329_v15  ;;  %v1726_v15 = vshrl.u32 %v2446_v37, 16  ;;  %v2471_v49 = vrot.slane %v2463_v52, 9  ;;  %v2499_v52 = vld [vmem:[%s3448_s29] sm:$0xff]  }
  0xe8   : > { %2642 = vmatpush3.bf16.msra.mxu1 %v2935_v5  ;;  %2645 = vmatprep.mubr.msk.bf16.mxu1 %vm499_vm3, %v2940_v16  ;;  %v1682_v5 = vsel %vm3485_vm2, %v1677_v63, %v1681_v51  ;;  %v1704_v3 = vor.u32 %v1703_v4, %v1700_v39  ;;  %v1729_v16 = vshll.u32 %v2446_v37, 16  ;;  %v1746_v51 = vor.u32 %v1745_v25, %v1742_v35  ;;  %v2467_v63 = vld [vmem:[%s3434_s9 + $0x38] sm:$0xe]  ;;  %v2465_v4 = vld [vmem:[%s3434_s9 + $0x28] sm:$0xe] }
  0xe9   : > { %2704 = vmatpush3.bf16.msra.mxu0 %v2933_v2  ;;  %2643 = vmatprep.subr.bf16.mxu1 %v2938_v17  ;;  %v1723_v2 = vrot.slane %v1721_v60, 5  ;;  %v2451_v32 = vcombine.low %v1682_v5, %v1696_v61  ;;  %v1728_v34 = vrot.slane %v1726_v15, 4  ;;  %v2475_v58 = vrot.slane %v2467_v63, 9  ;;  %v2515_v35 = vld [vmem:[%s3448_s29 + $0x10] sm:$0xff]  }
  0xea   : > { %2705 = vmatprep.subr.bf16.mxu0 %v2937_v29  ;;  %v1705_v24 = vrot.slane %v1704_v3, 4  ;;  %v1731_v10 = vrot.slane %v1729_v16, 5  ;;  %v1747_v12 = vrot.slane %v1746_v51, 4  ;;  %v1937_v60 = vrot.slane %v3790_v14, 5 }
  0xeb   : > { %v1929_v39 = vrot.slane %v3770_v50, 5  ;;  %v1926_v38 = vsel %vm3619_vm6, %v2474_v47, %v1925_v57  ;;  %v1917_v50 = vrot.slane %v3744_v20, 5  ;;  %v2473_v3 = vrot.slane %v2465_v4, 9 }
  0xec   : > { %2698 = vmatmul.mubr.msk.bf16.gmra.mrb[4].mxu0 %vm499_vm3, %v2936_v36  ;;  %2644 = vmatpush3.bf16.msra.mxu1 %v2938_v17  ;;  %v1710_v11 = vsel %vm3485_vm2, %v1705_v24, %v1709_v22  ;;  %v1737_v17 = vrot.slane %v1735_v19, 5  ;;  %v1732_v41 = vor.u32 %v1731_v10, %v1728_v34  ;;  %v1752_v48 = vsel %vm3485_vm2, %v1747_v12, %v1751_v9 }
  0xed   : > { %2706 = vmatpush3.bf16.msra.mxu0 %v2937_v29  ;;  %2709 = vmatprep.mubr.msk.bf16.mxu0 %vm499_vm3, %v2450_v28  ;;  %v1719_v29 = vrot.slane %v1718_v13, 4  ;;  %v1909_v28 = vrot.slane %v3725_v56, 5  ;;  %v2947_v56 = vld [vmem:[#allocation5 + $0x118] sm:$0xff]   ;;  %v1930_v61 = vsel %vm3619_vm6, %v2475_v58, %v1929_v39  ;;  %v1918_v21 = vsel %vm3619_vm6, %v2472_v43, %v1917_v50 }
  0xee   : > { %2707 = vmatprep.subr.bf16.mxu0 %v2939_v54  ;;  %2733 = vmatprep.subr.bf16.mxu1 %v3761_v40  ;;  %v1733_v44 = vrot.slane %v1732_v41, 4  ;;  %v2480_v37 = vcombine.low %v1926_v38, %v1930_v61  ;;  %v2500_v59 = vunpack.c.l.bf16 %v2499_v52 }
  0xef   : > { %2646 = vmatmul.mubr.msk.bf16.vlgmr.msra.gmra.mrb[0].mxu1 %vm499_vm3, %v2941_v8  ;;  %v1724_v36 = vsel %vm3485_vm2, %v1719_v29, %v1723_v2  ;;  %v1913_v8 = vrot.slane %v3734_v62, 5  ;;  %v2469_v2 = vld [vmem:[%s3434_s9 + $0x48] sm:$0xe] }
  0xf0   : > { %2737 = vmatpush3.bf16.msra.mxu1 %v3761_v40  ;;  %2649 = vmatprep.mubr.msk.bf16.mxu1 %vm499_vm3, %v2944_v6  ;;  %v2452_v18 = vcombine.low %v1710_v11, %v1724_v36  ;;  %v1738_v62 = vsel %vm3485_vm2, %v1733_v44, %v1737_v17  ;;  %v2468_v6 = vld [vmem:[%s3434_s9 + $0x40] sm:$0xe]  ;;  %v2477_v7 = vrot.slane %v2469_v2, 9  ;;  %v2490_v36 = vld [vmem:[#allocation7] ss:$0 sm:$0xff] }
  0xf1   : > { %2708 = vmatpush3.bf16.msra.mxu0 %v2939_v54  ;;  %2734 = vmatprep.subr.bf16.mxu1 %v3774_v1  ;;  %v2470_v54 = vrot.slane %v2462_v31, 9  ;;  %v2453_v5 = vcombine.low %v1738_v62, %v1752_v48  ;;  %v2476_v46 = vrot.slane %v2468_v6, 9  ;;  %v2516_v11 = vld [vmem:[%s3448_s29 + $0x18] sm:$0xff]   ;;  %v2501_v6 = vunpack.c.h.bf16 %v2499_v52 }
  0xf2   : > { %2717 = vmatprep.subr.bf16.mxu0 %v3761_v40  ;;  %v1938_v14 = vsel %vm3619_vm6, %v2477_v7, %v1937_v60 }
  0xf3   : > { %v1910_v53 = vsel %vm3619_vm6, %v2470_v54, %v1909_v28  ;;  %v1934_v13 = vsel %vm3619_vm6, %v2476_v46, %v1933_v23  ;;  %v2514_v23 = vld [vmem:[%s3448_s29 + $0x8] sm:$0xff]   ;;  %v2508_v28 = vunpack.c.l.bf16 %v2515_v35 }
  0xf4   : > { %2710 = vmatmul.mubr.msk.bf16.vlgmr.msra.gmra.mrb[0].mxu0 %vm499_vm3, %v2451_v32  ;;  %2738 = vmatpush3.bf16.msra.mxu1 %v3774_v1  ;;  %v2481_v20 = vcombine.low %v1934_v13, %v1938_v14  ;;  %v2504_v47 = vunpack.c.l.bf16 %v2514_v23  ;;  %v2505_v62 = vunpack.c.h.bf16 %v2514_v23 }
  0xf5   : > { %2718 = vmatpush3.bf16.msra.mxu0 %v3761_v40  ;;  %2713 = vmatprep.mubr.msk.bf16.mxu0 %vm499_vm3, %v2452_v18  ;;  %v1914_v40 = vsel %vm3619_vm6, %v2471_v49, %v1913_v8  ;;  %v2512_v18 = vunpack.c.l.bf16 %v2516_v11  ;;  %v2513_v8 = vunpack.c.h.bf16 %v2516_v11 }
  0xf6   : > { %2719 = vmatprep.subr.bf16.mxu0 %v3774_v1  ;;  %2735 = vmatprep.subr.bf16.mxu1 %v2946_v42  ;;  %v2478_v22 = vcombine.low %v1910_v53, %v1914_v40  ;;  %v2509_v53 = vunpack.c.h.bf16 %v2515_v35 }
  0xf7   : > { %2650 = vmatmul.mubr.msk.bf16.gmra.mrb[4].mxu1 %vm499_vm3, %v2945_v45 }
  0xf8   : > { %2739 = vmatpush3.bf16.msra.mxu1 %v2946_v42  ;;  %2729 = vmatprep.mubr.msk.bf16.mxu1 %vm499_vm3, %v2480_v37 }
  0xf9   : > { %2720 = vmatpush3.bf16.msra.mxu0 %v3774_v1  ;;  %2736 = vmatprep.subr.bf16.mxu1 %v2947_v56  ;;  %v1922_v1 = vsel %vm3619_vm6, %v2473_v3, %v1921_v33 }
  0xfa   : > { %2721 = vmatprep.subr.bf16.mxu0 %v2946_v42  ;;  %v2479_v15 = vcombine.low %v1918_v21, %v1922_v1 }
  0xfc   : > { %2714 = vmatmul.mubr.msk.bf16.gmra.mrb[4].mxu0 %vm499_vm3, %v2453_v5  ;;  %2740 = vmatpush3.bf16.msra.mxu1 %v2947_v56 }
  0xfd   : > { %2722 = vmatpush3.bf16.msra.mxu0 %v2946_v42  ;;  %2725 = vmatprep.mubr.msk.bf16.mxu0 %vm499_vm3, %v2478_v22 }
  0xfe   : > { %2723 = vmatprep.subr.bf16.mxu0 %v2947_v56 }
  0xff   : > { %2730 = vmatmul.mubr.msk.bf16.vlgmr.msra.gmra.mrb[8].mxu1 %vm499_vm3, %v2481_v20 }
 0x101   : > { %2724 = vmatpush3.bf16.msra.mxu0 %v2947_v56 }
 0x104   : > { %2726 = vmatmul.mubr.msk.bf16.vlgmr.msra.gmra.mrb[0].mxu0 %vm499_vm3, %v2479_v15 }
 0x1c2   : > { %v2647_v16 = vpop.f32.mrb[0].mxu1 }
 0x1c3   : > { %v995_v19 = vpop.f32.mrb[1].mxu1 }
 0x1c4   : > { %v2648_v24 = vpop.f32.mrb[2].mxu1 }
 0x1c5   : > { %v998_v30 = vpop.f32.mrb[3].mxu1 }
 0x1ca   : > { %v2651_v26 = vpop.f32.mrb[4].mxu1 }
 0x1cb   : > { %v1011_v55 = vpop.f32.mrb[5].mxu1 }
 0x1cc   : > { %v2652_v32 = vpop.f32.mrb[6].mxu1 }
 0x1cd   : > { %v1014_v29 = vpop.f32.mrb[7].mxu1 }
 0x1cf   : > { %v2715_v0 = vpop.f32.mrb[4].mxu0 }
 0x1d0   : > { %v2745_v34 = vadd.f32 %v2715_v0, %v2651_v26  ;;  %v1860_v10 = vpop.f32.mrb[5].mxu0 }
 0x1d1   : > { %v2747_v45 = vadd.f32 %v1860_v10, %v1011_v55  ;;  %v2716_v17 = vpop.f32.mrb[6].mxu0 }
 0x1d2   : > { %v2749_v25 = vadd.f32 %v2716_v17, %v2652_v32  ;;  %v1863_v42 = vpop.f32.mrb[7].mxu0  ;;  %v2731_v41 = vpop.f32.mrb[8].mxu1 }
 0x1d3   : > { %v2751_v9 = vadd.f32 %v1863_v42, %v1014_v29  ;;  %v2746_v31 = vadd.f32 %v2745_v34, %v2731_v41  ;;  %v2046_v51 = vpop.f32.mrb[9].mxu1 }
 0x1d4   : > { %v2748_v54 = vadd.f32 %v2747_v45, %v2046_v51  ;;  %v2732_v27 = vpop.f32.mrb[10].mxu1 }
 0x1d5   : > { %v2082_v44 = vadd.f32 %v2746_v31, %v2490_v36  ;;  %v2750_v49 = vadd.f32 %v2749_v25, %v2732_v27  ;;  %v2049_v63 = vpop.f32.mrb[11].mxu1 }
 0x1d6   : > { %v2080_v12 = vadd.f32 %v2748_v54, %v2490_v36  ;;  %v2752_v56 = vadd.f32 %v2751_v9, %v2049_v63 }
 0x1d7   : > { %v2727_v57 = vpop.f32.mrb[0].mxu0  ;;  %v2106_v58 = vadd.f32 %v2512_v18, %v2082_v44  ;;  %v2083_v60 = vadd.f32 %v2750_v49, %v2490_v36 }
 0x1d8   : > { %v2741_v40 = vadd.f32 %v2727_v57, %v2647_v16  ;;  %v2030_v39 = vpop.f32.mrb[1].mxu0  ;;  %v2104_v4 = vadd.f32 %v2508_v28, %v2080_v12  ;;  %v2081_v48 = vadd.f32 %v2752_v56, %v2490_v36 }
 0x1d9   : > { %v2114_v22 = vmax.f32 %v2106_v58, 0.0  ;;  %v2742_v38 = vadd.f32 %v2030_v39, %v995_v19  ;;  %v2728_v43 = vpop.f32.mrb[2].mxu0  ;;  %v2107_v2 = vadd.f32 %v2513_v8, %v2083_v60 }
 0x1da   : > { %v2078_v5 = vadd.f32 %v2741_v40, %v2490_v36  ;;  %v2112_v61 = vmax.f32 %v2104_v4, 0.0  ;;  %v2743_v50 = vadd.f32 %v2728_v43, %v2648_v24  ;;  %v2033_v3 = vpop.f32.mrb[3].mxu0  ;;  %v2105_v37 = vadd.f32 %v2509_v53, %v2081_v48 }
 0x1db   : > { %v2122_v33 = vpack.c.bf16 %v2114_v22, %v2114_v22  ;;  %v2076_v46 = vadd.f32 %v2742_v38, %v2490_v36  ;;  %v2115_v7 = vmax.f32 %v2107_v2, 0.0  ;;  %v2744_v13 = vadd.f32 %v2033_v3, %v998_v30 }
 0x1dc   : > { %v2102_v14 = vadd.f32 %v2504_v47, %v2078_v5  ;;  %v2120_v20 = vpack.c.bf16 %v2112_v61, %v2112_v61  ;;  %v2079_v21 = vadd.f32 %v2743_v50, %v2490_v36  ;;  %v2113_v1 = vmax.f32 %v2105_v37, 0.0 }
 0x1dd   : > { %2131 = vst.msk [vmem:[%s313_s24 + $0x18] sm:$0xf] %vm2124_vm7, %v2122_v33  ;;  %v2100_v15 = vadd.f32 %v2500_v59, %v2076_v46  ;;  %v2123_v16 = vpack.c.bf16 %v2115_v7, %v2115_v7  ;;  %v2077_v19 = vadd.f32 %v2744_v13, %v2490_v36 }
 0x1de   : > { %v2110_v26 = vmax.f32 %v2102_v14, 0.0  ;;  %2129 = vst.msk [vmem:[%s313_s24 + $0x10] sm:$0xf] %vm2124_vm7, %v2120_v20  ;;  %v2103_v24 = vadd.f32 %v2505_v62, %v2079_v21  ;;  %v2121_v55 = vpack.c.bf16 %v2113_v1, %v2113_v1 }
 0x1df   : > { %v2108_v32 = vmax.f32 %v2100_v15, 0.0  ;;  %2132 = vst.msk [vmem:[%s313_s24 + $0x1c] sm:$0xf] %vm2124_vm7, %v2123_v16  ;;  %v2101_v30 = vadd.f32 %v2501_v6, %v2077_v19 }
 0x1e0   : > { %v2118_v29 = vpack.c.bf16 %v2110_v26, %v2110_v26  ;;  %v2111_v0 = vmax.f32 %v2103_v24, 0.0  ;;  %2130 = vst.msk [vmem:[%s313_s24 + $0x14] sm:$0xf] %vm2124_vm7, %v2121_v55 }
 0x1e1   : > { %v2116_v34 = vpack.c.bf16 %v2108_v32, %v2108_v32  ;;  %v2109_v10 = vmax.f32 %v2101_v30, 0.0 }
 0x1e2   : > { %2127 = vst.msk [vmem:[%s313_s24 + $0x8] sm:$0xf] %vm2124_vm7, %v2118_v29  ;;  %v2119_v11 = vpack.c.bf16 %v2111_v0, %v2111_v0 }
 0x1e3   : > { %2125 = vst.msk [vmem:[%s313_s24] sm:$0xf] %vm2124_vm7, %v2116_v34  ;;  %v2117_v45 = vpack.c.bf16 %v2109_v10, %v2109_v10 }
 0x1e4   : > { %2128 = vst.msk [vmem:[%s313_s24 + $0xc] sm:$0xf] %vm2124_vm7, %v2119_v11 }
 0x1e5   : > { %2126 = vst.msk [vmem:[%s313_s24 + $0x4] sm:$0xf] %vm2124_vm7, %v2117_v45 }
 0x1e6   : > { %3077 = shalt.err (!%p3074_p13)
}
 0x1e7   : > { %s3078_s5 = scalar_lea.hbm %s3867_s21, 512  ;;  %s3082_s6 = scalar_lea.hbm %s3925_s4, 1024 }
 0x1e8   : > { %p3079_p3 = scmp.ne.s32.totalorder %s3867_s21, %s3078_s5  ;;  %p3083_p1 = scmp.lt.u32.totalorder %s3867_s21, %s3925_s4 }
 0x1e9   : > { %p3084_p10 = scmp.lt.u32.totalorder %s3082_s6, %s3078_s5  ;;  %p3086_p12 = scmp.lt.u32.totalorder %s3078_s5, %s3867_s21 }
 0x1ea   : > { %p3080_p4 = pnand %p3079_p3, %p3956_p7 }
 0x1eb   : > { %p3085_p9 = por %p3084_p10, %p3083_p1 }
 0x1ec   : > { %p3081_p8 = pneg %p3080_p4 }
 0x1ed   : > { %p3087_p0 = por %p3086_p12, %p3085_p9 }
 0x1ef   : > { %p3088_p11 = pnand %p3087_p0, %p3081_p8 }
 0x1f1   : > { %3091 = shalt.err (!%p3088_p11)
}
 0x1f2   : > { %s3163_s1 = smov 64   ;;  %s3164_s29 = smov 4  }
 0x1f3   : > { %2820 = dma.vmem_to_hbm [thread:$0]  (%p3956_p7), %s3869_s10, 512, %s3867_s21, %s2134_s18, %s3163_s1, %s3163_s1, %s3164_s29  }
 0x1f4 PF: > { %s2163_s24 = sand.u32 1, %s3134_s15   ;;  %p3957_p5 = scmp.ne.s32.totalorder %s3939_s28, 0 }
 0x1f5   : > { %p3958_p2 = scmp.ge.s32.totalorder %s3154_s20, 2  ;;  %s2164_s26 = scalar_lea.sflag [#allocation4], %s2163_s24 }
 0x1f7   : > { %p2837_p6 = pnand %p3958_p2, %p3957_p5 }
 0x1f9   : > { %3129 = dma.done.wait (!%p2837_p6), %s2164_s26, 512  }
 0x1fa   : > { %3131 = vsyncadd (!%p2837_p6), %s2164_s26, 4294966784  ;;  %s24_s20 = sadd.s32 1, %s3154_s20   ;;  %s3959_s15 = smov %s3138_s16 }
 0x1fb   : > { %p21_p13 = scmp.ge.s32.totalorder %s24_s20, 4   ;;  %s3960_s16 = smov %s3142_s17 }
 0x1fc   : > { %s3961_s17 = smov %s3354_s7  ;;  %s3962_s18 = smov %s3150_s19 }
 0x1fd   : > { %s3963_s19 = smov %s3965_s14  ;;  %23 = sbr.rel (!%p21_p13) target bundleno = 13 (0xd), region = 114 }
 0x204   :  { %2169 = vsyncpa [#allocation3], 1 }
 0x205   :  { %2171 = vsyncpa [#allocation3 + $0x1], 1 }
 0x206   :  { %2172 = vsyncpa [#allocation6], 1 }
 0x207   :  { %2173 = vsyncpa [#allocation9], 1 }
 0x208   :  { %2175 = vsyncpa [#allocation9 + $0x1], 1 }
 0x209   :  { %2176 = vsyncpa [#allocation4], 1 }
 0x20a   :  { %2178 = vsyncpa [#allocation4 + $0x1], 1 }

</bundles_post_ra>
